<compile_context>
chip_gen: v7x
topology: tpu7x:2x2x1
jax: 0.10.0
libtpu: 0.0.40
codegen_flags: <defaults>
</compile_context>

<pallas_src>
import functools
import math

import jax
import jax.numpy as jnp
from jax import lax
from jax.experimental import pallas as pl
from jax.experimental.pallas import tpu as pltpu


# ----------------------------- in-kernel helpers -----------------------------

def _layer_norm(z, g, b, eps):
    """LayerNorm over the last (feature) axis; f32 math (matches torch eps=1e-5)."""
    mean = jnp.mean(z, axis=-1, keepdims=True)
    zc = z - mean
    var = jnp.mean(zc * zc, axis=-1, keepdims=True)
    return zc * lax.rsqrt(var + eps) * g + b


def _split_heads(x, *, batch, seq, num_heads, head_dim):
    """(batch*seq, num_heads*head_dim) f32 -> (batch*num_heads, seq, head_dim) bf16.

    Built from static row/lane slices + leading-axis concat (conservative ops only),
    cast to bf16 ONCE on the gathered tensor.
    """
    parts = []
    for b in range(batch):
        rows = x[b * seq:(b + 1) * seq, :]
        for h in range(num_heads):
            parts.append(rows[:, h * head_dim:(h + 1) * head_dim][None])
    return jnp.concatenate(parts, axis=0).astype(jnp.bfloat16)


def _merge_heads(x, *, batch, seq, num_heads, head_dim):
    """(batch*num_heads, seq, head_dim) f32 -> (batch*seq, num_heads*head_dim) f32."""
    del head_dim
    rows = []
    for b in range(batch):
        heads = [x[b * num_heads + h] for h in range(num_heads)]
        rows.append(jnp.concatenate(heads, axis=-1))          # (seq, D) lane concat
    return jnp.concatenate(rows, axis=0)                      # (batch*seq, D)


def _mha(q, k, v, wo, bo, *, batch, q_len, kv_len, num_heads):
    """Multi-head attention core. q (B*Tq, D) f32 ALREADY scaled, k/v (B*Tk, D) f32.

    Head-batched QK^T and P@V (single batched dot_general each), one full-K Wo matmul.
    """
    D = wo.shape[0]
    hd = D // num_heads
    qh = _split_heads(q, batch=batch, seq=q_len, num_heads=num_heads, head_dim=hd)
    kh = _split_heads(k, batch=batch, seq=kv_len, num_heads=num_heads, head_dim=hd)
    vh = _split_heads(v, batch=batch, seq=kv_len, num_heads=num_heads, head_dim=hd)

    # TODO(synk): for long sequences, tile the KV axis (lane-dense, Tk % 128 == 0) with a
    # flash-style online softmax instead of materializing the full (B*H, Tq, Tk) scores.
    s = lax.dot_general(qh, kh, (((2,), (2,)), ((0,), (0,))),
                        preferred_element_type=jnp.float32)          # (B*H, Tq, Tk) f32
    s = s - jnp.max(s, axis=-1, keepdims=True)
    p = jnp.exp(s)
    p = p * pl.reciprocal(jnp.sum(p, axis=-1, keepdims=True), approx=True)
    pv = lax.dot_general(p.astype(jnp.bfloat16), vh, (((2,), (1,)), ((0,), (0,))),
                         preferred_element_type=jnp.float32)          # (B*H, Tq, hd) f32
    o = _merge_heads(pv, batch=batch, seq=q_len, num_heads=num_heads, head_dim=hd)
    return jnp.dot(o.astype(jnp.bfloat16), wo,
                   preferred_element_type=jnp.float32) + bo           # (B*Tq, D) f32


def _self_attention(x_bf, wqkv, bqkv, wo, bo, *, batch, seq, num_heads):
    """Fused (D, 3D) Q/K/V projection over the flattened (B*T) row axis + attention."""
    D = wo.shape[0]
    hd = D // num_heads
    qkv = jnp.dot(x_bf, wqkv, preferred_element_type=jnp.float32) + bqkv   # (B*T, 3D)
    q = qkv[:, :D] * (1.0 / math.sqrt(hd))     # fold scale into q before the bf16 cast
    k = qkv[:, D:2 * D]
    v = qkv[:, 2 * D:]
    return _mha(q, k, v, wo, bo, batch=batch, q_len=seq, kv_len=seq, num_heads=num_heads)


def _cross_attention(x_bf, mem_bf, wq, bq, wkv, bkv, wo, bo,
                     *, batch, q_len, kv_len, num_heads):
    """Q from decoder rows, fused (D, 2D) K/V projection from encoder memory rows."""
    D = wo.shape[0]
    hd = D // num_heads
    q = (jnp.dot(x_bf, wq, preferred_element_type=jnp.float32) + bq) * (1.0 / math.sqrt(hd))
    kv = jnp.dot(mem_bf, wkv, preferred_element_type=jnp.float32) + bkv    # (B*S, 2D)
    k = kv[:, :D]
    v = kv[:, D:]
    return _mha(q, k, v, wo, bo, batch=batch, q_len=q_len, kv_len=kv_len,
                num_heads=num_heads)


def _ffn(x_bf, w1, b1, w2, b2):
    """linear2(relu(linear1(x))) on the flattened row axis (dropout = identity in eval)."""
    h = jnp.dot(x_bf, w1, preferred_element_type=jnp.float32) + b1
    h = jnp.maximum(h, 0.0)
    return jnp.dot(h.astype(jnp.bfloat16), w2, preferred_element_type=jnp.float32) + b2


# ----------------------------- stacked-layer Pallas kernels -----------------------------

def _encoder_stack_kernel(src_ref,
                          wqkv_ref, bqkv_ref, wo_ref, bo_ref, ln1_g_ref, ln1_b_ref,
                          w1_ref, b1_ref, w2_ref, b2_ref, ln2_g_ref, ln2_b_ref,
                          o_ref, *, num_heads, eps):
    """Full TransformerEncoder stack. Grid axis = layer; o_ref is the resident activation."""
    layer = pl.program_id(0)
    B, T, D = o_ref.shape

    @pl.when(layer == 0)
    def _():
        o_ref[...] = src_ref[...]

    x = o_ref[...].reshape(B * T, D)                        # (B*T, D) f32, resident in VMEM
    attn = _self_attention(x.astype(jnp.bfloat16),
                           wqkv_ref[0], bqkv_ref[0], wo_ref[0], bo_ref[0],
                           batch=B, seq=T, num_heads=num_heads)
    x = _layer_norm(x + attn, ln1_g_ref[0], ln1_b_ref[0], eps)
    ff = _ffn(x.astype(jnp.bfloat16), w1_ref[0], b1_ref[0], w2_ref[0], b2_ref[0])
    y = _layer_norm(x + ff, ln2_g_ref[0], ln2_b_ref[0], eps)
    o_ref[...] = y.reshape(B, T, D)


def _decoder_stack_kernel(tgt_ref, mem_ref,
                          sa_wqkv_ref, sa_bqkv_ref, sa_wo_ref, sa_bo_ref,
                          ln1_g_ref, ln1_b_ref,
                          ca_wq_ref, ca_bq_ref, ca_wkv_ref, ca_bkv_ref,
                          ca_wo_ref, ca_bo_ref, ln2_g_ref, ln2_b_ref,
                          w1_ref, b1_ref, w2_ref, b2_ref, ln3_g_ref, ln3_b_ref,
                          out_w_ref, out_b_ref,
                          o_ref, *, num_heads, eps):
    """Full TransformerDecoder stack + fused output Linear on the last grid step."""
    layer = pl.program_id(0)
    B, T, D = o_ref.shape
    S = mem_ref.shape[1]

    @pl.when(layer == 0)
    def _():
        o_ref[...] = tgt_ref[...]

    x = o_ref[...].reshape(B * T, D)
    mem_bf = mem_ref[...].reshape(B * S, D).astype(jnp.bfloat16)

    sa = _self_attention(x.astype(jnp.bfloat16),
                         sa_wqkv_ref[0], sa_bqkv_ref[0], sa_wo_ref[0], sa_bo_ref[0],
                         batch=B, seq=T, num_heads=num_heads)
    x = _layer_norm(x + sa, ln1_g_ref[0], ln1_b_ref[0], eps)

    ca = _cross_attention(x.astype(jnp.bfloat16), mem_bf,
                          ca_wq_ref[0], ca_bq_ref[0], ca_wkv_ref[0], ca_bkv_ref[0],
                          ca_wo_ref[0], ca_bo_ref[0],
                          batch=B, q_len=T, kv_len=S, num_heads=num_heads)
    x = _layer_norm(x + ca, ln2_g_ref[0], ln2_b_ref[0], eps)

    ff = _ffn(x.astype(jnp.bfloat16), w1_ref[0], b1_ref[0], w2_ref[0], b2_ref[0])
    y = _layer_norm(x + ff, ln3_g_ref[0], ln3_b_ref[0], eps)
    o_ref[...] = y.reshape(B, T, D)

    @pl.when(layer == pl.num_programs(0) - 1)
    def _():
        out = jnp.dot(y.astype(jnp.bfloat16), out_w_ref[...],
                      preferred_element_type=jnp.float32) + out_b_ref[...]
        o_ref[...] = out.reshape(B, T, D)


# ----------------------------- pallas_call wrappers -----------------------------

def _const_spec(shape):
    """Block identical for every layer step (fetched once; constant block index)."""
    n = len(shape)
    return pl.BlockSpec(tuple(shape), lambda l, _n=n: (0,) * _n)


def _layer_spec(shape):
    """Per-layer slice of a (num_layers, ...) stacked weight; DMA'd per grid step."""
    n = len(shape)
    return pl.BlockSpec((1,) + tuple(shape), lambda l, _n=n: (l,) + (0,) * _n)


def _compiler_params():
    # Layer axis is sequential/stateful -> "arbitrary". Keep VMEM budget v7x-safe
    # (64 MiB physical there); weights are double-buffered across the layer axis.
    return pltpu.CompilerParams(
        dimension_semantics=("arbitrary",),
        vmem_limit_bytes=48 * 1024 * 1024,
    )
    # TODO(synk): at production d_model/d_ff, single-buffer the constant inputs
    # (pipeline_mode=pl.Buffered(1)) and tile w1/w2 over a d_ff grid axis if needed.


def encoder_stack(src, p, *, num_heads, eps=1e-5):
    B, S, D = src.shape
    L = p['wqkv'].shape[0]
    F = p['w1'].shape[2]
    flops = L * (6 * B * S * D * D + 4 * B * S * S * D + 2 * B * S * D * D
                 + 4 * B * S * D * F)
    wbytes = L * 2 * (3 * D * D + D * D + 2 * D * F)
    cost = pl.CostEstimate(flops=flops, transcendentals=L * num_heads * B * S * S,
                           bytes_accessed=wbytes + 2 * B * S * D * 4)
    return pl.pallas_call(
        functools.partial(_encoder_stack_kernel, num_heads=num_heads, eps=eps),
        out_shape=jax.ShapeDtypeStruct((B, S, D), jnp.float32),
        grid=(L,),
        in_specs=[
            _const_spec((B, S, D)),
            _layer_spec((D, 3 * D)), _layer_spec((1, 3 * D)),
            _layer_spec((D, D)), _layer_spec((1, D)),
            _layer_spec((1, D)), _layer_spec((1, D)),
            _layer_spec((D, F)), _layer_spec((1, F)),
            _layer_spec((F, D)), _layer_spec((1, D)),
            _layer_spec((1, D)), _layer_spec((1, D)),
        ],
        out_specs=_const_spec((B, S, D)),
        compiler_params=_compiler_params(),
        cost_estimate=cost,
    )(src, p['wqkv'], p['bqkv'], p['wo'], p['bo'], p['ln1_g'], p['ln1_b'],
      p['w1'], p['b1'], p['w2'], p['b2'], p['ln2_g'], p['ln2_b'])


def decoder_stack(tgt, memory, p, out_w, out_b, *, num_heads, eps=1e-5):
    B, T, D = tgt.shape
    S = memory.shape[1]
    L = p['sa_wqkv'].shape[0]
    F = p['w1'].shape[2]
    flops = L * (6 * B * T * D * D + 4 * B * T * T * D + 2 * B * T * D * D
                 + 2 * B * T * D * D + 4 * B * S * D * D + 4 * B * T * S * D
                 + 2 * B * T * D * D + 4 * B * T * D * F) + 2 * B * T * D * D
    wbytes = L * 2 * (3 * D * D + D * D + D * D + 2 * D * D + D * D + 2 * D * F) + 2 * D * D
    cost = pl.CostEstimate(flops=flops,
                           transcendentals=L * num_heads * B * (T * T + T * S),
                           bytes_accessed=wbytes + (2 * B * T * D + B * S * D) * 4)
    return pl.pallas_call(
        functools.partial(_decoder_stack_kernel, num_heads=num_heads, eps=eps),
        out_shape=jax.ShapeDtypeStruct((B, T, D), jnp.float32),
        grid=(L,),
        in_specs=[
            _const_spec((B, T, D)), _const_spec((B, S, D)),
            # self-attention
            _layer_spec((D, 3 * D)), _layer_spec((1, 3 * D)),
            _layer_spec((D, D)), _layer_spec((1, D)),
            _layer_spec((1, D)), _layer_spec((1, D)),
            # cross-attention
            _layer_spec((D, D)), _layer_spec((1, D)),
            _layer_spec((D, 2 * D)), _layer_spec((1, 2 * D)),
            _layer_spec((D, D)), _layer_spec((1, D)),
            _layer_spec((1, D)), _layer_spec((1, D)),
            # feed-forward
            _layer_spec((D, F)), _layer_spec((1, F)),
            _layer_spec((F, D)), _layer_spec((1, D)),
            _layer_spec((1, D)), _layer_spec((1, D)),
            # fused output linear
            _const_spec((D, D)), _const_spec((1, D)),
        ],
        out_specs=_const_spec((B, T, D)),
        compiler_params=_compiler_params(),
        cost_estimate=cost,
    )(tgt, memory,
      p['sa_wqkv'], p['sa_bqkv'], p['sa_wo'], p['sa_bo'], p['ln1_g'], p['ln1_b'],
      p['ca_wq'], p['ca_bq'], p['ca_wkv'], p['ca_bkv'], p['ca_wo'], p['ca_bo'],
      p['ln2_g'], p['ln2_b'],
      p['w1'], p['b1'], p['w2'], p['b2'], p['ln3_g'], p['ln3_b'],
      out_w, out_b)


# ----------------------------- parameters (weights bf16, biases/LN f32) -----------------------------

def _w(key, shape):
    return (0.02 * jax.random.normal(key, shape, jnp.float32)).astype(jnp.bfloat16)


def _stack_layers(layers):
    return {k: jnp.stack([lp[k] for lp in layers], axis=0) for k in layers[0]}


def init_encoder_params(key, num_layers, d, d_ff):
    def layer(k):
        k1, k2, k3, k4 = jax.random.split(k, 4)
        return dict(
            wqkv=_w(k1, (d, 3 * d)), bqkv=jnp.zeros((1, 3 * d), jnp.float32),
            wo=_w(k2, (d, d)), bo=jnp.zeros((1, d), jnp.float32),
            w1=_w(k3, (d, d_ff)), b1=jnp.zeros((1, d_ff), jnp.float32),
            w2=_w(k4, (d_ff, d)), b2=jnp.zeros((1, d), jnp.float32),
            ln1_g=jnp.ones((1, d), jnp.float32), ln1_b=jnp.zeros((1, d), jnp.float32),
            ln2_g=jnp.ones((1, d), jnp.float32), ln2_b=jnp.zeros((1, d), jnp.float32),
        )
    return _stack_layers([layer(jax.random.fold_in(key, i)) for i in range(num_layers)])


def init_decoder_params(key, num_layers, d, d_ff):
    def layer(k):
        ks = jax.random.split(k, 7)
        return dict(
            sa_wqkv=_w(ks[0], (d, 3 * d)), sa_bqkv=jnp.zeros((1, 3 * d), jnp.float32),
            sa_wo=_w(ks[1], (d, d)), sa_bo=jnp.zeros((1, d), jnp.float32),
            ca_wq=_w(ks[2], (d, d)), ca_bq=jnp.zeros((1, d), jnp.float32),
            ca_wkv=_w(ks[3], (d, 2 * d)), ca_bkv=jnp.zeros((1, 2 * d), jnp.float32),
            ca_wo=_w(ks[4], (d, d)), ca_bo=jnp.zeros((1, d), jnp.float32),
            w1=_w(ks[5], (d, d_ff)), b1=jnp.zeros((1, d_ff), jnp.float32),
            w2=_w(ks[6], (d_ff, d)), b2=jnp.zeros((1, d), jnp.float32),
            ln1_g=jnp.ones((1, d), jnp.float32), ln1_b=jnp.zeros((1, d), jnp.float32),
            ln2_g=jnp.ones((1, d), jnp.float32), ln2_b=jnp.zeros((1, d), jnp.float32),
            ln3_g=jnp.ones((1, d), jnp.float32), ln3_b=jnp.zeros((1, d), jnp.float32),
        )
    return _stack_layers([layer(jax.random.fold_in(key, i)) for i in range(num_layers)])


def init_params(key, d_model, d_ff, num_layers):
    ke, kd, ko = jax.random.split(key, 3)
    return dict(
        encoder=init_encoder_params(ke, num_layers, d_model, d_ff),
        decoder=init_decoder_params(kd, num_layers, d_model, d_ff),
        out_w=_w(ko, (d_model, d_model)),
        out_b=jnp.zeros((1, d_model), jnp.float32),
    )


# ----------------------------- model forward -----------------------------

def spectrogram_transformer_forward(params, src, tgt, *, num_heads):
    """src, tgt: [seq_len, batch, features] (PyTorch convention). Returns same layout."""
    x = jnp.transpose(src, (1, 0, 2))          # (B, S, D) batch-major for the kernels
    memory = encoder_stack(x, params['encoder'], num_heads=num_heads)
    y = jnp.transpose(tgt, (1, 0, 2))          # (B, T, D)
    out = decoder_stack(y, memory, params['decoder'], params['out_w'], params['out_b'],
                        num_heads=num_heads)
    return jnp.transpose(out, (1, 0, 2))       # (T, B, D)


# ----------------------------- main -----------------------------

if __name__ == "__main__":
    # Small shapes consistent with the module: d_model=128 (default input_dim),
    # num_heads=8, dim_feedforward=256, num_layers=2 (demo-sized), seq_len=8, batch=2.
    D_MODEL, NUM_HEADS, D_FF, NUM_LAYERS = 128, 8, 256, 2
    SEQ, BATCH = 8, 2

    key = jax.random.PRNGKey(0)
    kp, ks, kt = jax.random.split(key, 3)
    params = init_params(kp, D_MODEL, D_FF, NUM_LAYERS)
    src = jax.random.normal(ks, (SEQ, BATCH, D_MODEL), jnp.float32)
    tgt = jax.random.normal(kt, (SEQ, BATCH, D_MODEL), jnp.float32)

    fwd = jax.jit(functools.partial(spectrogram_transformer_forward, num_heads=NUM_HEADS))
    out = jax.block_until_ready(fwd(params, src, tgt))

    assert out.shape == (SEQ, BATCH, D_MODEL)
    assert bool(jnp.all(jnp.isfinite(out)))
    print("KERNEL_OK")
</pallas_src>

<mosaic_0001>
module attributes {stable_mosaic.version = 11 : i64} {
  func.func @_decoder_stack_kernel(%arg0: i32, %arg1: memref<2x8x128xf32, #tpu.memory_space<vmem>>, %arg2: memref<2x8x128xf32, #tpu.memory_space<vmem>>, %arg3: memref<1x128x384xbf16, #tpu.memory_space<vmem>>, %arg4: memref<1x1x384xf32, #tpu.memory_space<vmem>>, %arg5: memref<1x128x128xbf16, #tpu.memory_space<vmem>>, %arg6: memref<1x1x128xf32, #tpu.memory_space<vmem>>, %arg7: memref<1x1x128xf32, #tpu.memory_space<vmem>>, %arg8: memref<1x1x128xf32, #tpu.memory_space<vmem>>, %arg9: memref<1x128x128xbf16, #tpu.memory_space<vmem>>, %arg10: memref<1x1x128xf32, #tpu.memory_space<vmem>>, %arg11: memref<1x128x256xbf16, #tpu.memory_space<vmem>>, %arg12: memref<1x1x256xf32, #tpu.memory_space<vmem>>, %arg13: memref<1x128x128xbf16, #tpu.memory_space<vmem>>, %arg14: memref<1x1x128xf32, #tpu.memory_space<vmem>>, %arg15: memref<1x1x128xf32, #tpu.memory_space<vmem>>, %arg16: memref<1x1x128xf32, #tpu.memory_space<vmem>>, %arg17: memref<1x128x256xbf16, #tpu.memory_space<vmem>>, %arg18: memref<1x1x256xf32, #tpu.memory_space<vmem>>, %arg19: memref<1x256x128xbf16, #tpu.memory_space<vmem>>, %arg20: memref<1x1x128xf32, #tpu.memory_space<vmem>>, %arg21: memref<1x1x128xf32, #tpu.memory_space<vmem>>, %arg22: memref<1x1x128xf32, #tpu.memory_space<vmem>>, %arg23: memref<128x128xbf16, #tpu.memory_space<vmem>>, %arg24: memref<1x128xf32, #tpu.memory_space<vmem>>, %arg25: memref<2x8x128xf32, #tpu.memory_space<vmem>>) attributes {dimension_semantics = [#tpu.dimension_semantics<arbitrary>], iteration_bounds = array<i64: 2>, scalar_prefetch = 0 : i64, scratch_operands = 0 : i64, tpu.core_type = #tpu.core_type<tc>, window_params = [{pipeline_mode = #tpu.pipeline_mode<synchronous>, transform_indices = @transform_0, window_bounds = array<i64: 2, 8, 128>}, {pipeline_mode = #tpu.pipeline_mode<synchronous>, transform_indices = @transform_1, window_bounds = array<i64: 2, 8, 128>}, {transform_indices = @transform_2, window_bounds = array<i64: 1, 128, 384>}, {transform_indices = @transform_3, window_bounds = array<i64: 1, 1, 384>}, {transform_indices = @transform_4, window_bounds = array<i64: 1, 128, 128>}, {transform_indices = @transform_5, window_bounds = array<i64: 1, 1, 128>}, {transform_indices = @transform_6, window_bounds = array<i64: 1, 1, 128>}, {transform_indices = @transform_7, window_bounds = array<i64: 1, 1, 128>}, {transform_indices = @transform_8, window_bounds = array<i64: 1, 128, 128>}, {transform_indices = @transform_9, window_bounds = array<i64: 1, 1, 128>}, {transform_indices = @transform_10, window_bounds = array<i64: 1, 128, 256>}, {transform_indices = @transform_11, window_bounds = array<i64: 1, 1, 256>}, {transform_indices = @transform_12, window_bounds = array<i64: 1, 128, 128>}, {transform_indices = @transform_13, window_bounds = array<i64: 1, 1, 128>}, {transform_indices = @transform_14, window_bounds = array<i64: 1, 1, 128>}, {transform_indices = @transform_15, window_bounds = array<i64: 1, 1, 128>}, {transform_indices = @transform_16, window_bounds = array<i64: 1, 128, 256>}, {transform_indices = @transform_17, window_bounds = array<i64: 1, 1, 256>}, {transform_indices = @transform_18, window_bounds = array<i64: 1, 256, 128>}, {transform_indices = @transform_19, window_bounds = array<i64: 1, 1, 128>}, {transform_indices = @transform_20, window_bounds = array<i64: 1, 1, 128>}, {transform_indices = @transform_21, window_bounds = array<i64: 1, 1, 128>}, {pipeline_mode = #tpu.pipeline_mode<synchronous>, transform_indices = @transform_22, window_bounds = array<i64: 128, 128>}, {pipeline_mode = #tpu.pipeline_mode<synchronous>, transform_indices = @transform_23, window_bounds = array<i64: 1, 128>}, {pipeline_mode = #tpu.pipeline_mode<synchronous>, transform_indices = @transform_24, window_bounds = array<i64: 2, 8, 128>}]} {
    %c0_i32 = arith.constant 0 : i32
    %0 = arith.cmpi eq, %arg0, %c0_i32 : i32
    %1 = arith.extui %0 : i1 to i32
    %c0_i32_0 = arith.constant 0 : i32
    %2 = arith.cmpi ne, %1, %c0_i32_0 : i32
    scf.if %2 {
      %c0_102 = arith.constant 0 : index
      %c0_103 = arith.constant 0 : index
      %c0_104 = arith.constant 0 : index
      %466 = vector.load %arg1[%c0_102, %c0_103, %c0_104] : memref<2x8x128xf32, #tpu.memory_space<vmem>>, vector<2x8x128xf32>
      %c0_105 = arith.constant 0 : index
      %c0_106 = arith.constant 0 : index
      %c0_107 = arith.constant 0 : index
      %467 = vector.load %arg25[%c0_105, %c0_106, %c0_107] : memref<2x8x128xf32, #tpu.memory_space<vmem>>, vector<2x8x128xf32>
      tpu.vector_store %arg25[%c0_105, %c0_106, %c0_107], %466 {strides = array<i32>} : memref<2x8x128xf32, #tpu.memory_space<vmem>>, vector<2x8x128xf32>,
    } else {
    }
    %c0 = arith.constant 0 : index
    %c0_1 = arith.constant 0 : index
    %c0_2 = arith.constant 0 : index
    %3 = vector.load %arg25[%c0, %c0_1, %c0_2] : memref<2x8x128xf32, #tpu.memory_space<vmem>>, vector<2x8x128xf32>
    %4 = vector.shape_cast %3 : vector<2x8x128xf32> to vector<16x128xf32>
    %c0_3 = arith.constant 0 : index
    %c0_4 = arith.constant 0 : index
    %c0_5 = arith.constant 0 : index
    %5 = vector.load %arg2[%c0_3, %c0_4, %c0_5] : memref<2x8x128xf32, #tpu.memory_space<vmem>>, vector<2x8x128xf32>
    %6 = vector.shape_cast %5 : vector<2x8x128xf32> to vector<16x128xf32>
    %7 = arith.truncf %6 : vector<16x128xf32> to vector<16x128xbf16>
    %8 = arith.truncf %4 : vector<16x128xf32> to vector<16x128xbf16>
    %c0_6 = arith.constant 0 : index
    %c0_7 = arith.constant 0 : index
    %c0_8 = arith.constant 0 : index
    %9 = vector.load %arg3[%c0_6, %c0_7, %c0_8] : memref<1x128x384xbf16, #tpu.memory_space<vmem>>, vector<1x128x384xbf16>
    %10 = vector.shape_cast %9 : vector<1x128x384xbf16> to vector<128x384xbf16>
    %c0_9 = arith.constant 0 : index
    %c0_10 = arith.constant 0 : index
    %c0_11 = arith.constant 0 : index
    %11 = vector.load %arg4[%c0_9, %c0_10, %c0_11] : memref<1x1x384xf32, #tpu.memory_space<vmem>>, vector<1x1x384xf32>
    %12 = vector.shape_cast %11 : vector<1x1x384xf32> to vector<1x384xf32>
    %c0_12 = arith.constant 0 : index
    %c0_13 = arith.constant 0 : index
    %c0_14 = arith.constant 0 : index
    %13 = vector.load %arg5[%c0_12, %c0_13, %c0_14] : memref<1x128x128xbf16, #tpu.memory_space<vmem>>, vector<1x128x128xbf16>
    %14 = vector.shape_cast %13 : vector<1x128x128xbf16> to vector<128x128xbf16>
    %c0_15 = arith.constant 0 : index
    %c0_16 = arith.constant 0 : index
    %c0_17 = arith.constant 0 : index
    %15 = vector.load %arg6[%c0_15, %c0_16, %c0_17] : memref<1x1x128xf32, #tpu.memory_space<vmem>>, vector<1x1x128xf32>
    %16 = vector.shape_cast %15 : vector<1x1x128xf32> to vector<1x128xf32>
    %cst = arith.constant dense<0.000000e+00> : vector<16x384xf32>
    %17 = tpu.matmul %8, %10, %cst {dimension_numbers = #tpu.dot_dimension_numbers<[1], [0], [0], [1], [0, 0, 1, 1], [], []>} : vector<16x128xbf16>, vector<128x384xbf16>, vector<16x384xf32> -> vector<16x384xf32>
    %18 = vector.broadcast %12 : vector<1x384xf32> to vector<16x384xf32>
    %19 = arith.addf %17, %18 : vector<16x384xf32>
    %20 = vector.extract_strided_slice %19 {offsets = [0, 0], sizes = [16, 128], strides = [1, 1]} : vector<16x384xf32> to vector<16x128xf32>
    %cst_18 = arith.constant 2.500000e-01 : f32
    %21 = vector.broadcast %cst_18 : f32 to vector<16x128xf32>
    %22 = arith.mulf %20, %21 : vector<16x128xf32>
    %23 = vector.extract_strided_slice %19 {offsets = [0, 128], sizes = [16, 128], strides = [1, 1]} : vector<16x384xf32> to vector<16x128xf32>
    %24 = vector.extract_strided_slice %19 {offsets = [0, 256], sizes = [16, 128], strides = [1, 1]} : vector<16x384xf32> to vector<16x128xf32>
    %25 = vector.extract_strided_slice %22 {offsets = [0, 0], sizes = [8, 128], strides = [1, 1]} : vector<16x128xf32> to vector<8x128xf32>
    %26 = vector.extract_strided_slice %25 {offsets = [0, 0], sizes = [8, 16], strides = [1, 1]} : vector<8x128xf32> to vector<8x16xf32>
    %27 = vector.shape_cast %26 : vector<8x16xf32> to vector<1x8x16xf32>
    %28 = vector.extract_strided_slice %25 {offsets = [0, 16], sizes = [8, 16], strides = [1, 1]} : vector<8x128xf32> to vector<8x16xf32>
    %29 = vector.shape_cast %28 : vector<8x16xf32> to vector<1x8x16xf32>
    %30 = vector.extract_strided_slice %25 {offsets = [0, 32], sizes = [8, 16], strides = [1, 1]} : vector<8x128xf32> to vector<8x16xf32>
    %31 = vector.shape_cast %30 : vector<8x16xf32> to vector<1x8x16xf32>
    %32 = vector.extract_strided_slice %25 {offsets = [0, 48], sizes = [8, 16], strides = [1, 1]} : vector<8x128xf32> to vector<8x16xf32>
    %33 = vector.shape_cast %32 : vector<8x16xf32> to vector<1x8x16xf32>
    %34 = vector.extract_strided_slice %25 {offsets = [0, 64], sizes = [8, 16], strides = [1, 1]} : vector<8x128xf32> to vector<8x16xf32>
    %35 = vector.shape_cast %34 : vector<8x16xf32> to vector<1x8x16xf32>
    %36 = vector.extract_strided_slice %25 {offsets = [0, 80], sizes = [8, 16], strides = [1, 1]} : vector<8x128xf32> to vector<8x16xf32>
    %37 = vector.shape_cast %36 : vector<8x16xf32> to vector<1x8x16xf32>
    %38 = vector.extract_strided_slice %25 {offsets = [0, 96], sizes = [8, 16], strides = [1, 1]} : vector<8x128xf32> to vector<8x16xf32>
    %39 = vector.shape_cast %38 : vector<8x16xf32> to vector<1x8x16xf32>
    %40 = vector.extract_strided_slice %25 {offsets = [0, 112], sizes = [8, 16], strides = [1, 1]} : vector<8x128xf32> to vector<8x16xf32>
    %41 = vector.shape_cast %40 : vector<8x16xf32> to vector<1x8x16xf32>
    %42 = vector.extract_strided_slice %22 {offsets = [8, 0], sizes = [8, 128], strides = [1, 1]} : vector<16x128xf32> to vector<8x128xf32>
    %43 = vector.extract_strided_slice %42 {offsets = [0, 0], sizes = [8, 16], strides = [1, 1]} : vector<8x128xf32> to vector<8x16xf32>
    %44 = vector.shape_cast %43 : vector<8x16xf32> to vector<1x8x16xf32>
    %45 = vector.extract_strided_slice %42 {offsets = [0, 16], sizes = [8, 16], strides = [1, 1]} : vector<8x128xf32> to vector<8x16xf32>
    %46 = vector.shape_cast %45 : vector<8x16xf32> to vector<1x8x16xf32>
    %47 = vector.extract_strided_slice %42 {offsets = [0, 32], sizes = [8, 16], strides = [1, 1]} : vector<8x128xf32> to vector<8x16xf32>
    %48 = vector.shape_cast %47 : vector<8x16xf32> to vector<1x8x16xf32>
    %49 = vector.extract_strided_slice %42 {offsets = [0, 48], sizes = [8, 16], strides = [1, 1]} : vector<8x128xf32> to vector<8x16xf32>
    %50 = vector.shape_cast %49 : vector<8x16xf32> to vector<1x8x16xf32>
    %51 = vector.extract_strided_slice %42 {offsets = [0, 64], sizes = [8, 16], strides = [1, 1]} : vector<8x128xf32> to vector<8x16xf32>
    %52 = vector.shape_cast %51 : vector<8x16xf32> to vector<1x8x16xf32>
    %53 = vector.extract_strided_slice %42 {offsets = [0, 80], sizes = [8, 16], strides = [1, 1]} : vector<8x128xf32> to vector<8x16xf32>
    %54 = vector.shape_cast %53 : vector<8x16xf32> to vector<1x8x16xf32>
    %55 = vector.extract_strided_slice %42 {offsets = [0, 96], sizes = [8, 16], strides = [1, 1]} : vector<8x128xf32> to vector<8x16xf32>
    %56 = vector.shape_cast %55 : vector<8x16xf32> to vector<1x8x16xf32>
    %57 = vector.extract_strided_slice %42 {offsets = [0, 112], sizes = [8, 16], strides = [1, 1]} : vector<8x128xf32> to vector<8x16xf32>
    %58 = vector.shape_cast %57 : vector<8x16xf32> to vector<1x8x16xf32>
    %59 = tpu.concatenate %27, %29, %31, %33, %35, %37, %39, %41, %44, %46, %48, %50, %52, %54, %56, %58 in 0 : vector<1x8x16xf32>, vector<1x8x16xf32>, vector<1x8x16xf32>, vector<1x8x16xf32>, vector<1x8x16xf32>, vector<1x8x16xf32>, vector<1x8x16xf32>, vector<1x8x16xf32>, vector<1x8x16xf32>, vector<1x8x16xf32>, vector<1x8x16xf32>, vector<1x8x16xf32>, vector<1x8x16xf32>, vector<1x8x16xf32>, vector<1x8x16xf32>, vector<1x8x16xf32> -> vector<16x8x16xf32>
    %60 = arith.truncf %59 : vector<16x8x16xf32> to vector<16x8x16xbf16>
    %61 = vector.extract_strided_slice %23 {offsets = [0, 0], sizes = [8, 128], strides = [1, 1]} : vector<16x128xf32> to vector<8x128xf32>
    %62 = vector.extract_strided_slice %61 {offsets = [0, 0], sizes = [8, 16], strides = [1, 1]} : vector<8x128xf32> to vector<8x16xf32>
    %63 = vector.shape_cast %62 : vector<8x16xf32> to vector<1x8x16xf32>
    %64 = vector.extract_strided_slice %61 {offsets = [0, 16], sizes = [8, 16], strides = [1, 1]} : vector<8x128xf32> to vector<8x16xf32>
    %65 = vector.shape_cast %64 : vector<8x16xf32> to vector<1x8x16xf32>
    %66 = vector.extract_strided_slice %61 {offsets = [0, 32], sizes = [8, 16], strides = [1, 1]} : vector<8x128xf32> to vector<8x16xf32>
    %67 = vector.shape_cast %66 : vector<8x16xf32> to vector<1x8x16xf32>
    %68 = vector.extract_strided_slice %61 {offsets = [0, 48], sizes = [8, 16], strides = [1, 1]} : vector<8x128xf32> to vector<8x16xf32>
    %69 = vector.shape_cast %68 : vector<8x16xf32> to vector<1x8x16xf32>
    %70 = vector.extract_strided_slice %61 {offsets = [0, 64], sizes = [8, 16], strides = [1, 1]} : vector<8x128xf32> to vector<8x16xf32>
    %71 = vector.shape_cast %70 : vector<8x16xf32> to vector<1x8x16xf32>
    %72 = vector.extract_strided_slice %61 {offsets = [0, 80], sizes = [8, 16], strides = [1, 1]} : vector<8x128xf32> to vector<8x16xf32>
    %73 = vector.shape_cast %72 : vector<8x16xf32> to vector<1x8x16xf32>
    %74 = vector.extract_strided_slice %61 {offsets = [0, 96], sizes = [8, 16], strides = [1, 1]} : vector<8x128xf32> to vector<8x16xf32>
    %75 = vector.shape_cast %74 : vector<8x16xf32> to vector<1x8x16xf32>
    %76 = vector.extract_strided_slice %61 {offsets = [0, 112], sizes = [8, 16], strides = [1, 1]} : vector<8x128xf32> to vector<8x16xf32>
    %77 = vector.shape_cast %76 : vector<8x16xf32> to vector<1x8x16xf32>
    %78 = vector.extract_strided_slice %23 {offsets = [8, 0], sizes = [8, 128], strides = [1, 1]} : vector<16x128xf32> to vector<8x128xf32>
    %79 = vector.extract_strided_slice %78 {offsets = [0, 0], sizes = [8, 16], strides = [1, 1]} : vector<8x128xf32> to vector<8x16xf32>
    %80 = vector.shape_cast %79 : vector<8x16xf32> to vector<1x8x16xf32>
    %81 = vector.extract_strided_slice %78 {offsets = [0, 16], sizes = [8, 16], strides = [1, 1]} : vector<8x128xf32> to vector<8x16xf32>
    %82 = vector.shape_cast %81 : vector<8x16xf32> to vector<1x8x16xf32>
    %83 = vector.extract_strided_slice %78 {offsets = [0, 32], sizes = [8, 16], strides = [1, 1]} : vector<8x128xf32> to vector<8x16xf32>
    %84 = vector.shape_cast %83 : vector<8x16xf32> to vector<1x8x16xf32>
    %85 = vector.extract_strided_slice %78 {offsets = [0, 48], sizes = [8, 16], strides = [1, 1]} : vector<8x128xf32> to vector<8x16xf32>
    %86 = vector.shape_cast %85 : vector<8x16xf32> to vector<1x8x16xf32>
    %87 = vector.extract_strided_slice %78 {offsets = [0, 64], sizes = [8, 16], strides = [1, 1]} : vector<8x128xf32> to vector<8x16xf32>
    %88 = vector.shape_cast %87 : vector<8x16xf32> to vector<1x8x16xf32>
    %89 = vector.extract_strided_slice %78 {offsets = [0, 80], sizes = [8, 16], strides = [1, 1]} : vector<8x128xf32> to vector<8x16xf32>
    %90 = vector.shape_cast %89 : vector<8x16xf32> to vector<1x8x16xf32>
    %91 = vector.extract_strided_slice %78 {offsets = [0, 96], sizes = [8, 16], strides = [1, 1]} : vector<8x128xf32> to vector<8x16xf32>
    %92 = vector.shape_cast %91 : vector<8x16xf32> to vector<1x8x16xf32>
    %93 = vector.extract_strided_slice %78 {offsets = [0, 112], sizes = [8, 16], strides = [1, 1]} : vector<8x128xf32> to vector<8x16xf32>
    %94 = vector.shape_cast %93 : vector<8x16xf32> to vector<1x8x16xf32>
    %95 = tpu.concatenate %63, %65, %67, %69, %71, %73, %75, %77, %80, %82, %84, %86, %88, %90, %92, %94 in 0 : vector<1x8x16xf32>, vector<1x8x16xf32>, vector<1x8x16xf32>, vector<1x8x16xf32>, vector<1x8x16xf32>, vector<1x8x16xf32>, vector<1x8x16xf32>, vector<1x8x16xf32>, vector<1x8x16xf32>, vector<1x8x16xf32>, vector<1x8x16xf32>, vector<1x8x16xf32>, vector<1x8x16xf32>, vector<1x8x16xf32>, vector<1x8x16xf32>, vector<1x8x16xf32> -> vector<16x8x16xf32>
    %96 = arith.truncf %95 : vector<16x8x16xf32> to vector<16x8x16xbf16>
    %97 = vector.extract_strided_slice %24 {offsets = [0, 0], sizes = [8, 128], strides = [1, 1]} : vector<16x128xf32> to vector<8x128xf32>
    %98 = vector.extract_strided_slice %97 {offsets = [0, 0], sizes = [8, 16], strides = [1, 1]} : vector<8x128xf32> to vector<8x16xf32>
    %99 = vector.shape_cast %98 : vector<8x16xf32> to vector<1x8x16xf32>
    %100 = vector.extract_strided_slice %97 {offsets = [0, 16], sizes = [8, 16], strides = [1, 1]} : vector<8x128xf32> to vector<8x16xf32>
    %101 = vector.shape_cast %100 : vector<8x16xf32> to vector<1x8x16xf32>
    %102 = vector.extract_strided_slice %97 {offsets = [0, 32], sizes = [8, 16], strides = [1, 1]} : vector<8x128xf32> to vector<8x16xf32>
    %103 = vector.shape_cast %102 : vector<8x16xf32> to vector<1x8x16xf32>
    %104 = vector.extract_strided_slice %97 {offsets = [0, 48], sizes = [8, 16], strides = [1, 1]} : vector<8x128xf32> to vector<8x16xf32>
    %105 = vector.shape_cast %104 : vector<8x16xf32> to vector<1x8x16xf32>
    %106 = vector.extract_strided_slice %97 {offsets = [0, 64], sizes = [8, 16], strides = [1, 1]} : vector<8x128xf32> to vector<8x16xf32>
    %107 = vector.shape_cast %106 : vector<8x16xf32> to vector<1x8x16xf32>
    %108 = vector.extract_strided_slice %97 {offsets = [0, 80], sizes = [8, 16], strides = [1, 1]} : vector<8x128xf32> to vector<8x16xf32>
    %109 = vector.shape_cast %108 : vector<8x16xf32> to vector<1x8x16xf32>
    %110 = vector.extract_strided_slice %97 {offsets = [0, 96], sizes = [8, 16], strides = [1, 1]} : vector<8x128xf32> to vector<8x16xf32>
    %111 = vector.shape_cast %110 : vector<8x16xf32> to vector<1x8x16xf32>
    %112 = vector.extract_strided_slice %97 {offsets = [0, 112], sizes = [8, 16], strides = [1, 1]} : vector<8x128xf32> to vector<8x16xf32>
    %113 = vector.shape_cast %112 : vector<8x16xf32> to vector<1x8x16xf32>
    %114 = vector.extract_strided_slice %24 {offsets = [8, 0], sizes = [8, 128], strides = [1, 1]} : vector<16x128xf32> to vector<8x128xf32>
    %115 = vector.extract_strided_slice %114 {offsets = [0, 0], sizes = [8, 16], strides = [1, 1]} : vector<8x128xf32> to vector<8x16xf32>
    %116 = vector.shape_cast %115 : vector<8x16xf32> to vector<1x8x16xf32>
    %117 = vector.extract_strided_slice %114 {offsets = [0, 16], sizes = [8, 16], strides = [1, 1]} : vector<8x128xf32> to vector<8x16xf32>
    %118 = vector.shape_cast %117 : vector<8x16xf32> to vector<1x8x16xf32>
    %119 = vector.extract_strided_slice %114 {offsets = [0, 32], sizes = [8, 16], strides = [1, 1]} : vector<8x128xf32> to vector<8x16xf32>
    %120 = vector.shape_cast %119 : vector<8x16xf32> to vector<1x8x16xf32>
    %121 = vector.extract_strided_slice %114 {offsets = [0, 48], sizes = [8, 16], strides = [1, 1]} : vector<8x128xf32> to vector<8x16xf32>
    %122 = vector.shape_cast %121 : vector<8x16xf32> to vector<1x8x16xf32>
    %123 = vector.extract_strided_slice %114 {offsets = [0, 64], sizes = [8, 16], strides = [1, 1]} : vector<8x128xf32> to vector<8x16xf32>
    %124 = vector.shape_cast %123 : vector<8x16xf32> to vector<1x8x16xf32>
    %125 = vector.extract_strided_slice %114 {offsets = [0, 80], sizes = [8, 16], strides = [1, 1]} : vector<8x128xf32> to vector<8x16xf32>
    %126 = vector.shape_cast %125 : vector<8x16xf32> to vector<1x8x16xf32>
    %127 = vector.extract_strided_slice %114 {offsets = [0, 96], sizes = [8, 16], strides = [1, 1]} : vector<8x128xf32> to vector<8x16xf32>
    %128 = vector.shape_cast %127 : vector<8x16xf32> to vector<1x8x16xf32>
    %129 = vector.extract_strided_slice %114 {offsets = [0, 112], sizes = [8, 16], strides = [1, 1]} : vector<8x128xf32> to vector<8x16xf32>
    %130 = vector.shape_cast %129 : vector<8x16xf32> to vector<1x8x16xf32>
    %131 = tpu.concatenate %99, %101, %103, %105, %107, %109, %111, %113, %116, %118, %120, %122, %124, %126, %128, %130 in 0 : vector<1x8x16xf32>, vector<1x8x16xf32>, vector<1x8x16xf32>, vector<1x8x16xf32>, vector<1x8x16xf32>, vector<1x8x16xf32>, vector<1x8x16xf32>, vector<1x8x16xf32>, vector<1x8x16xf32>, vector<1x8x16xf32>, vector<1x8x16xf32>, vector<1x8x16xf32>, vector<1x8x16xf32>, vector<1x8x16xf32>, vector<1x8x16xf32>, vector<1x8x16xf32> -> vector<16x8x16xf32>
    %132 = arith.truncf %131 : vector<16x8x16xf32> to vector<16x8x16xbf16>
    %cst_19 = arith.constant dense<0.000000e+00> : vector<16x8x8xf32>
    %133 = tpu.matmul %60, %96, %cst_19 {dimension_numbers = #tpu.dot_dimension_numbers<[2], [2], [1], [1], [0, 0, 0, 1, 1, 1], [0], [0]>} : vector<16x8x16xbf16>, vector<16x8x16xbf16>, vector<16x8x8xf32> -> vector<16x8x8xf32>
    %cst_20 = arith.constant dense<0xFF800000> : vector<16x8xf32>
    %134 = vector.multi_reduction <maximumf>, %133, %cst_20 [2] : vector<16x8x8xf32> to vector<16x8xf32>
    %135 = vector.shape_cast %134 : vector<16x8xf32> to vector<16x8x1xf32>
    %136 = vector.broadcast %135 : vector<16x8x1xf32> to vector<16x8x8xf32>
    %137 = arith.subf %133, %136 : vector<16x8x8xf32>
    %138 = math.exp %137 : vector<16x8x8xf32>
    %cst_21 = arith.constant dense<0.000000e+00> : vector<16x8xf32>
    %139 = vector.multi_reduction <add>, %138, %cst_21 [2] : vector<16x8x8xf32> to vector<16x8xf32>
    %140 = vector.shape_cast %139 : vector<16x8xf32> to vector<16x8x1xf32>
    %141 = tpu.reciprocal %140 {approx = true} : vector<16x8x1xf32> -> vector<16x8x1xf32>
    %142 = vector.broadcast %141 : vector<16x8x1xf32> to vector<16x8x8xf32>
    %143 = arith.mulf %138, %142 : vector<16x8x8xf32>
    %144 = arith.truncf %143 : vector<16x8x8xf32> to vector<16x8x8xbf16>
    %cst_22 = arith.constant dense<0.000000e+00> : vector<16x8x16xf32>
    %145 = tpu.matmul %144, %132, %cst_22 {dimension_numbers = #tpu.dot_dimension_numbers<[2], [1], [1], [2], [0, 0, 0, 1, 1, 2], [0], [0]>} : vector<16x8x8xbf16>, vector<16x8x16xbf16>, vector<16x8x16xf32> -> vector<16x8x16xf32>
    %146 = vector.extract_strided_slice %145 {offsets = [0, 0, 0], sizes = [1, 8, 16], strides = [1, 1, 1]} : vector<16x8x16xf32> to vector<1x8x16xf32>
    %147 = vector.shape_cast %146 : vector<1x8x16xf32> to vector<8x16xf32>
    %148 = vector.extract_strided_slice %145 {offsets = [1, 0, 0], sizes = [1, 8, 16], strides = [1, 1, 1]} : vector<16x8x16xf32> to vector<1x8x16xf32>
    %149 = vector.shape_cast %148 : vector<1x8x16xf32> to vector<8x16xf32>
    %150 = vector.extract_strided_slice %145 {offsets = [2, 0, 0], sizes = [1, 8, 16], strides = [1, 1, 1]} : vector<16x8x16xf32> to vector<1x8x16xf32>
    %151 = vector.shape_cast %150 : vector<1x8x16xf32> to vector<8x16xf32>
    %152 = vector.extract_strided_slice %145 {offsets = [3, 0, 0], sizes = [1, 8, 16], strides = [1, 1, 1]} : vector<16x8x16xf32> to vector<1x8x16xf32>
    %153 = vector.shape_cast %152 : vector<1x8x16xf32> to vector<8x16xf32>
    %154 = vector.extract_strided_slice %145 {offsets = [4, 0, 0], sizes = [1, 8, 16], strides = [1, 1, 1]} : vector<16x8x16xf32> to vector<1x8x16xf32>
    %155 = vector.shape_cast %154 : vector<1x8x16xf32> to vector<8x16xf32>
    %156 = vector.extract_strided_slice %145 {offsets = [5, 0, 0], sizes = [1, 8, 16], strides = [1, 1, 1]} : vector<16x8x16xf32> to vector<1x8x16xf32>
    %157 = vector.shape_cast %156 : vector<1x8x16xf32> to vector<8x16xf32>
    %158 = vector.extract_strided_slice %145 {offsets = [6, 0, 0], sizes = [1, 8, 16], strides = [1, 1, 1]} : vector<16x8x16xf32> to vector<1x8x16xf32>
    %159 = vector.shape_cast %158 : vector<1x8x16xf32> to vector<8x16xf32>
    %160 = vector.extract_strided_slice %145 {offsets = [7, 0, 0], sizes = [1, 8, 16], strides = [1, 1, 1]} : vector<16x8x16xf32> to vector<1x8x16xf32>
    %161 = vector.shape_cast %160 : vector<1x8x16xf32> to vector<8x16xf32>
    %162 = tpu.concatenate %147, %149, %151, %153, %155, %157, %159, %161 in 1 : vector<8x16xf32>, vector<8x16xf32>, vector<8x16xf32>, vector<8x16xf32>, vector<8x16xf32>, vector<8x16xf32>, vector<8x16xf32>, vector<8x16xf32> -> vector<8x128xf32>
    %163 = vector.extract_strided_slice %145 {offsets = [8, 0, 0], sizes = [1, 8, 16], strides = [1, 1, 1]} : vector<16x8x16xf32> to vector<1x8x16xf32>
    %164 = vector.shape_cast %163 : vector<1x8x16xf32> to vector<8x16xf32>
    %165 = vector.extract_strided_slice %145 {offsets = [9, 0, 0], sizes = [1, 8, 16], strides = [1, 1, 1]} : vector<16x8x16xf32> to vector<1x8x16xf32>
    %166 = vector.shape_cast %165 : vector<1x8x16xf32> to vector<8x16xf32>
    %167 = vector.extract_strided_slice %145 {offsets = [10, 0, 0], sizes = [1, 8, 16], strides = [1, 1, 1]} : vector<16x8x16xf32> to vector<1x8x16xf32>
    %168 = vector.shape_cast %167 : vector<1x8x16xf32> to vector<8x16xf32>
    %169 = vector.extract_strided_slice %145 {offsets = [11, 0, 0], sizes = [1, 8, 16], strides = [1, 1, 1]} : vector<16x8x16xf32> to vector<1x8x16xf32>
    %170 = vector.shape_cast %169 : vector<1x8x16xf32> to vector<8x16xf32>
    %171 = vector.extract_strided_slice %145 {offsets = [12, 0, 0], sizes = [1, 8, 16], strides = [1, 1, 1]} : vector<16x8x16xf32> to vector<1x8x16xf32>
    %172 = vector.shape_cast %171 : vector<1x8x16xf32> to vector<8x16xf32>
    %173 = vector.extract_strided_slice %145 {offsets = [13, 0, 0], sizes = [1, 8, 16], strides = [1, 1, 1]} : vector<16x8x16xf32> to vector<1x8x16xf32>
    %174 = vector.shape_cast %173 : vector<1x8x16xf32> to vector<8x16xf32>
    %175 = vector.extract_strided_slice %145 {offsets = [14, 0, 0], sizes = [1, 8, 16], strides = [1, 1, 1]} : vector<16x8x16xf32> to vector<1x8x16xf32>
    %176 = vector.shape_cast %175 : vector<1x8x16xf32> to vector<8x16xf32>
    %177 = vector.extract_strided_slice %145 {offsets = [15, 0, 0], sizes = [1, 8, 16], strides = [1, 1, 1]} : vector<16x8x16xf32> to vector<1x8x16xf32>
    %178 = vector.shape_cast %177 : vector<1x8x16xf32> to vector<8x16xf32>
    %179 = tpu.concatenate %164, %166, %168, %170, %172, %174, %176, %178 in 1 : vector<8x16xf32>, vector<8x16xf32>, vector<8x16xf32>, vector<8x16xf32>, vector<8x16xf32>, vector<8x16xf32>, vector<8x16xf32>, vector<8x16xf32> -> vector<8x128xf32>
    %180 = tpu.concatenate %162, %179 in 0 : vector<8x128xf32>, vector<8x128xf32> -> vector<16x128xf32>
    %181 = arith.truncf %180 : vector<16x128xf32> to vector<16x128xbf16>
    %cst_23 = arith.constant dense<0.000000e+00> : vector<16x128xf32>
    %182 = tpu.matmul %181, %14, %cst_23 {dimension_numbers = #tpu.dot_dimension_numbers<[1], [0], [0], [1], [0, 0, 1, 1], [], []>} : vector<16x128xbf16>, vector<128x128xbf16>, vector<16x128xf32> -> vector<16x128xf32>
    %183 = vector.broadcast %16 : vector<1x128xf32> to vector<16x128xf32>
    %184 = arith.addf %182, %183 : vector<16x128xf32>
    %185 = arith.addf %4, %184 : vector<16x128xf32>
    %c0_24 = arith.constant 0 : index
    %c0_25 = arith.constant 0 : index
    %c0_26 = arith.constant 0 : index
    %186 = vector.load %arg7[%c0_24, %c0_25, %c0_26] : memref<1x1x128xf32, #tpu.memory_space<vmem>>, vector<1x1x128xf32>
    %187 = vector.shape_cast %186 : vector<1x1x128xf32> to vector<1x128xf32>
    %c0_27 = arith.constant 0 : index
    %c0_28 = arith.constant 0 : index
    %c0_29 = arith.constant 0 : index
    %188 = vector.load %arg8[%c0_27, %c0_28, %c0_29] : memref<1x1x128xf32, #tpu.memory_space<vmem>>, vector<1x1x128xf32>
    %189 = vector.shape_cast %188 : vector<1x1x128xf32> to vector<1x128xf32>
    %cst_30 = arith.constant dense<0.000000e+00> : vector<16xf32>
    %190 = vector.multi_reduction <add>, %185, %cst_30 [1] : vector<16x128xf32> to vector<16xf32>
    %191 = vector.shape_cast %190 : vector<16xf32> to vector<16x1xf32>
    %cst_31 = arith.constant 1.280000e+02 : f32
    %192 = vector.broadcast %cst_31 : f32 to vector<16x1xf32>
    %193 = arith.divf %191, %192 : vector<16x1xf32>
    %194 = vector.broadcast %193 : vector<16x1xf32> to vector<16x128xf32>
    %195 = arith.subf %185, %194 : vector<16x128xf32>
    %196 = arith.mulf %195, %195 : vector<16x128xf32>
    %cst_32 = arith.constant dense<0.000000e+00> : vector<16xf32>
    %197 = vector.multi_reduction <add>, %196, %cst_32 [1] : vector<16x128xf32> to vector<16xf32>
    %198 = vector.shape_cast %197 : vector<16xf32> to vector<16x1xf32>
    %cst_33 = arith.constant 1.280000e+02 : f32
    %199 = vector.broadcast %cst_33 : f32 to vector<16x1xf32>
    %200 = arith.divf %198, %199 : vector<16x1xf32>
    %cst_34 = arith.constant 9.99999974E-6 : f32
    %201 = vector.broadcast %cst_34 : f32 to vector<16x1xf32>
    %202 = arith.addf %200, %201 : vector<16x1xf32>
    %203 = math.rsqrt %202 : vector<16x1xf32>
    %204 = vector.broadcast %203 : vector<16x1xf32> to vector<16x128xf32>
    %205 = arith.mulf %195, %204 : vector<16x128xf32>
    %206 = vector.broadcast %187 : vector<1x128xf32> to vector<16x128xf32>
    %207 = arith.mulf %205, %206 : vector<16x128xf32>
    %208 = vector.broadcast %189 : vector<1x128xf32> to vector<16x128xf32>
    %209 = arith.addf %207, %208 : vector<16x128xf32>
    %210 = arith.truncf %209 : vector<16x128xf32> to vector<16x128xbf16>
    %c0_35 = arith.constant 0 : index
    %c0_36 = arith.constant 0 : index
    %c0_37 = arith.constant 0 : index
    %211 = vector.load %arg9[%c0_35, %c0_36, %c0_37] : memref<1x128x128xbf16, #tpu.memory_space<vmem>>, vector<1x128x128xbf16>
    %212 = vector.shape_cast %211 : vector<1x128x128xbf16> to vector<128x128xbf16>
    %c0_38 = arith.constant 0 : index
    %c0_39 = arith.constant 0 : index
    %c0_40 = arith.constant 0 : index
    %213 = vector.load %arg10[%c0_38, %c0_39, %c0_40] : memref<1x1x128xf32, #tpu.memory_space<vmem>>, vector<1x1x128xf32>
    %214 = vector.shape_cast %213 : vector<1x1x128xf32> to vector<1x128xf32>
    %c0_41 = arith.constant 0 : index
    %c0_42 = arith.constant 0 : index
    %c0_43 = arith.constant 0 : index
    %215 = vector.load %arg11[%c0_41, %c0_42, %c0_43] : memref<1x128x256xbf16, #tpu.memory_space<vmem>>, vector<1x128x256xbf16>
    %216 = vector.shape_cast %215 : vector<1x128x256xbf16> to vector<128x256xbf16>
    %c0_44 = arith.constant 0 : index
    %c0_45 = arith.constant 0 : index
    %c0_46 = arith.constant 0 : index
    %217 = vector.load %arg12[%c0_44, %c0_45, %c0_46] : memref<1x1x256xf32, #tpu.memory_space<vmem>>, vector<1x1x256xf32>
    %218 = vector.shape_cast %217 : vector<1x1x256xf32> to vector<1x256xf32>
    %c0_47 = arith.constant 0 : index
    %c0_48 = arith.constant 0 : index
    %c0_49 = arith.constant 0 : index
    %219 = vector.load %arg13[%c0_47, %c0_48, %c0_49] : memref<1x128x128xbf16, #tpu.memory_space<vmem>>, vector<1x128x128xbf16>
    %220 = vector.shape_cast %219 : vector<1x128x128xbf16> to vector<128x128xbf16>
    %c0_50 = arith.constant 0 : index
    %c0_51 = arith.constant 0 : index
    %c0_52 = arith.constant 0 : index
    %221 = vector.load %arg14[%c0_50, %c0_51, %c0_52] : memref<1x1x128xf32, #tpu.memory_space<vmem>>, vector<1x1x128xf32>
    %222 = vector.shape_cast %221 : vector<1x1x128xf32> to vector<1x128xf32>
    %cst_53 = arith.constant dense<0.000000e+00> : vector<16x128xf32>
    %223 = tpu.matmul %210, %212, %cst_53 {dimension_numbers = #tpu.dot_dimension_numbers<[1], [0], [0], [1], [0, 0, 1, 1], [], []>} : vector<16x128xbf16>, vector<128x128xbf16>, vector<16x128xf32> -> vector<16x128xf32>
    %224 = vector.broadcast %214 : vector<1x128xf32> to vector<16x128xf32>
    %225 = arith.addf %223, %224 : vector<16x128xf32>
    %cst_54 = arith.constant 2.500000e-01 : f32
    %226 = vector.broadcast %cst_54 : f32 to vector<16x128xf32>
    %227 = arith.mulf %225, %226 : vector<16x128xf32>
    %cst_55 = arith.constant dense<0.000000e+00> : vector<16x256xf32>
    %228 = tpu.matmul %7, %216, %cst_55 {dimension_numbers = #tpu.dot_dimension_numbers<[1], [0], [0], [1], [0, 0, 1, 1], [], []>} : vector<16x128xbf16>, vector<128x256xbf16>, vector<16x256xf32> -> vector<16x256xf32>
    %229 = vector.broadcast %218 : vector<1x256xf32> to vector<16x256xf32>
    %230 = arith.addf %228, %229 : vector<16x256xf32>
    %231 = vector.extract_strided_slice %230 {offsets = [0, 0], sizes = [16, 128], strides = [1, 1]} : vector<16x256xf32> to vector<16x128xf32>
    %232 = vector.extract_strided_slice %230 {offsets = [0, 128], sizes = [16, 128], strides = [1, 1]} : vector<16x256xf32> to vector<16x128xf32>
    %233 = vector.extract_strided_slice %227 {offsets = [0, 0], sizes = [8, 128], strides = [1, 1]} : vector<16x128xf32> to vector<8x128xf32>
    %234 = vector.extract_strided_slice %233 {offsets = [0, 0], sizes = [8, 16], strides = [1, 1]} : vector<8x128xf32> to vector<8x16xf32>
    %235 = vector.shape_cast %234 : vector<8x16xf32> to vector<1x8x16xf32>
    %236 = vector.extract_strided_slice %233 {offsets = [0, 16], sizes = [8, 16], strides = [1, 1]} : vector<8x128xf32> to vector<8x16xf32>
    %237 = vector.shape_cast %236 : vector<8x16xf32> to vector<1x8x16xf32>
    %238 = vector.extract_strided_slice %233 {offsets = [0, 32], sizes = [8, 16], strides = [1, 1]} : vector<8x128xf32> to vector<8x16xf32>
    %239 = vector.shape_cast %238 : vector<8x16xf32> to vector<1x8x16xf32>
    %240 = vector.extract_strided_slice %233 {offsets = [0, 48], sizes = [8, 16], strides = [1, 1]} : vector<8x128xf32> to vector<8x16xf32>
    %241 = vector.shape_cast %240 : vector<8x16xf32> to vector<1x8x16xf32>
    %242 = vector.extract_strided_slice %233 {offsets = [0, 64], sizes = [8, 16], strides = [1, 1]} : vector<8x128xf32> to vector<8x16xf32>
    %243 = vector.shape_cast %242 : vector<8x16xf32> to vector<1x8x16xf32>
    %244 = vector.extract_strided_slice %233 {offsets = [0, 80], sizes = [8, 16], strides = [1, 1]} : vector<8x128xf32> to vector<8x16xf32>
    %245 = vector.shape_cast %244 : vector<8x16xf32> to vector<1x8x16xf32>
    %246 = vector.extract_strided_slice %233 {offsets = [0, 96], sizes = [8, 16], strides = [1, 1]} : vector<8x128xf32> to vector<8x16xf32>
    %247 = vector.shape_cast %246 : vector<8x16xf32> to vector<1x8x16xf32>
    %248 = vector.extract_strided_slice %233 {offsets = [0, 112], sizes = [8, 16], strides = [1, 1]} : vector<8x128xf32> to vector<8x16xf32>
    %249 = vector.shape_cast %248 : vector<8x16xf32> to vector<1x8x16xf32>
    %250 = vector.extract_strided_slice %227 {offsets = [8, 0], sizes = [8, 128], strides = [1, 1]} : vector<16x128xf32> to vector<8x128xf32>
    %251 = vector.extract_strided_slice %250 {offsets = [0, 0], sizes = [8, 16], strides = [1, 1]} : vector<8x128xf32> to vector<8x16xf32>
    %252 = vector.shape_cast %251 : vector<8x16xf32> to vector<1x8x16xf32>
    %253 = vector.extract_strided_slice %250 {offsets = [0, 16], sizes = [8, 16], strides = [1, 1]} : vector<8x128xf32> to vector<8x16xf32>
    %254 = vector.shape_cast %253 : vector<8x16xf32> to vector<1x8x16xf32>
    %255 = vector.extract_strided_slice %250 {offsets = [0, 32], sizes = [8, 16], strides = [1, 1]} : vector<8x128xf32> to vector<8x16xf32>
    %256 = vector.shape_cast %255 : vector<8x16xf32> to vector<1x8x16xf32>
    %257 = vector.extract_strided_slice %250 {offsets = [0, 48], sizes = [8, 16], strides = [1, 1]} : vector<8x128xf32> to vector<8x16xf32>
    %258 = vector.shape_cast %257 : vector<8x16xf32> to vector<1x8x16xf32>
    %259 = vector.extract_strided_slice %250 {offsets = [0, 64], sizes = [8, 16], strides = [1, 1]} : vector<8x128xf32> to vector<8x16xf32>
    %260 = vector.shape_cast %259 : vector<8x16xf32> to vector<1x8x16xf32>
    %261 = vector.extract_strided_slice %250 {offsets = [0, 80], sizes = [8, 16], strides = [1, 1]} : vector<8x128xf32> to vector<8x16xf32>
    %262 = vector.shape_cast %261 : vector<8x16xf32> to vector<1x8x16xf32>
    %263 = vector.extract_strided_slice %250 {offsets = [0, 96], sizes = [8, 16], strides = [1, 1]} : vector<8x128xf32> to vector<8x16xf32>
    %264 = vector.shape_cast %263 : vector<8x16xf32> to vector<1x8x16xf32>
    %265 = vector.extract_strided_slice %250 {offsets = [0, 112], sizes = [8, 16], strides = [1, 1]} : vector<8x128xf32> to vector<8x16xf32>
    %266 = vector.shape_cast %265 : vector<8x16xf32> to vector<1x8x16xf32>
    %267 = tpu.concatenate %235, %237, %239, %241, %243, %245, %247, %249, %252, %254, %256, %258, %260, %262, %264, %266 in 0 : vector<1x8x16xf32>, vector<1x8x16xf32>, vector<1x8x16xf32>, vector<1x8x16xf32>, vector<1x8x16xf32>, vector<1x8x16xf32>, vector<1x8x16xf32>, vector<1x8x16xf32>, vector<1x8x16xf32>, vector<1x8x16xf32>, vector<1x8x16xf32>, vector<1x8x16xf32>, vector<1x8x16xf32>, vector<1x8x16xf32>, vector<1x8x16xf32>, vector<1x8x16xf32> -> vector<16x8x16xf32>
    %268 = arith.truncf %267 : vector<16x8x16xf32> to vector<16x8x16xbf16>
    %269 = vector.extract_strided_slice %231 {offsets = [0, 0], sizes = [8, 128], strides = [1, 1]} : vector<16x128xf32> to vector<8x128xf32>
    %270 = vector.extract_strided_slice %269 {offsets = [0, 0], sizes = [8, 16], strides = [1, 1]} : vector<8x128xf32> to vector<8x16xf32>
    %271 = vector.shape_cast %270 : vector<8x16xf32> to vector<1x8x16xf32>
    %272 = vector.extract_strided_slice %269 {offsets = [0, 16], sizes = [8, 16], strides = [1, 1]} : vector<8x128xf32> to vector<8x16xf32>
    %273 = vector.shape_cast %272 : vector<8x16xf32> to vector<1x8x16xf32>
    %274 = vector.extract_strided_slice %269 {offsets = [0, 32], sizes = [8, 16], strides = [1, 1]} : vector<8x128xf32> to vector<8x16xf32>
    %275 = vector.shape_cast %274 : vector<8x16xf32> to vector<1x8x16xf32>
    %276 = vector.extract_strided_slice %269 {offsets = [0, 48], sizes = [8, 16], strides = [1, 1]} : vector<8x128xf32> to vector<8x16xf32>
    %277 = vector.shape_cast %276 : vector<8x16xf32> to vector<1x8x16xf32>
    %278 = vector.extract_strided_slice %269 {offsets = [0, 64], sizes = [8, 16], strides = [1, 1]} : vector<8x128xf32> to vector<8x16xf32>
    %279 = vector.shape_cast %278 : vector<8x16xf32> to vector<1x8x16xf32>
    %280 = vector.extract_strided_slice %269 {offsets = [0, 80], sizes = [8, 16], strides = [1, 1]} : vector<8x128xf32> to vector<8x16xf32>
    %281 = vector.shape_cast %280 : vector<8x16xf32> to vector<1x8x16xf32>
    %282 = vector.extract_strided_slice %269 {offsets = [0, 96], sizes = [8, 16], strides = [1, 1]} : vector<8x128xf32> to vector<8x16xf32>
    %283 = vector.shape_cast %282 : vector<8x16xf32> to vector<1x8x16xf32>
    %284 = vector.extract_strided_slice %269 {offsets = [0, 112], sizes = [8, 16], strides = [1, 1]} : vector<8x128xf32> to vector<8x16xf32>
    %285 = vector.shape_cast %284 : vector<8x16xf32> to vector<1x8x16xf32>
    %286 = vector.extract_strided_slice %231 {offsets = [8, 0], sizes = [8, 128], strides = [1, 1]} : vector<16x128xf32> to vector<8x128xf32>
    %287 = vector.extract_strided_slice %286 {offsets = [0, 0], sizes = [8, 16], strides = [1, 1]} : vector<8x128xf32> to vector<8x16xf32>
    %288 = vector.shape_cast %287 : vector<8x16xf32> to vector<1x8x16xf32>
    %289 = vector.extract_strided_slice %286 {offsets = [0, 16], sizes = [8, 16], strides = [1, 1]} : vector<8x128xf32> to vector<8x16xf32>
    %290 = vector.shape_cast %289 : vector<8x16xf32> to vector<1x8x16xf32>
    %291 = vector.extract_strided_slice %286 {offsets = [0, 32], sizes = [8, 16], strides = [1, 1]} : vector<8x128xf32> to vector<8x16xf32>
    %292 = vector.shape_cast %291 : vector<8x16xf32> to vector<1x8x16xf32>
    %293 = vector.extract_strided_slice %286 {offsets = [0, 48], sizes = [8, 16], strides = [1, 1]} : vector<8x128xf32> to vector<8x16xf32>
    %294 = vector.shape_cast %293 : vector<8x16xf32> to vector<1x8x16xf32>
    %295 = vector.extract_strided_slice %286 {offsets = [0, 64], sizes = [8, 16], strides = [1, 1]} : vector<8x128xf32> to vector<8x16xf32>
    %296 = vector.shape_cast %295 : vector<8x16xf32> to vector<1x8x16xf32>
    %297 = vector.extract_strided_slice %286 {offsets = [0, 80], sizes = [8, 16], strides = [1, 1]} : vector<8x128xf32> to vector<8x16xf32>
    %298 = vector.shape_cast %297 : vector<8x16xf32> to vector<1x8x16xf32>
    %299 = vector.extract_strided_slice %286 {offsets = [0, 96], sizes = [8, 16], strides = [1, 1]} : vector<8x128xf32> to vector<8x16xf32>
    %300 = vector.shape_cast %299 : vector<8x16xf32> to vector<1x8x16xf32>
    %301 = vector.extract_strided_slice %286 {offsets = [0, 112], sizes = [8, 16], strides = [1, 1]} : vector<8x128xf32> to vector<8x16xf32>
    %302 = vector.shape_cast %301 : vector<8x16xf32> to vector<1x8x16xf32>
    %303 = tpu.concatenate %271, %273, %275, %277, %279, %281, %283, %285, %288, %290, %292, %294, %296, %298, %300, %302 in 0 : vector<1x8x16xf32>, vector<1x8x16xf32>, vector<1x8x16xf32>, vector<1x8x16xf32>, vector<1x8x16xf32>, vector<1x8x16xf32>, vector<1x8x16xf32>, vector<1x8x16xf32>, vector<1x8x16xf32>, vector<1x8x16xf32>, vector<1x8x16xf32>, vector<1x8x16xf32>, vector<1x8x16xf32>, vector<1x8x16xf32>, vector<1x8x16xf32>, vector<1x8x16xf32> -> vector<16x8x16xf32>
    %304 = arith.truncf %303 : vector<16x8x16xf32> to vector<16x8x16xbf16>
    %305 = vector.extract_strided_slice %232 {offsets = [0, 0], sizes = [8, 128], strides = [1, 1]} : vector<16x128xf32> to vector<8x128xf32>
    %306 = vector.extract_strided_slice %305 {offsets = [0, 0], sizes = [8, 16], strides = [1, 1]} : vector<8x128xf32> to vector<8x16xf32>
    %307 = vector.shape_cast %306 : vector<8x16xf32> to vector<1x8x16xf32>
    %308 = vector.extract_strided_slice %305 {offsets = [0, 16], sizes = [8, 16], strides = [1, 1]} : vector<8x128xf32> to vector<8x16xf32>
    %309 = vector.shape_cast %308 : vector<8x16xf32> to vector<1x8x16xf32>
    %310 = vector.extract_strided_slice %305 {offsets = [0, 32], sizes = [8, 16], strides = [1, 1]} : vector<8x128xf32> to vector<8x16xf32>
    %311 = vector.shape_cast %310 : vector<8x16xf32> to vector<1x8x16xf32>
    %312 = vector.extract_strided_slice %305 {offsets = [0, 48], sizes = [8, 16], strides = [1, 1]} : vector<8x128xf32> to vector<8x16xf32>
    %313 = vector.shape_cast %312 : vector<8x16xf32> to vector<1x8x16xf32>
    %314 = vector.extract_strided_slice %305 {offsets = [0, 64], sizes = [8, 16], strides = [1, 1]} : vector<8x128xf32> to vector<8x16xf32>
    %315 = vector.shape_cast %314 : vector<8x16xf32> to vector<1x8x16xf32>
    %316 = vector.extract_strided_slice %305 {offsets = [0, 80], sizes = [8, 16], strides = [1, 1]} : vector<8x128xf32> to vector<8x16xf32>
    %317 = vector.shape_cast %316 : vector<8x16xf32> to vector<1x8x16xf32>
    %318 = vector.extract_strided_slice %305 {offsets = [0, 96], sizes = [8, 16], strides = [1, 1]} : vector<8x128xf32> to vector<8x16xf32>
    %319 = vector.shape_cast %318 : vector<8x16xf32> to vector<1x8x16xf32>
    %320 = vector.extract_strided_slice %305 {offsets = [0, 112], sizes = [8, 16], strides = [1, 1]} : vector<8x128xf32> to vector<8x16xf32>
    %321 = vector.shape_cast %320 : vector<8x16xf32> to vector<1x8x16xf32>
    %322 = vector.extract_strided_slice %232 {offsets = [8, 0], sizes = [8, 128], strides = [1, 1]} : vector<16x128xf32> to vector<8x128xf32>
    %323 = vector.extract_strided_slice %322 {offsets = [0, 0], sizes = [8, 16], strides = [1, 1]} : vector<8x128xf32> to vector<8x16xf32>
    %324 = vector.shape_cast %323 : vector<8x16xf32> to vector<1x8x16xf32>
    %325 = vector.extract_strided_slice %322 {offsets = [0, 16], sizes = [8, 16], strides = [1, 1]} : vector<8x128xf32> to vector<8x16xf32>
    %326 = vector.shape_cast %325 : vector<8x16xf32> to vector<1x8x16xf32>
    %327 = vector.extract_strided_slice %322 {offsets = [0, 32], sizes = [8, 16], strides = [1, 1]} : vector<8x128xf32> to vector<8x16xf32>
    %328 = vector.shape_cast %327 : vector<8x16xf32> to vector<1x8x16xf32>
    %329 = vector.extract_strided_slice %322 {offsets = [0, 48], sizes = [8, 16], strides = [1, 1]} : vector<8x128xf32> to vector<8x16xf32>
    %330 = vector.shape_cast %329 : vector<8x16xf32> to vector<1x8x16xf32>
    %331 = vector.extract_strided_slice %322 {offsets = [0, 64], sizes = [8, 16], strides = [1, 1]} : vector<8x128xf32> to vector<8x16xf32>
    %332 = vector.shape_cast %331 : vector<8x16xf32> to vector<1x8x16xf32>
    %333 = vector.extract_strided_slice %322 {offsets = [0, 80], sizes = [8, 16], strides = [1, 1]} : vector<8x128xf32> to vector<8x16xf32>
    %334 = vector.shape_cast %333 : vector<8x16xf32> to vector<1x8x16xf32>
    %335 = vector.extract_strided_slice %322 {offsets = [0, 96], sizes = [8, 16], strides = [1, 1]} : vector<8x128xf32> to vector<8x16xf32>
    %336 = vector.shape_cast %335 : vector<8x16xf32> to vector<1x8x16xf32>
    %337 = vector.extract_strided_slice %322 {offsets = [0, 112], sizes = [8, 16], strides = [1, 1]} : vector<8x128xf32> to vector<8x16xf32>
    %338 = vector.shape_cast %337 : vector<8x16xf32> to vector<1x8x16xf32>
    %339 = tpu.concatenate %307, %309, %311, %313, %315, %317, %319, %321, %324, %326, %328, %330, %332, %334, %336, %338 in 0 : vector<1x8x16xf32>, vector<1x8x16xf32>, vector<1x8x16xf32>, vector<1x8x16xf32>, vector<1x8x16xf32>, vector<1x8x16xf32>, vector<1x8x16xf32>, vector<1x8x16xf32>, vector<1x8x16xf32>, vector<1x8x16xf32>, vector<1x8x16xf32>, vector<1x8x16xf32>, vector<1x8x16xf32>, vector<1x8x16xf32>, vector<1x8x16xf32>, vector<1x8x16xf32> -> vector<16x8x16xf32>
    %340 = arith.truncf %339 : vector<16x8x16xf32> to vector<16x8x16xbf16>
    %cst_56 = arith.constant dense<0.000000e+00> : vector<16x8x8xf32>
    %341 = tpu.matmul %268, %304, %cst_56 {dimension_numbers = #tpu.dot_dimension_numbers<[2], [2], [1], [1], [0, 0, 0, 1, 1, 1], [0], [0]>} : vector<16x8x16xbf16>, vector<16x8x16xbf16>, vector<16x8x8xf32> -> vector<16x8x8xf32>
    %cst_57 = arith.constant dense<0xFF800000> : vector<16x8xf32>
    %342 = vector.multi_reduction <maximumf>, %341, %cst_57 [2] : vector<16x8x8xf32> to vector<16x8xf32>
    %343 = vector.shape_cast %342 : vector<16x8xf32> to vector<16x8x1xf32>
    %344 = vector.broadcast %343 : vector<16x8x1xf32> to vector<16x8x8xf32>
    %345 = arith.subf %341, %344 : vector<16x8x8xf32>
    %346 = math.exp %345 : vector<16x8x8xf32>
    %cst_58 = arith.constant dense<0.000000e+00> : vector<16x8xf32>
    %347 = vector.multi_reduction <add>, %346, %cst_58 [2] : vector<16x8x8xf32> to vector<16x8xf32>
    %348 = vector.shape_cast %347 : vector<16x8xf32> to vector<16x8x1xf32>
    %349 = tpu.reciprocal %348 {approx = true} : vector<16x8x1xf32> -> vector<16x8x1xf32>
    %350 = vector.broadcast %349 : vector<16x8x1xf32> to vector<16x8x8xf32>
    %351 = arith.mulf %346, %350 : vector<16x8x8xf32>
    %352 = arith.truncf %351 : vector<16x8x8xf32> to vector<16x8x8xbf16>
    %cst_59 = arith.constant dense<0.000000e+00> : vector<16x8x16xf32>
    %353 = tpu.matmul %352, %340, %cst_59 {dimension_numbers = #tpu.dot_dimension_numbers<[2], [1], [1], [2], [0, 0, 0, 1, 1, 2], [0], [0]>} : vector<16x8x8xbf16>, vector<16x8x16xbf16>, vector<16x8x16xf32> -> vector<16x8x16xf32>
    %354 = vector.extract_strided_slice %353 {offsets = [0, 0, 0], sizes = [1, 8, 16], strides = [1, 1, 1]} : vector<16x8x16xf32> to vector<1x8x16xf32>
    %355 = vector.shape_cast %354 : vector<1x8x16xf32> to vector<8x16xf32>
    %356 = vector.extract_strided_slice %353 {offsets = [1, 0, 0], sizes = [1, 8, 16], strides = [1, 1, 1]} : vector<16x8x16xf32> to vector<1x8x16xf32>
    %357 = vector.shape_cast %356 : vector<1x8x16xf32> to vector<8x16xf32>
    %358 = vector.extract_strided_slice %353 {offsets = [2, 0, 0], sizes = [1, 8, 16], strides = [1, 1, 1]} : vector<16x8x16xf32> to vector<1x8x16xf32>
    %359 = vector.shape_cast %358 : vector<1x8x16xf32> to vector<8x16xf32>
    %360 = vector.extract_strided_slice %353 {offsets = [3, 0, 0], sizes = [1, 8, 16], strides = [1, 1, 1]} : vector<16x8x16xf32> to vector<1x8x16xf32>
    %361 = vector.shape_cast %360 : vector<1x8x16xf32> to vector<8x16xf32>
    %362 = vector.extract_strided_slice %353 {offsets = [4, 0, 0], sizes = [1, 8, 16], strides = [1, 1, 1]} : vector<16x8x16xf32> to vector<1x8x16xf32>
    %363 = vector.shape_cast %362 : vector<1x8x16xf32> to vector<8x16xf32>
    %364 = vector.extract_strided_slice %353 {offsets = [5, 0, 0], sizes = [1, 8, 16], strides = [1, 1, 1]} : vector<16x8x16xf32> to vector<1x8x16xf32>
    %365 = vector.shape_cast %364 : vector<1x8x16xf32> to vector<8x16xf32>
    %366 = vector.extract_strided_slice %353 {offsets = [6, 0, 0], sizes = [1, 8, 16], strides = [1, 1, 1]} : vector<16x8x16xf32> to vector<1x8x16xf32>
    %367 = vector.shape_cast %366 : vector<1x8x16xf32> to vector<8x16xf32>
    %368 = vector.extract_strided_slice %353 {offsets = [7, 0, 0], sizes = [1, 8, 16], strides = [1, 1, 1]} : vector<16x8x16xf32> to vector<1x8x16xf32>
    %369 = vector.shape_cast %368 : vector<1x8x16xf32> to vector<8x16xf32>
    %370 = tpu.concatenate %355, %357, %359, %361, %363, %365, %367, %369 in 1 : vector<8x16xf32>, vector<8x16xf32>, vector<8x16xf32>, vector<8x16xf32>, vector<8x16xf32>, vector<8x16xf32>, vector<8x16xf32>, vector<8x16xf32> -> vector<8x128xf32>
    %371 = vector.extract_strided_slice %353 {offsets = [8, 0, 0], sizes = [1, 8, 16], strides = [1, 1, 1]} : vector<16x8x16xf32> to vector<1x8x16xf32>
    %372 = vector.shape_cast %371 : vector<1x8x16xf32> to vector<8x16xf32>
    %373 = vector.extract_strided_slice %353 {offsets = [9, 0, 0], sizes = [1, 8, 16], strides = [1, 1, 1]} : vector<16x8x16xf32> to vector<1x8x16xf32>
    %374 = vector.shape_cast %373 : vector<1x8x16xf32> to vector<8x16xf32>
    %375 = vector.extract_strided_slice %353 {offsets = [10, 0, 0], sizes = [1, 8, 16], strides = [1, 1, 1]} : vector<16x8x16xf32> to vector<1x8x16xf32>
    %376 = vector.shape_cast %375 : vector<1x8x16xf32> to vector<8x16xf32>
    %377 = vector.extract_strided_slice %353 {offsets = [11, 0, 0], sizes = [1, 8, 16], strides = [1, 1, 1]} : vector<16x8x16xf32> to vector<1x8x16xf32>
    %378 = vector.shape_cast %377 : vector<1x8x16xf32> to vector<8x16xf32>
    %379 = vector.extract_strided_slice %353 {offsets = [12, 0, 0], sizes = [1, 8, 16], strides = [1, 1, 1]} : vector<16x8x16xf32> to vector<1x8x16xf32>
    %380 = vector.shape_cast %379 : vector<1x8x16xf32> to vector<8x16xf32>
    %381 = vector.extract_strided_slice %353 {offsets = [13, 0, 0], sizes = [1, 8, 16], strides = [1, 1, 1]} : vector<16x8x16xf32> to vector<1x8x16xf32>
    %382 = vector.shape_cast %381 : vector<1x8x16xf32> to vector<8x16xf32>
    %383 = vector.extract_strided_slice %353 {offsets = [14, 0, 0], sizes = [1, 8, 16], strides = [1, 1, 1]} : vector<16x8x16xf32> to vector<1x8x16xf32>
    %384 = vector.shape_cast %383 : vector<1x8x16xf32> to vector<8x16xf32>
    %385 = vector.extract_strided_slice %353 {offsets = [15, 0, 0], sizes = [1, 8, 16], strides = [1, 1, 1]} : vector<16x8x16xf32> to vector<1x8x16xf32>
    %386 = vector.shape_cast %385 : vector<1x8x16xf32> to vector<8x16xf32>
    %387 = tpu.concatenate %372, %374, %376, %378, %380, %382, %384, %386 in 1 : vector<8x16xf32>, vector<8x16xf32>, vector<8x16xf32>, vector<8x16xf32>, vector<8x16xf32>, vector<8x16xf32>, vector<8x16xf32>, vector<8x16xf32> -> vector<8x128xf32>
    %388 = tpu.concatenate %370, %387 in 0 : vector<8x128xf32>, vector<8x128xf32> -> vector<16x128xf32>
    %389 = arith.truncf %388 : vector<16x128xf32> to vector<16x128xbf16>
    %cst_60 = arith.constant dense<0.000000e+00> : vector<16x128xf32>
    %390 = tpu.matmul %389, %220, %cst_60 {dimension_numbers = #tpu.dot_dimension_numbers<[1], [0], [0], [1], [0, 0, 1, 1], [], []>} : vector<16x128xbf16>, vector<128x128xbf16>, vector<16x128xf32> -> vector<16x128xf32>
    %391 = vector.broadcast %222 : vector<1x128xf32> to vector<16x128xf32>
    %392 = arith.addf %390, %391 : vector<16x128xf32>
    %393 = arith.addf %209, %392 : vector<16x128xf32>
    %c0_61 = arith.constant 0 : index
    %c0_62 = arith.constant 0 : index
    %c0_63 = arith.constant 0 : index
    %394 = vector.load %arg15[%c0_61, %c0_62, %c0_63] : memref<1x1x128xf32, #tpu.memory_space<vmem>>, vector<1x1x128xf32>
    %395 = vector.shape_cast %394 : vector<1x1x128xf32> to vector<1x128xf32>
    %c0_64 = arith.constant 0 : index
    %c0_65 = arith.constant 0 : index
    %c0_66 = arith.constant 0 : index
    %396 = vector.load %arg16[%c0_64, %c0_65, %c0_66] : memref<1x1x128xf32, #tpu.memory_space<vmem>>, vector<1x1x128xf32>
    %397 = vector.shape_cast %396 : vector<1x1x128xf32> to vector<1x128xf32>
    %cst_67 = arith.constant dense<0.000000e+00> : vector<16xf32>
    %398 = vector.multi_reduction <add>, %393, %cst_67 [1] : vector<16x128xf32> to vector<16xf32>
    %399 = vector.shape_cast %398 : vector<16xf32> to vector<16x1xf32>
    %cst_68 = arith.constant 1.280000e+02 : f32
    %400 = vector.broadcast %cst_68 : f32 to vector<16x1xf32>
    %401 = arith.divf %399, %400 : vector<16x1xf32>
    %402 = vector.broadcast %401 : vector<16x1xf32> to vector<16x128xf32>
    %403 = arith.subf %393, %402 : vector<16x128xf32>
    %404 = arith.mulf %403, %403 : vector<16x128xf32>
    %cst_69 = arith.constant dense<0.000000e+00> : vector<16xf32>
    %405 = vector.multi_reduction <add>, %404, %cst_69 [1] : vector<16x128xf32> to vector<16xf32>
    %406 = vector.shape_cast %405 : vector<16xf32> to vector<16x1xf32>
    %cst_70 = arith.constant 1.280000e+02 : f32
    %407 = vector.broadcast %cst_70 : f32 to vector<16x1xf32>
    %408 = arith.divf %406, %407 : vector<16x1xf32>
    %cst_71 = arith.constant 9.99999974E-6 : f32
    %409 = vector.broadcast %cst_71 : f32 to vector<16x1xf32>
    %410 = arith.addf %408, %409 : vector<16x1xf32>
    %411 = math.rsqrt %410 : vector<16x1xf32>
    %412 = vector.broadcast %411 : vector<16x1xf32> to vector<16x128xf32>
    %413 = arith.mulf %403, %412 : vector<16x128xf32>
    %414 = vector.broadcast %395 : vector<1x128xf32> to vector<16x128xf32>
    %415 = arith.mulf %413, %414 : vector<16x128xf32>
    %416 = vector.broadcast %397 : vector<1x128xf32> to vector<16x128xf32>
    %417 = arith.addf %415, %416 : vector<16x128xf32>
    %418 = arith.truncf %417 : vector<16x128xf32> to vector<16x128xbf16>
    %c0_72 = arith.constant 0 : index
    %c0_73 = arith.constant 0 : index
    %c0_74 = arith.constant 0 : index
    %419 = vector.load %arg17[%c0_72, %c0_73, %c0_74] : memref<1x128x256xbf16, #tpu.memory_space<vmem>>, vector<1x128x256xbf16>
    %420 = vector.shape_cast %419 : vector<1x128x256xbf16> to vector<128x256xbf16>
    %c0_75 = arith.constant 0 : index
    %c0_76 = arith.constant 0 : index
    %c0_77 = arith.constant 0 : index
    %421 = vector.load %arg18[%c0_75, %c0_76, %c0_77] : memref<1x1x256xf32, #tpu.memory_space<vmem>>, vector<1x1x256xf32>
    %422 = vector.shape_cast %421 : vector<1x1x256xf32> to vector<1x256xf32>
    %c0_78 = arith.constant 0 : index
    %c0_79 = arith.constant 0 : index
    %c0_80 = arith.constant 0 : index
    %423 = vector.load %arg19[%c0_78, %c0_79, %c0_80] : memref<1x256x128xbf16, #tpu.memory_space<vmem>>, vector<1x256x128xbf16>
    %424 = vector.shape_cast %423 : vector<1x256x128xbf16> to vector<256x128xbf16>
    %c0_81 = arith.constant 0 : index
    %c0_82 = arith.constant 0 : index
    %c0_83 = arith.constant 0 : index
    %425 = vector.load %arg20[%c0_81, %c0_82, %c0_83] : memref<1x1x128xf32, #tpu.memory_space<vmem>>, vector<1x1x128xf32>
    %426 = vector.shape_cast %425 : vector<1x1x128xf32> to vector<1x128xf32>
    %cst_84 = arith.constant dense<0.000000e+00> : vector<16x256xf32>
    %427 = tpu.matmul %418, %420, %cst_84 {dimension_numbers = #tpu.dot_dimension_numbers<[1], [0], [0], [1], [0, 0, 1, 1], [], []>} : vector<16x128xbf16>, vector<128x256xbf16>, vector<16x256xf32> -> vector<16x256xf32>
    %428 = vector.broadcast %422 : vector<1x256xf32> to vector<16x256xf32>
    %429 = arith.addf %427, %428 : vector<16x256xf32>
    %cst_85 = arith.constant 0.000000e+00 : f32
    %430 = vector.broadcast %cst_85 : f32 to vector<16x256xf32>
    %431 = arith.maximumf %429, %430 : vector<16x256xf32>
    %432 = arith.truncf %431 : vector<16x256xf32> to vector<16x256xbf16>
    %cst_86 = arith.constant dense<0.000000e+00> : vector<16x128xf32>
    %433 = tpu.matmul %432, %424, %cst_86 {dimension_numbers = #tpu.dot_dimension_numbers<[1], [0], [0], [1], [0, 0, 1, 1], [], []>} : vector<16x256xbf16>, vector<256x128xbf16>, vector<16x128xf32> -> vector<16x128xf32>
    %434 = vector.broadcast %426 : vector<1x128xf32> to vector<16x128xf32>
    %435 = arith.addf %433, %434 : vector<16x128xf32>
    %436 = arith.addf %417, %435 : vector<16x128xf32>
    %c0_87 = arith.constant 0 : index
    %c0_88 = arith.constant 0 : index
    %c0_89 = arith.constant 0 : index
    %437 = vector.load %arg21[%c0_87, %c0_88, %c0_89] : memref<1x1x128xf32, #tpu.memory_space<vmem>>, vector<1x1x128xf32>
    %438 = vector.shape_cast %437 : vector<1x1x128xf32> to vector<1x128xf32>
    %c0_90 = arith.constant 0 : index
    %c0_91 = arith.constant 0 : index
    %c0_92 = arith.constant 0 : index
    %439 = vector.load %arg22[%c0_90, %c0_91, %c0_92] : memref<1x1x128xf32, #tpu.memory_space<vmem>>, vector<1x1x128xf32>
    %440 = vector.shape_cast %439 : vector<1x1x128xf32> to vector<1x128xf32>
    %cst_93 = arith.constant dense<0.000000e+00> : vector<16xf32>
    %441 = vector.multi_reduction <add>, %436, %cst_93 [1] : vector<16x128xf32> to vector<16xf32>
    %442 = vector.shape_cast %441 : vector<16xf32> to vector<16x1xf32>
    %cst_94 = arith.constant 1.280000e+02 : f32
    %443 = vector.broadcast %cst_94 : f32 to vector<16x1xf32>
    %444 = arith.divf %442, %443 : vector<16x1xf32>
    %445 = vector.broadcast %444 : vector<16x1xf32> to vector<16x128xf32>
    %446 = arith.subf %436, %445 : vector<16x128xf32>
    %447 = arith.mulf %446, %446 : vector<16x128xf32>
    %cst_95 = arith.constant dense<0.000000e+00> : vector<16xf32>
    %448 = vector.multi_reduction <add>, %447, %cst_95 [1] : vector<16x128xf32> to vector<16xf32>
    %449 = vector.shape_cast %448 : vector<16xf32> to vector<16x1xf32>
    %cst_96 = arith.constant 1.280000e+02 : f32
    %450 = vector.broadcast %cst_96 : f32 to vector<16x1xf32>
    %451 = arith.divf %449, %450 : vector<16x1xf32>
    %cst_97 = arith.constant 9.99999974E-6 : f32
    %452 = vector.broadcast %cst_97 : f32 to vector<16x1xf32>
    %453 = arith.addf %451, %452 : vector<16x1xf32>
    %454 = math.rsqrt %453 : vector<16x1xf32>
    %455 = vector.broadcast %454 : vector<16x1xf32> to vector<16x128xf32>
    %456 = arith.mulf %446, %455 : vector<16x128xf32>
    %457 = vector.broadcast %438 : vector<1x128xf32> to vector<16x128xf32>
    %458 = arith.mulf %456, %457 : vector<16x128xf32>
    %459 = vector.broadcast %440 : vector<1x128xf32> to vector<16x128xf32>
    %460 = arith.addf %458, %459 : vector<16x128xf32>
    %461 = vector.shape_cast %460 : vector<16x128xf32> to vector<2x8x128xf32>
    %c0_98 = arith.constant 0 : index
    %c0_99 = arith.constant 0 : index
    %c0_100 = arith.constant 0 : index
    %462 = vector.load %arg25[%c0_98, %c0_99, %c0_100] : memref<2x8x128xf32, #tpu.memory_space<vmem>>, vector<2x8x128xf32>
    tpu.vector_store %arg25[%c0_98, %c0_99, %c0_100], %461 {strides = array<i32>} : memref<2x8x128xf32, #tpu.memory_space<vmem>>, vector<2x8x128xf32>,
    %c1_i32 = arith.constant 1 : i32
    %463 = arith.cmpi eq, %arg0, %c1_i32 : i32
    %464 = arith.extui %463 : i1 to i32
    %c0_i32_101 = arith.constant 0 : i32
    %465 = arith.cmpi ne, %464, %c0_i32_101 : i32
    scf.if %465 {
      %466 = arith.truncf %460 : vector<16x128xf32> to vector<16x128xbf16>
      %c0_102 = arith.constant 0 : index
      %c0_103 = arith.constant 0 : index
      %467 = vector.load %arg23[%c0_102, %c0_103] : memref<128x128xbf16, #tpu.memory_space<vmem>>, vector<128x128xbf16>
      %cst_104 = arith.constant dense<0.000000e+00> : vector<16x128xf32>
      %468 = tpu.matmul %466, %467, %cst_104 {dimension_numbers = #tpu.dot_dimension_numbers<[1], [0], [0], [1], [0, 0, 1, 1], [], []>} : vector<16x128xbf16>, vector<128x128xbf16>, vector<16x128xf32> -> vector<16x128xf32>
      %c0_105 = arith.constant 0 : index
      %c0_106 = arith.constant 0 : index
      %469 = vector.load %arg24[%c0_105, %c0_106] : memref<1x128xf32, #tpu.memory_space<vmem>>, vector<1x128xf32>
      %470 = vector.broadcast %469 : vector<1x128xf32> to vector<16x128xf32>
      %471 = arith.addf %468, %470 : vector<16x128xf32>
      %472 = vector.shape_cast %471 : vector<16x128xf32> to vector<2x8x128xf32>
      %c0_107 = arith.constant 0 : index
      %c0_108 = arith.constant 0 : index
      %c0_109 = arith.constant 0 : index
      %473 = vector.load %arg25[%c0_107, %c0_108, %c0_109] : memref<2x8x128xf32, #tpu.memory_space<vmem>>, vector<2x8x128xf32>
      tpu.vector_store %arg25[%c0_107, %c0_108, %c0_109], %472 {strides = array<i32>} : memref<2x8x128xf32, #tpu.memory_space<vmem>>, vector<2x8x128xf32>,
    } else {
    }
    return
  }
  func.func @transform_0(%arg0: i32) -> (i32, i32, i32) {
    %c0_i32 = arith.constant 0 : i32
    %c0_i32_0 = arith.constant 0 : i32
    %c0_i32_1 = arith.constant 0 : i32
    %c0_i32_2 = arith.constant 0 : i32
    return %c0_i32, %c0_i32_0, %c0_i32_1 : i32, i32, i32
  }
  func.func @transform_1(%arg0: i32) -> (i32, i32, i32) {
    %c0_i32 = arith.constant 0 : i32
    %c0_i32_0 = arith.constant 0 : i32
    %c0_i32_1 = arith.constant 0 : i32
    %c0_i32_2 = arith.constant 0 : i32
    return %c0_i32, %c0_i32_0, %c0_i32_1 : i32, i32, i32
  }
  func.func @transform_2(%arg0: i32) -> (i32, i32, i32) {
    %c0_i32 = arith.constant 0 : i32
    %c0_i32_0 = arith.constant 0 : i32
    %c0_i32_1 = arith.constant 0 : i32
    return %arg0, %c0_i32, %c0_i32_0 : i32, i32, i32
  }
  func.func @transform_3(%arg0: i32) -> (i32, i32, i32) {
    %c0_i32 = arith.constant 0 : i32
    %c0_i32_0 = arith.constant 0 : i32
    %c0_i32_1 = arith.constant 0 : i32
    return %arg0, %c0_i32, %c0_i32_0 : i32, i32, i32
  }
  func.func @transform_4(%arg0: i32) -> (i32, i32, i32) {
    %c0_i32 = arith.constant 0 : i32
    %c0_i32_0 = arith.constant 0 : i32
    %c0_i32_1 = arith.constant 0 : i32
    return %arg0, %c0_i32, %c0_i32_0 : i32, i32, i32
  }
  func.func @transform_5(%arg0: i32) -> (i32, i32, i32) {
    %c0_i32 = arith.constant 0 : i32
    %c0_i32_0 = arith.constant 0 : i32
    %c0_i32_1 = arith.constant 0 : i32
    return %arg0, %c0_i32, %c0_i32_0 : i32, i32, i32
  }
  func.func @transform_6(%arg0: i32) -> (i32, i32, i32) {
    %c0_i32 = arith.constant 0 : i32
    %c0_i32_0 = arith.constant 0 : i32
    %c0_i32_1 = arith.constant 0 : i32
    return %arg0, %c0_i32, %c0_i32_0 : i32, i32, i32
  }
  func.func @transform_7(%arg0: i32) -> (i32, i32, i32) {
    %c0_i32 = arith.constant 0 : i32
    %c0_i32_0 = arith.constant 0 : i32
    %c0_i32_1 = arith.constant 0 : i32
    return %arg0, %c0_i32, %c0_i32_0 : i32, i32, i32
  }
  func.func @transform_8(%arg0: i32) -> (i32, i32, i32) {
    %c0_i32 = arith.constant 0 : i32
    %c0_i32_0 = arith.constant 0 : i32
    %c0_i32_1 = arith.constant 0 : i32
    return %arg0, %c0_i32, %c0_i32_0 : i32, i32, i32
  }
  func.func @transform_9(%arg0: i32) -> (i32, i32, i32) {
    %c0_i32 = arith.constant 0 : i32
    %c0_i32_0 = arith.constant 0 : i32
    %c0_i32_1 = arith.constant 0 : i32
    return %arg0, %c0_i32, %c0_i32_0 : i32, i32, i32
  }
  func.func @transform_10(%arg0: i32) -> (i32, i32, i32) {
    %c0_i32 = arith.constant 0 : i32
    %c0_i32_0 = arith.constant 0 : i32
    %c0_i32_1 = arith.constant 0 : i32
    return %arg0, %c0_i32, %c0_i32_0 : i32, i32, i32
  }
  func.func @transform_11(%arg0: i32) -> (i32, i32, i32) {
    %c0_i32 = arith.constant 0 : i32
    %c0_i32_0 = arith.constant 0 : i32
    %c0_i32_1 = arith.constant 0 : i32
    return %arg0, %c0_i32, %c0_i32_0 : i32, i32, i32
  }
  func.func @transform_12(%arg0: i32) -> (i32, i32, i32) {
    %c0_i32 = arith.constant 0 : i32
    %c0_i32_0 = arith.constant 0 : i32
    %c0_i32_1 = arith.constant 0 : i32
    return %arg0, %c0_i32, %c0_i32_0 : i32, i32, i32
  }
  func.func @transform_13(%arg0: i32) -> (i32, i32, i32) {
    %c0_i32 = arith.constant 0 : i32
    %c0_i32_0 = arith.constant 0 : i32
    %c0_i32_1 = arith.constant 0 : i32
    return %arg0, %c0_i32, %c0_i32_0 : i32, i32, i32
  }
  func.func @transform_14(%arg0: i32) -> (i32, i32, i32) {
    %c0_i32 = arith.constant 0 : i32
    %c0_i32_0 = arith.constant 0 : i32
    %c0_i32_1 = arith.constant 0 : i32
    return %arg0, %c0_i32, %c0_i32_0 : i32, i32, i32
  }
  func.func @transform_15(%arg0: i32) -> (i32, i32, i32) {
    %c0_i32 = arith.constant 0 : i32
    %c0_i32_0 = arith.constant 0 : i32
    %c0_i32_1 = arith.constant 0 : i32
    return %arg0, %c0_i32, %c0_i32_0 : i32, i32, i32
  }
  func.func @transform_16(%arg0: i32) -> (i32, i32, i32) {
    %c0_i32 = arith.constant 0 : i32
    %c0_i32_0 = arith.constant 0 : i32
    %c0_i32_1 = arith.constant 0 : i32
    return %arg0, %c0_i32, %c0_i32_0 : i32, i32, i32
  }
  func.func @transform_17(%arg0: i32) -> (i32, i32, i32) {
    %c0_i32 = arith.constant 0 : i32
    %c0_i32_0 = arith.constant 0 : i32
    %c0_i32_1 = arith.constant 0 : i32
    return %arg0, %c0_i32, %c0_i32_0 : i32, i32, i32
  }
  func.func @transform_18(%arg0: i32) -> (i32, i32, i32) {
    %c0_i32 = arith.constant 0 : i32
    %c0_i32_0 = arith.constant 0 : i32
    %c0_i32_1 = arith.constant 0 : i32
    return %arg0, %c0_i32, %c0_i32_0 : i32, i32, i32
  }
  func.func @transform_19(%arg0: i32) -> (i32, i32, i32) {
    %c0_i32 = arith.constant 0 : i32
    %c0_i32_0 = arith.constant 0 : i32
    %c0_i32_1 = arith.constant 0 : i32
    return %arg0, %c0_i32, %c0_i32_0 : i32, i32, i32
  }
  func.func @transform_20(%arg0: i32) -> (i32, i32, i32) {
    %c0_i32 = arith.constant 0 : i32
    %c0_i32_0 = arith.constant 0 : i32
    %c0_i32_1 = arith.constant 0 : i32
    return %arg0, %c0_i32, %c0_i32_0 : i32, i32, i32
  }
  func.func @transform_21(%arg0: i32) -> (i32, i32, i32) {
    %c0_i32 = arith.constant 0 : i32
    %c0_i32_0 = arith.constant 0 : i32
    %c0_i32_1 = arith.constant 0 : i32
    return %arg0, %c0_i32, %c0_i32_0 : i32, i32, i32
  }
  func.func @transform_22(%arg0: i32) -> (i32, i32) {
    %c0_i32 = arith.constant 0 : i32
    %c0_i32_0 = arith.constant 0 : i32
    %c0_i32_1 = arith.constant 0 : i32
    return %c0_i32, %c0_i32_0 : i32, i32
  }
  func.func @transform_23(%arg0: i32) -> (i32, i32) {
    %c0_i32 = arith.constant 0 : i32
    %c0_i32_0 = arith.constant 0 : i32
    %c0_i32_1 = arith.constant 0 : i32
    return %c0_i32, %c0_i32_0 : i32, i32
  }
  func.func @transform_24(%arg0: i32) -> (i32, i32, i32) {
    %c0_i32 = arith.constant 0 : i32
    %c0_i32_0 = arith.constant 0 : i32
    %c0_i32_1 = arith.constant 0 : i32
    %c0_i32_2 = arith.constant 0 : i32
    return %c0_i32, %c0_i32_0, %c0_i32_1 : i32, i32, i32
  }
}

module attributes {stable_mosaic.version = 11 : i64} {
  func.func @_encoder_stack_kernel(%arg0: i32, %arg1: memref<2x8x128xf32, #tpu.memory_space<vmem>>, %arg2: memref<1x128x384xbf16, #tpu.memory_space<vmem>>, %arg3: memref<1x1x384xf32, #tpu.memory_space<vmem>>, %arg4: memref<1x128x128xbf16, #tpu.memory_space<vmem>>, %arg5: memref<1x1x128xf32, #tpu.memory_space<vmem>>, %arg6: memref<1x1x128xf32, #tpu.memory_space<vmem>>, %arg7: memref<1x1x128xf32, #tpu.memory_space<vmem>>, %arg8: memref<1x128x256xbf16, #tpu.memory_space<vmem>>, %arg9: memref<1x1x256xf32, #tpu.memory_space<vmem>>, %arg10: memref<1x256x128xbf16, #tpu.memory_space<vmem>>, %arg11: memref<1x1x128xf32, #tpu.memory_space<vmem>>, %arg12: memref<1x1x128xf32, #tpu.memory_space<vmem>>, %arg13: memref<1x1x128xf32, #tpu.memory_space<vmem>>, %arg14: memref<2x8x128xf32, #tpu.memory_space<vmem>>) attributes {dimension_semantics = [#tpu.dimension_semantics<arbitrary>], iteration_bounds = array<i64: 2>, scalar_prefetch = 0 : i64, scratch_operands = 0 : i64, tpu.core_type = #tpu.core_type<tc>, window_params = [{pipeline_mode = #tpu.pipeline_mode<synchronous>, transform_indices = @transform_0, window_bounds = array<i64: 2, 8, 128>}, {transform_indices = @transform_1, window_bounds = array<i64: 1, 128, 384>}, {transform_indices = @transform_2, window_bounds = array<i64: 1, 1, 384>}, {transform_indices = @transform_3, window_bounds = array<i64: 1, 128, 128>}, {transform_indices = @transform_4, window_bounds = array<i64: 1, 1, 128>}, {transform_indices = @transform_5, window_bounds = array<i64: 1, 1, 128>}, {transform_indices = @transform_6, window_bounds = array<i64: 1, 1, 128>}, {transform_indices = @transform_7, window_bounds = array<i64: 1, 128, 256>}, {transform_indices = @transform_8, window_bounds = array<i64: 1, 1, 256>}, {transform_indices = @transform_9, window_bounds = array<i64: 1, 256, 128>}, {transform_indices = @transform_10, window_bounds = array<i64: 1, 1, 128>}, {transform_indices = @transform_11, window_bounds = array<i64: 1, 1, 128>}, {transform_indices = @transform_12, window_bounds = array<i64: 1, 1, 128>}, {pipeline_mode = #tpu.pipeline_mode<synchronous>, transform_indices = @transform_13, window_bounds = array<i64: 2, 8, 128>}]} {
    %c0_i32 = arith.constant 0 : i32
    %0 = arith.cmpi eq, %arg0, %c0_i32 : i32
    %1 = arith.extui %0 : i1 to i32
    %c0_i32_0 = arith.constant 0 : i32
    %2 = arith.cmpi ne, %1, %c0_i32_0 : i32
    scf.if %2 {
      %c0_61 = arith.constant 0 : index
      %c0_62 = arith.constant 0 : index
      %c0_63 = arith.constant 0 : index
      %252 = vector.load %arg1[%c0_61, %c0_62, %c0_63] : memref<2x8x128xf32, #tpu.memory_space<vmem>>, vector<2x8x128xf32>
      %c0_64 = arith.constant 0 : index
      %c0_65 = arith.constant 0 : index
      %c0_66 = arith.constant 0 : index
      %253 = vector.load %arg14[%c0_64, %c0_65, %c0_66] : memref<2x8x128xf32, #tpu.memory_space<vmem>>, vector<2x8x128xf32>
      tpu.vector_store %arg14[%c0_64, %c0_65, %c0_66], %252 {strides = array<i32>} : memref<2x8x128xf32, #tpu.memory_space<vmem>>, vector<2x8x128xf32>,
    } else {
    }
    %c0 = arith.constant 0 : index
    %c0_1 = arith.constant 0 : index
    %c0_2 = arith.constant 0 : index
    %3 = vector.load %arg14[%c0, %c0_1, %c0_2] : memref<2x8x128xf32, #tpu.memory_space<vmem>>, vector<2x8x128xf32>
    %4 = vector.shape_cast %3 : vector<2x8x128xf32> to vector<16x128xf32>
    %5 = arith.truncf %4 : vector<16x128xf32> to vector<16x128xbf16>
    %c0_3 = arith.constant 0 : index
    %c0_4 = arith.constant 0 : index
    %c0_5 = arith.constant 0 : index
    %6 = vector.load %arg2[%c0_3, %c0_4, %c0_5] : memref<1x128x384xbf16, #tpu.memory_space<vmem>>, vector<1x128x384xbf16>
    %7 = vector.shape_cast %6 : vector<1x128x384xbf16> to vector<128x384xbf16>
    %c0_6 = arith.constant 0 : index
    %c0_7 = arith.constant 0 : index
    %c0_8 = arith.constant 0 : index
    %8 = vector.load %arg3[%c0_6, %c0_7, %c0_8] : memref<1x1x384xf32, #tpu.memory_space<vmem>>, vector<1x1x384xf32>
    %9 = vector.shape_cast %8 : vector<1x1x384xf32> to vector<1x384xf32>
    %c0_9 = arith.constant 0 : index
    %c0_10 = arith.constant 0 : index
    %c0_11 = arith.constant 0 : index
    %10 = vector.load %arg4[%c0_9, %c0_10, %c0_11] : memref<1x128x128xbf16, #tpu.memory_space<vmem>>, vector<1x128x128xbf16>
    %11 = vector.shape_cast %10 : vector<1x128x128xbf16> to vector<128x128xbf16>
    %c0_12 = arith.constant 0 : index
    %c0_13 = arith.constant 0 : index
    %c0_14 = arith.constant 0 : index
    %12 = vector.load %arg5[%c0_12, %c0_13, %c0_14] : memref<1x1x128xf32, #tpu.memory_space<vmem>>, vector<1x1x128xf32>
    %13 = vector.shape_cast %12 : vector<1x1x128xf32> to vector<1x128xf32>
    %cst = arith.constant dense<0.000000e+00> : vector<16x384xf32>
    %14 = tpu.matmul %5, %7, %cst {dimension_numbers = #tpu.dot_dimension_numbers<[1], [0], [0], [1], [0, 0, 1, 1], [], []>} : vector<16x128xbf16>, vector<128x384xbf16>, vector<16x384xf32> -> vector<16x384xf32>
    %15 = vector.broadcast %9 : vector<1x384xf32> to vector<16x384xf32>
    %16 = arith.addf %14, %15 : vector<16x384xf32>
    %17 = vector.extract_strided_slice %16 {offsets = [0, 0], sizes = [16, 128], strides = [1, 1]} : vector<16x384xf32> to vector<16x128xf32>
    %cst_15 = arith.constant 2.500000e-01 : f32
    %18 = vector.broadcast %cst_15 : f32 to vector<16x128xf32>
    %19 = arith.mulf %17, %18 : vector<16x128xf32>
    %20 = vector.extract_strided_slice %16 {offsets = [0, 128], sizes = [16, 128], strides = [1, 1]} : vector<16x384xf32> to vector<16x128xf32>
    %21 = vector.extract_strided_slice %16 {offsets = [0, 256], sizes = [16, 128], strides = [1, 1]} : vector<16x384xf32> to vector<16x128xf32>
    %22 = vector.extract_strided_slice %19 {offsets = [0, 0], sizes = [8, 128], strides = [1, 1]} : vector<16x128xf32> to vector<8x128xf32>
    %23 = vector.extract_strided_slice %22 {offsets = [0, 0], sizes = [8, 16], strides = [1, 1]} : vector<8x128xf32> to vector<8x16xf32>
    %24 = vector.shape_cast %23 : vector<8x16xf32> to vector<1x8x16xf32>
    %25 = vector.extract_strided_slice %22 {offsets = [0, 16], sizes = [8, 16], strides = [1, 1]} : vector<8x128xf32> to vector<8x16xf32>
    %26 = vector.shape_cast %25 : vector<8x16xf32> to vector<1x8x16xf32>
    %27 = vector.extract_strided_slice %22 {offsets = [0, 32], sizes = [8, 16], strides = [1, 1]} : vector<8x128xf32> to vector<8x16xf32>
    %28 = vector.shape_cast %27 : vector<8x16xf32> to vector<1x8x16xf32>
    %29 = vector.extract_strided_slice %22 {offsets = [0, 48], sizes = [8, 16], strides = [1, 1]} : vector<8x128xf32> to vector<8x16xf32>
    %30 = vector.shape_cast %29 : vector<8x16xf32> to vector<1x8x16xf32>
    %31 = vector.extract_strided_slice %22 {offsets = [0, 64], sizes = [8, 16], strides = [1, 1]} : vector<8x128xf32> to vector<8x16xf32>
    %32 = vector.shape_cast %31 : vector<8x16xf32> to vector<1x8x16xf32>
    %33 = vector.extract_strided_slice %22 {offsets = [0, 80], sizes = [8, 16], strides = [1, 1]} : vector<8x128xf32> to vector<8x16xf32>
    %34 = vector.shape_cast %33 : vector<8x16xf32> to vector<1x8x16xf32>
    %35 = vector.extract_strided_slice %22 {offsets = [0, 96], sizes = [8, 16], strides = [1, 1]} : vector<8x128xf32> to vector<8x16xf32>
    %36 = vector.shape_cast %35 : vector<8x16xf32> to vector<1x8x16xf32>
    %37 = vector.extract_strided_slice %22 {offsets = [0, 112], sizes = [8, 16], strides = [1, 1]} : vector<8x128xf32> to vector<8x16xf32>
    %38 = vector.shape_cast %37 : vector<8x16xf32> to vector<1x8x16xf32>
    %39 = vector.extract_strided_slice %19 {offsets = [8, 0], sizes = [8, 128], strides = [1, 1]} : vector<16x128xf32> to vector<8x128xf32>
    %40 = vector.extract_strided_slice %39 {offsets = [0, 0], sizes = [8, 16], strides = [1, 1]} : vector<8x128xf32> to vector<8x16xf32>
    %41 = vector.shape_cast %40 : vector<8x16xf32> to vector<1x8x16xf32>
    %42 = vector.extract_strided_slice %39 {offsets = [0, 16], sizes = [8, 16], strides = [1, 1]} : vector<8x128xf32> to vector<8x16xf32>
    %43 = vector.shape_cast %42 : vector<8x16xf32> to vector<1x8x16xf32>
    %44 = vector.extract_strided_slice %39 {offsets = [0, 32], sizes = [8, 16], strides = [1, 1]} : vector<8x128xf32> to vector<8x16xf32>
    %45 = vector.shape_cast %44 : vector<8x16xf32> to vector<1x8x16xf32>
    %46 = vector.extract_strided_slice %39 {offsets = [0, 48], sizes = [8, 16], strides = [1, 1]} : vector<8x128xf32> to vector<8x16xf32>
    %47 = vector.shape_cast %46 : vector<8x16xf32> to vector<1x8x16xf32>
    %48 = vector.extract_strided_slice %39 {offsets = [0, 64], sizes = [8, 16], strides = [1, 1]} : vector<8x128xf32> to vector<8x16xf32>
    %49 = vector.shape_cast %48 : vector<8x16xf32> to vector<1x8x16xf32>
    %50 = vector.extract_strided_slice %39 {offsets = [0, 80], sizes = [8, 16], strides = [1, 1]} : vector<8x128xf32> to vector<8x16xf32>
    %51 = vector.shape_cast %50 : vector<8x16xf32> to vector<1x8x16xf32>
    %52 = vector.extract_strided_slice %39 {offsets = [0, 96], sizes = [8, 16], strides = [1, 1]} : vector<8x128xf32> to vector<8x16xf32>
    %53 = vector.shape_cast %52 : vector<8x16xf32> to vector<1x8x16xf32>
    %54 = vector.extract_strided_slice %39 {offsets = [0, 112], sizes = [8, 16], strides = [1, 1]} : vector<8x128xf32> to vector<8x16xf32>
    %55 = vector.shape_cast %54 : vector<8x16xf32> to vector<1x8x16xf32>
    %56 = tpu.concatenate %24, %26, %28, %30, %32, %34, %36, %38, %41, %43, %45, %47, %49, %51, %53, %55 in 0 : vector<1x8x16xf32>, vector<1x8x16xf32>, vector<1x8x16xf32>, vector<1x8x16xf32>, vector<1x8x16xf32>, vector<1x8x16xf32>, vector<1x8x16xf32>, vector<1x8x16xf32>, vector<1x8x16xf32>, vector<1x8x16xf32>, vector<1x8x16xf32>, vector<1x8x16xf32>, vector<1x8x16xf32>, vector<1x8x16xf32>, vector<1x8x16xf32>, vector<1x8x16xf32> -> vector<16x8x16xf32>
    %57 = arith.truncf %56 : vector<16x8x16xf32> to vector<16x8x16xbf16>
    %58 = vector.extract_strided_slice %20 {offsets = [0, 0], sizes = [8, 128], strides = [1, 1]} : vector<16x128xf32> to vector<8x128xf32>
    %59 = vector.extract_strided_slice %58 {offsets = [0, 0], sizes = [8, 16], strides = [1, 1]} : vector<8x128xf32> to vector<8x16xf32>
    %60 = vector.shape_cast %59 : vector<8x16xf32> to vector<1x8x16xf32>
    %61 = vector.extract_strided_slice %58 {offsets = [0, 16], sizes = [8, 16], strides = [1, 1]} : vector<8x128xf32> to vector<8x16xf32>
    %62 = vector.shape_cast %61 : vector<8x16xf32> to vector<1x8x16xf32>
    %63 = vector.extract_strided_slice %58 {offsets = [0, 32], sizes = [8, 16], strides = [1, 1]} : vector<8x128xf32> to vector<8x16xf32>
    %64 = vector.shape_cast %63 : vector<8x16xf32> to vector<1x8x16xf32>
    %65 = vector.extract_strided_slice %58 {offsets = [0, 48], sizes = [8, 16], strides = [1, 1]} : vector<8x128xf32> to vector<8x16xf32>
    %66 = vector.shape_cast %65 : vector<8x16xf32> to vector<1x8x16xf32>
    %67 = vector.extract_strided_slice %58 {offsets = [0, 64], sizes = [8, 16], strides = [1, 1]} : vector<8x128xf32> to vector<8x16xf32>
    %68 = vector.shape_cast %67 : vector<8x16xf32> to vector<1x8x16xf32>
    %69 = vector.extract_strided_slice %58 {offsets = [0, 80], sizes = [8, 16], strides = [1, 1]} : vector<8x128xf32> to vector<8x16xf32>
    %70 = vector.shape_cast %69 : vector<8x16xf32> to vector<1x8x16xf32>
    %71 = vector.extract_strided_slice %58 {offsets = [0, 96], sizes = [8, 16], strides = [1, 1]} : vector<8x128xf32> to vector<8x16xf32>
    %72 = vector.shape_cast %71 : vector<8x16xf32> to vector<1x8x16xf32>
    %73 = vector.extract_strided_slice %58 {offsets = [0, 112], sizes = [8, 16], strides = [1, 1]} : vector<8x128xf32> to vector<8x16xf32>
    %74 = vector.shape_cast %73 : vector<8x16xf32> to vector<1x8x16xf32>
    %75 = vector.extract_strided_slice %20 {offsets = [8, 0], sizes = [8, 128], strides = [1, 1]} : vector<16x128xf32> to vector<8x128xf32>
    %76 = vector.extract_strided_slice %75 {offsets = [0, 0], sizes = [8, 16], strides = [1, 1]} : vector<8x128xf32> to vector<8x16xf32>
    %77 = vector.shape_cast %76 : vector<8x16xf32> to vector<1x8x16xf32>
    %78 = vector.extract_strided_slice %75 {offsets = [0, 16], sizes = [8, 16], strides = [1, 1]} : vector<8x128xf32> to vector<8x16xf32>
    %79 = vector.shape_cast %78 : vector<8x16xf32> to vector<1x8x16xf32>
    %80 = vector.extract_strided_slice %75 {offsets = [0, 32], sizes = [8, 16], strides = [1, 1]} : vector<8x128xf32> to vector<8x16xf32>
    %81 = vector.shape_cast %80 : vector<8x16xf32> to vector<1x8x16xf32>
    %82 = vector.extract_strided_slice %75 {offsets = [0, 48], sizes = [8, 16], strides = [1, 1]} : vector<8x128xf32> to vector<8x16xf32>
    %83 = vector.shape_cast %82 : vector<8x16xf32> to vector<1x8x16xf32>
    %84 = vector.extract_strided_slice %75 {offsets = [0, 64], sizes = [8, 16], strides = [1, 1]} : vector<8x128xf32> to vector<8x16xf32>
    %85 = vector.shape_cast %84 : vector<8x16xf32> to vector<1x8x16xf32>
    %86 = vector.extract_strided_slice %75 {offsets = [0, 80], sizes = [8, 16], strides = [1, 1]} : vector<8x128xf32> to vector<8x16xf32>
    %87 = vector.shape_cast %86 : vector<8x16xf32> to vector<1x8x16xf32>
    %88 = vector.extract_strided_slice %75 {offsets = [0, 96], sizes = [8, 16], strides = [1, 1]} : vector<8x128xf32> to vector<8x16xf32>
    %89 = vector.shape_cast %88 : vector<8x16xf32> to vector<1x8x16xf32>
    %90 = vector.extract_strided_slice %75 {offsets = [0, 112], sizes = [8, 16], strides = [1, 1]} : vector<8x128xf32> to vector<8x16xf32>
    %91 = vector.shape_cast %90 : vector<8x16xf32> to vector<1x8x16xf32>
    %92 = tpu.concatenate %60, %62, %64, %66, %68, %70, %72, %74, %77, %79, %81, %83, %85, %87, %89, %91 in 0 : vector<1x8x16xf32>, vector<1x8x16xf32>, vector<1x8x16xf32>, vector<1x8x16xf32>, vector<1x8x16xf32>, vector<1x8x16xf32>, vector<1x8x16xf32>, vector<1x8x16xf32>, vector<1x8x16xf32>, vector<1x8x16xf32>, vector<1x8x16xf32>, vector<1x8x16xf32>, vector<1x8x16xf32>, vector<1x8x16xf32>, vector<1x8x16xf32>, vector<1x8x16xf32> -> vector<16x8x16xf32>
    %93 = arith.truncf %92 : vector<16x8x16xf32> to vector<16x8x16xbf16>
    %94 = vector.extract_strided_slice %21 {offsets = [0, 0], sizes = [8, 128], strides = [1, 1]} : vector<16x128xf32> to vector<8x128xf32>
    %95 = vector.extract_strided_slice %94 {offsets = [0, 0], sizes = [8, 16], strides = [1, 1]} : vector<8x128xf32> to vector<8x16xf32>
    %96 = vector.shape_cast %95 : vector<8x16xf32> to vector<1x8x16xf32>
    %97 = vector.extract_strided_slice %94 {offsets = [0, 16], sizes = [8, 16], strides = [1, 1]} : vector<8x128xf32> to vector<8x16xf32>
    %98 = vector.shape_cast %97 : vector<8x16xf32> to vector<1x8x16xf32>
    %99 = vector.extract_strided_slice %94 {offsets = [0, 32], sizes = [8, 16], strides = [1, 1]} : vector<8x128xf32> to vector<8x16xf32>
    %100 = vector.shape_cast %99 : vector<8x16xf32> to vector<1x8x16xf32>
    %101 = vector.extract_strided_slice %94 {offsets = [0, 48], sizes = [8, 16], strides = [1, 1]} : vector<8x128xf32> to vector<8x16xf32>
    %102 = vector.shape_cast %101 : vector<8x16xf32> to vector<1x8x16xf32>
    %103 = vector.extract_strided_slice %94 {offsets = [0, 64], sizes = [8, 16], strides = [1, 1]} : vector<8x128xf32> to vector<8x16xf32>
    %104 = vector.shape_cast %103 : vector<8x16xf32> to vector<1x8x16xf32>
    %105 = vector.extract_strided_slice %94 {offsets = [0, 80], sizes = [8, 16], strides = [1, 1]} : vector<8x128xf32> to vector<8x16xf32>
    %106 = vector.shape_cast %105 : vector<8x16xf32> to vector<1x8x16xf32>
    %107 = vector.extract_strided_slice %94 {offsets = [0, 96], sizes = [8, 16], strides = [1, 1]} : vector<8x128xf32> to vector<8x16xf32>
    %108 = vector.shape_cast %107 : vector<8x16xf32> to vector<1x8x16xf32>
    %109 = vector.extract_strided_slice %94 {offsets = [0, 112], sizes = [8, 16], strides = [1, 1]} : vector<8x128xf32> to vector<8x16xf32>
    %110 = vector.shape_cast %109 : vector<8x16xf32> to vector<1x8x16xf32>
    %111 = vector.extract_strided_slice %21 {offsets = [8, 0], sizes = [8, 128], strides = [1, 1]} : vector<16x128xf32> to vector<8x128xf32>
    %112 = vector.extract_strided_slice %111 {offsets = [0, 0], sizes = [8, 16], strides = [1, 1]} : vector<8x128xf32> to vector<8x16xf32>
    %113 = vector.shape_cast %112 : vector<8x16xf32> to vector<1x8x16xf32>
    %114 = vector.extract_strided_slice %111 {offsets = [0, 16], sizes = [8, 16], strides = [1, 1]} : vector<8x128xf32> to vector<8x16xf32>
    %115 = vector.shape_cast %114 : vector<8x16xf32> to vector<1x8x16xf32>
    %116 = vector.extract_strided_slice %111 {offsets = [0, 32], sizes = [8, 16], strides = [1, 1]} : vector<8x128xf32> to vector<8x16xf32>
    %117 = vector.shape_cast %116 : vector<8x16xf32> to vector<1x8x16xf32>
    %118 = vector.extract_strided_slice %111 {offsets = [0, 48], sizes = [8, 16], strides = [1, 1]} : vector<8x128xf32> to vector<8x16xf32>
    %119 = vector.shape_cast %118 : vector<8x16xf32> to vector<1x8x16xf32>
    %120 = vector.extract_strided_slice %111 {offsets = [0, 64], sizes = [8, 16], strides = [1, 1]} : vector<8x128xf32> to vector<8x16xf32>
    %121 = vector.shape_cast %120 : vector<8x16xf32> to vector<1x8x16xf32>
    %122 = vector.extract_strided_slice %111 {offsets = [0, 80], sizes = [8, 16], strides = [1, 1]} : vector<8x128xf32> to vector<8x16xf32>
    %123 = vector.shape_cast %122 : vector<8x16xf32> to vector<1x8x16xf32>
    %124 = vector.extract_strided_slice %111 {offsets = [0, 96], sizes = [8, 16], strides = [1, 1]} : vector<8x128xf32> to vector<8x16xf32>
    %125 = vector.shape_cast %124 : vector<8x16xf32> to vector<1x8x16xf32>
    %126 = vector.extract_strided_slice %111 {offsets = [0, 112], sizes = [8, 16], strides = [1, 1]} : vector<8x128xf32> to vector<8x16xf32>
    %127 = vector.shape_cast %126 : vector<8x16xf32> to vector<1x8x16xf32>
    %128 = tpu.concatenate %96, %98, %100, %102, %104, %106, %108, %110, %113, %115, %117, %119, %121, %123, %125, %127 in 0 : vector<1x8x16xf32>, vector<1x8x16xf32>, vector<1x8x16xf32>, vector<1x8x16xf32>, vector<1x8x16xf32>, vector<1x8x16xf32>, vector<1x8x16xf32>, vector<1x8x16xf32>, vector<1x8x16xf32>, vector<1x8x16xf32>, vector<1x8x16xf32>, vector<1x8x16xf32>, vector<1x8x16xf32>, vector<1x8x16xf32>, vector<1x8x16xf32>, vector<1x8x16xf32> -> vector<16x8x16xf32>
    %129 = arith.truncf %128 : vector<16x8x16xf32> to vector<16x8x16xbf16>
    %cst_16 = arith.constant dense<0.000000e+00> : vector<16x8x8xf32>
    %130 = tpu.matmul %57, %93, %cst_16 {dimension_numbers = #tpu.dot_dimension_numbers<[2], [2], [1], [1], [0, 0, 0, 1, 1, 1], [0], [0]>} : vector<16x8x16xbf16>, vector<16x8x16xbf16>, vector<16x8x8xf32> -> vector<16x8x8xf32>
    %cst_17 = arith.constant dense<0xFF800000> : vector<16x8xf32>
    %131 = vector.multi_reduction <maximumf>, %130, %cst_17 [2] : vector<16x8x8xf32> to vector<16x8xf32>
    %132 = vector.shape_cast %131 : vector<16x8xf32> to vector<16x8x1xf32>
    %133 = vector.broadcast %132 : vector<16x8x1xf32> to vector<16x8x8xf32>
    %134 = arith.subf %130, %133 : vector<16x8x8xf32>
    %135 = math.exp %134 : vector<16x8x8xf32>
    %cst_18 = arith.constant dense<0.000000e+00> : vector<16x8xf32>
    %136 = vector.multi_reduction <add>, %135, %cst_18 [2] : vector<16x8x8xf32> to vector<16x8xf32>
    %137 = vector.shape_cast %136 : vector<16x8xf32> to vector<16x8x1xf32>
    %138 = tpu.reciprocal %137 {approx = true} : vector<16x8x1xf32> -> vector<16x8x1xf32>
    %139 = vector.broadcast %138 : vector<16x8x1xf32> to vector<16x8x8xf32>
    %140 = arith.mulf %135, %139 : vector<16x8x8xf32>
    %141 = arith.truncf %140 : vector<16x8x8xf32> to vector<16x8x8xbf16>
    %cst_19 = arith.constant dense<0.000000e+00> : vector<16x8x16xf32>
    %142 = tpu.matmul %141, %129, %cst_19 {dimension_numbers = #tpu.dot_dimension_numbers<[2], [1], [1], [2], [0, 0, 0, 1, 1, 2], [0], [0]>} : vector<16x8x8xbf16>, vector<16x8x16xbf16>, vector<16x8x16xf32> -> vector<16x8x16xf32>
    %143 = vector.extract_strided_slice %142 {offsets = [0, 0, 0], sizes = [1, 8, 16], strides = [1, 1, 1]} : vector<16x8x16xf32> to vector<1x8x16xf32>
    %144 = vector.shape_cast %143 : vector<1x8x16xf32> to vector<8x16xf32>
    %145 = vector.extract_strided_slice %142 {offsets = [1, 0, 0], sizes = [1, 8, 16], strides = [1, 1, 1]} : vector<16x8x16xf32> to vector<1x8x16xf32>
    %146 = vector.shape_cast %145 : vector<1x8x16xf32> to vector<8x16xf32>
    %147 = vector.extract_strided_slice %142 {offsets = [2, 0, 0], sizes = [1, 8, 16], strides = [1, 1, 1]} : vector<16x8x16xf32> to vector<1x8x16xf32>
    %148 = vector.shape_cast %147 : vector<1x8x16xf32> to vector<8x16xf32>
    %149 = vector.extract_strided_slice %142 {offsets = [3, 0, 0], sizes = [1, 8, 16], strides = [1, 1, 1]} : vector<16x8x16xf32> to vector<1x8x16xf32>
    %150 = vector.shape_cast %149 : vector<1x8x16xf32> to vector<8x16xf32>
    %151 = vector.extract_strided_slice %142 {offsets = [4, 0, 0], sizes = [1, 8, 16], strides = [1, 1, 1]} : vector<16x8x16xf32> to vector<1x8x16xf32>
    %152 = vector.shape_cast %151 : vector<1x8x16xf32> to vector<8x16xf32>
    %153 = vector.extract_strided_slice %142 {offsets = [5, 0, 0], sizes = [1, 8, 16], strides = [1, 1, 1]} : vector<16x8x16xf32> to vector<1x8x16xf32>
    %154 = vector.shape_cast %153 : vector<1x8x16xf32> to vector<8x16xf32>
    %155 = vector.extract_strided_slice %142 {offsets = [6, 0, 0], sizes = [1, 8, 16], strides = [1, 1, 1]} : vector<16x8x16xf32> to vector<1x8x16xf32>
    %156 = vector.shape_cast %155 : vector<1x8x16xf32> to vector<8x16xf32>
    %157 = vector.extract_strided_slice %142 {offsets = [7, 0, 0], sizes = [1, 8, 16], strides = [1, 1, 1]} : vector<16x8x16xf32> to vector<1x8x16xf32>
    %158 = vector.shape_cast %157 : vector<1x8x16xf32> to vector<8x16xf32>
    %159 = tpu.concatenate %144, %146, %148, %150, %152, %154, %156, %158 in 1 : vector<8x16xf32>, vector<8x16xf32>, vector<8x16xf32>, vector<8x16xf32>, vector<8x16xf32>, vector<8x16xf32>, vector<8x16xf32>, vector<8x16xf32> -> vector<8x128xf32>
    %160 = vector.extract_strided_slice %142 {offsets = [8, 0, 0], sizes = [1, 8, 16], strides = [1, 1, 1]} : vector<16x8x16xf32> to vector<1x8x16xf32>
    %161 = vector.shape_cast %160 : vector<1x8x16xf32> to vector<8x16xf32>
    %162 = vector.extract_strided_slice %142 {offsets = [9, 0, 0], sizes = [1, 8, 16], strides = [1, 1, 1]} : vector<16x8x16xf32> to vector<1x8x16xf32>
    %163 = vector.shape_cast %162 : vector<1x8x16xf32> to vector<8x16xf32>
    %164 = vector.extract_strided_slice %142 {offsets = [10, 0, 0], sizes = [1, 8, 16], strides = [1, 1, 1]} : vector<16x8x16xf32> to vector<1x8x16xf32>
    %165 = vector.shape_cast %164 : vector<1x8x16xf32> to vector<8x16xf32>
    %166 = vector.extract_strided_slice %142 {offsets = [11, 0, 0], sizes = [1, 8, 16], strides = [1, 1, 1]} : vector<16x8x16xf32> to vector<1x8x16xf32>
    %167 = vector.shape_cast %166 : vector<1x8x16xf32> to vector<8x16xf32>
    %168 = vector.extract_strided_slice %142 {offsets = [12, 0, 0], sizes = [1, 8, 16], strides = [1, 1, 1]} : vector<16x8x16xf32> to vector<1x8x16xf32>
    %169 = vector.shape_cast %168 : vector<1x8x16xf32> to vector<8x16xf32>
    %170 = vector.extract_strided_slice %142 {offsets = [13, 0, 0], sizes = [1, 8, 16], strides = [1, 1, 1]} : vector<16x8x16xf32> to vector<1x8x16xf32>
    %171 = vector.shape_cast %170 : vector<1x8x16xf32> to vector<8x16xf32>
    %172 = vector.extract_strided_slice %142 {offsets = [14, 0, 0], sizes = [1, 8, 16], strides = [1, 1, 1]} : vector<16x8x16xf32> to vector<1x8x16xf32>
    %173 = vector.shape_cast %172 : vector<1x8x16xf32> to vector<8x16xf32>
    %174 = vector.extract_strided_slice %142 {offsets = [15, 0, 0], sizes = [1, 8, 16], strides = [1, 1, 1]} : vector<16x8x16xf32> to vector<1x8x16xf32>
    %175 = vector.shape_cast %174 : vector<1x8x16xf32> to vector<8x16xf32>
    %176 = tpu.concatenate %161, %163, %165, %167, %169, %171, %173, %175 in 1 : vector<8x16xf32>, vector<8x16xf32>, vector<8x16xf32>, vector<8x16xf32>, vector<8x16xf32>, vector<8x16xf32>, vector<8x16xf32>, vector<8x16xf32> -> vector<8x128xf32>
    %177 = tpu.concatenate %159, %176 in 0 : vector<8x128xf32>, vector<8x128xf32> -> vector<16x128xf32>
    %178 = arith.truncf %177 : vector<16x128xf32> to vector<16x128xbf16>
    %cst_20 = arith.constant dense<0.000000e+00> : vector<16x128xf32>
    %179 = tpu.matmul %178, %11, %cst_20 {dimension_numbers = #tpu.dot_dimension_numbers<[1], [0], [0], [1], [0, 0, 1, 1], [], []>} : vector<16x128xbf16>, vector<128x128xbf16>, vector<16x128xf32> -> vector<16x128xf32>
    %180 = vector.broadcast %13 : vector<1x128xf32> to vector<16x128xf32>
    %181 = arith.addf %179, %180 : vector<16x128xf32>
    %182 = arith.addf %4, %181 : vector<16x128xf32>
    %c0_21 = arith.constant 0 : index
    %c0_22 = arith.constant 0 : index
    %c0_23 = arith.constant 0 : index
    %183 = vector.load %arg6[%c0_21, %c0_22, %c0_23] : memref<1x1x128xf32, #tpu.memory_space<vmem>>, vector<1x1x128xf32>
    %184 = vector.shape_cast %183 : vector<1x1x128xf32> to vector<1x128xf32>
    %c0_24 = arith.constant 0 : index
    %c0_25 = arith.constant 0 : index
    %c0_26 = arith.constant 0 : index
    %185 = vector.load %arg7[%c0_24, %c0_25, %c0_26] : memref<1x1x128xf32, #tpu.memory_space<vmem>>, vector<1x1x128xf32>
    %186 = vector.shape_cast %185 : vector<1x1x128xf32> to vector<1x128xf32>
    %cst_27 = arith.constant dense<0.000000e+00> : vector<16xf32>
    %187 = vector.multi_reduction <add>, %182, %cst_27 [1] : vector<16x128xf32> to vector<16xf32>
    %188 = vector.shape_cast %187 : vector<16xf32> to vector<16x1xf32>
    %cst_28 = arith.constant 1.280000e+02 : f32
    %189 = vector.broadcast %cst_28 : f32 to vector<16x1xf32>
    %190 = arith.divf %188, %189 : vector<16x1xf32>
    %191 = vector.broadcast %190 : vector<16x1xf32> to vector<16x128xf32>
    %192 = arith.subf %182, %191 : vector<16x128xf32>
    %193 = arith.mulf %192, %192 : vector<16x128xf32>
    %cst_29 = arith.constant dense<0.000000e+00> : vector<16xf32>
    %194 = vector.multi_reduction <add>, %193, %cst_29 [1] : vector<16x128xf32> to vector<16xf32>
    %195 = vector.shape_cast %194 : vector<16xf32> to vector<16x1xf32>
    %cst_30 = arith.constant 1.280000e+02 : f32
    %196 = vector.broadcast %cst_30 : f32 to vector<16x1xf32>
    %197 = arith.divf %195, %196 : vector<16x1xf32>
    %cst_31 = arith.constant 9.99999974E-6 : f32
    %198 = vector.broadcast %cst_31 : f32 to vector<16x1xf32>
    %199 = arith.addf %197, %198 : vector<16x1xf32>
    %200 = math.rsqrt %199 : vector<16x1xf32>
    %201 = vector.broadcast %200 : vector<16x1xf32> to vector<16x128xf32>
    %202 = arith.mulf %192, %201 : vector<16x128xf32>
    %203 = vector.broadcast %184 : vector<1x128xf32> to vector<16x128xf32>
    %204 = arith.mulf %202, %203 : vector<16x128xf32>
    %205 = vector.broadcast %186 : vector<1x128xf32> to vector<16x128xf32>
    %206 = arith.addf %204, %205 : vector<16x128xf32>
    %207 = arith.truncf %206 : vector<16x128xf32> to vector<16x128xbf16>
    %c0_32 = arith.constant 0 : index
    %c0_33 = arith.constant 0 : index
    %c0_34 = arith.constant 0 : index
    %208 = vector.load %arg8[%c0_32, %c0_33, %c0_34] : memref<1x128x256xbf16, #tpu.memory_space<vmem>>, vector<1x128x256xbf16>
    %209 = vector.shape_cast %208 : vector<1x128x256xbf16> to vector<128x256xbf16>
    %c0_35 = arith.constant 0 : index
    %c0_36 = arith.constant 0 : index
    %c0_37 = arith.constant 0 : index
    %210 = vector.load %arg9[%c0_35, %c0_36, %c0_37] : memref<1x1x256xf32, #tpu.memory_space<vmem>>, vector<1x1x256xf32>
    %211 = vector.shape_cast %210 : vector<1x1x256xf32> to vector<1x256xf32>
    %c0_38 = arith.constant 0 : index
    %c0_39 = arith.constant 0 : index
    %c0_40 = arith.constant 0 : index
    %212 = vector.load %arg10[%c0_38, %c0_39, %c0_40] : memref<1x256x128xbf16, #tpu.memory_space<vmem>>, vector<1x256x128xbf16>
    %213 = vector.shape_cast %212 : vector<1x256x128xbf16> to vector<256x128xbf16>
    %c0_41 = arith.constant 0 : index
    %c0_42 = arith.constant 0 : index
    %c0_43 = arith.constant 0 : index
    %214 = vector.load %arg11[%c0_41, %c0_42, %c0_43] : memref<1x1x128xf32, #tpu.memory_space<vmem>>, vector<1x1x128xf32>
    %215 = vector.shape_cast %214 : vector<1x1x128xf32> to vector<1x128xf32>
    %cst_44 = arith.constant dense<0.000000e+00> : vector<16x256xf32>
    %216 = tpu.matmul %207, %209, %cst_44 {dimension_numbers = #tpu.dot_dimension_numbers<[1], [0], [0], [1], [0, 0, 1, 1], [], []>} : vector<16x128xbf16>, vector<128x256xbf16>, vector<16x256xf32> -> vector<16x256xf32>
    %217 = vector.broadcast %211 : vector<1x256xf32> to vector<16x256xf32>
    %218 = arith.addf %216, %217 : vector<16x256xf32>
    %cst_45 = arith.constant 0.000000e+00 : f32
    %219 = vector.broadcast %cst_45 : f32 to vector<16x256xf32>
    %220 = arith.maximumf %218, %219 : vector<16x256xf32>
    %221 = arith.truncf %220 : vector<16x256xf32> to vector<16x256xbf16>
    %cst_46 = arith.constant dense<0.000000e+00> : vector<16x128xf32>
    %222 = tpu.matmul %221, %213, %cst_46 {dimension_numbers = #tpu.dot_dimension_numbers<[1], [0], [0], [1], [0, 0, 1, 1], [], []>} : vector<16x256xbf16>, vector<256x128xbf16>, vector<16x128xf32> -> vector<16x128xf32>
    %223 = vector.broadcast %215 : vector<1x128xf32> to vector<16x128xf32>
    %224 = arith.addf %222, %223 : vector<16x128xf32>
    %225 = arith.addf %206, %224 : vector<16x128xf32>
    %c0_47 = arith.constant 0 : index
    %c0_48 = arith.constant 0 : index
    %c0_49 = arith.constant 0 : index
    %226 = vector.load %arg12[%c0_47, %c0_48, %c0_49] : memref<1x1x128xf32, #tpu.memory_space<vmem>>, vector<1x1x128xf32>
    %227 = vector.shape_cast %226 : vector<1x1x128xf32> to vector<1x128xf32>
    %c0_50 = arith.constant 0 : index
    %c0_51 = arith.constant 0 : index
    %c0_52 = arith.constant 0 : index
    %228 = vector.load %arg13[%c0_50, %c0_51, %c0_52] : memref<1x1x128xf32, #tpu.memory_space<vmem>>, vector<1x1x128xf32>
    %229 = vector.shape_cast %228 : vector<1x1x128xf32> to vector<1x128xf32>
    %cst_53 = arith.constant dense<0.000000e+00> : vector<16xf32>
    %230 = vector.multi_reduction <add>, %225, %cst_53 [1] : vector<16x128xf32> to vector<16xf32>
    %231 = vector.shape_cast %230 : vector<16xf32> to vector<16x1xf32>
    %cst_54 = arith.constant 1.280000e+02 : f32
    %232 = vector.broadcast %cst_54 : f32 to vector<16x1xf32>
    %233 = arith.divf %231, %232 : vector<16x1xf32>
    %234 = vector.broadcast %233 : vector<16x1xf32> to vector<16x128xf32>
    %235 = arith.subf %225, %234 : vector<16x128xf32>
    %236 = arith.mulf %235, %235 : vector<16x128xf32>
    %cst_55 = arith.constant dense<0.000000e+00> : vector<16xf32>
    %237 = vector.multi_reduction <add>, %236, %cst_55 [1] : vector<16x128xf32> to vector<16xf32>
    %238 = vector.shape_cast %237 : vector<16xf32> to vector<16x1xf32>
    %cst_56 = arith.constant 1.280000e+02 : f32
    %239 = vector.broadcast %cst_56 : f32 to vector<16x1xf32>
    %240 = arith.divf %238, %239 : vector<16x1xf32>
    %cst_57 = arith.constant 9.99999974E-6 : f32
    %241 = vector.broadcast %cst_57 : f32 to vector<16x1xf32>
    %242 = arith.addf %240, %241 : vector<16x1xf32>
    %243 = math.rsqrt %242 : vector<16x1xf32>
    %244 = vector.broadcast %243 : vector<16x1xf32> to vector<16x128xf32>
    %245 = arith.mulf %235, %244 : vector<16x128xf32>
    %246 = vector.broadcast %227 : vector<1x128xf32> to vector<16x128xf32>
    %247 = arith.mulf %245, %246 : vector<16x128xf32>
    %248 = vector.broadcast %229 : vector<1x128xf32> to vector<16x128xf32>
    %249 = arith.addf %247, %248 : vector<16x128xf32>
    %250 = vector.shape_cast %249 : vector<16x128xf32> to vector<2x8x128xf32>
    %c0_58 = arith.constant 0 : index
    %c0_59 = arith.constant 0 : index
    %c0_60 = arith.constant 0 : index
    %251 = vector.load %arg14[%c0_58, %c0_59, %c0_60] : memref<2x8x128xf32, #tpu.memory_space<vmem>>, vector<2x8x128xf32>
    tpu.vector_store %arg14[%c0_58, %c0_59, %c0_60], %250 {strides = array<i32>} : memref<2x8x128xf32, #tpu.memory_space<vmem>>, vector<2x8x128xf32>,
    return
  }
  func.func @transform_0(%arg0: i32) -> (i32, i32, i32) {
    %c0_i32 = arith.constant 0 : i32
    %c0_i32_0 = arith.constant 0 : i32
    %c0_i32_1 = arith.constant 0 : i32
    %c0_i32_2 = arith.constant 0 : i32
    return %c0_i32, %c0_i32_0, %c0_i32_1 : i32, i32, i32
  }
  func.func @transform_1(%arg0: i32) -> (i32, i32, i32) {
    %c0_i32 = arith.constant 0 : i32
    %c0_i32_0 = arith.constant 0 : i32
    %c0_i32_1 = arith.constant 0 : i32
    return %arg0, %c0_i32, %c0_i32_0 : i32, i32, i32
  }
  func.func @transform_2(%arg0: i32) -> (i32, i32, i32) {
    %c0_i32 = arith.constant 0 : i32
    %c0_i32_0 = arith.constant 0 : i32
    %c0_i32_1 = arith.constant 0 : i32
    return %arg0, %c0_i32, %c0_i32_0 : i32, i32, i32
  }
  func.func @transform_3(%arg0: i32) -> (i32, i32, i32) {
    %c0_i32 = arith.constant 0 : i32
    %c0_i32_0 = arith.constant 0 : i32
    %c0_i32_1 = arith.constant 0 : i32
    return %arg0, %c0_i32, %c0_i32_0 : i32, i32, i32
  }
  func.func @transform_4(%arg0: i32) -> (i32, i32, i32) {
    %c0_i32 = arith.constant 0 : i32
    %c0_i32_0 = arith.constant 0 : i32
    %c0_i32_1 = arith.constant 0 : i32
    return %arg0, %c0_i32, %c0_i32_0 : i32, i32, i32
  }
  func.func @transform_5(%arg0: i32) -> (i32, i32, i32) {
    %c0_i32 = arith.constant 0 : i32
    %c0_i32_0 = arith.constant 0 : i32
    %c0_i32_1 = arith.constant 0 : i32
    return %arg0, %c0_i32, %c0_i32_0 : i32, i32, i32
  }
  func.func @transform_6(%arg0: i32) -> (i32, i32, i32) {
    %c0_i32 = arith.constant 0 : i32
    %c0_i32_0 = arith.constant 0 : i32
    %c0_i32_1 = arith.constant 0 : i32
    return %arg0, %c0_i32, %c0_i32_0 : i32, i32, i32
  }
  func.func @transform_7(%arg0: i32) -> (i32, i32, i32) {
    %c0_i32 = arith.constant 0 : i32
    %c0_i32_0 = arith.constant 0 : i32
    %c0_i32_1 = arith.constant 0 : i32
    return %arg0, %c0_i32, %c0_i32_0 : i32, i32, i32
  }
  func.func @transform_8(%arg0: i32) -> (i32, i32, i32) {
    %c0_i32 = arith.constant 0 : i32
    %c0_i32_0 = arith.constant 0 : i32
    %c0_i32_1 = arith.constant 0 : i32
    return %arg0, %c0_i32, %c0_i32_0 : i32, i32, i32
  }
  func.func @transform_9(%arg0: i32) -> (i32, i32, i32) {
    %c0_i32 = arith.constant 0 : i32
    %c0_i32_0 = arith.constant 0 : i32
    %c0_i32_1 = arith.constant 0 : i32
    return %arg0, %c0_i32, %c0_i32_0 : i32, i32, i32
  }
  func.func @transform_10(%arg0: i32) -> (i32, i32, i32) {
    %c0_i32 = arith.constant 0 : i32
    %c0_i32_0 = arith.constant 0 : i32
    %c0_i32_1 = arith.constant 0 : i32
    return %arg0, %c0_i32, %c0_i32_0 : i32, i32, i32
  }
  func.func @transform_11(%arg0: i32) -> (i32, i32, i32) {
    %c0_i32 = arith.constant 0 : i32
    %c0_i32_0 = arith.constant 0 : i32
    %c0_i32_1 = arith.constant 0 : i32
    return %arg0, %c0_i32, %c0_i32_0 : i32, i32, i32
  }
  func.func @transform_12(%arg0: i32) -> (i32, i32, i32) {
    %c0_i32 = arith.constant 0 : i32
    %c0_i32_0 = arith.constant 0 : i32
    %c0_i32_1 = arith.constant 0 : i32
    return %arg0, %c0_i32, %c0_i32_0 : i32, i32, i32
  }
  func.func @transform_13(%arg0: i32) -> (i32, i32, i32) {
    %c0_i32 = arith.constant 0 : i32
    %c0_i32_0 = arith.constant 0 : i32
    %c0_i32_1 = arith.constant 0 : i32
    %c0_i32_2 = arith.constant 0 : i32
    return %c0_i32, %c0_i32_0, %c0_i32_1 : i32, i32, i32
  }
}

</mosaic_0001>

<bundles_post_ra>
// kernel: spectrogram_transformer_forward.2
= control target key start
LH: loop header
LB: loop body
LE: loop exit
PB: predicated region body
PF: predicated region fallthrough
CT: control target
= control target key end

     0   :  { %s6257_s0 = inlined_call_operand.vmem [shape: f32[2,8,128], index: 0, kind: input, shape index: {}]   ;;  %s6258_s1 = inlined_call_operand.hbm [shape: bf16[2,128,384], index: 1, kind: input, shape index: {}]   ;;  %s6259_s2 = inlined_call_operand.hbm [shape: f32[2,1,384], index: 2, kind: input, shape index: {}]   ;;  %s6260_s3 = inlined_call_operand.hbm [shape: bf16[2,128,128], index: 3, kind: input, shape index: {}]   ;;  %s6261_s4 = inlined_call_operand.hbm [shape: f32[2,1,128], index: 4, kind: input, shape index: {}]   ;;  %s6262_s5 = inlined_call_operand.hbm [shape: f32[2,1,128], index: 5, kind: input, shape index: {}]   ;;  %s6263_s6 = inlined_call_operand.hbm [shape: f32[2,1,128], index: 6, kind: input, shape index: {}]   ;;  %s6264_s7 = inlined_call_operand.hbm [shape: bf16[2,128,256], index: 7, kind: input, shape index: {}]   ;;  %s6265_s8 = inlined_call_operand.hbm [shape: f32[2,1,256], index: 8, kind: input, shape index: {}]   ;;  %s6266_s9 = inlined_call_operand.hbm [shape: bf16[2,256,128], index: 9, kind: input, shape index: {}]   ;;  %s6267_s10 = inlined_call_operand.hbm [shape: f32[2,1,128], index: 10, kind: input, shape index: {}]   ;;  %s6268_s11 = inlined_call_operand.hbm [shape: f32[2,1,128], index: 11, kind: input, shape index: {}]   ;;  %s6269_s12 = inlined_call_operand.hbm [shape: f32[2,1,128], index: 12, kind: input, shape index: {}]   ;;  %s6270_s13 = inlined_call_operand.vmem [shape: f32[2,8,128], index: 13, kind: output, shape index: {}]  }
   0x1   :  { %6290 = sst [smem:[#allocation32_spill]] %s6257_s0 }
   0x2   :  { %6291 = sst [smem:[#allocation33_spill]] %s6259_s2 }
   0x3   :  { %6292 = sst [smem:[#allocation34_spill]] %s6261_s4 }
   0x4   :  { %6293 = sst [smem:[#allocation35_spill]] %s6263_s6 }
   0x5   :  { %6294 = sst [smem:[#allocation36_spill]] %s6270_s13 }
   0x6   :  { %18 = vsyncpa [#allocation3], 0 }
   0x7   :  { %20 = vsyncpa [#allocation3 + $0x1], 0 }
   0x8   :  { %21 = vsyncpa [#allocation5], 0 }
   0x9   :  { %23 = vsyncpa [#allocation5 + $0x1], 0 }
   0xa   :  { %24 = vsyncpa [#allocation8], 0 }
   0xb   :  { %26 = vsyncpa [#allocation8 + $0x1], 0 }
   0xc   :  { %27 = vsyncpa [#allocation11], 0 }
   0xd   :  { %29 = vsyncpa [#allocation11 + $0x1], 0 }
   0xe   :  { %30 = vsyncpa [#allocation14], 0 }
   0xf   :  { %32 = vsyncpa [#allocation14 + $0x1], 0 }
  0x10   :  { %33 = vsyncpa [#allocation17], 0 }
  0x11   :  { %35 = vsyncpa [#allocation17 + $0x1], 0 }
  0x12   :  { %36 = vsyncpa [#allocation20], 0 }
  0x13   :  { %38 = vsyncpa [#allocation20 + $0x1], 0  ;;  %s5123_s25 = smov 0   ;;  %s5125_s26 = smov 0  }
  0x14   :  { %s5127_s27 = smov 0   ;;  %s5129_s28 = smov 0  }
  0x15 LB: > { %6295 = sst [smem:[#allocation28_spill]] %s5019_s27  ;;  %s5142_s29 = sadd.s32 4294967295, %s5023_s28   ;;  %s5023_s28 = sphi %s5129_s28, %s6333_s28   ;;  %s5019_s27 = sphi %s5127_s27, %s6335_s27   ;;  %s5015_s26 = sphi %s5125_s26, %s6337_s26   ;;  %s5011_s25 = sphi %s5123_s25, %s6336_s25  }
  0x16   : > { %6296 = sst [smem:[#allocation29_spill]] %s5142_s29  ;;  %s5145_s30 = sadd.s32 1, %s5023_s28  }
  0x17   : > { %6297 = sst [smem:[#allocation30_spill]] %s5145_s30  ;;  %s69_s14 = ssub.s32 %s5023_s28, %s5145_s30 }
  0x18   : > { %s72_s15 = sadd.s32 1, %s5019_s27  ;;  %p70_p0 = scmp.eq.s32.totalorder %s69_s14, 0 }
  0x19   : > { %p79_p1 = scmp.ne.s32.totalorder %s5019_s27, %s5015_s26  ;;  %p80_p2 = scmp.eq.s32.totalorder %s5023_s28, 0 }
  0x1a   : > { %p85_p3 = scmp.ne.s32.totalorder %s5015_s26, %s5011_s25  ;;  %p86_p5 = scmp.eq.s32.totalorder %s5142_s29, 0 }
  0x1b   : > { %s5155_s16 = scalar_select %p70_p0, %s5019_s27, %s72_s15  }
  0x1c   : > { %p81_p4 = por %p80_p2, %p79_p1  ;;  %p4362_p6 = scmp.lt.s32.totalorder %s5023_s28, 2 }
  0x1d   : > { %6298 = sst [smem:[#allocation31_spill]] %s5155_s16  ;;  %p5159_p7 = por %p86_p5, %p85_p3 }
  0x1e   : > { %s5164_s18 = sand.u32 1, %s5019_s27   ;;  %p5166_p8 = pnand %p4362_p6, %p81_p4 }
  0x1f   : > { %s6299_s17 = scalar_select %p5159_p7, 1, 0 }
  0x20   : > { %s6300_s19 = scalar_select %p5166_p8, 1, 0 }
  0x21   : > { %s5171_s20 = sand.u32 1, %s5023_s28   ;;  %s4297_s21 = smul.u32 3, %s5164_s18 }
  0x22   : > { %s4298_s22 = smul.u32 48, %s5023_s28  ;;  %s6301_s2 = sld [smem:[#allocation33_spill]] }
  0x23   : > { %s444_s14 = scalar_lea.vmem [#allocation4], %s4297_s21  ;;  %p5189_p12 = pneg %p5166_p8 }
  0x24   : > { %s452_s15 = sshll.u32 %s444_s14, 4  ;;  %s5181_s15 = int_to_ptr.vmem [resolvable:$true] %s452_s15 }
  0x28   : > { %s5179_s25 = scalar_lea.hbm %s6301_s2, %s4298_s22  ;;  %s4610_s21 = scalar_lea.hbm %s6301_s2, 96 }
  0x29   : > { %s4605_s27 = scalar_lea.hbm %s5179_s25, 48  ;;  %p4611_p1 = scmp.lt.u32.totalorder %s5179_s25, %s6301_s2 }
  0x2a   : > { %p4606_p11 = scmp.ne.s32.totalorder %s5179_s25, %s4605_s27  ;;  %p4612_p2 = scmp.lt.u32.totalorder %s4610_s21, %s4605_s27 }
  0x2b   : > { %p4614_p4 = scmp.lt.u32.totalorder %s4605_s27, %s5179_s25 }
  0x2c   : > { %p4608_p13 = pnand %p5189_p12, %p4606_p11  ;;  %p4613_p3 = por %p4612_p2, %p4611_p1 }
  0x2e   : > { %p4609_p0 = pneg %p4608_p13  ;;  %p4615_p5 = por %p4614_p4, %p4613_p3 }
  0x30   : > { %p4616_p6 = pnand %p4615_p5, %p4609_p0 }
  0x32   : > { %4619 = shalt.err (!%p4616_p6)
}
  0x33   : > { %s4620_s16 = scalar_lea.vmem %s5181_s15, 48  ;;  %s5025_s22 = smov [#allocation4]  }
  0x34   : > { %p4621_p11 = scmp.ne.s32.totalorder %s5181_s15, %s4620_s16  ;;  %s4625_s23 = sshll.u32 %s5025_s22, 4  ;;  %s4626_s23 = int_to_ptr.vmem [resolvable:$false] %s4625_s23 }
  0x35   : > { %s4627_s24 = scalar_lea.vmem %s4626_s23, 96  ;;  %p4628_p10 = scmp.lt.s32.totalorder %s5181_s15, %s4626_s23 }
  0x36   : > { %p4623_p13 = pnand %p4621_p11, %p5189_p12  ;;  %p4629_p7 = scmp.lt.s32.totalorder %s4627_s24, %s4620_s16 }
  0x38   : > { %p4624_p9 = pneg %p4623_p13  ;;  %p4630_p1 = por %p4629_p7, %p4628_p10 }
  0x3a   : > { %p4631_p2 = pnand %p4630_p1, %p4624_p9 }
  0x3c   : > { %4634 = shalt.err (!%p4631_p2)
}
  0x3d   : > { %s6303_s27 = scalar_lea.sflag [#allocation5], %s5171_s20  ;;  %p6304_p0 = scmp.lt.s32.totalorder %s5023_s28, 3 }
  0x3e   : > { %4331 = dma.hbm_to_vmem [thread:$0]  (!%p5166_p8), %s5179_s25, 48, %s5181_s15, %s6303_s27  }
  0x3f   : > { %p6305_p3 = scmp.ge.s32.totalorder %s5023_s28, 1  ;;  %s5223_s21 = sshll.u32 %s5023_s28, 4 }
  0x40   : > { %s6307_s4 = sld [smem:[#allocation34_spill]]  ;;  %s483_s24 = scalar_lea.vmem [#allocation7], %s5164_s18 }
  0x41   : > { %p5218_p4 = pnand %p6305_p3, %p6304_p0  ;;  %s490_s25 = sshll.u32 %s483_s24, 4  ;;  %s491_s25 = int_to_ptr.vmem [resolvable:$true] %s490_s25 }
  0x43   : > { %s6306_s16 = scalar_select %p5218_p4, 1, 0 }
  0x46   : > { %s5229_s23 = scalar_lea.hbm %s6307_s4, %s5223_s21  ;;  %s4640_s0 = scalar_lea.hbm %s6307_s4, 32 }
  0x47   : > { %s4635_s27 = scalar_lea.hbm %s5229_s23, 16  ;;  %p4641_p5 = scmp.lt.u32.totalorder %s5229_s23, %s6307_s4 }
  0x48   : > { %p4636_p7 = scmp.ne.s32.totalorder %s5229_s23, %s4635_s27  ;;  %p4642_p6 = scmp.lt.u32.totalorder %s4640_s0, %s4635_s27 }
  0x49   : > { %p4644_p13 = scmp.lt.u32.totalorder %s4635_s27, %s5229_s23 }
  0x4a   : > { %p4638_p9 = pnand %p4636_p7, %p5189_p12  ;;  %p4643_p11 = por %p4642_p6, %p4641_p5 }
  0x4c   : > { %p4639_p10 = pneg %p4638_p9  ;;  %p4645_p1 = por %p4644_p13, %p4643_p11 }
  0x4e   : > { %p4646_p2 = pnand %p4645_p1, %p4639_p10 }
  0x50   : > { %4649 = shalt.err (!%p4646_p2)
}
  0x51   : > { %s4650_s24 = scalar_lea.vmem %s491_s25, 16  ;;  %s5026_s15 = smov [#allocation7]  }
  0x52   : > { %p4651_p0 = scmp.ne.s32.totalorder %s491_s25, %s4650_s24  ;;  %s4655_s29 = sshll.u32 %s5026_s15, 4  ;;  %s4656_s29 = int_to_ptr.vmem [resolvable:$false] %s4655_s29 }
  0x53   : > { %s4657_s2 = scalar_lea.vmem %s4656_s29, 32  ;;  %p4658_p9 = scmp.lt.s32.totalorder %s491_s25, %s4656_s29 }
  0x54   : > { %p4653_p3 = pnand %p4651_p0, %p5189_p12  ;;  %p4659_p4 = scmp.lt.s32.totalorder %s4657_s2, %s4650_s24 }
  0x56   : > { %p4654_p7 = pneg %p4653_p3  ;;  %p4660_p8 = por %p4659_p4, %p4658_p9 }
  0x58   : > { %p4661_p5 = pnand %p4660_p8, %p4654_p7 }
  0x5a   : > { %4664 = shalt.err (!%p4661_p5)
}
  0x5b   : > { %p6308_p6 = scmp.ne.s32.totalorder %s6300_s19, 0  ;;  %s6309_s0 = scalar_lea.sflag [#allocation8], %s5171_s20 }
  0x5c   : > { %s6310_s6 = sld [smem:[#allocation35_spill]]  ;;  %s517_s29 = scalar_lea.vmem [#allocation10], %s5164_s18 }
  0x5d   : > { %4337 = dma.hbm_to_vmem [thread:$0]  (!%p6308_p6), %s5229_s23, 16, %s491_s25, %s6309_s0  }
  0x5e   : > { %s524_s14 = sshll.u32 %s517_s29, 4  ;;  %s3836_s22 = sshll.u32 %s5164_s18, 1  ;;  %s5259_s14 = int_to_ptr.vmem [resolvable:$true] %s524_s14 }
  0x5f   : > { %s6282_s24 = scalar_lea.sflag [#allocation11], %s5171_s20 }
  0x62   : > { %s5256_s27 = scalar_lea.hbm %s6310_s6, %s5223_s21  ;;  %s4670_s0 = scalar_lea.hbm %s6310_s6, 32 }
  0x63   : > { %s4665_s2 = scalar_lea.hbm %s5256_s27, 16  ;;  %p4671_p11 = scmp.lt.u32.totalorder %s5256_s27, %s6310_s6 }
  0x64   : > { %p4666_p8 = scmp.ne.s32.totalorder %s5256_s27, %s4665_s2  ;;  %p4672_p13 = scmp.lt.u32.totalorder %s4670_s0, %s4665_s2 }
  0x65   : > { %p4674_p2 = scmp.lt.u32.totalorder %s4665_s2, %s5256_s27 }
  0x66   : > { %p4668_p4 = pnand %p4666_p8, %p5189_p12  ;;  %p4673_p1 = por %p4672_p13, %p4671_p11 }
  0x68   : > { %p4669_p10 = pneg %p4668_p4  ;;  %p4675_p0 = por %p4674_p2, %p4673_p1 }
  0x6a   : > { %p4676_p3 = pnand %p4675_p0, %p4669_p10 }
  0x6c   : > { %4679 = shalt.err (!%p4676_p3)
}
  0x6d   : > { %s4680_s29 = scalar_lea.vmem %s5259_s14, 16  ;;  %s5027_s23 = smov [#allocation10]  }
  0x6e   : > { %p4681_p7 = scmp.ne.s32.totalorder %s5259_s14, %s4680_s29  ;;  %s4685_s25 = sshll.u32 %s5027_s23, 4  ;;  %s4686_s25 = int_to_ptr.vmem [resolvable:$false] %s4685_s25 }
  0x6f   : > { %s4687_s13 = scalar_lea.vmem %s4686_s25, 32  ;;  %p4688_p8 = scmp.lt.s32.totalorder %s5259_s14, %s4686_s25 }
  0x70   : > { %p4683_p9 = pnand %p4681_p7, %p5189_p12  ;;  %p4689_p4 = scmp.lt.s32.totalorder %s4687_s13, %s4680_s29 }
  0x72   : > { %p4684_p5 = pneg %p4683_p9  ;;  %p4690_p11 = por %p4689_p4, %p4688_p8 }
  0x74   : > { %p4691_p13 = pnand %p4690_p11, %p4684_p5 }
  0x76   : > { %4694 = shalt.err (!%p4691_p13)
}
  0x77   : > { %4343 = dma.hbm_to_vmem [thread:$0]  (!%p6308_p6), %s5256_s27, 16, %s5259_s14, %s6282_s24  }
  0x78   : > { %s3957_s2 = sshll.u32 %s5023_s28, 5  ;;  %s556_s29 = scalar_lea.vmem [#allocation13], %s3836_s22 }
  0x79   : > { %s5290_s23 = scalar_lea.hbm %s6265_s8, %s3957_s2  ;;  %s564_s25 = sshll.u32 %s556_s29, 4  ;;  %s565_s25 = int_to_ptr.vmem [resolvable:$true] %s564_s25 }
  0x7a   : > { %s6284_s13 = scalar_lea.sflag [#allocation14], %s5171_s20  ;;  %s4695_s4 = scalar_lea.hbm %s5290_s23, 32 }
  0x7b   : > { %p4696_p10 = scmp.ne.s32.totalorder %s5290_s23, %s4695_s4  ;;  %s4700_s0 = scalar_lea.hbm %s6265_s8, 64 }
  0x7c   : > { %p4701_p0 = scmp.lt.u32.totalorder %s5290_s23, %s6265_s8  ;;  %p4702_p3 = scmp.lt.u32.totalorder %s4700_s0, %s4695_s4 }
  0x7d   : > { %p4698_p1 = pnand %p4696_p10, %p5189_p12  ;;  %p4704_p9 = scmp.lt.u32.totalorder %s4695_s4, %s5290_s23 }
  0x7e   : > { %p4703_p7 = por %p4702_p3, %p4701_p0 }
  0x7f   : > { %p4699_p2 = pneg %p4698_p1 }
  0x80   : > { %p4705_p5 = por %p4704_p9, %p4703_p7 }
  0x82   : > { %p4706_p8 = pnand %p4705_p5, %p4699_p2 }
  0x84   : > { %4709 = shalt.err (!%p4706_p8)
}
  0x85   : > { %s4710_s22 = scalar_lea.vmem %s565_s25, 32  ;;  %s5028_s29 = smov [#allocation13]  }
  0x86   : > { %p4711_p4 = scmp.ne.s32.totalorder %s565_s25, %s4710_s22  ;;  %s4715_s24 = sshll.u32 %s5028_s29, 4  ;;  %s4716_s24 = int_to_ptr.vmem [resolvable:$false] %s4715_s24 }
  0x87   : > { %s4717_s27 = scalar_lea.vmem %s4716_s24, 64  ;;  %p4718_p10 = scmp.lt.s32.totalorder %s565_s25, %s4716_s24 }
  0x88   : > { %p4713_p11 = pnand %p4711_p4, %p5189_p12  ;;  %p4719_p1 = scmp.lt.s32.totalorder %s4717_s27, %s4710_s22 }
  0x8a   : > { %p4714_p13 = pneg %p4713_p11  ;;  %p4720_p6 = por %p4719_p1, %p4718_p10 }
  0x8c   : > { %p4721_p0 = pnand %p4720_p6, %p4714_p13 }
  0x8e   : > { %4724 = shalt.err (!%p4721_p0)
}
  0x8f   : > { %p6311_p3 = scmp.ne.s32.totalorder %s6300_s19, 0  ;;  %s5318_s0 = scalar_lea.hbm %s6267_s10, %s5223_s21 }
  0x90   : > { %s595_s24 = scalar_lea.vmem [#allocation16], %s5164_s18  ;;  %s4295_s15 = smul.u32 192, %s5164_s18 }
  0x91   : > { %4349 = dma.hbm_to_vmem [thread:$0]  (!%p6311_p3), %s5290_s23, 32, %s565_s25, %s6284_s13  }
  0x92   : > { %s602_s2 = sshll.u32 %s595_s24, 4  ;;  %s6285_s22 = scalar_lea.sflag [#allocation17], %s5171_s20  ;;  %s5321_s2 = int_to_ptr.vmem [resolvable:$true] %s602_s2 }
  0x93   : > { %s4725_s29 = scalar_lea.hbm %s5318_s0, 16  ;;  %s4730_s27 = scalar_lea.hbm %s6267_s10, 32 }
  0x94   : > { %p4726_p6 = scmp.ne.s32.totalorder %s5318_s0, %s4725_s29  ;;  %p4731_p9 = scmp.lt.u32.totalorder %s5318_s0, %s6267_s10 }
  0x95   : > { %p4732_p5 = scmp.lt.u32.totalorder %s4730_s27, %s4725_s29  ;;  %p4734_p4 = scmp.lt.u32.totalorder %s4725_s29, %s5318_s0 }
  0x96   : > { %p4728_p2 = pnand %p4726_p6, %p5189_p12 }
  0x97   : > { %p4733_p8 = por %p4732_p5, %p4731_p9 }
  0x98   : > { %p4729_p7 = pneg %p4728_p2 }
  0x99   : > { %p4735_p11 = por %p4734_p4, %p4733_p8 }
  0x9b   : > { %p4736_p13 = pnand %p4735_p11, %p4729_p7 }
  0x9d   : > { %4739 = shalt.err (!%p4736_p13)
}
  0x9e   : > { %s4740_s24 = scalar_lea.vmem %s5321_s2, 16  ;;  %s5029_s23 = smov [#allocation16]  }
  0x9f   : > { %p4741_p10 = scmp.ne.s32.totalorder %s5321_s2, %s4740_s24  ;;  %s4745_s25 = sshll.u32 %s5029_s23, 4  ;;  %s4746_s25 = int_to_ptr.vmem [resolvable:$false] %s4745_s25 }
  0xa0   : > { %s4747_s4 = scalar_lea.vmem %s4746_s25, 32  ;;  %p4748_p6 = scmp.lt.s32.totalorder %s5321_s2, %s4746_s25 }
  0xa1   : > { %p4743_p1 = pnand %p4741_p10, %p5189_p12  ;;  %p4749_p2 = scmp.lt.s32.totalorder %s4747_s4, %s4740_s24 }
  0xa3   : > { %p4744_p0 = pneg %p4743_p1  ;;  %p4750_p9 = por %p4749_p2, %p4748_p6 }
  0xa5   : > { %p4751_p5 = pnand %p4750_p9, %p4744_p0 }
  0xa7   : > { %4754 = shalt.err (!%p4751_p5)
}
  0xa8   : > { %4355 = dma.hbm_to_vmem [thread:$0]  (!%p6311_p3), %s5318_s0, 16, %s5321_s2, %s6285_s22  }
  0xa9   : > { %s4296_s29 = smul.u32 3072, %s5023_s28  ;;  %s423_s27 = scalar_lea.vmem [#allocation2], %s4295_s15 }
  0xaa   : > { %s430_s14 = sshll.u32 %s423_s27, 4  ;;  %s3827_s4 = sshll.u32 %s5164_s18, 6  ;;  %s5356_s14 = int_to_ptr.vmem [resolvable:$true] %s430_s14 }
  0xab   : > { %s5354_s25 = scalar_lea.hbm %s6258_s1, %s4296_s29  ;;  %s420_s13 = scalar_lea.sflag [#allocation3], %s5164_s18 }
  0xac   : > { %s4755_s6 = scalar_lea.hbm %s5354_s25, 3072  ;;  %s4760_s15 = scalar_lea.hbm %s6258_s1, 6144 }
  0xad   : > { %p4756_p7 = scmp.ne.s32.totalorder %s5354_s25, %s4755_s6  ;;  %p4761_p11 = scmp.lt.u32.totalorder %s5354_s25, %s6258_s1 }
  0xae   : > { %p4762_p13 = scmp.lt.u32.totalorder %s4760_s15, %s4755_s6  ;;  %p4764_p1 = scmp.lt.u32.totalorder %s4755_s6, %s5354_s25 }
  0xaf   : > { %p4758_p8 = pnand %p4756_p7, %p5189_p12 }
  0xb0   : > { %p4763_p10 = por %p4762_p13, %p4761_p11 }
  0xb1   : > { %p4759_p4 = pneg %p4758_p8 }
  0xb2   : > { %p4765_p0 = por %p4764_p1, %p4763_p10 }
  0xb4   : > { %p4766_p6 = pnand %p4765_p0, %p4759_p4 }
  0xb6   : > { %4769 = shalt.err (!%p4766_p6)
}
  0xb7   : > { %s4770_s24 = scalar_lea.vmem %s5356_s14, 3072  ;;  %s5030_s23 = smov [#allocation2]  }
  0xb8   : > { %p4771_p2 = scmp.ne.s32.totalorder %s5356_s14, %s4770_s24  ;;  %s4775_s0 = sshll.u32 %s5030_s23, 4  ;;  %s4776_s0 = int_to_ptr.vmem [resolvable:$false] %s4775_s0 }
  0xb9   : > { %s4777_s2 = scalar_lea.vmem %s4776_s0, 6144  ;;  %p4778_p7 = scmp.lt.s32.totalorder %s5356_s14, %s4776_s0 }
  0xba   : > { %p4773_p9 = pnand %p4771_p2, %p5189_p12  ;;  %p4779_p8 = scmp.lt.s32.totalorder %s4777_s2, %s4770_s24 }
  0xbc   : > { %p4774_p5 = pneg %p4773_p9  ;;  %p4780_p11 = por %p4779_p8, %p4778_p7 }
  0xbe   : > { %p4781_p13 = pnand %p4780_p11, %p4774_p5 }
  0xc0   : > { %4784 = shalt.err (!%p4781_p13)
}
  0xc1   : > { %s5031_s6 = smov 192   ;;  %s5032_s15 = smov 12  }
  0xc2   : > { %4328 = dma.hbm_to_vmem [thread:$0]  (!%p6311_p3), %s5354_s25, 3072, %s5356_s14, %s420_s13, %s5031_s6, %s5031_s6, %s5032_s15  }
  0xc3   : > { %s3955_s27 = sshll.u32 %s5023_s28, 10  ;;  %s463_s0 = scalar_lea.vmem [#allocation6], %s3827_s4 }
  0xc4   : > { %s5387_s24 = scalar_lea.hbm %s6260_s3, %s3955_s27  ;;  %s470_s2 = sshll.u32 %s463_s0, 4  ;;  %s5391_s2 = int_to_ptr.vmem [resolvable:$true] %s470_s2 }
  0xc5   : > { %s4785_s22 = scalar_lea.hbm %s5387_s24, 1024  ;;  %s4790_s25 = scalar_lea.hbm %s6260_s3, 2048 }
  0xc6   : > { %p4786_p4 = scmp.ne.s32.totalorder %s5387_s24, %s4785_s22  ;;  %p4791_p0 = scmp.lt.u32.totalorder %s5387_s24, %s6260_s3 }
  0xc7   : > { %p4792_p6 = scmp.lt.u32.totalorder %s4790_s25, %s4785_s22  ;;  %p4794_p9 = scmp.lt.u32.totalorder %s4785_s22, %s5387_s24 }
  0xc8   : > { %p4788_p10 = pnand %p4786_p4, %p5189_p12 }
  0xc9   : > { %p4793_p2 = por %p4792_p6, %p4791_p0 }
  0xca   : > { %p4789_p1 = pneg %p4788_p10 }
  0xcb   : > { %p4795_p5 = por %p4794_p9, %p4793_p2 }
  0xcd   : > { %p4796_p7 = pnand %p4795_p5, %p4789_p1 }
  0xcf   : > { %4799 = shalt.err (!%p4796_p7)
}
  0xd0   : > { %s4800_s4 = scalar_lea.vmem %s5391_s2, 1024  ;;  %s5033_s27 = smov [#allocation6]  }
  0xd1   : > { %p4801_p8 = scmp.ne.s32.totalorder %s5391_s2, %s4800_s4  ;;  %s4805_s29 = sshll.u32 %s5033_s27, 4  ;;  %s4806_s29 = int_to_ptr.vmem [resolvable:$false] %s4805_s29 }
  0xd2   : > { %s4807_s23 = scalar_lea.vmem %s4806_s29, 2048  ;;  %p4808_p4 = scmp.lt.s32.totalorder %s5391_s2, %s4806_s29 }
  0xd3   : > { %p4803_p11 = pnand %p4801_p8, %p5189_p12  ;;  %p4809_p10 = scmp.lt.s32.totalorder %s4807_s23, %s4800_s4 }
  0xd5   : > { %p4804_p13 = pneg %p4803_p11  ;;  %p4810_p0 = por %p4809_p10, %p4808_p4 }
  0xd7   : > { %p4811_p6 = pnand %p4810_p0, %p4804_p13 }
  0xd9   : > { %4814 = shalt.err (!%p4811_p6)
}
  0xda   : > { %s6286_s22 = smov 64   ;;  %s6288_s0 = smov 4  }
  0xdb   : > { %s6312_s13 = scalar_lea.sflag [#allocation5], %s5171_s20  ;;  %s5423_s6 = scalar_lea.hbm %s6262_s5, %s5223_s21 }
  0xdc   : > { %4334 = dma.hbm_to_vmem [thread:$0]  (!%p6311_p3), %s5387_s24, 1024, %s5391_s2, %s6312_s13, %s6286_s22, %s6286_s22, %s6288_s0  }
  0xdd   : > { %s500_s15 = scalar_lea.vmem [#allocation9], %s5164_s18  ;;  %s3833_s27 = sshll.u32 %s5164_s18, 7 }
  0xde   : > { %s507_s4 = sshll.u32 %s500_s15, 4  ;;  %s4815_s29 = scalar_lea.hbm %s5423_s6, 16  ;;  %s508_s4 = int_to_ptr.vmem [resolvable:$true] %s507_s4 }
  0xdf   : > { %p4816_p1 = scmp.ne.s32.totalorder %s5423_s6, %s4815_s29  ;;  %s4820_s2 = scalar_lea.hbm %s6262_s5, 32 }
  0xe0   : > { %p4821_p5 = scmp.lt.u32.totalorder %s5423_s6, %s6262_s5  ;;  %p4822_p7 = scmp.lt.u32.totalorder %s4820_s2, %s4815_s29 }
  0xe1   : > { %p4818_p2 = pnand %p4816_p1, %p5189_p12  ;;  %p4824_p11 = scmp.lt.u32.totalorder %s4815_s29, %s5423_s6 }
  0xe2   : > { %p4823_p8 = por %p4822_p7, %p4821_p5 }
  0xe3   : > { %p4819_p9 = pneg %p4818_p2 }
  0xe4   : > { %p4825_p13 = por %p4824_p11, %p4823_p8 }
  0xe6   : > { %p4826_p4 = pnand %p4825_p13, %p4819_p9 }
  0xe8   : > { %4829 = shalt.err (!%p4826_p4)
}
  0xe9   : > { %s4830_s25 = scalar_lea.vmem %s508_s4, 16  ;;  %s5036_s15 = smov [#allocation9]  }
  0xea   : > { %p4831_p10 = scmp.ne.s32.totalorder %s508_s4, %s4830_s25  ;;  %s4835_s22 = sshll.u32 %s5036_s15, 4  ;;  %s4836_s22 = int_to_ptr.vmem [resolvable:$false] %s4835_s22 }
  0xeb   : > { %s4837_s23 = scalar_lea.vmem %s4836_s22, 32  ;;  %p4838_p1 = scmp.lt.s32.totalorder %s508_s4, %s4836_s22 }
  0xec   : > { %p4833_p0 = pnand %p4831_p10, %p5189_p12  ;;  %p4839_p2 = scmp.lt.s32.totalorder %s4837_s23, %s4830_s25 }
  0xee   : > { %p4834_p6 = pneg %p4833_p0  ;;  %p4840_p3 = por %p4839_p2, %p4838_p1 }
  0xf0   : > { %p4841_p5 = pnand %p4840_p3, %p4834_p6 }
  0xf2   : > { %4844 = shalt.err (!%p4841_p5)
}
  0xf3   : > { %p6313_p7 = scmp.ne.s32.totalorder %s6300_s19, 0  ;;  %s6314_s29 = scalar_lea.sflag [#allocation8], %s5171_s20 }
  0xf4   : > { %s3956_s24 = sshll.u32 %s5023_s28, 11  ;;  %s535_s14 = scalar_lea.vmem [#allocation12], %s3833_s27 }
  0xf5   : > { %4340 = dma.hbm_to_vmem [thread:$0]  (!%p6313_p7), %s5423_s6, 16, %s508_s4, %s6314_s29  }
  0xf6   : > { %s5452_s22 = scalar_lea.hbm %s6264_s7, %s3956_s24  ;;  %s542_s25 = sshll.u32 %s535_s14, 4  ;;  %s5456_s25 = int_to_ptr.vmem [resolvable:$true] %s542_s25 }
  0xf7   : > { %s4845_s15 = scalar_lea.hbm %s5452_s22, 2048  ;;  %s4850_s23 = scalar_lea.hbm %s6264_s7, 4096 }
  0xf8   : > { %p4846_p3 = scmp.ne.s32.totalorder %s5452_s22, %s4845_s15  ;;  %p4851_p11 = scmp.lt.u32.totalorder %s5452_s22, %s6264_s7 }
  0xf9   : > { %p4852_p13 = scmp.lt.u32.totalorder %s4850_s23, %s4845_s15  ;;  %p4854_p10 = scmp.lt.u32.totalorder %s4845_s15, %s5452_s22 }
  0xfa   : > { %p4848_p9 = pnand %p4846_p3, %p5189_p12 }
  0xfb   : > { %p4853_p4 = por %p4852_p13, %p4851_p11 }
  0xfc   : > { %p4849_p8 = pneg %p4848_p9 }
  0xfd   : > { %p4855_p0 = por %p4854_p10, %p4853_p4 }
  0xff   : > { %p4856_p6 = pnand %p4855_p0, %p4849_p8 }
 0x101   : > { %4859 = shalt.err (!%p4856_p6)
}
 0x102   : > { %s4860_s13 = scalar_lea.vmem %s5456_s25, 2048  ;;  %s5037_s14 = smov [#allocation12]  }
 0x103   : > { %p4861_p1 = scmp.ne.s32.totalorder %s5456_s25, %s4860_s13  ;;  %s4865_s6 = sshll.u32 %s5037_s14, 4  ;;  %s4866_s6 = int_to_ptr.vmem [resolvable:$false] %s4865_s6 }
 0x104   : > { %s4867_s4 = scalar_lea.vmem %s4866_s6, 4096  ;;  %p4868_p3 = scmp.lt.s32.totalorder %s5456_s25, %s4866_s6 }
 0x105   : > { %p4863_p2 = pnand %p4861_p1, %p5189_p12  ;;  %p4869_p9 = scmp.lt.s32.totalorder %s4867_s4, %s4860_s13 }
 0x107   : > { %p4864_p5 = pneg %p4863_p2  ;;  %p4870_p11 = por %p4869_p9, %p4868_p3 }
 0x109   : > { %p4871_p13 = pnand %p4870_p11, %p4864_p5 }
 0x10b   : > { %4874 = shalt.err (!%p4871_p13)
}
 0x10c   : > { %s5038_s15 = smov 128   ;;  %s5039_s23 = smov 8  }
 0x10d   : > { %s6315_s29 = scalar_lea.sflag [#allocation11], %s5171_s20  ;;  %s5486_s13 = scalar_lea.hbm %s6266_s9, %s3956_s24 }
 0x10e   : > { %4346 = dma.hbm_to_vmem [thread:$0]  (!%p6313_p7), %s5452_s22, 2048, %s5456_s25, %s6315_s29, %s5038_s15, %s5038_s15, %s5039_s23  }
 0x10f   : > { %s575_s6 = scalar_lea.vmem [#allocation15], %s3833_s27  ;;  %s4875_s0 = scalar_lea.hbm %s5486_s13, 2048 }
 0x110   : > { %s582_s4 = sshll.u32 %s575_s6, 4  ;;  %p4876_p8 = scmp.ne.s32.totalorder %s5486_s13, %s4875_s0  ;;  %s5490_s4 = int_to_ptr.vmem [resolvable:$true] %s582_s4 }
 0x111   : > { %s4880_s25 = scalar_lea.hbm %s6266_s9, 4096  ;;  %p4881_p0 = scmp.lt.u32.totalorder %s5486_s13, %s6266_s9 }
 0x112   : > { %p4878_p4 = pnand %p4876_p8, %p5189_p12  ;;  %p4882_p6 = scmp.lt.u32.totalorder %s4880_s25, %s4875_s0 }
 0x113   : > { %p4884_p2 = scmp.lt.u32.totalorder %s4875_s0, %s5486_s13 }
 0x114   : > { %p4879_p10 = pneg %p4878_p4  ;;  %p4883_p1 = por %p4882_p6, %p4881_p0 }
 0x116   : > { %p4885_p5 = por %p4884_p2, %p4883_p1 }
 0x118   : > { %p4886_p3 = pnand %p4885_p5, %p4879_p10 }
 0x11a   : > { %4889 = shalt.err (!%p4886_p3)
}
 0x11b   : > { %s4890_s27 = scalar_lea.vmem %s5490_s4, 2048  ;;  %s5040_s23 = smov [#allocation15]  }
 0x11c   : > { %p4891_p9 = scmp.ne.s32.totalorder %s5490_s4, %s4890_s27  ;;  %s4895_s29 = sshll.u32 %s5040_s23, 4  ;;  %s4896_s29 = int_to_ptr.vmem [resolvable:$false] %s4895_s29 }
 0x11d   : > { %s4897_s2 = scalar_lea.vmem %s4896_s29, 4096  ;;  %p4898_p8 = scmp.lt.s32.totalorder %s5490_s4, %s4896_s29 }
 0x11e   : > { %p4893_p11 = pnand %p4891_p9, %p5189_p12  ;;  %p4899_p4 = scmp.lt.s32.totalorder %s4897_s2, %s4890_s27 }
 0x120   : > { %p4894_p13 = pneg %p4893_p11  ;;  %p4900_p0 = por %p4899_p4, %p4898_p8 }
 0x122   : > { %p4901_p6 = pnand %p4900_p0, %p4894_p13 }
 0x124   : > { %4904 = shalt.err (!%p4901_p6)
}
 0x125   : > { %s6316_s0 = smov 4   ;;  %s6317_s14 = smov 64  }
 0x126   : > { %s6318_s6 = scalar_lea.sflag [#allocation14], %s5171_s20  ;;  %s5522_s25 = scalar_lea.hbm %s6268_s11, %s5223_s21 }
 0x127   : > { %4352 = dma.hbm_to_vmem [thread:$0]  (!%p6313_p7), %s5486_s13, 2048, %s5490_s4, %s6318_s6, %s6317_s14, %s6317_s14, %s6316_s0  }
 0x128   : > { %s612_s24 = scalar_lea.vmem [#allocation18], %s5164_s18  ;;  %s4905_s27 = scalar_lea.hbm %s5522_s25, 16 }
 0x129   : > { %s619_s15 = sshll.u32 %s612_s24, 4  ;;  %p4906_p10 = scmp.ne.s32.totalorder %s5522_s25, %s4905_s27  ;;  %s620_s15 = int_to_ptr.vmem [resolvable:$true] %s619_s15 }
 0x12a   : > { %s4910_s13 = scalar_lea.hbm %s6268_s11, 32  ;;  %p4911_p5 = scmp.lt.u32.totalorder %s5522_s25, %s6268_s11 }
 0x12b   : > { %p4908_p1 = pnand %p4906_p10, %p5189_p12  ;;  %p4912_p3 = scmp.lt.u32.totalorder %s4910_s13, %s4905_s27 }
 0x12c   : > { %p4914_p11 = scmp.lt.u32.totalorder %s4905_s27, %s5522_s25 }
 0x12d   : > { %p4909_p2 = pneg %p4908_p1  ;;  %p4913_p9 = por %p4912_p3, %p4911_p5 }
 0x12f   : > { %p4915_p13 = por %p4914_p11, %p4913_p9 }
 0x131   : > { %p4916_p8 = pnand %p4915_p13, %p4909_p2 }
 0x133   : > { %4919 = shalt.err (!%p4916_p8)
}
 0x134   : > { %s4920_s0 = scalar_lea.vmem %s620_s15, 16  ;;  %s5041_s14 = smov [#allocation18]  }
 0x135   : > { %p4921_p4 = scmp.ne.s32.totalorder %s620_s15, %s4920_s0  ;;  %s4925_s6 = sshll.u32 %s5041_s14, 4  ;;  %s4926_s6 = int_to_ptr.vmem [resolvable:$false] %s4925_s6 }
 0x136   : > { %s4927_s28 = scalar_lea.vmem %s4926_s6, 32  ;;  %p4928_p10 = scmp.lt.s32.totalorder %s620_s15, %s4926_s6 }
 0x137   : > { %p4923_p0 = pnand %p4921_p4, %p5189_p12  ;;  %p4929_p1 = scmp.lt.s32.totalorder %s4927_s28, %s4920_s0 }
 0x139   : > { %p4924_p6 = pneg %p4923_p0  ;;  %p4930_p7 = por %p4929_p1, %p4928_p10 }
 0x13b   : > { %p4931_p3 = pnand %p4930_p7, %p4924_p6 }
 0x13d   : > { %4934 = shalt.err (!%p4931_p3)
}
 0x13e   : > { %p6319_p5 = scmp.ne.s32.totalorder %s6300_s19, 0  ;;  %s6320_s22 = scalar_lea.sflag [#allocation17], %s5171_s20 }
 0x13f   : > { %s5548_s23 = scalar_lea.hbm %s6269_s12, %s5223_s21  ;;  %s629_s29 = scalar_lea.vmem [#allocation19], %s5164_s18 }
 0x140   : > { %4358 = dma.hbm_to_vmem [thread:$0]  (!%p6319_p5), %s5522_s25, 16, %s620_s15, %s6320_s22  }
 0x141   : > { %s636_s13 = sshll.u32 %s629_s29, 4  ;;  %s627_s4 = scalar_lea.sflag [#allocation20], %s5164_s18  ;;  %s637_s13 = int_to_ptr.vmem [resolvable:$true] %s636_s13 }
 0x142   : > { %s4935_s20 = scalar_lea.hbm %s5548_s23, 16  ;;  %s4940_s15 = scalar_lea.hbm %s6269_s12, 32 }
 0x143   : > { %p4936_p7 = scmp.ne.s32.totalorder %s5548_s23, %s4935_s20  ;;  %p4941_p11 = scmp.lt.u32.totalorder %s5548_s23, %s6269_s12 }
 0x144   : > { %p4942_p13 = scmp.lt.u32.totalorder %s4940_s15, %s4935_s20  ;;  %p4944_p4 = scmp.lt.u32.totalorder %s4935_s20, %s5548_s23 }
 0x145   : > { %p4938_p2 = pnand %p4936_p7, %p5189_p12 }
 0x146   : > { %p4943_p8 = por %p4942_p13, %p4941_p11 }
 0x147   : > { %p4939_p9 = pneg %p4938_p2 }
 0x148   : > { %p4945_p0 = por %p4944_p4, %p4943_p8 }
 0x14a   : > { %p4946_p6 = pnand %p4945_p0, %p4939_p9 }
 0x14c   : > { %4949 = shalt.err (!%p4946_p6)
}
 0x14d   : > { %s4950_s18 = scalar_lea.vmem %s637_s13, 16  ;;  %s5042_s14 = smov [#allocation19]  }
 0x14e   : > { %p4951_p10 = scmp.ne.s32.totalorder %s637_s13, %s4950_s18  ;;  %s4955_s6 = sshll.u32 %s5042_s14, 4  ;;  %s4956_s6 = int_to_ptr.vmem [resolvable:$false] %s4955_s6 }
 0x14f   : > { %s4957_s28 = scalar_lea.vmem %s4956_s6, 32  ;;  %p4958_p7 = scmp.lt.s32.totalorder %s637_s13, %s4956_s6 }
 0x150   : > { %p4953_p1 = pnand %p4951_p10, %p5189_p12  ;;  %p4959_p2 = scmp.lt.s32.totalorder %s4957_s28, %s4950_s18 }
 0x152   : > { %p4954_p3 = pneg %p4953_p1  ;;  %p4960_p5 = por %p4959_p2, %p4958_p7 }
 0x154   : > { %p4961_p11 = pnand %p4960_p5, %p4954_p3 }
 0x156   : > { %4964 = shalt.err (!%p4961_p11)
}
 0x157   : > { %p6321_p13 = scmp.ne.s32.totalorder %s6300_s19, 0  ;;  %p6322_p9 = scmp.ne.s32.totalorder %s6306_s16, 0 }
 0x158   : > { %s5572_s30 = sand.u32 (!%p6322_p9), 1, %s5015_s26   ;;  %p6323_p12 = scmp.ne.s32.totalorder (!%p6322_p9), %s6299_s17, 0 }
 0x159   : > { %4361 = dma.hbm_to_vmem [thread:$0]  (!%p6321_p13), %s5548_s23, 16, %s637_s13, %s627_s4  }
 0x15a   : > { %645 = sbr.rel (%p6322_p9) target bundleno = 3018 (0xbca), region = 72  ;;  %s648_s24 = scalar_lea.sflag (!%p6322_p9), [#allocation3], %s5572_s30 }
 0x15b   : > { %s4299_s22 = smul.u32 (!%p6322_p9), 192, %s5572_s30 }
 0x15d   : > { %s5576_s27 = scalar_lea.vmem (!%p6322_p9), [#allocation2], %s4299_s22 }
 0x161   : > { %4982 = dma.done.wait (%p6323_p12), %s648_s24, 3072  }
 0x162   : > { %4984 = vsyncadd (%p6323_p12), %s648_s24, 4294964224  ;;  %s6324_s19 = sld [smem:[#allocation29_spill]]  ;;  %s4300_s23 = smul.u32 3, %s5572_s30 }
 0x164   : > { %s5584_s13 = scalar_lea.vmem [#allocation4], %s4300_s23 }
 0x168   : > { %s656_s16 = sand.u32 1, %s6324_s19  }
 0x169   : > { %s657_s29 = scalar_lea.sflag [#allocation5], %s656_s16 }
 0x16a   : > { %4986 = dma.done.wait (%p6323_p12), %s657_s29, 1072  }
 0x16b   : > { %4988 = vsyncadd (%p6323_p12), %s657_s29, 4294966224  ;;  %s3846_s4 = sshll.u32 %s5572_s30, 6  ;;  %s675_s2 = scalar_lea.sflag [#allocation8], %s656_s16 }
 0x16c   : > { %s5591_s20 = scalar_lea.vmem [#allocation6], %s3846_s4  ;;  %s677_s25 = scalar_lea.vmem [#allocation7], %s5572_s30 }
 0x16d   : > { %4990 = dma.done.wait (%p6323_p12), %s675_s2, 32  }
 0x16e   : > { %4992 = vsyncadd (%p6323_p12), %s675_s2, 4294967264  ;;  %s691_s0 = scalar_lea.sflag [#allocation11], %s656_s16 }
 0x16f   : > { %4994 = dma.done.wait (%p6323_p12), %s691_s0, 2064  }
 0x170   : > { %4996 = vsyncadd (%p6323_p12), %s691_s0, 4294965232  ;;  %s3847_s18 = sshll.u32 %s5572_s30, 7  ;;  %s3848_s14 = sshll.u32 %s5572_s30, 1 }
 0x171   : > { %s5606_s6 = scalar_lea.vmem [#allocation12], %s3847_s18  ;;  %s708_s28 = scalar_lea.sflag [#allocation14], %s656_s16 }
 0x172   : > { %s5608_s22 = scalar_lea.vmem [#allocation13], %s3848_s14 }
 0x173   : > { %4998 = dma.done.wait (%p6323_p12), %s708_s28, 2080  }
 0x174   : > { %5000 = vsyncadd (%p6323_p12), %s708_s28, 4294965216  ;;  %s5614_s24 = scalar_lea.vmem [#allocation15], %s3847_s18  ;;  %s726_s23 = scalar_lea.sflag [#allocation17], %s656_s16 }
 0x175   : > { %5002 = dma.done.wait (%p6323_p12), %s726_s23, 32  }
 0x176   : > { %5004 = vsyncadd (%p6323_p12), %s726_s23, 4294967264  ;;  %s742_s2 = scalar_lea.sflag [#allocation20], %s5572_s30 }
 0x177   : > { %5006 = dma.done.wait (%p6323_p12), %s742_s2, 16  }
 0x178   : > { %5008 = vsyncadd (%p6323_p12), %s742_s2, 4294967280  ;;  %p3850_p5 = scmp.ne.s32.totalorder %s6324_s19, 0 }
 0x179   : > { %s6325_s14 = sld [smem:[#allocation32_spill]] (!%p3850_p5)  ;;  %s6326_s21 = sld [smem:[#allocation36_spill]] (!%p3850_p5) }
 0x17a   : > { %835 = sbr.rel (%p3850_p5) target bundleno = 385 (0x181), region = 124 }
 0x17f   : > { %v836_v0 = vld [vmem:[%s6325_s14] sm:$0xff] (!%p3850_p5)  ;;  %v837_v1 = vld [vmem:[%s6325_s14 + $0x8] sm:$0xff] (!%p3850_p5) }
 0x180   : > { %838 = vst [vmem:[%s6326_s21] sm:$0xff] (!%p3850_p5), %v836_v0  ;;  %839 = vst [vmem:[%s6326_s21 + $0x8] sm:$0xff] (!%p3850_p5), %v837_v1 }
 0x181 PF: > { %v4451_v2 = vld [vmem:[%s5576_s27 + $0x4] ss:$12 sps:$4 sm:$0xff]   ;;  %v4453_v3 = vld [vmem:[%s5576_s27] ss:$12 sps:$4 sm:$0xff]   ;;  %v5043_v4 = vmov 0   ;;  %v5044_v5 = vmov 0.0   ;;  %v894_v31 = vlaneseq }
 0x182   : > { %1069 = vmatprep.mubr.bf16.mxu0 %v5043_v4  ;;  %4063 = vmatprep.subr.bf16.mxu1 %v5044_v5  ;;  %v4454_v6 = vld [vmem:[%s5576_s27 + $0x1c] ss:$12 sps:$4 sm:$0xff]   ;;  %vm5045_vm0 = vmmov 0   ;;  %v4456_v7 = vld [vmem:[%s5576_s27 + $0x18] ss:$12 sps:$4 sm:$0xff]   ;;  %s6327_s15 = sld [smem:[#allocation36_spill]] }
 0x183   : > { %1037 = vmatprep.subr.bf16.mxu0 %v4451_v2  ;;  %4079 = vmatprep.mubr.msk.bf16.mxu1 %vm5045_vm0, %v5044_v5  ;;  %v4457_v8 = vld [vmem:[%s5576_s27 + $0x34] ss:$12 sps:$4 sm:$0xff]   ;;  %v4459_v9 = vld [vmem:[%s5576_s27 + $0x30] ss:$12 sps:$4 sm:$0xff]   ;;  %v4460_v10 = vld [vmem:[%s5576_s27 + $0x4c] ss:$12 sps:$4 sm:$0xff]  }
 0x184   : > { %1038 = vmatpush1.bf16.msra.mxu0 %v4453_v3  ;;  %v4462_v11 = vld [vmem:[%s5576_s27 + $0x48] ss:$12 sps:$4 sm:$0xff]   ;;  %v4463_v12 = vld [vmem:[%s5576_s27 + $0x64] ss:$12 sps:$4 sm:$0xff]   ;;  %v4476_v14 = vld [vmem:[%s5576_s27 + $0x20] ss:$12 sps:$4 sm:$0xff]  }
 0x185   : > { %1039 = vmatprep.subr.bf16.mxu0 %v4454_v6  ;;  %v4475_v13 = vld [vmem:[%s5576_s27 + $0x8] ss:$12 sps:$4 sm:$0xff]   ;;  %v4465_v15 = vld [vmem:[%s5576_s27 + $0x60] ss:$12 sps:$4 sm:$0xff]   ;;  %v4477_v17 = vld [vmem:[%s5576_s27 + $0x38] ss:$12 sps:$4 sm:$0xff]  }
 0x186   : > { %4064 = vmatpush3.bf16.msra.mxu1 %v4475_v13  ;;  %v4466_v16 = vld [vmem:[%s5576_s27 + $0x7c] ss:$12 sps:$4 sm:$0xff]   ;;  %v4468_v18 = vld [vmem:[%s5576_s27 + $0x78] ss:$12 sps:$4 sm:$0xff]   ;;  %v4469_v19 = vld [vmem:[%s5576_s27 + $0x94] ss:$12 sps:$4 sm:$0xff]  }
 0x187   : > { %4065 = vmatprep.subr.bf16.mxu1 %v5044_v5  ;;  %v4478_v20 = vld [vmem:[%s5576_s27 + $0x50] ss:$12 sps:$4 sm:$0xff]   ;;  %v4472_v22 = vld [vmem:[%s5576_s27 + $0xac] ss:$12 sps:$4 sm:$0xff]   ;;  %v4479_v23 = vld [vmem:[%s5576_s27 + $0x68] ss:$12 sps:$4 sm:$0xff]  }
 0x188   : > { %1040 = vmatpush1.bf16.msra.mxu0 %v4456_v7  ;;  %v4471_v21 = vld [vmem:[%s5576_s27 + $0x90] ss:$12 sps:$4 sm:$0xff]   ;;  %v4474_v24 = vld [vmem:[%s5576_s27 + $0xa8] ss:$12 sps:$4 sm:$0xff]   ;;  %v840_v25 = vld [vmem:[%s6327_s15] sm:$0xff]  ;;  %v5688_v32 = vshrl.u32 %v894_v31, 7 }
 0x189   : > { %1041 = vmatprep.subr.bf16.mxu0 %v4457_v8  ;;  %v841_v26 = vld [vmem:[%s6327_s15 + $0x8] sm:$0xff]  ;;  %v4481_v29 = vld [vmem:[%s5576_s27 + $0x98] ss:$12 sps:$4 sm:$0xff]   ;;  %v4482_v30 = vld [vmem:[%s5576_s27 + $0xb0] ss:$12 sps:$4 sm:$0xff]   ;;  %vm1303_vm1 = vcmask 130048  }
 0x18a   : > { %4066 = vmatpush3.bf16.msra.mxu1 %v4476_v14  ;;  %v4480_v27 = vld [vmem:[%s5576_s27 + $0x80] ss:$12 sps:$4 sm:$0xff]   ;;  %v842_v28 = vpack.c.bf16 %v841_v26, %v840_v25  ;;  %v896_v33 = vsub.s32 0, %v5688_v32  ;;  %v900_v34 = vsub.s32 1, %v5688_v32  ;;  %s5046_s27 = smov 96   ;;  %s5047_s4 = smov 112  }
 0x18b   : > { %4067 = vmatprep.subr.bf16.mxu1 %v5044_v5  ;;  %v875_v35 = vld [vmem:[%s5584_s13] sm:$0x7]  ;;  %s5048_s13 = smov 64   ;;  %s5049_s2 = smov 80   ;;  %v904_v51 = vsub.s32 2, %v5688_v32  ;;  %vm2236_vm2 = vcmask 1043456  }
 0x18c   : > { %1042 = vmatpush1.bf16.msra.mxu0 %v4459_v9  ;;  %v897_v36 = vrot.slane %v875_v35, %v896_v33  ;;  %v901_v37 = vrot.slane %v875_v35, %v900_v34  ;;  %s5050_s0 = smov 48   ;;  %s5051_s16 = smov 32   ;;  %vm2040_vm3 = vcmask 64512   ;;  %vm2999_vm4 = vcmask 261120  }
 0x18d   : > { %1043 = vmatprep.subr.bf16.mxu0 %v4460_v10  ;;  %s5052_s18 = smov 16   ;;  %v905_v54 = vrot.slane %v875_v35, %v904_v51  ;;  %vm3001_vm5 = vcmask 392192   ;;  %vm3003_vm6 = vcmask 523264   ;;  %vm3005_vm7 = vcmask 654336   ;;  %s6332_s19 = scalar_lea.vmem [#allocation19], %s5572_s30 }
 0x18e   : > { %4068 = vmatpush3.bf16.msra.mxu1 %v4477_v17  ;;  %vm3007_vm8 = vcmask 785408   ;;  %vm3009_vm9 = vcmask 916480  }
 0x18f   : > { %4069 = vmatprep.subr.bf16.mxu1 %v5044_v5 }
 0x190   : > { %1044 = vmatpush1.bf16.msra.mxu0 %v4462_v11 }
 0x191   : > { %1045 = vmatprep.subr.bf16.mxu0 %v4463_v12 }
 0x192   : > { %4070 = vmatpush3.bf16.msra.mxu1 %v4478_v20 }
 0x193   : > { %4071 = vmatprep.subr.bf16.mxu1 %v5044_v5 }
 0x194   : > { %1046 = vmatpush1.bf16.msra.mxu0 %v4465_v15 }
 0x195   : > { %1047 = vmatprep.subr.bf16.mxu0 %v4466_v16 }
 0x196   : > { %4072 = vmatpush3.bf16.msra.mxu1 %v4479_v23 }
 0x197   : > { %4073 = vmatprep.subr.bf16.mxu1 %v5044_v5 }
 0x198   : > { %1048 = vmatpush1.bf16.msra.mxu0 %v4468_v18 }
 0x199   : > { %1049 = vmatprep.subr.bf16.mxu0 %v4469_v19 }
 0x19a   : > { %4074 = vmatpush3.bf16.msra.mxu1 %v4480_v27 }
 0x19b   : > { %4075 = vmatprep.subr.bf16.mxu1 %v5044_v5 }
 0x19c   : > { %1050 = vmatpush1.bf16.msra.mxu0 %v4471_v21 }
 0x19d   : > { %1051 = vmatprep.subr.bf16.mxu0 %v4472_v22 }
 0x19e   : > { %4076 = vmatpush3.bf16.msra.mxu1 %v4481_v29 }
 0x19f   : > { %4077 = vmatprep.subr.bf16.mxu1 %v5044_v5 }
 0x1a0   : > { %1052 = vmatpush1.bf16.msra.mxu0 %v4474_v24 }
 0x1a1   : > { %4107 = vmatprep.subr.bf16.mxu0 %v5044_v5 }
 0x1a2   : > { %4078 = vmatpush3.bf16.msra.mxu1 %v4482_v30 }
 0x1a3   : > { %1070 = vmatmul.mubr.bf16.vlgmr.msra.gmra.mrb[0].mxu0 %v842_v28  ;;  %4083 = vmatprep.subr.bf16.mxu1 %v5044_v5 }
 0x1a4   : > { %4109 = vmatprep.mubr.msk.bf16.mxu0 %vm5045_vm0, %v5044_v5 }
 0x1a5   : > { %4080 = vmatmul.mubr.bf16.vlgmr.msra.gmra.mrb[0].mxu1 %v842_v28 }
 0x1a6   : > { %4085 = vmatprep.mubr.msk.bf16.mxu1 %vm5045_vm0, %v5044_v5 }
 0x276   : > { %v1071_v38 = vpop.f32.mrb[0].mxu0 }
 0x277   : > { %v1073_v39 = vpop.f32.mrb[1].mxu0  ;;  %v1072_v40 = vadd.f32 %v1071_v38, %v897_v36 }
 0x278   : > { %v1074_v41 = vadd.f32 %v1073_v39, %v901_v37  ;;  %v1075_v42 = vpop.f32.mrb[2].mxu0  ;;  %v1114_v52 = vpop.f32.mrb[0].mxu1 }
 0x279   : > { %v1077_v43 = vpop.f32.mrb[3].mxu0  ;;  %v1121_v45 = vmul.f32 0.25, %v1072_v40  ;;  %v1076_v48 = vadd.f32 %v1075_v42, %v897_v36  ;;  %v4081_v53 = vpop.f32.mrb[1].mxu1  ;;  %v5749_v55 = vadd.f32 %v1114_v52, %v905_v54 }
 0x27a   : > { %1187 = vrot.lane.b32.xlu1 %v1074_v41, %s5046_s27  ;;  %1184 = vrot.lane.b32.xlu0 %v1074_v41, %s5047_s4  ;;  %v1227_v44 = vpack.c.bf16 %v1074_v41, %v1074_v41  ;;  %v5716_v49 = vadd.f32 %v1077_v43, %v901_v37  ;;  %v1117_v56 = vpop.f32.mrb[2].mxu1 }
 0x27b   : > { %v1167_v47 = vpack.c.bf16 %v1121_v45, %v1121_v45  ;;  %v5722_v50 = vmul.f32 0.25, %v1076_v48  ;;  %v4082_v57 = vpop.f32.mrb[3].mxu1  ;;  %v5757_v58 = vadd.f32 %v1117_v56, %v905_v54 }
 0x27c   : > { %v1308_v46 = vsel %vm1303_vm1, %v1227_v44, 0  ;;  %v1235_v24 = vpack.c.bf16 %v5716_v49, %v5716_v49 }
 0x27d   : > { %4084 = vmatpush3.bf16.xpose.msra.mxu1 %v1308_v46  ;;  %v4411_v59 = vpack.i.bf16 %v5757_v58, %v5749_v55 }
 0x27e   : > { %1127 = vrot.lane.b32.xlu1 %v1121_v45, %s5046_s27  ;;  %1124 = vrot.lane.b32.xlu0 %v1121_v45, %s5047_s4  ;;  %v1676_v30 = vsel %vm1303_vm1, %v1235_v24, 0 }
 0x27f   : > { %4089 = vmatprep.subr.bf16.mxu1 %v5044_v5 }
 0x282   : > { %1193 = vrot.lane.b32.xlu1 %v1074_v41, %s5048_s13  ;;  %1190 = vrot.lane.b32.xlu0 %v1074_v41, %s5049_s2 }
 0x284   : > { %4086 = vmatmul.mubr.msk.bf16.vlgmr.msra.gmra.mrb[4].mxu1 %vm1303_vm1, %v1167_v47 }
 0x285   : > { %4091 = vmatprep.mubr.msk.bf16.mxu1 %vm5045_vm0, %v5044_v5 }
 0x286   : > { %1196 = vrot.lane.b32.xlu1 %v1074_v41, %s5050_s0  ;;  %1130 = vrot.lane.b32.xlu0 %v1121_v45, %s5049_s2 }
 0x28a   : > { %1199 = vrot.lane.b32.xlu1 %v1074_v41, %s5051_s16  ;;  %1133 = vrot.lane.b32.xlu0 %v1121_v45, %s5048_s13 }
 0x28e   : > { %1202 = vrot.lane.b32.xlu1 %v1074_v41, %s5052_s18  ;;  %1136 = vrot.lane.b32.xlu0 %v1121_v45, %s5050_s0  ;;  %v1175_v41 = vpack.c.bf16 %v5722_v50, %v5722_v50 }
 0x292   : > { %1142 = vrot.lane.b32.xlu1 %v1121_v45, %s5052_s18  ;;  %1139 = vrot.lane.b32.xlu0 %v1121_v45, %s5051_s16 }
 0x296   : > { %1209 = vrot.lane.b32.xlu1 %v5716_v49, %s5046_s27  ;;  %1206 = vrot.lane.b32.xlu0 %v5716_v49, %s5047_s4 }
 0x29a   : > { %1212 = vrot.lane.b32.xlu1 %v5716_v49, %s5049_s2  ;;  %1146 = vrot.lane.b32.xlu0 %v5722_v50, %s5047_s4 }
 0x29e   : > { %1215 = vrot.lane.b32.xlu1 %v5716_v49, %s5048_s13  ;;  %1149 = vrot.lane.b32.xlu0 %v5722_v50, %s5046_s27 }
 0x2a2   : > { %1218 = vrot.lane.b32.xlu1 %v5716_v49, %s5050_s0  ;;  %1152 = vrot.lane.b32.xlu0 %v5722_v50, %s5049_s2 }
 0x2a6   : > { %1221 = vrot.lane.b32.xlu1 %v5716_v49, %s5051_s16  ;;  %1155 = vrot.lane.b32.xlu0 %v5722_v50, %s5048_s13 }
 0x2aa   : > { %1224 = vrot.lane.b32.xlu1 %v5716_v49, %s5052_s18  ;;  %1158 = vrot.lane.b32.xlu0 %v5722_v50, %s5050_s0 }
 0x2ae   : > { %1164 = vrot.lane.b32.xlu1 %v5722_v50, %s5052_s18  ;;  %1161 = vrot.lane.b32.xlu0 %v5722_v50, %s5051_s16 }
 0x2b2   : > { %1247 = vrot.lane.b32.xlu0 %v5749_v55, %s5046_s27  ;;  %4412 = vrot.lane.b32.xlu1 %v4411_v59, %s5047_s4 }
 0x2b6   : > { %1256 = vrot.lane.b32.xlu0 %v5749_v55, %s5050_s0  ;;  %1250 = vrot.lane.b32.xlu1 %v5749_v55, %s5049_s2 }
 0x2ba   : > { %1262 = vrot.lane.b32.xlu0 %v5749_v55, %s5052_s18  ;;  %1253 = vrot.lane.b32.xlu1 %v5749_v55, %s5048_s13 }
 0x2be   : > { %1259 = vrot.lane.b32.xlu1 %v5749_v55, %s5051_s16 }
 0x2ec   : > { %v1188_v60 = vpop.permute.xlu1 %1187  ;;  %v1185_v61 = vpop.permute.xlu0 %1184 }
 0x2ed   : > { %v1228_v62 = vpack.c.bf16 %v1185_v61, %v1185_v61  ;;  %v1229_v2 = vpack.c.bf16 %v1188_v60, %v1188_v60 }
 0x2ef   : > { %v1354_v63 = vsel %vm1303_vm1, %v1228_v62, 0  ;;  %v1400_v9 = vsel %vm1303_vm1, %v1229_v2, 0  ;;  %v1287_v2 = vpack.c.bf16 %v5749_v55, %v5749_v55 }
 0x2f0   : > { %v1128_v0 = vpop.permute.xlu1 %1127  ;;  %v1125_v1 = vpop.permute.xlu0 %1124  ;;  %4090 = vmatpush3.bf16.xpose.msra.mxu1 %v1354_v63 }
 0x2f1   : > { %4095 = vmatprep.subr.bf16.mxu1 %v5044_v5  ;;  %v1168_v7 = vpack.c.bf16 %v1125_v1, %v1125_v1  ;;  %v1169_v16 = vpack.c.bf16 %v1128_v0, %v1128_v0 }
 0x2f4   : > { %v1194_v3 = vpop.permute.xlu1 %1193  ;;  %v1191_v6 = vpop.permute.xlu0 %1190 }
 0x2f5   : > { %v1231_v8 = vpack.c.bf16 %v1194_v3, %v1194_v3  ;;  %v1230_v13 = vpack.c.bf16 %v1191_v6, %v1191_v6 }
 0x2f7   : > { %v1492_v10 = vsel %vm1303_vm1, %v1231_v8, 0  ;;  %4092 = vmatmul.mubr.msk.bf16.vlgmr.msra.gmra.mrb[8].mxu1 %vm1303_vm1, %v1168_v7  ;;  %v1446_v19 = vsel %vm1303_vm1, %v1230_v13, 0  ;;  %v2238_v8 = vsel %vm2236_vm2, %v1287_v2, 0 }
 0x2f8   : > { %4108 = vmatpush3.bf16.xpose.msra.mxu0 %v1492_v10  ;;  %v1197_v11 = vpop.permute.xlu1 %1196  ;;  %v1131_v12 = vpop.permute.xlu0 %1130  ;;  %4096 = vmatpush3.bf16.xpose.msra.mxu1 %v1400_v9 }
 0x2f9   : > { %4097 = vmatprep.mubr.msk.bf16.mxu1 %vm5045_vm0, %v5044_v5  ;;  %4101 = vmatprep.subr.bf16.mxu1 %v5044_v5  ;;  %v1232_v23 = vpack.c.bf16 %v1197_v11, %v1197_v11  ;;  %v1170_v27 = vpack.c.bf16 %v1131_v12, %v1131_v12 }
 0x2fa   : > { %4119 = vmatprep.subr.bf16.mxu0 %v5044_v5 }
 0x2fb   : > { %v1538_v29 = vsel %vm1303_vm1, %v1232_v23, 0 }
 0x2fc   : > { %v1200_v14 = vpop.permute.xlu1 %1199  ;;  %v1134_v15 = vpop.permute.xlu0 %1133 }
 0x2fd   : > { %v1233_v17 = vpack.c.bf16 %v1200_v14, %v1200_v14  ;;  %v1171_v18 = vpack.c.bf16 %v1134_v15, %v1134_v15 }
 0x2ff   : > { %v1584_v20 = vsel %vm1303_vm1, %v1233_v17, 0  ;;  %4098 = vmatmul.mubr.msk.bf16.vlgmr.msra.gmra.mrb[12].mxu1 %vm1303_vm1, %v1169_v16  ;;  %4110 = vmatmul.mubr.msk.bf16.vlgmr.msra.gmra.mrb[4].mxu0 %vm1303_vm1, %v1171_v18 }
 0x300   : > { %v1203_v21 = vpop.permute.xlu1 %1202  ;;  %4120 = vmatpush3.bf16.xpose.msra.mxu0 %v1584_v20  ;;  %v1137_v22 = vpop.permute.xlu0 %1136  ;;  %4102 = vmatpush3.bf16.xpose.msra.mxu1 %v1446_v19 }
 0x301   : > { %4103 = vmatprep.mubr.msk.bf16.mxu1 %vm5045_vm0, %v5044_v5  ;;  %4121 = vmatprep.mubr.msk.bf16.mxu0 %vm5045_vm0, %v5044_v5  ;;  %v1234_v36 = vpack.c.bf16 %v1203_v21, %v1203_v21  ;;  %v1172_v40 = vpack.c.bf16 %v1137_v22, %v1137_v22 }
 0x302   : > { %4113 = vmatprep.subr.bf16.mxu1 %v5044_v5  ;;  %4131 = vmatprep.subr.bf16.mxu0 %v5044_v5 }
 0x303   : > { %v1630_v42 = vsel %vm1303_vm1, %v1234_v36, 0 }
 0x304   : > { %v1143_v25 = vpop.permute.xlu1 %1142  ;;  %v1140_v26 = vpop.permute.xlu0 %1139 }
 0x305   : > { %v1173_v28 = vpack.c.bf16 %v1140_v26, %v1140_v26  ;;  %v1174_v50 = vpack.c.bf16 %v1143_v25, %v1143_v25 }
 0x307   : > { %4104 = vmatmul.mubr.msk.bf16.vlgmr.msra.gmra.mrb[16].mxu1 %vm1303_vm1, %v1170_v27  ;;  %4122 = vmatmul.mubr.msk.bf16.vlgmr.msra.gmra.mrb[8].mxu0 %vm1303_vm1, %v1173_v28 }
 0x308   : > { %v1210_v31 = vpop.permute.xlu1 %1209  ;;  %4132 = vmatpush3.bf16.xpose.msra.mxu0 %v1676_v30  ;;  %v1207_v35 = vpop.permute.xlu0 %1206  ;;  %4114 = vmatpush3.bf16.xpose.msra.mxu1 %v1538_v29 }
 0x309   : > { %4115 = vmatprep.mubr.msk.bf16.mxu1 %vm5045_vm0, %v5044_v5  ;;  %4133 = vmatprep.mubr.msk.bf16.mxu0 %vm5045_vm0, %v5044_v5  ;;  %v1237_v37 = vpack.c.bf16 %v1210_v31, %v1210_v31  ;;  %v1236_v46 = vpack.c.bf16 %v1207_v35, %v1207_v35 }
 0x30a   : > { %4125 = vmatprep.subr.bf16.mxu1 %v5044_v5  ;;  %4143 = vmatprep.subr.bf16.mxu0 %v5044_v5 }
 0x30b   : > { %v1768_v43 = vsel %vm1303_vm1, %v1237_v37, 0  ;;  %v1722_v52 = vsel %vm1303_vm1, %v1236_v46, 0 }
 0x30c   : > { %v1213_v38 = vpop.permute.xlu1 %1212  ;;  %v1147_v39 = vpop.permute.xlu0 %1146 }
 0x30d   : > { %v1238_v57 = vpack.c.bf16 %v1213_v38, %v1213_v38  ;;  %v1176_v61 = vpack.c.bf16 %v1147_v39, %v1147_v39 }
 0x30f   : > { %4116 = vmatmul.mubr.msk.bf16.vlgmr.msra.gmra.mrb[20].mxu1 %vm1303_vm1, %v1172_v40  ;;  %4134 = vmatmul.mubr.msk.bf16.vlgmr.msra.gmra.mrb[12].mxu0 %vm1303_vm1, %v1175_v41  ;;  %v1814_v63 = vsel %vm1303_vm1, %v1238_v57, 0 }
 0x310   : > { %v1216_v44 = vpop.permute.xlu1 %1215  ;;  %4144 = vmatpush3.bf16.xpose.msra.mxu0 %v1768_v43  ;;  %v1150_v45 = vpop.permute.xlu0 %1149  ;;  %4126 = vmatpush3.bf16.xpose.msra.mxu1 %v1630_v42 }
 0x311   : > { %4127 = vmatprep.mubr.msk.bf16.mxu1 %vm5045_vm0, %v5044_v5  ;;  %4145 = vmatprep.mubr.msk.bf16.mxu0 %vm5045_vm0, %v5044_v5  ;;  %v1239_v47 = vpack.c.bf16 %v1216_v44, %v1216_v44  ;;  %v1177_v51 = vpack.c.bf16 %v1150_v45, %v1150_v45 }
 0x312   : > { %4137 = vmatprep.subr.bf16.mxu1 %v5044_v5  ;;  %4155 = vmatprep.subr.bf16.mxu0 %v5044_v5 }
 0x313   : > { %v1860_v53 = vsel %vm1303_vm1, %v1239_v47, 0 }
 0x314   : > { %v1219_v48 = vpop.permute.xlu1 %1218  ;;  %v1153_v49 = vpop.permute.xlu0 %1152 }
 0x315   : > { %v1240_v3 = vpack.c.bf16 %v1219_v48, %v1219_v48  ;;  %v1178_v6 = vpack.c.bf16 %v1153_v49, %v1153_v49 }
 0x317   : > { %4128 = vmatmul.mubr.msk.bf16.vlgmr.msra.gmra.mrb[24].mxu1 %vm1303_vm1, %v1174_v50  ;;  %4146 = vmatmul.mubr.msk.bf16.vlgmr.msra.gmra.mrb[16].mxu0 %vm1303_vm1, %v1177_v51  ;;  %v1906_v9 = vsel %vm1303_vm1, %v1240_v3, 0 }
 0x318   : > { %v1222_v54 = vpop.permute.xlu1 %1221  ;;  %4156 = vmatpush3.bf16.xpose.msra.mxu0 %v1860_v53  ;;  %v1156_v56 = vpop.permute.xlu0 %1155  ;;  %4138 = vmatpush3.bf16.xpose.msra.mxu1 %v1722_v52 }
 0x319   : > { %4139 = vmatprep.mubr.msk.bf16.mxu1 %vm5045_vm0, %v5044_v5  ;;  %4157 = vmatprep.mubr.msk.bf16.mxu0 %vm5045_vm0, %v5044_v5  ;;  %v1241_v59 = vpack.c.bf16 %v1222_v54, %v1222_v54  ;;  %v1179_v62 = vpack.c.bf16 %v1156_v56, %v1156_v56 }
 0x31a   : > { %4149 = vmatprep.subr.bf16.mxu1 %v5044_v5  ;;  %4167 = vmatprep.subr.bf16.mxu0 %v5044_v5 }
 0x31b   : > { %v1952_v0 = vsel %vm1303_vm1, %v1241_v59, 0 }
 0x31c   : > { %v1159_v60 = vpop.permute.xlu0 %1158  ;;  %v1225_v10 = vpop.permute.xlu1 %1224 }
 0x31d   : > { %v1242_v55 = vpack.c.bf16 %v1225_v10, %v1225_v10  ;;  %v1180_v11 = vpack.c.bf16 %v1159_v60, %v1159_v60 }
 0x31f   : > { %4140 = vmatmul.mubr.msk.bf16.vlgmr.msra.gmra.mrb[28].mxu1 %vm1303_vm1, %v1176_v61  ;;  %4158 = vmatmul.mubr.msk.bf16.vlgmr.msra.gmra.mrb[20].mxu0 %vm1303_vm1, %v1179_v62  ;;  %v1998_v12 = vsel %vm1303_vm1, %v1242_v55, 0 }
 0x320   : > { %4168 = vmatpush3.bf16.xpose.msra.mxu0 %v1952_v0  ;;  %4150 = vmatpush3.bf16.xpose.msra.mxu1 %v1814_v63  ;;  %v1162_v1 = vpop.permute.xlu0 %1161  ;;  %v1165_v13 = vpop.permute.xlu1 %1164 }
 0x321   : > { %4151 = vmatprep.mubr.msk.bf16.mxu1 %vm5045_vm0, %v5044_v5  ;;  %4169 = vmatprep.mubr.msk.bf16.mxu0 %vm5045_vm0, %v5044_v5  ;;  %v1181_v7 = vpack.c.bf16 %v1162_v1, %v1162_v1  ;;  %v1182_v14 = vpack.c.bf16 %v1165_v13, %v1165_v13 }
 0x322   : > { %4161 = vmatprep.subr.bf16.mxu1 %v5044_v5  ;;  %4179 = vmatprep.subr.bf16.mxu0 %v5044_v5 }
 0x324   : > { %v5855_v20 = vpop.permute.xlu1 %4412  ;;  %v5864_v29 = vpop.permute.xlu0 %1247 }
 0x325   : > { %v4414_v21 = vunpack.i.l.bf16 %v5855_v20 }
 0x327   : > { %4152 = vmatmul.mubr.msk.bf16.vlgmr.msra.gmra.mrb[32].mxu1 %vm1303_vm1, %v1178_v6  ;;  %4170 = vmatmul.mubr.msk.bf16.vlgmr.msra.gmra.mrb[24].mxu0 %vm1303_vm1, %v1181_v7  ;;  %v1288_v22 = vpack.c.bf16 %v4414_v21, %v4414_v21 }
 0x328   : > { %4162 = vmatpush3.bf16.xpose.msra.mxu1 %v1906_v9  ;;  %4163 = vmatprep.mubr.msk.bf16.mxu1 %vm5045_vm0, %v5044_v5  ;;  %v5874_v43 = vpop.permute.xlu0 %1256 }
 0x329   : > { %4173 = vmatprep.subr.bf16.mxu1 %v5044_v5  ;;  %4180 = vmatpush3.bf16.msra.mxu0 %v2238_v8  ;;  %v2284_v23 = vsel %vm2236_vm2, %v1288_v22, 0 }
 0x32a   : > { %4181 = vmatprep.mubr.msk.bf16.mxu0 %vm5045_vm0, %v5044_v5  ;;  %4191 = vmatprep.subr.bf16.mxu0 %v5044_v5 }
 0x32c   : > { %v5884_v54 = vpop.permute.xlu0 %1262 }
 0x32f   : > { %4164 = vmatmul.mubr.msk.bf16.vlgmr.msra.gmra.mrb[36].mxu1 %vm1303_vm1, %v1180_v11 }
 0x330   : > { %4174 = vmatpush3.bf16.xpose.msra.mxu1 %v1998_v12  ;;  %4175 = vmatprep.mubr.msk.bf16.mxu1 %vm5045_vm0, %v5044_v5 }
 0x331   : > { %4185 = vmatprep.subr.bf16.mxu1 %v5044_v5 }
 0x337   : > { %4176 = vmatmul.mubr.msk.bf16.vlgmr.msra.gmra.mrb[40].mxu1 %vm1303_vm1, %v1182_v14 }
 0x338   : > { %4187 = vmatprep.mubr.msk.bf16.mxu1 %vm5045_vm0, %v5044_v5  ;;  %4186 = vmatpush3.bf16.msra.mxu1 %v2284_v23 }
 0x339   : > { %4197 = vmatprep.subr.bf16.mxu1 %v5044_v5 }
 0x357   : > { %v5851_v15 = vpop.f32.mrb[4].mxu1 }
 0x358   : > { %v4087_v16 = vpop.f32.mrb[5].mxu1  ;;  %v2041_v17 = vsel %vm2040_vm3, %v5851_v15, -inf }
 0x359   : > { %2042 = vmax.xlane.f32.xlu0 %v2041_v17  ;;  %v1347_v18 = vpop.f32.mrb[6].mxu1 }
 0x35a   : > { %v4088_v19 = vpop.f32.mrb[7].mxu1 }
 0x3ca   : > { %v5860_v24 = vpop.f32.mrb[8].mxu1 }
 0x3cb   : > { %v4093_v25 = vpop.f32.mrb[9].mxu1  ;;  %v2044_v26 = vsel %vm2040_vm3, %v5860_v24, -inf }
 0x3cc   : > { %2045 = vmax.xlane.f32.xlu1 %v2044_v26  ;;  %v1393_v27 = vpop.f32.mrb[10].mxu1 }
 0x3cd   : > { %v4094_v28 = vpop.f32.mrb[11].mxu1 }
 0x3d2   : > { %v5866_v30 = vpop.f32.mrb[12].mxu1  ;;  %v5868_v31 = vpop.f32.mrb[4].mxu0 }
 0x3d3   : > { %v4099_v35 = vpop.f32.mrb[13].mxu1  ;;  %v4111_v36 = vpop.f32.mrb[5].mxu0  ;;  %v2053_v37 = vsel %vm2040_vm3, %v5868_v31, -inf  ;;  %v2047_v38 = vsel %vm2040_vm3, %v5866_v30, -inf }
 0x3d4   : > { %v1531_v39 = vpop.f32.mrb[6].mxu0  ;;  %2054 = vmax.xlane.f32.xlu1 %v2053_v37  ;;  %2048 = vmax.xlane.f32.xlu0 %v2047_v38  ;;  %v1439_v40 = vpop.f32.mrb[14].mxu1 }
 0x3d5   : > { %v4100_v41 = vpop.f32.mrb[15].mxu1  ;;  %v4112_v42 = vpop.f32.mrb[7].mxu0 }
 0x3da   : > { %v5876_v44 = vpop.f32.mrb[8].mxu0  ;;  %v5878_v45 = vpop.f32.mrb[16].mxu1 }
 0x3db   : > { %v4105_v46 = vpop.f32.mrb[17].mxu1  ;;  %v4123_v47 = vpop.f32.mrb[9].mxu0  ;;  %v2059_v48 = vsel %vm2040_vm3, %v5876_v44, -inf  ;;  %v2050_v49 = vsel %vm2040_vm3, %v5878_v45, -inf }
 0x3dc   : > { %v1623_v50 = vpop.f32.mrb[10].mxu0  ;;  %2060 = vmax.xlane.f32.xlu1 %v2059_v48  ;;  %2051 = vmax.xlane.f32.xlu0 %v2050_v49  ;;  %v1485_v51 = vpop.f32.mrb[18].mxu1 }
 0x3dd   : > { %v4106_v52 = vpop.f32.mrb[19].mxu1  ;;  %v4124_v53 = vpop.f32.mrb[11].mxu0 }
 0x3e2   : > { %v5886_v56 = vpop.f32.mrb[12].mxu0  ;;  %v5888_v57 = vpop.f32.mrb[20].mxu1 }
 0x3e3   : > { %v4117_v59 = vpop.f32.mrb[21].mxu1  ;;  %v4135_v60 = vpop.f32.mrb[13].mxu0  ;;  %v2065_v61 = vsel %vm2040_vm3, %v5886_v56, -inf  ;;  %v2056_v62 = vsel %vm2040_vm3, %v5888_v57, -inf }
 0x3e4   : > { %v1715_v63 = vpop.f32.mrb[14].mxu0  ;;  %2066 = vmax.xlane.f32.xlu1 %v2065_v61  ;;  %2057 = vmax.xlane.f32.xlu0 %v2056_v62  ;;  %v1577_v0 = vpop.f32.mrb[22].mxu1 }
 0x3e5   : > { %v4118_v1 = vpop.f32.mrb[23].mxu1  ;;  %v4136_v2 = vpop.f32.mrb[15].mxu0 }
 0x3e6   : > { %v2043_v3 = vpop.xlane.xlu0 %2042  ;;  %v5935_v1 = vpop.permute.xlu1 %1250 }
 0x3e7   : > { %v2089_v6 = vsub.f32 %v5851_v15, %v2043_v3 }
 0x3e9   : > { %v2105_v17 = vmul.f32 1.442695, %v2089_v6 }
 0x3ea   : > { %v5895_v7 = vpop.f32.mrb[24].mxu1  ;;  %v5897_v8 = vpop.f32.mrb[16].mxu0 }
 0x3eb   : > { %v4129_v9 = vpop.f32.mrb[25].mxu1  ;;  %v4147_v10 = vpop.f32.mrb[17].mxu0  ;;  %v2071_v55 = vsel %vm2040_vm3, %v5897_v8, -inf  ;;  %v2062_v11 = vsel %vm2040_vm3, %v5895_v7, -inf  ;;  %4531 = vpow2.f32 %v2105_v17 }
 0x3ec   : > { %v1807_v12 = vpop.f32.mrb[18].mxu0  ;;  %2072 = vmax.xlane.f32.xlu1 %v2071_v55  ;;  %2063 = vmax.xlane.f32.xlu0 %v2062_v11  ;;  %v1669_v13 = vpop.f32.mrb[26].mxu1 }
 0x3ed   : > { %v4130_v14 = vpop.f32.mrb[27].mxu1  ;;  %v4148_v16 = vpop.f32.mrb[19].mxu0 }
 0x3ee   : > { %v5937_v2 = vpop.permute.xlu1 %1253 }
 0x3f2   : > { %v5903_v15 = vpop.f32.mrb[28].mxu1  ;;  %v5905_v18 = vpop.f32.mrb[20].mxu0 }
 0x3f3   : > { %v4141_v19 = vpop.f32.mrb[29].mxu1  ;;  %v4159_v21 = vpop.f32.mrb[21].mxu0  ;;  %v2077_v22 = vsel %vm2040_vm3, %v5905_v18, -inf  ;;  %v2068_v23 = vsel %vm2040_vm3, %v5903_v15, -inf }
 0x3f4   : > { %v1899_v25 = vpop.f32.mrb[22].mxu0  ;;  %2078 = vmax.xlane.f32.xlu1 %v2077_v22  ;;  %2069 = vmax.xlane.f32.xlu0 %v2068_v23  ;;  %v1761_v26 = vpop.f32.mrb[30].mxu1 }
 0x3f5   : > { %v4142_v27 = vpop.f32.mrb[31].mxu1  ;;  %v4160_v28 = vpop.f32.mrb[23].mxu0 }
 0x3f6   : > { %v5919_v41 = vpop.eup %4531  ;;  %v5939_v3 = vpop.permute.xlu1 %1259 }
 0x3f7   : > { %v2137_v49 = vsel %vm2040_vm3, %v5919_v41, 0.0 }
 0x3fa   : > { %v5911_v35 = vpop.f32.mrb[32].mxu1  ;;  %v5913_v36 = vpop.f32.mrb[24].mxu0 }
 0x3fb   : > { %v4153_v37 = vpop.f32.mrb[33].mxu1  ;;  %v4171_v38 = vpop.f32.mrb[25].mxu0  ;;  %v2083_v39 = vsel %vm2040_vm3, %v5913_v36, -inf  ;;  %v2074_v40 = vsel %vm2040_vm3, %v5911_v35, -inf }
 0x3fc   : > { %v1991_v42 = vpop.f32.mrb[26].mxu0  ;;  %2084 = vmax.xlane.f32.xlu1 %v2083_v39  ;;  %2075 = vmax.xlane.f32.xlu0 %v2074_v40  ;;  %v1853_v46 = vpop.f32.mrb[34].mxu1 }
 0x3fd   : > { %v4154_v47 = vpop.f32.mrb[35].mxu1  ;;  %v4172_v48 = vpop.f32.mrb[27].mxu0 }
 0x400   : > { %2138 = vadd.xlane.f32.xlu1 %v2137_v49 }
 0x402   : > { %v5923_v50 = vpop.f32.mrb[36].mxu1 }
 0x403   : > { %v4165_v51 = vpop.f32.mrb[37].mxu1  ;;  %v2080_v52 = vsel %vm2040_vm3, %v5923_v50, -inf }
 0x404   : > { %2081 = vmax.xlane.f32.xlu0 %v2080_v52  ;;  %v1945_v53 = vpop.f32.mrb[38].mxu1 }
 0x405   : > { %v4166_v59 = vpop.f32.mrb[39].mxu1 }
 0x40a   : > { %v5927_v60 = vpop.f32.mrb[40].mxu1 }
 0x40b   : > { %v4177_v61 = vpop.f32.mrb[41].mxu1  ;;  %v2086_v0 = vsel %vm2040_vm3, %v5927_v60, -inf }
 0x40c   : > { %v2037_v62 = vpop.f32.mrb[42].mxu1 }
 0x40d   : > { %v4178_v63 = vpop.f32.mrb[43].mxu1 }
 0x411   : > { %1272 = vrot.lane.b32.xlu1 %v5757_v58, %s5049_s2 }
 0x41a   : > { %1269 = vrot.lane.b32.xlu0 %v5757_v58, %s5046_s27 }
 0x439   : > { %2087 = vmax.xlane.f32.xlu0 %v2086_v0 }
 0x459   : > { %v2046_v6 = vpop.xlane.xlu1 %2045 }
 0x45a   : > { %v2090_v9 = vsub.f32 %v5860_v24, %v2046_v6 }
 0x45c   : > { %v2107_v10 = vmul.f32 1.442695, %v2090_v9 }
 0x45e   : > { %4533 = vpow2.f32 %v2107_v10 }
 0x461   : > { %v2055_v55 = vpop.xlane.xlu1 %2054  ;;  %v2049_v11 = vpop.xlane.xlu0 %2048 }
 0x462   : > { %v2093_v12 = vsub.f32 %v5868_v31, %v2055_v55  ;;  %v2091_v13 = vsub.f32 %v5866_v30, %v2049_v11 }
 0x464   : > { %v2113_v14 = vmul.f32 1.442695, %v2093_v12  ;;  %v2109_v16 = vmul.f32 1.442695, %v2091_v13 }
 0x466   : > { %4535 = vpow2.f32 %v2113_v14 }
 0x467   : > { %4537 = vpow2.f32 %v2109_v16 }
 0x468   : > { %v5944_v17 = vpop.eup %4533 }
 0x469   : > { %v2061_v19 = vpop.xlane.xlu1 %2060  ;;  %v2052_v21 = vpop.xlane.xlu0 %2051  ;;  %v2140_v22 = vsel %vm2040_vm3, %v5944_v17, 0.0 }
 0x46a   : > { %v2095_v24 = vsub.f32 %v5876_v44, %v2061_v19  ;;  %v2092_v23 = vsub.f32 %v5878_v45, %v2052_v21  ;;  %2141 = vadd.xlane.f32.xlu0 %v2140_v22  ;;  %v1289_v21 = vpack.c.bf16 %v5864_v29, %v5864_v29 }
 0x46c   : > { %v2117_v25 = vmul.f32 1.442695, %v2095_v24  ;;  %v2111_v31 = vmul.f32 1.442695, %v2092_v23 }
 0x46e   : > { %4539 = vpow2.f32 %v2117_v25  ;;  %v2330_v25 = vsel %vm2236_vm2, %v1289_v21, 0 }
 0x46f   : > { %4541 = vpow2.f32 %v2111_v31 }
 0x470   : > { %v5950_v30 = vpop.eup %4535 }
 0x471   : > { %v2058_v26 = vpop.xlane.xlu0 %2057  ;;  %v2149_v27 = vsel %vm2040_vm3, %v5950_v30, 0.0  ;;  %v5954_v28 = vpop.eup %4537 }
 0x472   : > { %v2094_v37 = vsub.f32 %v5888_v57, %v2058_v26  ;;  %2150 = vadd.xlane.f32.xlu1 %v2149_v27  ;;  %v2143_v44 = vsel %vm2040_vm3, %v5954_v28, 0.0  ;;  %v2067_v57 = vpop.xlane.xlu1 %2066 }
 0x473   : > { %v2097_v12 = vsub.f32 %v5886_v56, %v2067_v57 }
 0x474   : > { %v2115_v38 = vmul.f32 1.442695, %v2094_v37 }
 0x475   : > { %v2121_v14 = vmul.f32 1.442695, %v2097_v12 }
 0x476   : > { %2144 = vadd.xlane.f32.xlu1 %v2143_v44  ;;  %4543 = vpow2.f32 %v2115_v38 }
 0x478   : > { %v5959_v45 = vpop.eup %4539 }
 0x479   : > { %v2064_v39 = vpop.xlane.xlu0 %2063  ;;  %v2155_v40 = vsel %vm2040_vm3, %v5959_v45, 0.0  ;;  %v5963_v42 = vpop.eup %4541 }
 0x47a   : > { %v2096_v46 = vsub.f32 %v5895_v7, %v2064_v39  ;;  %2156 = vadd.xlane.f32.xlu0 %v2155_v40  ;;  %v2146_v48 = vsel %vm2040_vm3, %v5963_v42, 0.0  ;;  %v2073_v51 = vpop.xlane.xlu1 %2072 }
 0x47c   : > { %v2119_v47 = vmul.f32 1.442695, %v2096_v46 }
 0x47e   : > { %2147 = vadd.xlane.f32.xlu0 %v2146_v48  ;;  %4545 = vpow2.f32 %v2119_v47 }
 0x480   : > { %v5968_v49 = vpop.eup %4543 }
 0x481   : > { %v2070_v52 = vpop.xlane.xlu0 %2069  ;;  %v2152_v59 = vsel %vm2040_vm3, %v5968_v49, 0.0  ;;  %v2079_v7 = vpop.xlane.xlu1 %2078 }
 0x482   : > { %v2098_v53 = vsub.f32 %v5903_v15, %v2070_v52  ;;  %2153 = vadd.xlane.f32.xlu0 %v2152_v59  ;;  %v2101_v23 = vsub.f32 %v5905_v18, %v2079_v7 }
 0x484   : > { %v2123_v61 = vmul.f32 1.442695, %v2098_v53 }
 0x486   : > { %4547 = vpow2.f32 %v2123_v61 }
 0x487   : > { %1275 = vrot.lane.b32.xlu1 %v5757_v58, %s5048_s13 }
 0x488   : > { %v5975_v62 = vpop.eup %4545 }
 0x489   : > { %v2085_v63 = vpop.xlane.xlu1 %2084  ;;  %v2076_v0 = vpop.xlane.xlu0 %2075  ;;  %v2158_v9 = vsel %vm2040_vm3, %v5975_v62, 0.0 }
 0x48a   : > { %v2100_v6 = vsub.f32 %v5911_v35, %v2076_v0  ;;  %2159 = vadd.xlane.f32.xlu0 %v2158_v9  ;;  %v2099_v35 = vsub.f32 %v5897_v8, %v2073_v51  ;;  %v2129_v8 = vmul.f32 1.442695, %v2101_v23  ;;  %v2103_v29 = vsub.f32 %v5913_v36, %v2085_v63 }
 0x48b   : > { %v1290_v0 = vpack.c.bf16 %v5935_v1, %v5935_v1 }
 0x48c   : > { %v2127_v15 = vmul.f32 1.442695, %v2100_v6  ;;  %v2125_v24 = vmul.f32 1.442695, %v2099_v35 }
 0x48d   : > { %v2139_v10 = vpop.xlane.xlu1 %2138 }
 0x48e   : > { %4549 = vpow2.f32 %v2127_v15 }
 0x48f   : > { %4551 = vrcp.f32 %v2139_v10  ;;  %v2376_v10 = vsel %vm2236_vm2, %v1290_v0, 0 }
 0x490   : > { %v5980_v55 = vpop.eup %4547  ;;  %4553 = vpow2.f32 %v2121_v14 }
 0x491   : > { %v2164_v11 = vsel %vm2040_vm3, %v5980_v55, 0.0  ;;  %4555 = vpow2.f32 %v2125_v24  ;;  %v2082_v39 = vpop.xlane.xlu0 %2081  ;;  %v6034_v61 = vpop.permute.xlu1 %1272  ;;  %v1293_v24 = vpack.c.bf16 %v5939_v3, %v5939_v3 }
 0x492   : > { %2165 = vadd.xlane.f32.xlu0 %v2164_v11  ;;  %4557 = vpow2.f32 %v2129_v8  ;;  %v2102_v40 = vsub.f32 %v5923_v50, %v2082_v39 }
 0x494   : > { %v2131_v46 = vmul.f32 1.442695, %v2102_v40  ;;  %v4415_v40 = vunpack.i.h.bf16 %v5855_v20 }
 0x495   : > { %v6019_v47 = vpop.permute.xlu0 %1269 }
 0x498   : > { %v5985_v13 = vpop.eup %4549 }
 0x499   : > { %v4552_v16 = vpop.eup %4551  ;;  %v2170_v19 = vsel %vm2040_vm3, %v5985_v13, 0.0 }
 0x49a   : > { %v2201_v22 = vmul.f32 %v4552_v16, %v5919_v41  ;;  %2171 = vadd.xlane.f32.xlu0 %v2170_v19  ;;  %v2133_v41 = vmul.f32 1.442695, %v2103_v29  ;;  %v6000_v31 = vpop.eup %4553 }
 0x49b   : > { %v2161_v18 = vsel %vm2040_vm3, %v6000_v31, 0.0  ;;  %v6004_v26 = vpop.eup %4555 }
 0x49c   : > { %v2217_v56 = vpack.c.bf16 %v2201_v22, %v2201_v22  ;;  %4559 = vpow2.f32 %v2133_v41  ;;  %v2167_v27 = vsel %vm2040_vm3, %v6004_v26, 0.0  ;;  %v6008_v37 = vpop.eup %4557 }
 0x49d   : > { %v2173_v36 = vsel %vm2040_vm3, %v6008_v37, 0.0  ;;  %4561 = vpow2.f32 %v2131_v46 }
 0x49e   : > { %4182 = vmatmul.mubr.msk.bf16.vlgmr.msra.gmra.mrb[28].mxu0 %vm2040_vm3, %v2217_v56 }
 0x49f   : > { %4192 = vmatpush3.bf16.msra.mxu0 %v2330_v25  ;;  %4193 = vmatprep.mubr.msk.bf16.mxu0 %vm5045_vm0, %v5044_v5 }
 0x4a0   : > { %4203 = vmatprep.subr.bf16.mxu0 %v5044_v5 }
 0x4a6   : > { %v6014_v38 = vpop.eup %4559 }
 0x4a7   : > { %v2179_v44 = vsel %vm2040_vm3, %v6014_v38, 0.0  ;;  %v6022_v52 = vpop.eup %4561 }
 0x4a8   : > { %v2176_v53 = vsel %vm2040_vm3, %v6022_v52, 0.0 }
 0x4ab   : > { %2162 = vadd.xlane.f32.xlu1 %v2161_v18 }
 0x4af   : > { %2168 = vadd.xlane.f32.xlu1 %v2167_v27  ;;  %v1295_v27 = vpack.c.bf16 %v5757_v58, %v5757_v58 }
 0x4b0   : > { %1278 = vrot.lane.b32.xlu0 %v5757_v58, %s5050_s0 }
 0x4b1   : > { %v2606_v46 = vsel %vm2236_vm2, %v1295_v27, 0 }
 0x4b3   : > { %2174 = vadd.xlane.f32.xlu1 %v2173_v36 }
 0x4b7   : > { %2180 = vadd.xlane.f32.xlu1 %v2179_v44 }
 0x4c6   : > { %v2088_v57 = vpop.xlane.xlu0 %2087 }
 0x4c7   : > { %v2104_v48 = vsub.f32 %v5927_v60, %v2088_v57 }
 0x4c9   : > { %v2135_v51 = vmul.f32 1.442695, %v2104_v48 }
 0x4cb   : > { %4563 = vpow2.f32 %v2135_v51 }
 0x4cf   : > { %2177 = vadd.xlane.f32.xlu0 %v2176_v53  ;;  %v1298_v53 = vpack.c.bf16 %v6034_v61, %v6034_v61 }
 0x4d5   : > { %v6026_v59 = vpop.eup %4563 }
 0x4d6   : > { %v2182_v50 = vsel %vm2040_vm3, %v6026_v59, 0.0 }
 0x4d7   : > { %2183 = vadd.xlane.f32.xlu1 %v2182_v50 }
 0x4e5   : > { %1284 = vrot.lane.b32.xlu0 %v5757_v58, %s5052_s18 }
 0x4e8   : > { %1281 = vrot.lane.b32.xlu1 %v5757_v58, %s5051_s16  ;;  %v1296_v58 = vpack.c.bf16 %v4415_v40, %v4415_v40 }
 0x4ea   : > { %v2652_v51 = vsel %vm2236_vm2, %v1296_v58, 0 }
 0x4f7   : > { %v2142_v60 = vpop.xlane.xlu0 %2141 }
 0x4f8   : > { %4565 = vrcp.f32 %v2142_v60 }
 0x4ff   : > { %v2151_v7 = vpop.xlane.xlu1 %2150 }
 0x502   : > { %v4566_v63 = vpop.eup %4565 }
 0x503   : > { %v2202_v6 = vmul.f32 %v4566_v63, %v5944_v17  ;;  %v2145_v9 = vpop.xlane.xlu1 %2144  ;;  %v1291_v17 = vpack.c.bf16 %v5937_v2, %v5937_v2 }
 0x504   : > { %4567 = vrcp.f32 %v2145_v9 }
 0x505   : > { %v2218_v15 = vpack.c.bf16 %v2202_v6, %v2202_v6  ;;  %4569 = vrcp.f32 %v2151_v7  ;;  %v2422_v21 = vsel %vm2236_vm2, %v1291_v17, 0  ;;  %v2744_v7 = vsel %vm2236_vm2, %v1298_v53, 0 }
 0x507   : > { %4188 = vmatmul.mubr.msk.bf16.vlgmr.msra.gmra.mrb[44].mxu1 %vm2040_vm3, %v2218_v15  ;;  %v2157_v11 = vpop.xlane.xlu0 %2156  ;;  %v1276_v63 = vpop.permute.xlu1 %1275 }
 0x508   : > { %4198 = vmatpush3.bf16.msra.mxu1 %v2376_v10  ;;  %4199 = vmatprep.mubr.msk.bf16.mxu1 %vm5045_vm0, %v5044_v5 }
 0x509   : > { %4209 = vmatprep.subr.bf16.mxu1 %v5044_v5 }
 0x50b   : > { %v2148_v12 = vpop.xlane.xlu0 %2147 }
 0x50c   : > { %4571 = vrcp.f32 %v2148_v12  ;;  %v1297_v12 = vpack.c.bf16 %v6019_v47, %v6019_v47 }
 0x50d   : > { %4573 = vrcp.f32 %v2157_v11 }
 0x50e   : > { %v4568_v1 = vpop.eup %4567 }
 0x50f   : > { %v2203_v14 = vmul.f32 %v4568_v1, %v5954_v28  ;;  %v2154_v35 = vpop.xlane.xlu0 %2153  ;;  %v4570_v19 = vpop.eup %4569  ;;  %v1292_v28 = vpack.c.bf16 %v5874_v43, %v5874_v43 }
 0x510   : > { %4575 = vrcp.f32 %v2154_v35  ;;  %v2205_v22 = vmul.f32 %v4570_v19, %v5950_v30  ;;  %v2514_v30 = vsel %vm2236_vm2, %v1293_v24, 0  ;;  %v2698_v35 = vsel %vm2236_vm2, %v1297_v12, 0 }
 0x511   : > { %v2219_v16 = vpack.c.bf16 %v2203_v14, %v2203_v14  ;;  %v2468_v18 = vsel %vm2236_vm2, %v1292_v28, 0  ;;  %v1299_v19 = vpack.c.bf16 %v1276_v63, %v1276_v63 }
 0x512   : > { %v2221_v8 = vpack.c.bf16 %v2205_v22, %v2205_v22 }
 0x513   : > { %4194 = vmatmul.mubr.msk.bf16.vlgmr.msra.gmra.mrb[32].mxu0 %vm2040_vm3, %v2219_v16 }
 0x514   : > { %4204 = vmatpush3.bf16.msra.mxu0 %v2422_v21  ;;  %4205 = vmatprep.mubr.msk.bf16.mxu0 %vm5045_vm0, %v5044_v5 }
 0x515   : > { %4215 = vmatprep.subr.bf16.mxu0 %v5044_v5 }
 0x516   : > { %v4572_v2 = vpop.eup %4571 }
 0x517   : > { %v2204_v23 = vmul.f32 %v4572_v2, %v5963_v42  ;;  %v2160_v56 = vpop.xlane.xlu0 %2159  ;;  %v4574_v29 = vpop.eup %4573  ;;  %v1294_v42 = vpack.c.bf16 %v5884_v54, %v5884_v54 }
 0x518   : > { %4577 = vrcp.f32 %v2160_v56  ;;  %v2207_v43 = vmul.f32 %v4574_v29, %v5959_v45 }
 0x519   : > { %v2220_v25 = vpack.c.bf16 %v2204_v23, %v2204_v23  ;;  %v2560_v39 = vsel %vm2236_vm2, %v1294_v42, 0 }
 0x51a   : > { %v4576_v41 = vpop.eup %4575 }
 0x51b   : > { %4200 = vmatmul.mubr.msk.bf16.vlgmr.msra.gmra.mrb[48].mxu1 %vm2040_vm3, %v2220_v25  ;;  %4206 = vmatmul.mubr.msk.bf16.vlgmr.msra.gmra.mrb[36].mxu0 %vm2040_vm3, %v2221_v8  ;;  %v2206_v3 = vmul.f32 %v4576_v41, %v5968_v49  ;;  %v2223_v49 = vpack.c.bf16 %v2207_v43, %v2207_v43 }
 0x51c   : > { %4210 = vmatpush3.bf16.msra.mxu1 %v2468_v18  ;;  %4216 = vmatpush3.bf16.msra.mxu0 %v2514_v30 }
 0x51d   : > { %4211 = vmatprep.mubr.msk.bf16.mxu1 %vm5045_vm0, %v5044_v5  ;;  %4217 = vmatprep.mubr.msk.bf16.mxu0 %vm5045_vm0, %v5044_v5  ;;  %v2222_v45 = vpack.c.bf16 %v2206_v3, %v2206_v3 }
 0x51e   : > { %4221 = vmatprep.subr.bf16.mxu1 %v5044_v5  ;;  %4227 = vmatprep.subr.bf16.mxu0 %v5044_v5 }
 0x51f   : > { %v2166_v36 = vpop.xlane.xlu0 %2165 }
 0x520   : > { %4579 = vrcp.f32 %v2166_v36 }
 0x522   : > { %v4578_v44 = vpop.eup %4577 }
 0x523   : > { %4212 = vmatmul.mubr.msk.bf16.vlgmr.msra.gmra.mrb[52].mxu1 %vm2040_vm3, %v2222_v45  ;;  %4218 = vmatmul.mubr.msk.bf16.vlgmr.msra.gmra.mrb[40].mxu0 %vm2040_vm3, %v2223_v49  ;;  %v2208_v54 = vmul.f32 %v4578_v44, %v5975_v62 }
 0x524   : > { %4222 = vmatpush3.bf16.msra.mxu1 %v2560_v39  ;;  %4228 = vmatpush3.bf16.msra.mxu0 %v2606_v46 }
 0x525   : > { %4223 = vmatprep.mubr.msk.bf16.mxu1 %vm5045_vm0, %v5044_v5  ;;  %4233 = vmatprep.subr.bf16.mxu1 %v5044_v5  ;;  %v2224_v57 = vpack.c.bf16 %v2208_v54, %v2208_v54 }
 0x526   : > { %4229 = vmatprep.mubr.msk.bf16.mxu0 %vm5045_vm0, %v5044_v5  ;;  %4239 = vmatprep.subr.bf16.mxu0 %v5044_v5 }
 0x527   : > { %v2172_v20 = vpop.xlane.xlu0 %2171 }
 0x528   : > { %4581 = vrcp.f32 %v2172_v20 }
 0x52a   : > { %v4580_v48 = vpop.eup %4579 }
 0x52b   : > { %4224 = vmatmul.mubr.msk.bf16.vlgmr.msra.gmra.mrb[56].mxu1 %vm2040_vm3, %v2224_v57  ;;  %v2210_v62 = vmul.f32 %v4580_v48, %v5980_v55  ;;  %v1279_v0 = vpop.permute.xlu0 %1278 }
 0x52c   : > { %4234 = vmatpush3.bf16.msra.mxu1 %v2652_v51  ;;  %4235 = vmatprep.mubr.msk.bf16.mxu1 %vm5045_vm0, %v5044_v5  ;;  %v1300_v55 = vpack.c.bf16 %v1279_v0, %v1279_v0 }
 0x52d   : > { %4245 = vmatprep.subr.bf16.mxu1 %v5044_v5  ;;  %v2226_v50 = vpack.c.bf16 %v2210_v62, %v2210_v62 }
 0x52e   : > { %v2836_v15 = vsel %vm2236_vm2, %v1300_v55, 0 }
 0x532   : > { %v4582_v60 = vpop.eup %4581 }
 0x533   : > { %4236 = vmatmul.mubr.msk.bf16.vlgmr.msra.gmra.mrb[60].mxu1 %vm2040_vm3, %v2226_v50  ;;  %v2212_v6 = vmul.f32 %v4582_v60, %v5985_v13 }
 0x534   : > { %4246 = vmatpush3.bf16.msra.mxu1 %v2744_v7  ;;  %4247 = vmatprep.mubr.msk.bf16.mxu1 %vm5045_vm0, %v5044_v5 }
 0x535   : > { %4257 = vmatprep.subr.bf16.mxu1 %v5044_v5  ;;  %v2228_v61 = vpack.c.bf16 %v2212_v6, %v2212_v6 }
 0x538   : > { %v2163_v9 = vpop.xlane.xlu1 %2162 }
 0x539   : > { %4583 = vrcp.f32 %v2163_v9 }
 0x53b   : > { %4248 = vmatmul.mubr.msk.bf16.vlgmr.msra.gmra.mrb[64].mxu1 %vm2040_vm3, %v2228_v61 }
 0x53c   : > { %4258 = vmatpush3.bf16.msra.mxu1 %v2836_v15  ;;  %v2169_v10 = vpop.xlane.xlu1 %2168  ;;  %4259 = vmatprep.mubr.msk.bf16.mxu1 %vm5045_vm0, %v5044_v5 }
 0x53d   : > { %4585 = vrcp.f32 %v2169_v10  ;;  %4269 = vmatprep.subr.bf16.mxu1 %v5044_v5 }
 0x540   : > { %v2175_v11 = vpop.xlane.xlu1 %2174 }
 0x541   : > { %4587 = vrcp.f32 %v2175_v11 }
 0x543   : > { %v4584_v13 = vpop.eup %4583 }
 0x544   : > { %v2209_v1 = vmul.f32 %v4584_v13, %v6000_v31  ;;  %v2790_v31 = vsel %vm2236_vm2, %v1299_v19, 0 }
 0x546   : > { %v2225_v17 = vpack.c.bf16 %v2209_v1, %v2209_v1 }
 0x547   : > { %v4586_v14 = vpop.eup %4585 }
 0x548   : > { %4230 = vmatmul.mubr.msk.bf16.vlgmr.msra.gmra.mrb[44].mxu0 %vm2040_vm3, %v2225_v17  ;;  %v2211_v16 = vmul.f32 %v4586_v14, %v6004_v26  ;;  %v2181_v26 = vpop.xlane.xlu1 %2180 }
 0x549   : > { %4240 = vmatpush3.bf16.msra.mxu0 %v2698_v35  ;;  %4241 = vmatprep.mubr.msk.bf16.mxu0 %vm5045_vm0, %v5044_v5  ;;  %4589 = vrcp.f32 %v2181_v26 }
 0x54a   : > { %4251 = vmatprep.subr.bf16.mxu0 %v5044_v5  ;;  %v2227_v21 = vpack.c.bf16 %v2211_v16, %v2211_v16 }
 0x54b   : > { %v4588_v47 = vpop.eup %4587 }
 0x54c   : > { %v2213_v22 = vmul.f32 %v4588_v47, %v6008_v37 }
 0x54e   : > { %v2229_v2 = vpack.c.bf16 %v2213_v22, %v2213_v22 }
 0x550   : > { %4242 = vmatmul.mubr.msk.bf16.vlgmr.msra.gmra.mrb[48].mxu0 %vm2040_vm3, %v2227_v21 }
 0x551   : > { %4252 = vmatpush3.bf16.msra.mxu0 %v2790_v31  ;;  %4253 = vmatprep.mubr.msk.bf16.mxu0 %vm5045_vm0, %v5044_v5 }
 0x552   : > { %4263 = vmatprep.subr.bf16.mxu0 %v5044_v5 }
 0x553   : > { %v4590_v23 = vpop.eup %4589 }
 0x554   : > { %v2215_v37 = vmul.f32 %v4590_v23, %v6014_v38 }
 0x556   : > { %v2231_v42 = vpack.c.bf16 %v2215_v37, %v2215_v37 }
 0x558   : > { %4254 = vmatmul.mubr.msk.bf16.vlgmr.msra.gmra.mrb[52].mxu0 %vm2040_vm3, %v2229_v2 }
 0x559   : > { %4265 = vmatprep.mubr.msk.bf16.mxu0 %vm5045_vm0, %v5044_v5 }
 0x55c   : > { %v2178_v28 = vpop.xlane.xlu0 %2177 }
 0x55d   : > { %4591 = vrcp.f32 %v2178_v28 }
 0x560   : > { %v1285_v56 = vpop.permute.xlu0 %1284 }
 0x561   : > { %v1302_v41 = vpack.c.bf16 %v1285_v56, %v1285_v56 }
 0x563   : > { %v2928_v3 = vsel %vm2236_vm2, %v1302_v41, 0  ;;  %v4484_v41 = vld [vmem:[%s5591_s20 + $0x8] sm:$0xff]  }
 0x564   : > { %v2184_v24 = vpop.xlane.xlu1 %2183 }
 0x565   : > { %4593 = vrcp.f32 %v2184_v24 }
 0x567   : > { %v4592_v25 = vpop.eup %4591 }
 0x568   : > { %v1282_v8 = vpop.permute.xlu1 %1281  ;;  %v2214_v29 = vmul.f32 %v4592_v25, %v6022_v52  ;;  %v4483_v25 = vld [vmem:[%s5591_s20] sm:$0xff]  }
 0x569   : > { %v1301_v18 = vpack.c.bf16 %v1282_v8, %v1282_v8 }
 0x56a   : > { %v2230_v43 = vpack.c.bf16 %v2214_v29, %v2214_v29 }
 0x56b   : > { %v2882_v30 = vsel %vm2236_vm2, %v1301_v18, 0 }
 0x56c   : > { %4264 = vmatpush3.bf16.msra.mxu0 %v2882_v30  ;;  %4260 = vmatmul.mubr.msk.bf16.vlgmr.msra.gmra.mrb[68].mxu1 %vm2040_vm3, %v2230_v43  ;;  %v4485_v30 = vld [vmem:[%s5591_s20 + $0x10] sm:$0xff]  }
 0x56d   : > { %4275 = vmatprep.subr.bf16.mxu0 %v5044_v5  ;;  %4270 = vmatpush3.bf16.msra.mxu1 %v2928_v3 }
 0x56e   : > { %4271 = vmatprep.mubr.msk.bf16.mxu1 %vm5045_vm0, %v5044_v5 }
 0x56f   : > { %v4594_v38 = vpop.eup %4593  ;;  %4266 = vmatmul.mubr.msk.bf16.vlgmr.msra.gmra.mrb[56].mxu0 %vm2040_vm3, %v2231_v42 }
 0x570   : > { %v2216_v52 = vmul.f32 %v4594_v38, %v6026_v59  ;;  %4291 = vmatprep.mubr.msk.bf16.mxu0 %vm5045_vm0, %v5044_v5  ;;  %4276 = vmatpush3.bf16.msra.mxu0 %v4483_v25 }
 0x571   : > { %v6135_v27 = vpop.f32.mrb[28].mxu0  ;;  %4277 = vmatprep.subr.bf16.mxu0 %v5044_v5 }
 0x572   : > { %v2232_v36 = vpack.c.bf16 %v2216_v52, %v2216_v52  ;;  %v4183_v45 = vpop.f32.mrb[29].mxu0  ;;  %v4486_v52 = vld [vmem:[%s5591_s20 + $0x18] sm:$0xff]  }
 0x573   : > { %v2277_v49 = vpop.f32.mrb[30].mxu0  ;;  %v4487_v45 = vld [vmem:[%s5591_s20 + $0x20] sm:$0xff]  }
 0x574   : > { %v4184_v44 = vpop.f32.mrb[31].mxu0  ;;  %4272 = vmatmul.mubr.msk.bf16.vlgmr.msra.gmra.mrb[72].mxu1 %vm2040_vm3, %v2232_v36  ;;  %4278 = vmatpush3.bf16.msra.mxu0 %v4484_v41  ;;  %v4488_v49 = vld [vmem:[%s5591_s20 + $0x28] sm:$0xff]  }
 0x575   : > { %3359 = vmatprep.mubr.bf16.mxu1 %v5043_v4  ;;  %4279 = vmatprep.subr.bf16.mxu0 %v5044_v5  ;;  %v4489_v44 = vld [vmem:[%s5591_s20 + $0x30] sm:$0xff]  }
 0x578   : > { %4280 = vmatpush3.bf16.msra.mxu0 %v4485_v30 }
 0x579   : > { %4281 = vmatprep.subr.bf16.mxu0 %v5044_v5 }
 0x57c   : > { %4282 = vmatpush3.bf16.msra.mxu0 %v4486_v52 }
 0x57d   : > { %4283 = vmatprep.subr.bf16.mxu0 %v5044_v5 }
 0x580   : > { %4284 = vmatpush3.bf16.msra.mxu0 %v4487_v45 }
 0x581   : > { %4285 = vmatprep.subr.bf16.mxu0 %v5044_v5 }
 0x584   : > { %4286 = vmatpush3.bf16.msra.mxu0 %v4488_v49  ;;  %v4603_v49 = vld [vmem:[%s6327_s15] sm:$0xff] }
 0x585   : > { %4287 = vmatprep.subr.bf16.mxu0 %v5044_v5 }
 0x588   : > { %4288 = vmatpush3.bf16.msra.mxu0 %v4489_v44 }
 0x589   : > { %4289 = vmatprep.subr.bf16.mxu0 %v5044_v5 }
 0x5da   : > { %v2320_v39 = vpop.f32.mrb[44].mxu1 }
 0x5db   : > { %v4189_v40 = vpop.f32.mrb[45].mxu1 }
 0x5dc   : > { %v2323_v46 = vpop.f32.mrb[46].mxu1  ;;  %v4490_v40 = vld [vmem:[%s5591_s20 + $0x38] sm:$0xff]  }
 0x5dd   : > { %v4190_v54 = vpop.f32.mrb[47].mxu1  ;;  %4290 = vmatpush3.bf16.msra.mxu0 %v4490_v40 }
 0x5e6   : > { %v2366_v58 = vpop.f32.mrb[32].mxu0 }
 0x5e7   : > { %v4195_v20 = vpop.f32.mrb[33].mxu0 }
 0x5e8   : > { %v2369_v59 = vpop.f32.mrb[34].mxu0 }
 0x5e9   : > { %v4196_v57 = vpop.f32.mrb[35].mxu0 }
 0x5ee   : > { %v2412_v48 = vpop.f32.mrb[48].mxu1  ;;  %v2458_v51 = vpop.f32.mrb[36].mxu0 }
 0x5ef   : > { %v4201_v62 = vpop.f32.mrb[49].mxu1  ;;  %v4207_v53 = vpop.f32.mrb[37].mxu0 }
 0x5f0   : > { %v2415_v50 = vpop.f32.mrb[50].mxu1  ;;  %v2461_v60 = vpop.f32.mrb[38].mxu0 }
 0x5f1   : > { %v4202_v7 = vpop.f32.mrb[51].mxu1  ;;  %v4208_v63 = vpop.f32.mrb[39].mxu0 }
 0x5f6   : > { %v6139_v0 = vpop.f32.mrb[52].mxu1  ;;  %v6141_v6 = vpop.f32.mrb[40].mxu0 }
 0x5f7   : > { %v4213_v4 = vpop.f32.mrb[53].mxu1  ;;  %v4219_v55 = vpop.f32.mrb[41].mxu0 }
 0x5f8   : > { %v2507_v9 = vpop.f32.mrb[54].mxu1  ;;  %v2553_v61 = vpop.f32.mrb[42].mxu0 }
 0x5f9   : > { %v4214_v15 = vpop.f32.mrb[55].mxu1  ;;  %v4220_v10 = vpop.f32.mrb[43].mxu0 }
 0x5fe   : > { %v6143_v11 = vpop.f32.mrb[56].mxu1 }
 0x5ff   : > { %v4225_v13 = vpop.f32.mrb[57].mxu1 }
 0x600   : > { %v2599_v12 = vpop.f32.mrb[58].mxu1 }
 0x601   : > { %v4226_v1 = vpop.f32.mrb[59].mxu1 }
 0x606   : > { %v2688_v17 = vpop.f32.mrb[60].mxu1 }
 0x607   : > { %v4416_v14 = vpack.i.bf16 %v2688_v17, %v2320_v39  ;;  %v4237_v35 = vpop.f32.mrb[61].mxu1 }
 0x608   : > { %v2691_v16 = vpop.f32.mrb[62].mxu1 }
 0x609   : > { %4417 = vrot.lane.b32.xlu1 %v4416_v14, %s5052_s18  ;;  %v4238_v19 = vpop.f32.mrb[63].mxu1 }
 0x60e   : > { %v2780_v21 = vpop.f32.mrb[64].mxu1 }
 0x60f   : > { %v4426_v47 = vpack.i.bf16 %v2780_v21, %v2412_v48  ;;  %v4249_v31 = vpop.f32.mrb[65].mxu1 }
 0x610   : > { %v2783_v22 = vpop.f32.mrb[66].mxu1 }
 0x611   : > { %4427 = vrot.lane.b32.xlu1 %v4426_v47, %s5050_s0  ;;  %v4250_v2 = vpop.f32.mrb[67].mxu1 }
 0x61b   : > { %v6147_v26 = vpop.f32.mrb[44].mxu0 }
 0x61c   : > { %v4231_v28 = vpop.f32.mrb[45].mxu0 }
 0x61d   : > { %v2645_v24 = vpop.f32.mrb[46].mxu0 }
 0x61e   : > { %v4232_v23 = vpop.f32.mrb[47].mxu0 }
 0x623   : > { %v2734_v56 = vpop.f32.mrb[48].mxu0 }
 0x624   : > { %v4421_v8 = vpack.i.bf16 %v2734_v56, %v2366_v58  ;;  %v4243_v37 = vpop.f32.mrb[49].mxu0 }
 0x625   : > { %v2737_v29 = vpop.f32.mrb[50].mxu0 }
 0x626   : > { %4422 = vrot.lane.b32.xlu0 %v4421_v8, %s5051_s16  ;;  %v4244_v18 = vpop.f32.mrb[51].mxu0 }
 0x62b   : > { %v2826_v43 = vpop.f32.mrb[52].mxu0 }
 0x62c   : > { %v4431_v3 = vpack.i.bf16 %v2826_v43, %v2458_v51  ;;  %v4255_v42 = vpop.f32.mrb[53].mxu0  ;;  %v3907_v43 = vld [vmem:[%s677_s25] ss:$0 sm:$0xff]  ;;  %s6328_s25 = scalar_lea.vmem [#allocation9], %s5572_s30 }
 0x62d   : > { %v2829_v38 = vpop.f32.mrb[54].mxu0 }
 0x62e   : > { %4432 = vrot.lane.b32.xlu0 %v4431_v3, %s5048_s13  ;;  %v4256_v36 = vpop.f32.mrb[55].mxu0 }
 0x63f   : > { %v2872_v39 = vpop.f32.mrb[68].mxu1 }
 0x640   : > { %v4436_v46 = vpack.i.bf16 %v2872_v39, %v6139_v0  ;;  %v4261_v54 = vpop.f32.mrb[69].mxu1  ;;  %v4604_v39 = vld [vmem:[%s6327_s15 + $0x8] sm:$0xff] }
 0x641   : > { %v2875_v58 = vpop.f32.mrb[70].mxu1  ;;  %v4493_v54 = vld [vmem:[%s5606_s6 + $0x4] ss:$8 sps:$4 sm:$0xff]  }
 0x642   : > { %v2918_v20 = vpop.f32.mrb[56].mxu0  ;;  %4437 = vrot.lane.b32.xlu1 %v4436_v46, %s5049_s2  ;;  %v4262_v57 = vpop.f32.mrb[71].mxu1  ;;  %v4491_v46 = vld [vmem:[%s5606_s6] ss:$8 sps:$4 sm:$0xff]   ;;  %v4496_v58 = vld [vmem:[%s5606_s6 + $0x14] ss:$8 sps:$4 sm:$0xff]   ;;  %3327 = vmatprep.subr.bf16.mxu1 %v4493_v54 }
 0x643   : > { %v4441_v59 = vpack.i.bf16 %v2918_v20, %v6141_v6  ;;  %v4267_v48 = vpop.f32.mrb[57].mxu0  ;;  %3328 = vmatpush1.bf16.msra.mxu1 %v4491_v46  ;;  %v4494_v20 = vld [vmem:[%s5606_s6 + $0x10] ss:$8 sps:$4 sm:$0xff]  }
 0x644   : > { %v2921_v51 = vpop.f32.mrb[58].mxu0  ;;  %3329 = vmatprep.subr.bf16.mxu1 %v4496_v58 }
 0x645   : > { %4442 = vrot.lane.b32.xlu0 %v4441_v59, %s5046_s27  ;;  %v4268_v62 = vpop.f32.mrb[59].mxu0 }
 0x647   : > { %v2964_v53 = vpop.f32.mrb[72].mxu1  ;;  %3330 = vmatpush1.bf16.msra.mxu1 %v4494_v20 }
 0x648   : > { %v4446_v5 = vpack.i.bf16 %v2964_v53, %v6143_v11  ;;  %v4273_v50 = vpop.f32.mrb[73].mxu1 }
 0x649   : > { %v2967_v60 = vpop.f32.mrb[74].mxu1 }
 0x64a   : > { %4447 = vrot.lane.b32.xlu1 %v4446_v5, %s5047_s4  ;;  %v4274_v7 = vpop.f32.mrb[75].mxu1  ;;  %v4499_v60 = vld [vmem:[%s5606_s6 + $0x24] ss:$8 sps:$4 sm:$0xff]  }
 0x64b   : > { %v4497_v7 = vld [vmem:[%s5606_s6 + $0x20] ss:$8 sps:$4 sm:$0xff]   ;;  %3331 = vmatprep.subr.bf16.mxu1 %v4499_v60 }
 0x64c   : > { %3332 = vmatpush1.bf16.msra.mxu1 %v4497_v7 }
 0x67b   : > { %v4418_v63 = vpop.permute.xlu1 %4417 }
 0x67c   : > { %v4420_v6 = vunpack.i.h.bf16 %v4418_v63  ;;  %v4419_v55 = vunpack.i.l.bf16 %v4418_v63  ;;  %v4502_v63 = vld [vmem:[%s5606_s6 + $0x34] ss:$8 sps:$4 sm:$0xff]  }
 0x67d   : > { %3333 = vmatprep.subr.bf16.mxu1 %v4502_v63 }
 0x67e   : > { %v3039_v13 = vsel %vm1303_vm1, %v6147_v26, %v4420_v6  ;;  %v2998_v11 = vsel %vm1303_vm1, %v6135_v27, %v4419_v55  ;;  %v4503_v6 = vld [vmem:[%s5606_s6 + $0x40] ss:$8 sps:$4 sm:$0xff]   ;;  %v4508_v55 = vld [vmem:[%s5606_s6 + $0x54] ss:$8 sps:$4 sm:$0xff]  }
 0x683   : > { %v4428_v4 = vpop.permute.xlu1 %4427 }
 0x684   : > { %v4430_v16 = vunpack.i.h.bf16 %v4428_v4  ;;  %v4429_v19 = vunpack.i.l.bf16 %v4428_v4  ;;  %v4505_v4 = vld [vmem:[%s5606_s6 + $0x44] ss:$8 sps:$4 sm:$0xff]  }
 0x698   : > { %v4423_v0 = vpop.permute.xlu0 %4422 }
 0x699   : > { %v4425_v61 = vunpack.i.h.bf16 %v4423_v0  ;;  %v4424_v15 = vunpack.i.l.bf16 %v4423_v0  ;;  %v4500_v0 = vld [vmem:[%s5606_s6 + $0x30] ss:$8 sps:$4 sm:$0xff]  }
 0x69a   : > { %3334 = vmatpush1.bf16.msra.mxu1 %v4500_v0 }
 0x69b   : > { %v3000_v1 = vsel %vm2999_vm4, %v2998_v11, %v4424_v15  ;;  %v3040_v17 = vsel %vm2999_vm4, %v3039_v13, %v4425_v61  ;;  %3335 = vmatprep.subr.bf16.mxu1 %v4505_v4  ;;  %v4509_v61 = vld [vmem:[%s5606_s6 + $0x60] ss:$8 sps:$4 sm:$0xff]   ;;  %v4511_v15 = vld [vmem:[%s5606_s6 + $0x64] ss:$8 sps:$4 sm:$0xff]   ;;  %v4512_v13 = vld [vmem:[%s5606_s6 + $0x70] ss:$8 sps:$4 sm:$0xff]  }
 0x69c   : > { %v3002_v2 = vsel %vm3001_vm5, %v3000_v1, %v4429_v19  ;;  %v3041_v28 = vsel %vm3001_vm5, %v3040_v17, %v4430_v16  ;;  %v4515_v11 = vld [vmem:[%s5614_s24 + $0x40] sm:$0xff]   ;;  %v4517_v1 = vld [vmem:[%s5614_s24 + $0x48] sm:$0xff]   ;;  %v4521_v16 = vld [vmem:[%s5614_s24 + $0x58] sm:$0xff]  }
 0x69d   : > { %4041 = vmatprep.subr.bf16.mxu0 %v4515_v11  ;;  %v4518_v17 = vld [vmem:[%s5614_s24 + $0x8] sm:$0xff]   ;;  %v4522_v19 = vld [vmem:[%s5614_s24 + $0x18] sm:$0xff]  }
 0x69e   : > { %3336 = vmatpush1.bf16.msra.mxu1 %v4503_v6 }
 0x69f   : > { %3337 = vmatprep.subr.bf16.mxu1 %v4508_v55 }
 0x6a0   : > { %v4433_v9 = vpop.permute.xlu0 %4432 }
 0x6a1   : > { %v4435_v14 = vunpack.i.h.bf16 %v4433_v9  ;;  %v4434_v35 = vunpack.i.l.bf16 %v4433_v9  ;;  %v4506_v9 = vld [vmem:[%s5606_s6 + $0x50] ss:$8 sps:$4 sm:$0xff]  }
 0x6a2   : > { %3338 = vmatpush1.bf16.msra.mxu1 %v4506_v9 }
 0x6a3   : > { %v3004_v27 = vsel %vm3003_vm6, %v3002_v2, %v4434_v35  ;;  %v3042_v26 = vsel %vm3003_vm6, %v3041_v28, %v4435_v14  ;;  %3339 = vmatprep.subr.bf16.mxu1 %v4511_v15  ;;  %v4519_v14 = vld [vmem:[%s5614_s24 + $0x50] sm:$0xff]  }
 0x6a4   : > { %v4520_v35 = vld [vmem:[%s5614_s24 + $0x10] sm:$0xff]  }
 0x6a6   : > { %3340 = vmatpush1.bf16.msra.mxu1 %v4509_v61 }
 0x6b4   : > { %v4438_v10 = vpop.permute.xlu1 %4437 }
 0x6b5   : > { %v4440_v21 = vunpack.i.h.bf16 %v4438_v10  ;;  %v4439_v47 = vunpack.i.l.bf16 %v4438_v10  ;;  %v4514_v10 = vld [vmem:[%s5606_s6 + $0x74] ss:$8 sps:$4 sm:$0xff]   ;;  %s6329_s6 = scalar_lea.vmem [#allocation10], %s5572_s30 }
 0x6b6   : > { %3341 = vmatprep.subr.bf16.mxu1 %v4514_v10 }
 0x6b7   : > { %v4443_v12 = vpop.permute.xlu0 %4442  ;;  %v3043_v23 = vsel %vm3005_vm7, %v3042_v26, %v4440_v21  ;;  %v3006_v56 = vsel %vm3005_vm7, %v3004_v27, %v4439_v47  ;;  %3342 = vmatpush1.bf16.msra.mxu1 %v4512_v13  ;;  %v4523_v21 = vld [vmem:[%s5614_s24 + $0x60] sm:$0xff]  }
 0x6b8   : > { %v4445_v31 = vunpack.i.h.bf16 %v4443_v12  ;;  %v4444_v22 = vunpack.i.l.bf16 %v4443_v12  ;;  %v4516_v12 = vld [vmem:[%s5614_s24] sm:$0xff]  }
 0x6b9   : > { %v4524_v47 = vld [vmem:[%s5614_s24 + $0x20] sm:$0xff]  }
 0x6ba   : > { %v3008_v37 = vsel %vm3007_vm8, %v3006_v56, %v4444_v22  ;;  %v3044_v29 = vsel %vm3007_vm8, %v3043_v23, %v4445_v31  ;;  %v4525_v31 = vld [vmem:[%s5614_s24 + $0x68] sm:$0xff]  }
 0x6bc   : > { %v4448_v24 = vpop.permute.xlu1 %4447 }
 0x6bd   : > { %v4450_v25 = vunpack.i.h.bf16 %v4448_v24  ;;  %v4449_v8 = vunpack.i.l.bf16 %v4448_v24 }
 0x6bf   : > { %v3045_v41 = vsel %vm3009_vm9, %v3044_v29, %v4450_v25  ;;  %v3010_v18 = vsel %vm3009_vm9, %v3008_v37, %v4449_v8  ;;  %v3916_v25 = vld [vmem:[%s6328_s25] ss:$0 sm:$0xff] }
 0x6c0   : > { %v3046_v30 = vpack.c.bf16 %v3045_v41, %v3010_v18  ;;  %v3917_v41 = vld [vmem:[%s6329_s6] ss:$0 sm:$0xff] }
 0x6c2   : > { %4292 = vmatmul.mubr.bf16.vlgmr.msra.gmra.mrb[60].mxu0 %v3046_v30 }
 0x6c3   : > { %4042 = vmatpush3.bf16.msra.mxu0 %v4516_v12 }
 0x6c4   : > { %4043 = vmatprep.subr.bf16.mxu0 %v4517_v1 }
 0x6c7   : > { %4044 = vmatpush3.bf16.msra.mxu0 %v4518_v17 }
 0x6c8   : > { %4045 = vmatprep.subr.bf16.mxu0 %v4519_v14 }
 0x6cb   : > { %4046 = vmatpush3.bf16.msra.mxu0 %v4520_v35 }
 0x6cc   : > { %4047 = vmatprep.subr.bf16.mxu0 %v4521_v16 }
 0x6cf   : > { %4048 = vmatpush3.bf16.msra.mxu0 %v4522_v19 }
 0x6d0   : > { %4049 = vmatprep.subr.bf16.mxu0 %v4523_v21 }
 0x6d3   : > { %4050 = vmatpush3.bf16.msra.mxu0 %v4524_v47 }
 0x6d4   : > { %4051 = vmatprep.subr.bf16.mxu0 %v4525_v31 }
 0x795   : > { %v3135_v3 = vpop.f32.mrb[60].mxu0 }
 0x796   : > { %v3136_v42 = vadd.f32 %v3907_v43, %v3135_v3  ;;  %v4293_v38 = vpop.f32.mrb[61].mxu0 }
 0x797   : > { %v3138_v52 = vpop.f32.mrb[62].mxu0  ;;  %v4527_v38 = vld [vmem:[%s5614_s24 + $0x70] sm:$0xff]  }
 0x798   : > { %v3139_v36 = vadd.f32 %v3907_v43, %v3138_v52  ;;  %v4294_v45 = vpop.f32.mrb[63].mxu0  ;;  %v3142_v44 = vadd.f32 %v4603_v49, %v3136_v42  ;;  %v4526_v42 = vld [vmem:[%s5614_s24 + $0x28] sm:$0xff]   ;;  %v4528_v52 = vld [vmem:[%s5614_s24 + $0x30] sm:$0xff]   ;;  %v3202_v49 = vld [vmem:[%s5608_s22] sm:$0x3]  ;;  %s6330_s22 = scalar_lea.vmem [#allocation16], %s5572_s30 }
 0x799   : > { %4052 = vmatpush3.bf16.msra.mxu0 %v4526_v42  ;;  %v4530_v45 = vld [vmem:[%s5614_s24 + $0x38] sm:$0xff]   ;;  %v3934_v32 = vld [vmem:[%s6330_s22] ss:$0 sm:$0xff] }
 0x79a   : > { %3146 = vadd.xlane.f32.xlu0 %v3142_v44  ;;  %v3143_v40 = vadd.f32 %v4604_v39, %v3139_v36  ;;  %4053 = vmatprep.subr.bf16.mxu0 %v4527_v38  ;;  %v4529_v36 = vld [vmem:[%s5614_s24 + $0x78] sm:$0xff]   ;;  %v3244_v39 = vrot.slane %v3202_v49, %v900_v34  ;;  %s6331_s24 = scalar_lea.vmem [#allocation18], %s5572_s30 }
 0x79c   : > { %3148 = vadd.xlane.f32.xlu1 %v3143_v40 }
 0x79d   : > { %4054 = vmatpush3.bf16.msra.mxu0 %v4528_v52 }
 0x79e   : > { %4055 = vmatprep.subr.bf16.mxu0 %v4529_v36 }
 0x7a1   : > { %4056 = vmatpush3.bf16.msra.mxu0 %v4530_v45 }
 0x827   : > { %v3147_v59 = vpop.xlane.xlu0 %3146 }
 0x828   : > { %v3151_v57 = vmul.f32 0.0078125, %v3147_v59 }
 0x829   : > { %v3149_v48 = vpop.xlane.xlu1 %3148 }
 0x82a   : > { %v3153_v51 = vsub.f32 %v3142_v44, %v3151_v57  ;;  %v3152_v62 = vmul.f32 0.0078125, %v3149_v48  ;;  %v3240_v44 = vrot.slane %v3202_v49, %v896_v33 }
 0x82c   : > { %v6190_v53 = vsub.f32 %v3143_v40, %v3152_v62  ;;  %v3155_v5 = vmul.f32 %v3153_v51, %v3153_v51 }
 0x82e   : > { %3157 = vadd.xlane.f32.xlu0 %v3155_v5  ;;  %v3156_v50 = vmul.f32 %v6190_v53, %v6190_v53 }
 0x832   : > { %3159 = vadd.xlane.f32.xlu0 %v3156_v50 }
 0x8bb   : > { %v3158_v22 = vpop.xlane.xlu0 %3157 }
 0x8bc   : > { %v3161_v2 = vmul.f32 0.0078125, %v3158_v22 }
 0x8be   : > { %v3163_v28 = vadd.f32 1e-05, %v3161_v2  ;;  %v3951_v2 = vld [vmem:[%s6331_s24] ss:$0 sm:$0xff] }
 0x8bf   : > { %v3160_v27 = vpop.xlane.xlu0 %3159 }
 0x8c0   : > { %4595 = vrsqrt.f32 %v3163_v28  ;;  %v3162_v26 = vmul.f32 0.0078125, %v3160_v27 }
 0x8c2   : > { %v3164_v24 = vadd.f32 1e-05, %v3162_v26  ;;  %v3952_v26 = vld [vmem:[%s6332_s19] ss:$0 sm:$0xff] }
 0x8c4   : > { %4597 = vrsqrt.f32 %v3164_v24 }
 0x8ca   : > { %v4596_v23 = vpop.eup %4595 }
 0x8cb   : > { %v3167_v56 = vmul.f32 %v4596_v23, %v3153_v51 }
 0x8cd   : > { %v3175_v29 = vmul.f32 %v3916_v25, %v3167_v56 }
 0x8ce   : > { %v4598_v8 = vpop.eup %4597 }
 0x8cf   : > { %v3168_v37 = vmul.f32 %v4598_v8, %v6190_v53  ;;  %v3183_v30 = vadd.f32 %v3917_v41, %v3175_v29 }
 0x8d1   : > { %v3176_v18 = vmul.f32 %v3916_v25, %v3168_v37 }
 0x8d3   : > { %v3184_v43 = vadd.f32 %v3917_v41, %v3176_v18 }
 0x8d5   : > { %v3185_v3 = vpack.c.bf16 %v3184_v43, %v3183_v30 }
 0x8d7   : > { %3360 = vmatmul.mubr.bf16.vlgmr.msra.gmra.mrb[76].mxu1 %v3185_v3 }
 0x9aa   : > { %v3361_v40 = vpop.f32.mrb[76].mxu1 }
 0x9ab   : > { %v3362_v46 = vadd.f32 %v3361_v40, %v3240_v44  ;;  %v3363_v54 = vpop.f32.mrb[77].mxu1 }
 0x9ac   : > { %v3364_v58 = vadd.f32 %v3363_v54, %v3244_v39  ;;  %v3365_v20 = vpop.f32.mrb[78].mxu1 }
 0x9ad   : > { %v3366_v59 = vadd.f32 %v3365_v20, %v3240_v44  ;;  %v3367_v57 = vpop.f32.mrb[79].mxu1  ;;  %v3370_v51 = vmax.f32 %v3362_v46, 0.0 }
 0x9ae   : > { %v3368_v48 = vadd.f32 %v3367_v57, %v3244_v39  ;;  %v3371_v53 = vmax.f32 %v3364_v58, 0.0 }
 0x9af   : > { %v3372_v62 = vmax.f32 %v3366_v59, 0.0 }
 0x9b0   : > { %v3373_v5 = vmax.f32 %v3368_v48, 0.0 }
 0x9b1   : > { %v3374_v50 = vpack.c.bf16 %v3372_v62, %v3370_v51 }
 0x9b2   : > { %v3375_v60 = vpack.c.bf16 %v3373_v5, %v3371_v53 }
 0x9b4   : > { %3510 = vmatprep.mubr.bf16.mxu0 %v3375_v60 }
 0x9b5   : > { %3511 = vmatmul.mubr.bf16.vlgmr.msra.gmra.mrb[64].mxu0 %v3374_v50 }
 0xa88   : > { %v4057_v33 = vpop.f32.mrb[64].mxu0 }
 0xa89   : > { %v4058_v34 = vpop.f32.mrb[65].mxu0 }
 0xa8a   : > { %v4059_v7 = vadd.f32 %v4058_v34, %v4057_v33  ;;  %v4060_v63 = vpop.f32.mrb[66].mxu0 }
 0xa8b   : > { %v4061_v0 = vpop.f32.mrb[67].mxu0 }
 0xa8c   : > { %v3513_v4 = vadd.f32 %v4059_v7, %v3934_v32  ;;  %v4062_v6 = vadd.f32 %v4061_v0, %v4060_v63 }
 0xa8e   : > { %v3516_v55 = vadd.f32 %v4062_v6, %v3934_v32  ;;  %v3519_v9 = vadd.f32 %v3513_v4, %v3183_v30 }
 0xa90   : > { %3523 = vadd.xlane.f32.xlu1 %v3519_v9  ;;  %v3520_v61 = vadd.f32 %v3516_v55, %v3184_v43 }
 0xa92   : > { %3525 = vadd.xlane.f32.xlu0 %v3520_v61 }
 0xb1d   : > { %v3524_v15 = vpop.xlane.xlu1 %3523 }
 0xb1e   : > { %v3527_v10 = vmul.f32 0.0078125, %v3524_v15 }
 0xb1f   : > { %v3526_v13 = vpop.xlane.xlu0 %3525 }
 0xb20   : > { %v3529_v11 = vsub.f32 %v3519_v9, %v3527_v10  ;;  %v3528_v12 = vmul.f32 0.0078125, %v3526_v13 }
 0xb22   : > { %v3530_v1 = vsub.f32 %v3520_v61, %v3528_v12  ;;  %v3531_v17 = vmul.f32 %v3529_v11, %v3529_v11 }
 0xb24   : > { %3533 = vadd.xlane.f32.xlu1 %v3531_v17  ;;  %v3532_v14 = vmul.f32 %v3530_v1, %v3530_v1 }
 0xb26   : > { %3535 = vadd.xlane.f32.xlu0 %v3532_v14 }
 0xbb1   : > { %v3534_v35 = vpop.xlane.xlu1 %3533 }
 0xbb2   : > { %v3537_v16 = vmul.f32 0.0078125, %v3534_v35 }
 0xbb3   : > { %v3536_v19 = vpop.xlane.xlu0 %3535 }
 0xbb4   : > { %v3539_v21 = vadd.f32 1e-05, %v3537_v16  ;;  %v3538_v47 = vmul.f32 0.0078125, %v3536_v19 }
 0xbb6   : > { %4599 = vrsqrt.f32 %v3539_v21  ;;  %v3540_v31 = vadd.f32 1e-05, %v3538_v47 }
 0xbb8   : > { %4601 = vrsqrt.f32 %v3540_v31 }
 0xbc0   : > { %v4600_v22 = vpop.eup %4599 }
 0xbc1   : > { %v3543_v28 = vmul.f32 %v4600_v22, %v3529_v11 }
 0xbc2   : > { %v4602_v27 = vpop.eup %4601 }
 0xbc3   : > { %v3551_v24 = vmul.f32 %v3951_v2, %v3543_v28  ;;  %v3544_v23 = vmul.f32 %v4602_v27, %v3530_v1 }
 0xbc5   : > { %v3559_v56 = vadd.f32 %v3952_v26, %v3551_v24  ;;  %v3552_v25 = vmul.f32 %v3951_v2, %v3544_v23 }
 0xbc7   : > { %3561 = vst [vmem:[%s6327_s15] sm:$0xff] %v3559_v56  ;;  %v3560_v8 = vadd.f32 %v3952_v26, %v3552_v25 }
 0xbc9   : > { %3562 = vst [vmem:[%s6327_s15 + $0x8] sm:$0xff] %v3560_v8 }
 0xbca PF: > { %s6333_s28 = sld [smem:[#allocation30_spill]]  ;;  %s6334_s13 = sld [smem:[#allocation28_spill]] }
 0xbcb   : > { %s6335_s27 = sld [smem:[#allocation31_spill]]  ;;  %s6336_s25 = smov %s5015_s26 }
 0xbd0   : > { %p41_p8 = scmp.ge.s32.totalorder %s6333_s28, 4   ;;  %s6337_s26 = smov %s6334_s13 }
 0xbd2   :  { %43 = sbr.rel (!%p41_p8) target bundleno = 21 (0x15), region = 245 }
 0xbd9   :  { %3574 = vsyncpa [#allocation3], 1 }
 0xbda   :  { %3576 = vsyncpa [#allocation3 + $0x1], 1 }
 0xbdb   :  { %3577 = vsyncpa [#allocation5], 1 }
 0xbdc   :  { %3579 = vsyncpa [#allocation5 + $0x1], 1 }
 0xbdd   :  { %3580 = vsyncpa [#allocation8], 1 }
 0xbde   :  { %3582 = vsyncpa [#allocation8 + $0x1], 1 }
 0xbdf   :  { %3583 = vsyncpa [#allocation11], 1 }
 0xbe0   :  { %3585 = vsyncpa [#allocation11 + $0x1], 1 }
 0xbe1   :  { %3586 = vsyncpa [#allocation14], 1 }
 0xbe2   :  { %3588 = vsyncpa [#allocation14 + $0x1], 1 }
 0xbe3   :  { %3589 = vsyncpa [#allocation17], 1 }
 0xbe4   :  { %3591 = vsyncpa [#allocation17 + $0x1], 1 }
 0xbe5   :  { %3592 = vsyncpa [#allocation20], 1 }
 0xbe6   :  { %3594 = vsyncpa [#allocation20 + $0x1], 1 }

// kernel: spectrogram_transformer_forward.3
= control target key start
LH: loop header
LB: loop body
LE: loop exit
PB: predicated region body
PF: predicated region fallthrough
CT: control target
= control target key end

     0   :  { %s10765_s0 = inlined_call_operand.vmem [shape: f32[2,8,128], index: 0, kind: input, shape index: {}]   ;;  %s10766_s1 = inlined_call_operand.vmem [shape: f32[2,8,128], index: 1, kind: input, shape index: {}]   ;;  %s10767_s2 = inlined_call_operand.vmem [shape: bf16[2,128,384], index: 2, kind: input, shape index: {}]   ;;  %s10768_s3 = inlined_call_operand.hbm [shape: f32[2,1,384], index: 3, kind: input, shape index: {}]   ;;  %s10769_s4 = inlined_call_operand.hbm [shape: bf16[2,128,128], index: 4, kind: input, shape index: {}]   ;;  %s10770_s5 = inlined_call_operand.hbm [shape: f32[2,1,128], index: 5, kind: input, shape index: {}]   ;;  %s10771_s6 = inlined_call_operand.hbm [shape: f32[2,1,128], index: 6, kind: input, shape index: {}]   ;;  %s10772_s7 = inlined_call_operand.hbm [shape: f32[2,1,128], index: 7, kind: input, shape index: {}]   ;;  %s10773_s8 = inlined_call_operand.hbm [shape: bf16[2,128,128], index: 8, kind: input, shape index: {}]   ;;  %s10774_s9 = inlined_call_operand.hbm [shape: f32[2,1,128], index: 9, kind: input, shape index: {}]   ;;  %s10775_s10 = inlined_call_operand.vmem [shape: bf16[2,128,256], index: 10, kind: input, shape index: {}]   ;;  %s10776_s11 = inlined_call_operand.hbm [shape: f32[2,1,256], index: 11, kind: input, shape index: {}]   ;;  %s10777_s12 = inlined_call_operand.hbm [shape: bf16[2,128,128], index: 12, kind: input, shape index: {}]   ;;  %s10778_s13 = inlined_call_operand.hbm [shape: f32[2,1,128], index: 13, kind: input, shape index: {}]   ;;  %s10779_s14 = inlined_call_operand.hbm [shape: f32[2,1,128], index: 14, kind: input, shape index: {}]   ;;  %s10780_s15 = inlined_call_operand.hbm [shape: f32[2,1,128], index: 15, kind: input, shape index: {}]   ;;  %s10781_s16 = inlined_call_operand.vmem [shape: bf16[2,128,256], index: 16, kind: input, shape index: {}]   ;;  %s10782_s17 = inlined_call_operand.hbm [shape: f32[2,1,256], index: 17, kind: input, shape index: {}]   ;;  %s10783_s18 = inlined_call_operand.vmem [shape: bf16[2,256,128], index: 18, kind: input, shape index: {}]   ;;  %s10784_s19 = inlined_call_operand.hbm [shape: f32[2,1,128], index: 19, kind: input, shape index: {}]   ;;  %s10785_s20 = inlined_call_operand.hbm [shape: f32[2,1,128], index: 20, kind: input, shape index: {}]   ;;  %s10786_s21 = inlined_call_operand.hbm [shape: f32[2,1,128], index: 21, kind: input, shape index: {}]   ;;  %s10787_s22 = inlined_call_operand.vmem [shape: bf16[128,128], index: 22, kind: input, shape index: {}]   ;;  %s10788_s23 = inlined_call_operand.vmem [shape: f32[1,128], index: 23, kind: input, shape index: {}]   ;;  %s10789_s24 = inlined_call_operand.vmem [shape: f32[2,8,128], index: 24, kind: output, shape index: {}]  }
   0x1   :  { %10829 = sst [smem:[#allocation42_spill]] %s10765_s0 }
   0x2   :  { %10830 = sst [smem:[#allocation43_spill]] %s10766_s1 }
   0x3   :  { %10831 = sst [smem:[#allocation44_spill]] %s10767_s2 }
   0x4   :  { %10832 = sst [smem:[#allocation45_spill]] %s10768_s3 }
   0x5   :  { %10833 = sst [smem:[#allocation46_spill]] %s10769_s4 }
   0x6   :  { %10834 = sst [smem:[#allocation47_spill]] %s10770_s5 }
   0x7   :  { %10835 = sst [smem:[#allocation48_spill]] %s10771_s6 }
   0x8   :  { %10836 = sst [smem:[#allocation49_spill]] %s10772_s7 }
   0x9   :  { %10837 = sst [smem:[#allocation50_spill]] %s10773_s8 }
   0xa   :  { %10838 = sst [smem:[#allocation51_spill]] %s10774_s9 }
   0xb   :  { %10839 = sst [smem:[#allocation52_spill]] %s10775_s10 }
   0xc   :  { %10840 = sst [smem:[#allocation53_spill]] %s10776_s11 }
   0xd   :  { %10841 = sst [smem:[#allocation54_spill]] %s10777_s12 }
   0xe   :  { %10842 = sst [smem:[#allocation55_spill]] %s10778_s13 }
   0xf   :  { %10843 = sst [smem:[#allocation56_spill]] %s10779_s14 }
  0x10   :  { %10844 = sst [smem:[#allocation57_spill]] %s10780_s15 }
  0x11   :  { %10845 = sst [smem:[#allocation58_spill]] %s10781_s16 }
  0x12   :  { %10846 = sst [smem:[#allocation59_spill]] %s10782_s17 }
  0x13   :  { %10847 = sst [smem:[#allocation60_spill]] %s10783_s18 }
  0x14   :  { %10848 = sst [smem:[#allocation61_spill]] %s10787_s22 }
  0x15   :  { %10849 = sst [smem:[#allocation62_spill]] %s10788_s23 }
  0x16   :  { %10850 = sst [smem:[#allocation63_spill]] %s10789_s24 }
  0x17   :  { %29 = vsyncpa [#allocation3], 0 }
  0x18   :  { %31 = vsyncpa [#allocation3 + $0x1], 0 }
  0x19   :  { %32 = vsyncpa [#allocation5], 0 }
  0x1a   :  { %34 = vsyncpa [#allocation5 + $0x1], 0 }
  0x1b   :  { %35 = vsyncpa [#allocation8], 0 }
  0x1c   :  { %37 = vsyncpa [#allocation8 + $0x1], 0 }
  0x1d   :  { %38 = vsyncpa [#allocation11], 0 }
  0x1e   :  { %40 = vsyncpa [#allocation11 + $0x1], 0 }
  0x1f   :  { %41 = vsyncpa [#allocation14], 0 }
  0x20   :  { %43 = vsyncpa [#allocation14 + $0x1], 0 }
  0x21   :  { %44 = vsyncpa [#allocation17], 0 }
  0x22   :  { %46 = vsyncpa [#allocation17 + $0x1], 0 }
  0x23   :  { %47 = vsyncpa [#allocation20], 0 }
  0x24   :  { %49 = vsyncpa [#allocation20 + $0x1], 0 }
  0x25   :  { %50 = vsyncpa [#allocation23], 0 }
  0x26   :  { %52 = vsyncpa [#allocation23 + $0x1], 0 }
  0x27   :  { %53 = vsyncpa [#allocation26], 0 }
  0x28   :  { %55 = vsyncpa [#allocation26 + $0x1], 0  ;;  %s8921_s5 = smov 0   ;;  %s8923_s26 = smov 0  }
  0x29   :  { %s8925_s27 = smov 0   ;;  %s8927_s28 = smov 0  }
  0x2a LB: > { %10851 = sst [smem:[#allocation36_spill]] %s8756_s26  ;;  %s8940_s6 = sadd.s32 4294967295, %s8764_s28   ;;  %s8764_s28 = sphi %s8927_s28, %s10911_s28   ;;  %s8760_s27 = sphi %s8925_s27, %s10914_s27   ;;  %s8756_s26 = sphi %s8923_s26, %s10913_s26   ;;  %s8752_s5 = sphi %s8921_s5, %s10912_s5  }
  0x2b   : > { %10852 = sst [smem:[#allocation37_spill]] %s8760_s27  ;;  %s8943_s2 = sadd.s32 1, %s8764_s28  }
  0x2c   : > { %10853 = sst [smem:[#allocation38_spill]] %s8940_s6  ;;  %s133_s29 = ssub.s32 %s8764_s28, %s8943_s2 }
  0x2d   : > { %10854 = sst [smem:[#allocation39_spill]] %s8943_s2  ;;  %s136_s0 = sadd.s32 1, %s8760_s27 }
  0x2e   : > { %p134_p0 = scmp.eq.s32.totalorder %s133_s29, 0  ;;  %p143_p1 = scmp.ne.s32.totalorder %s8760_s27, %s8756_s26 }
  0x2f   : > { %p144_p2 = scmp.eq.s32.totalorder %s8764_s28, 0  ;;  %p149_p3 = scmp.ne.s32.totalorder %s8756_s26, %s8752_s5 }
  0x30   : > { %s8953_s7 = scalar_select %p134_p0, %s8760_s27, %s136_s0  }
  0x31   : > { %p8955_p4 = por %p144_p2, %p143_p1  ;;  %p150_p5 = scmp.eq.s32.totalorder %s8940_s6, 0 }
  0x32   : > { %10855 = sst [smem:[#allocation40_spill]] %s8953_s7  ;;  %p6908_p7 = scmp.ge.s32.totalorder %s8764_s28, 2 }
  0x33   : > { %p8960_p6 = por %p150_p5, %p149_p3  ;;  %s8966_s25 = sand.u32 (!%p6908_p7), 1, %s8760_s27  }
  0x34   : > { %712 = sbr.rel (%p6908_p7) target bundleno = 494 (0x1ee), region = 32  ;;  %s8969_s8 = sand.u32 (!%p6908_p7), 1, %s8764_s28  }
  0x35   : > { %s10857_s3 = scalar_select %p8960_p6, 1, 0 }
  0x36   : > { %s8972_s4 = sshll.u32 (!%p6908_p7), %s8966_s25, 6  ;;  %s8975_s1 = sshll.u32 (!%p6908_p7), %s8764_s28, 10 }
  0x37   : > { %10858 = sst [smem:[#allocation41_spill]] %s10857_s3  ;;  %s10859_s0 = sld [smem:[#allocation46_spill]] (!%p6908_p7) }
  0x38   : > { %s747_s27 = scalar_lea.vmem (!%p6908_p7), [#allocation4], %s8972_s4  ;;  %s8987_s23 = sshll.u32 (!%p6908_p7), %s8764_s28, 4 }
  0x39   : > { %s754_s2 = sshll.u32 (!%p6908_p7), %s747_s27, 4  ;;  %s10811_s22 = scalar_lea.sflag (!%p6908_p7), [#allocation5], %s8969_s8  ;;  %s8984_s2 = int_to_ptr.vmem [resolvable:$true] %s754_s2 }
  0x3d   : > { %s8981_s7 = scalar_lea.hbm %s10859_s0, %s8975_s1  ;;  %s8254_s29 = scalar_lea.hbm %s10859_s0, 2048 }
  0x3e   : > { %s8250_s24 = scalar_lea.hbm %s8981_s7, 1024  ;;  %p8255_p11 = scmp.lt.u32.totalorder %s8981_s7, %s10859_s0 }
  0x3f   : > { %p8251_p8 = scmp.ne.s32.totalorder %s8981_s7, %s8250_s24  ;;  %p8256_p12 = scmp.lt.u32.totalorder %s8254_s29, %s8250_s24 }
  0x40   : > { %p8258_p0 = scmp.lt.u32.totalorder %s8250_s24, %s8981_s7 }
  0x41   : > { %p8252_p9 = pnand %p8251_p8, %p8955_p4  ;;  %p8257_p13 = por %p8256_p12, %p8255_p11 }
  0x43   : > { %p8253_p10 = pneg %p8252_p9  ;;  %p8259_p1 = por %p8258_p0, %p8257_p13 }
  0x45   : > { %p8260_p2 = pnand %p8259_p1, %p8253_p10 }
  0x47   : > { %8263 = shalt.err (!%p8260_p2)
}
  0x48   : > { %s8264_s27 = scalar_lea.vmem %s8984_s2, 1024  ;;  %s8766_s18 = smov [#allocation4]  }
  0x49   : > { %p8265_p3 = scmp.ne.s32.totalorder %s8984_s2, %s8264_s27  ;;  %s8268_s5 = sshll.u32 %s8766_s18, 4  ;;  %s8269_s5 = int_to_ptr.vmem [resolvable:$false] %s8268_s5 }
  0x4a   : > { %s8270_s10 = scalar_lea.vmem %s8269_s5, 2048  ;;  %p8271_p8 = scmp.lt.s32.totalorder %s8984_s2, %s8269_s5 }
  0x4b   : > { %p8266_p5 = pnand %p8265_p3, %p8955_p4  ;;  %p8272_p9 = scmp.lt.s32.totalorder %s8270_s10, %s8264_s27 }
  0x4d   : > { %p8267_p7 = pneg %p8266_p5  ;;  %p8273_p11 = por %p8272_p9, %p8271_p8 }
  0x4f   : > { %p8274_p12 = pnand %p8273_p11, %p8267_p7 }
  0x51   : > { %8277 = shalt.err (!%p8274_p12)
}
  0x52   : > { %s10812_s16 = smov 64   ;;  %s10820_s24 = smov 4  }
  0x53   : > { %7823 = dma.hbm_to_vmem [thread:$0]  (%p8955_p4), %s8981_s7, 1024, %s8984_s2, %s10811_s22, %s10812_s16, %s10812_s16, %s10820_s24  }
  0x54   : > { %s10860_s18 = sld [smem:[#allocation48_spill]]  ;;  %s784_s10 = scalar_lea.vmem [#allocation7], %s8966_s25 }
  0x55   : > { %s791_s0 = sshll.u32 %s784_s10, 4  ;;  %s10815_s6 = scalar_lea.sflag [#allocation8], %s8969_s8  ;;  %s792_s0 = int_to_ptr.vmem [resolvable:$true] %s791_s0 }
  0x5a   : > { %s9020_s5 = scalar_lea.hbm %s10860_s18, %s8987_s23  ;;  %s8282_s7 = scalar_lea.hbm %s10860_s18, 32 }
  0x5b   : > { %s8278_s3 = scalar_lea.hbm %s9020_s5, 16  ;;  %p8283_p1 = scmp.lt.u32.totalorder %s9020_s5, %s10860_s18 }
  0x5c   : > { %p8279_p10 = scmp.ne.s32.totalorder %s9020_s5, %s8278_s3  ;;  %p8284_p2 = scmp.lt.u32.totalorder %s8282_s7, %s8278_s3 }
  0x5d   : > { %p8286_p5 = scmp.lt.u32.totalorder %s8278_s3, %s9020_s5 }
  0x5e   : > { %p8280_p13 = pnand %p8279_p10, %p8955_p4  ;;  %p8285_p3 = por %p8284_p2, %p8283_p1 }
  0x60   : > { %p8281_p0 = pneg %p8280_p13  ;;  %p8287_p7 = por %p8286_p5, %p8285_p3 }
  0x62   : > { %p8288_p8 = pnand %p8287_p7, %p8281_p0 }
  0x64   : > { %8291 = shalt.err (!%p8288_p8)
}
  0x65   : > { %s8292_s10 = scalar_lea.vmem %s792_s0, 16  ;;  %s8769_s22 = smov [#allocation7]  }
  0x66   : > { %p8293_p9 = scmp.ne.s32.totalorder %s792_s0, %s8292_s10  ;;  %s8296_s16 = sshll.u32 %s8769_s22, 4  ;;  %s8297_s16 = int_to_ptr.vmem [resolvable:$false] %s8296_s16 }
  0x67   : > { %s8298_s26 = scalar_lea.vmem %s8297_s16, 32  ;;  %p8299_p10 = scmp.lt.s32.totalorder %s792_s0, %s8297_s16 }
  0x68   : > { %p8294_p11 = pnand %p8293_p9, %p8955_p4  ;;  %p8300_p13 = scmp.lt.s32.totalorder %s8298_s26, %s8292_s10 }
  0x6a   : > { %p8295_p12 = pneg %p8294_p11  ;;  %p8301_p6 = por %p8300_p13, %p8299_p10 }
  0x6c   : > { %p8302_p1 = pnand %p8301_p6, %p8295_p12 }
  0x6e   : > { %8305 = shalt.err (!%p8302_p1)
}
  0x6f   : > { %7825 = dma.hbm_to_vmem [thread:$0]  (%p8955_p4), %s9020_s5, 16, %s792_s0, %s10815_s6  }
  0x70   : > { %s10861_s2 = sld [smem:[#allocation50_spill]]  ;;  %s819_s16 = scalar_lea.vmem [#allocation10], %s8972_s4 }
  0x71   : > { %s826_s29 = sshll.u32 %s819_s16, 4  ;;  %s10819_s27 = sshll.u32 %s8966_s25, 1  ;;  %s9050_s29 = int_to_ptr.vmem [resolvable:$true] %s826_s29 }
  0x72   : > { %s10824_s10 = scalar_lea.sflag [#allocation11], %s8969_s8 }
  0x76   : > { %s9047_s7 = scalar_lea.hbm %s10861_s2, %s8975_s1  ;;  %s8310_s3 = scalar_lea.hbm %s10861_s2, 2048 }
  0x77   : > { %s8306_s26 = scalar_lea.hbm %s9047_s7, 1024  ;;  %p8311_p3 = scmp.lt.u32.totalorder %s9047_s7, %s10861_s2 }
  0x78   : > { %p8307_p6 = scmp.ne.s32.totalorder %s9047_s7, %s8306_s26  ;;  %p8312_p5 = scmp.lt.u32.totalorder %s8310_s3, %s8306_s26 }
  0x79   : > { %p8314_p8 = scmp.lt.u32.totalorder %s8306_s26, %s9047_s7 }
  0x7a   : > { %p8308_p0 = pnand %p8307_p6, %p8955_p4  ;;  %p8313_p7 = por %p8312_p5, %p8311_p3 }
  0x7c   : > { %p8309_p2 = pneg %p8308_p0  ;;  %p8315_p9 = por %p8314_p8, %p8313_p7 }
  0x7e   : > { %p8316_p11 = pnand %p8315_p9, %p8309_p2 }
  0x80   : > { %8319 = shalt.err (!%p8316_p11)
}
  0x81   : > { %s8320_s16 = scalar_lea.vmem %s9050_s29, 1024  ;;  %s8770_s0 = smov [#allocation10]  }
  0x82   : > { %p8321_p12 = scmp.ne.s32.totalorder %s9050_s29, %s8320_s16  ;;  %s8324_s5 = sshll.u32 %s8770_s0, 4  ;;  %s8325_s5 = int_to_ptr.vmem [resolvable:$false] %s8324_s5 }
  0x83   : > { %s8326_s6 = scalar_lea.vmem %s8325_s5, 2048  ;;  %p8327_p1 = scmp.lt.s32.totalorder %s9050_s29, %s8325_s5 }
  0x84   : > { %p8322_p10 = pnand %p8321_p12, %p8955_p4  ;;  %p8328_p6 = scmp.lt.s32.totalorder %s8326_s6, %s8320_s16 }
  0x86   : > { %p8323_p13 = pneg %p8322_p10  ;;  %p8329_p0 = por %p8328_p6, %p8327_p1 }
  0x88   : > { %p8330_p3 = pnand %p8329_p0, %p8323_p13 }
  0x8a   : > { %8333 = shalt.err (!%p8330_p3)
}
  0x8b   : > { %s10862_s26 = smov 64   ;;  %s10818_s3 = sshll.u32 %s8764_s28, 5 }
  0x8c   : > { %7827 = dma.hbm_to_vmem [thread:$0]  (%p8955_p4), %s9047_s7, 1024, %s9050_s29, %s10824_s10, %s10862_s26, %s10862_s26, %s10820_s24  }
  0x8d   : > { %s10863_s11 = sld [smem:[#allocation53_spill]]  ;;  %s865_s5 = scalar_lea.vmem [#allocation13], %s10819_s27 }
  0x8e   : > { %s873_s6 = sshll.u32 %s865_s5, 4  ;;  %s10821_s2 = scalar_lea.sflag [#allocation14], %s8969_s8  ;;  %s874_s6 = int_to_ptr.vmem [resolvable:$true] %s873_s6 }
  0x93   : > { %s9086_s0 = scalar_lea.hbm %s10863_s11, %s10818_s3  ;;  %s8338_s22 = scalar_lea.hbm %s10863_s11, 64 }
  0x94   : > { %s8334_s18 = scalar_lea.hbm %s9086_s0, 32  ;;  %p8339_p8 = scmp.lt.u32.totalorder %s9086_s0, %s10863_s11 }
  0x95   : > { %p8335_p2 = scmp.ne.s32.totalorder %s9086_s0, %s8334_s18  ;;  %p8340_p9 = scmp.lt.u32.totalorder %s8338_s22, %s8334_s18 }
  0x96   : > { %p8342_p12 = scmp.lt.u32.totalorder %s8334_s18, %s9086_s0 }
  0x97   : > { %p8336_p5 = pnand %p8335_p2, %p8955_p4  ;;  %p8341_p11 = por %p8340_p9, %p8339_p8 }
  0x99   : > { %p8337_p7 = pneg %p8336_p5  ;;  %p8343_p10 = por %p8342_p12, %p8341_p11 }
  0x9b   : > { %p8344_p13 = pnand %p8343_p10, %p8337_p7 }
  0x9d   : > { %8347 = shalt.err (!%p8344_p13)
}
  0x9e   : > { %s8348_s5 = scalar_lea.vmem %s874_s6, 32  ;;  %s8771_s27 = smov [#allocation13]  }
  0x9f   : > { %p8349_p1 = scmp.ne.s32.totalorder %s874_s6, %s8348_s5  ;;  %s8352_s24 = sshll.u32 %s8771_s27, 4  ;;  %s8353_s24 = int_to_ptr.vmem [resolvable:$false] %s8352_s24 }
  0xa0   : > { %s8354_s7 = scalar_lea.vmem %s8353_s24, 64  ;;  %p8355_p3 = scmp.lt.s32.totalorder %s874_s6, %s8353_s24 }
  0xa1   : > { %p8350_p6 = pnand %p8349_p1, %p8955_p4  ;;  %p8356_p2 = scmp.lt.s32.totalorder %s8354_s7, %s8348_s5 }
  0xa3   : > { %p8351_p0 = pneg %p8350_p6  ;;  %p8357_p5 = por %p8356_p2, %p8355_p3 }
  0xa5   : > { %p8358_p8 = pnand %p8357_p5, %p8351_p0 }
  0xa7   : > { %8361 = shalt.err (!%p8358_p8)
}
  0xa8   : > { %7829 = dma.hbm_to_vmem [thread:$0]  (%p8955_p4), %s9086_s0, 32, %s874_s6, %s10821_s2  }
  0xa9   : > { %s10864_s13 = sld [smem:[#allocation55_spill]]  ;;  %s904_s24 = scalar_lea.vmem [#allocation16], %s8966_s25 }
  0xaa   : > { %s911_s29 = sshll.u32 %s904_s24, 4  ;;  %s10822_s22 = scalar_lea.sflag [#allocation17], %s8969_s8  ;;  %s912_s29 = int_to_ptr.vmem [resolvable:$true] %s911_s29 }
  0xaf   : > { %s9114_s27 = scalar_lea.hbm %s10864_s13, %s8987_s23  ;;  %s8366_s6 = scalar_lea.hbm %s10864_s13, 32 }
  0xb0   : > { %s8362_s16 = scalar_lea.hbm %s9114_s27, 16  ;;  %p8367_p12 = scmp.lt.u32.totalorder %s9114_s27, %s10864_s13 }
  0xb1   : > { %p8363_p7 = scmp.ne.s32.totalorder %s9114_s27, %s8362_s16  ;;  %p8368_p10 = scmp.lt.u32.totalorder %s8366_s6, %s8362_s16 }
  0xb2   : > { %p8370_p1 = scmp.lt.u32.totalorder %s8362_s16, %s9114_s27 }
  0xb3   : > { %p8364_p9 = pnand %p8363_p7, %p8955_p4  ;;  %p8369_p13 = por %p8368_p10, %p8367_p12 }
  0xb5   : > { %p8365_p11 = pneg %p8364_p9  ;;  %p8371_p6 = por %p8370_p1, %p8369_p13 }
  0xb7   : > { %p8372_p0 = pnand %p8371_p6, %p8365_p11 }
  0xb9   : > { %8375 = shalt.err (!%p8372_p0)
}
  0xba   : > { %s8376_s3 = scalar_lea.vmem %s912_s29, 16  ;;  %s8772_s24 = smov [#allocation16]  }
  0xbb   : > { %p8377_p3 = scmp.ne.s32.totalorder %s912_s29, %s8376_s3  ;;  %s8380_s2 = sshll.u32 %s8772_s24, 4  ;;  %s8381_s2 = int_to_ptr.vmem [resolvable:$false] %s8380_s2 }
  0xbc   : > { %s8382_s5 = scalar_lea.vmem %s8381_s2, 32  ;;  %p8383_p8 = scmp.lt.s32.totalorder %s912_s29, %s8381_s2 }
  0xbd   : > { %p8378_p2 = pnand %p8377_p3, %p8955_p4  ;;  %p8384_p7 = scmp.lt.s32.totalorder %s8382_s5, %s8376_s3 }
  0xbf   : > { %p8379_p5 = pneg %p8378_p2  ;;  %p8385_p9 = por %p8384_p7, %p8383_p8 }
  0xc1   : > { %p8386_p10 = pnand %p8385_p9, %p8379_p5 }
  0xc3   : > { %8389 = shalt.err (!%p8386_p10)
}
  0xc4   : > { %7831 = dma.hbm_to_vmem [thread:$0]  (%p8955_p4), %s9114_s27, 16, %s912_s29, %s10822_s22  }
  0xc5   : > { %s10865_s15 = sld [smem:[#allocation57_spill]]  ;;  %s938_s2 = scalar_lea.vmem [#allocation19], %s8966_s25 }
  0xc6   : > { %s945_s7 = sshll.u32 %s938_s2, 4  ;;  %s10823_s18 = scalar_lea.sflag [#allocation20], %s8969_s8  ;;  %s946_s7 = int_to_ptr.vmem [resolvable:$true] %s945_s7 }
  0xcb   : > { %s9141_s6 = scalar_lea.hbm %s10865_s15, %s8987_s23  ;;  %s8394_s29 = scalar_lea.hbm %s10865_s15, 32 }
  0xcc   : > { %s8390_s3 = scalar_lea.hbm %s9141_s6, 16  ;;  %p8395_p1 = scmp.lt.u32.totalorder %s9141_s6, %s10865_s15 }
  0xcd   : > { %p8391_p11 = scmp.ne.s32.totalorder %s9141_s6, %s8390_s3  ;;  %p8396_p6 = scmp.lt.u32.totalorder %s8394_s29, %s8390_s3 }
  0xce   : > { %p8398_p3 = scmp.lt.u32.totalorder %s8390_s3, %s9141_s6 }
  0xcf   : > { %p8392_p12 = pnand %p8391_p11, %p8955_p4  ;;  %p8397_p0 = por %p8396_p6, %p8395_p1 }
  0xd1   : > { %p8393_p13 = pneg %p8392_p12  ;;  %p8399_p2 = por %p8398_p3, %p8397_p0 }
  0xd3   : > { %p8400_p5 = pnand %p8399_p2, %p8393_p13 }
  0xd5   : > { %8403 = shalt.err (!%p8400_p5)
}
  0xd6   : > { %s8404_s0 = scalar_lea.vmem %s946_s7, 16  ;;  %s8773_s2 = smov [#allocation19]  }
  0xd7   : > { %p8405_p8 = scmp.ne.s32.totalorder %s946_s7, %s8404_s0  ;;  %s8408_s22 = sshll.u32 %s8773_s2, 4  ;;  %s8409_s22 = int_to_ptr.vmem [resolvable:$false] %s8408_s22 }
  0xd8   : > { %s8410_s24 = scalar_lea.vmem %s8409_s22, 32  ;;  %p8411_p10 = scmp.lt.s32.totalorder %s946_s7, %s8409_s22 }
  0xd9   : > { %p8406_p7 = pnand %p8405_p8, %p8955_p4  ;;  %p8412_p11 = scmp.lt.s32.totalorder %s8410_s24, %s8404_s0 }
  0xdb   : > { %p8407_p9 = pneg %p8406_p7  ;;  %p8413_p12 = por %p8412_p11, %p8411_p10 }
  0xdd   : > { %p8414_p1 = pnand %p8413_p12, %p8407_p9 }
  0xdf   : > { %8417 = shalt.err (!%p8414_p1)
}
  0xe0   : > { %7833 = dma.hbm_to_vmem [thread:$0]  (%p8955_p4), %s9141_s6, 16, %s946_s7, %s10823_s18  }
  0xe1   : > { %s9168_s29 = scalar_lea.hbm %s10784_s19, %s8987_s23  ;;  %s990_s22 = scalar_lea.vmem [#allocation22], %s8966_s25 }
  0xe2   : > { %s997_s5 = sshll.u32 %s990_s22, 4  ;;  %s7818_s16 = smul.u32 3, %s8966_s25  ;;  %s9171_s5 = int_to_ptr.vmem [resolvable:$true] %s997_s5 }
  0xe3   : > { %s10825_s0 = scalar_lea.sflag [#allocation23], %s8969_s8  ;;  %s8418_s2 = scalar_lea.hbm %s9168_s29, 16 }
  0xe4   : > { %p8419_p13 = scmp.ne.s32.totalorder %s9168_s29, %s8418_s2  ;;  %s8422_s24 = scalar_lea.hbm %s10784_s19, 32 }
  0xe5   : > { %p8423_p3 = scmp.lt.u32.totalorder %s9168_s29, %s10784_s19  ;;  %p8424_p2 = scmp.lt.u32.totalorder %s8422_s24, %s8418_s2 }
  0xe6   : > { %p8420_p6 = pnand %p8419_p13, %p8955_p4  ;;  %p8426_p8 = scmp.lt.u32.totalorder %s8418_s2, %s9168_s29 }
  0xe7   : > { %p8425_p5 = por %p8424_p2, %p8423_p3 }
  0xe8   : > { %p8421_p0 = pneg %p8420_p6 }
  0xe9   : > { %p8427_p7 = por %p8426_p8, %p8425_p5 }
  0xeb   : > { %p8428_p9 = pnand %p8427_p7, %p8421_p0 }
  0xed   : > { %8431 = shalt.err (!%p8428_p9)
}
  0xee   : > { %s8432_s22 = scalar_lea.vmem %s9171_s5, 16  ;;  %s8774_s6 = smov [#allocation22]  }
  0xef   : > { %p8433_p10 = scmp.ne.s32.totalorder %s9171_s5, %s8432_s22  ;;  %s8436_s7 = sshll.u32 %s8774_s6, 4  ;;  %s8437_s7 = int_to_ptr.vmem [resolvable:$false] %s8436_s7 }
  0xf0   : > { %s8438_s3 = scalar_lea.vmem %s8437_s7, 32  ;;  %p8439_p1 = scmp.lt.s32.totalorder %s9171_s5, %s8437_s7 }
  0xf1   : > { %p8434_p11 = pnand %p8433_p10, %p8955_p4  ;;  %p8440_p13 = scmp.lt.s32.totalorder %s8438_s3, %s8432_s22 }
  0xf3   : > { %p8435_p12 = pneg %p8434_p11  ;;  %p8441_p6 = por %p8440_p13, %p8439_p1 }
  0xf5   : > { %p8442_p3 = pnand %p8441_p6, %p8435_p12 }
  0xf7   : > { %8445 = shalt.err (!%p8442_p3)
}
  0xf8   : > { %7835 = dma.hbm_to_vmem [thread:$0]  (%p8955_p4), %s9168_s29, 16, %s9171_s5, %s10825_s0  }
  0xf9   : > { %s7819_s2 = smul.u32 48, %s8764_s28  ;;  %s728_s24 = scalar_lea.vmem [#allocation2], %s7818_s16 }
  0xfa   : > { %s736_s27 = sshll.u32 %s728_s24, 4  ;;  %s10866_s7 = sld [smem:[#allocation45_spill]]  ;;  %s737_s27 = int_to_ptr.vmem [resolvable:$true] %s736_s27 }
  0xfb   : > { %s725_s18 = scalar_lea.sflag [#allocation3], %s8966_s25 }
 0x100   : > { %s9204_s3 = scalar_lea.hbm %s10866_s7, %s7819_s2  ;;  %s8450_s16 = scalar_lea.hbm %s10866_s7, 96 }
 0x101   : > { %s8446_s10 = scalar_lea.hbm %s9204_s3, 48  ;;  %p8451_p8 = scmp.lt.u32.totalorder %s9204_s3, %s10866_s7 }
 0x102   : > { %p8447_p0 = scmp.ne.s32.totalorder %s9204_s3, %s8446_s10  ;;  %p8452_p7 = scmp.lt.u32.totalorder %s8450_s16, %s8446_s10 }
 0x103   : > { %p8454_p10 = scmp.lt.u32.totalorder %s8446_s10, %s9204_s3 }
 0x104   : > { %p8448_p2 = pnand %p8447_p0, %p8955_p4  ;;  %p8453_p9 = por %p8452_p7, %p8451_p8 }
 0x106   : > { %p8449_p5 = pneg %p8448_p2  ;;  %p8455_p11 = por %p8454_p10, %p8453_p9 }
 0x108   : > { %p8456_p12 = pnand %p8455_p11, %p8449_p5 }
 0x10a   : > { %8459 = shalt.err (!%p8456_p12)
}
 0x10b   : > { %s8460_s2 = scalar_lea.vmem %s737_s27, 48  ;;  %s8775_s6 = smov [#allocation2]  }
 0x10c   : > { %p8461_p1 = scmp.ne.s32.totalorder %s737_s27, %s8460_s2  ;;  %s8464_s22 = sshll.u32 %s8775_s6, 4  ;;  %s8465_s22 = int_to_ptr.vmem [resolvable:$false] %s8464_s22 }
 0x10d   : > { %s8466_s29 = scalar_lea.vmem %s8465_s22, 96  ;;  %p8467_p3 = scmp.lt.s32.totalorder %s737_s27, %s8465_s22 }
 0x10e   : > { %p8462_p13 = pnand %p8461_p1, %p8955_p4  ;;  %p8468_p0 = scmp.lt.s32.totalorder %s8466_s29, %s8460_s2 }
 0x110   : > { %p8463_p6 = pneg %p8462_p13  ;;  %p8469_p2 = por %p8468_p0, %p8467_p3 }
 0x112   : > { %p8470_p7 = pnand %p8469_p2, %p8463_p6 }
 0x114   : > { %8473 = shalt.err (!%p8470_p7)
}
 0x115   : > { %7822 = dma.hbm_to_vmem [thread:$0]  (%p8955_p4), %s9204_s3, 48, %s737_s27, %s725_s18  }
 0x116   : > { %s10867_s5 = sld [smem:[#allocation47_spill]]  ;;  %s767_s2 = scalar_lea.vmem [#allocation6], %s8966_s25 }
 0x117   : > { %s774_s6 = sshll.u32 %s767_s2, 4  ;;  %s775_s6 = int_to_ptr.vmem [resolvable:$true] %s774_s6 }
 0x11c   : > { %s10868_s16 = smov %s10867_s5  ;;  %s9228_s24 = scalar_lea.hbm %s10867_s5, %s8987_s23 }
 0x11d   : > { %s8474_s22 = scalar_lea.hbm %s9228_s24, 16  ;;  %s8478_s18 = scalar_lea.hbm %s10868_s16, 32 }
 0x11e   : > { %p8475_p5 = scmp.ne.s32.totalorder %s9228_s24, %s8474_s22  ;;  %p8479_p10 = scmp.lt.u32.totalorder %s9228_s24, %s10868_s16 }
 0x11f   : > { %p8480_p11 = scmp.lt.u32.totalorder %s8478_s18, %s8474_s22  ;;  %p8482_p1 = scmp.lt.u32.totalorder %s8474_s22, %s9228_s24 }
 0x120   : > { %p8476_p8 = pnand %p8475_p5, %p8955_p4 }
 0x121   : > { %p8481_p12 = por %p8480_p11, %p8479_p10 }
 0x122   : > { %p8477_p9 = pneg %p8476_p8 }
 0x123   : > { %p8483_p13 = por %p8482_p1, %p8481_p12 }
 0x125   : > { %p8484_p6 = pnand %p8483_p13, %p8477_p9 }
 0x127   : > { %8487 = shalt.err (!%p8484_p6)
}
 0x128   : > { %s8488_s10 = scalar_lea.vmem %s775_s6, 16  ;;  %s8776_s0 = smov [#allocation6]  }
 0x129   : > { %p8489_p3 = scmp.ne.s32.totalorder %s775_s6, %s8488_s10  ;;  %s8492_s5 = sshll.u32 %s8776_s0, 4  ;;  %s8493_s5 = int_to_ptr.vmem [resolvable:$false] %s8492_s5 }
 0x12a   : > { %s8494_s7 = scalar_lea.vmem %s8493_s5, 32  ;;  %p8495_p7 = scmp.lt.s32.totalorder %s775_s6, %s8493_s5 }
 0x12b   : > { %p8490_p0 = pnand %p8489_p3, %p8955_p4  ;;  %p8496_p5 = scmp.lt.s32.totalorder %s8494_s7, %s8488_s10 }
 0x12d   : > { %p8491_p2 = pneg %p8490_p0  ;;  %p8497_p8 = por %p8496_p5, %p8495_p7 }
 0x12f   : > { %p8498_p10 = pnand %p8497_p8, %p8491_p2 }
 0x131   : > { %8501 = shalt.err (!%p8498_p10)
}
 0x132   : > { %s10869_s2 = scalar_lea.sflag [#allocation5], %s8969_s8  ;;  %s10870_s18 = sld [smem:[#allocation49_spill]] }
 0x133   : > { %7824 = dma.hbm_to_vmem [thread:$0]  (%p8955_p4), %s9228_s24, 16, %s775_s6, %s10869_s2  }
 0x134   : > { %s801_s3 = scalar_lea.vmem [#allocation9], %s8966_s25 }
 0x135   : > { %s808_s10 = sshll.u32 %s801_s3, 4  ;;  %s809_s10 = int_to_ptr.vmem [resolvable:$true] %s808_s10 }
 0x138   : > { %s9254_s27 = scalar_lea.hbm %s10870_s18, %s8987_s23  ;;  %s8506_s24 = scalar_lea.hbm %s10870_s18, 32 }
 0x139   : > { %s8502_s0 = scalar_lea.hbm %s9254_s27, 16  ;;  %p8507_p1 = scmp.lt.u32.totalorder %s9254_s27, %s10870_s18 }
 0x13a   : > { %p8503_p9 = scmp.ne.s32.totalorder %s9254_s27, %s8502_s0  ;;  %p8508_p13 = scmp.lt.u32.totalorder %s8506_s24, %s8502_s0 }
 0x13b   : > { %p8510_p3 = scmp.lt.u32.totalorder %s8502_s0, %s9254_s27 }
 0x13c   : > { %p8504_p11 = pnand %p8503_p9, %p8955_p4  ;;  %p8509_p6 = por %p8508_p13, %p8507_p1 }
 0x13e   : > { %p8505_p12 = pneg %p8504_p11  ;;  %p8511_p0 = por %p8510_p3, %p8509_p6 }
 0x140   : > { %p8512_p2 = pnand %p8511_p0, %p8505_p12 }
 0x142   : > { %8515 = shalt.err (!%p8512_p2)
}
 0x143   : > { %s8516_s22 = scalar_lea.vmem %s809_s10, 16  ;;  %s8777_s29 = smov [#allocation9]  }
 0x144   : > { %p8517_p7 = scmp.ne.s32.totalorder %s809_s10, %s8516_s22  ;;  %s8520_s3 = sshll.u32 %s8777_s29, 4  ;;  %s8521_s3 = int_to_ptr.vmem [resolvable:$false] %s8520_s3 }
 0x145   : > { %s8522_s5 = scalar_lea.vmem %s8521_s3, 32  ;;  %p8523_p10 = scmp.lt.s32.totalorder %s809_s10, %s8521_s3 }
 0x146   : > { %p8518_p5 = pnand %p8517_p7, %p8955_p4  ;;  %p8524_p9 = scmp.lt.s32.totalorder %s8522_s5, %s8516_s22 }
 0x148   : > { %p8519_p8 = pneg %p8518_p5  ;;  %p8525_p11 = por %p8524_p9, %p8523_p10 }
 0x14a   : > { %p8526_p1 = pnand %p8525_p11, %p8519_p8 }
 0x14c   : > { %8529 = shalt.err (!%p8526_p1)
}
 0x14d   : > { %s10871_s0 = scalar_lea.sflag [#allocation8], %s8969_s8  ;;  %s10872_s9 = sld [smem:[#allocation51_spill]] }
 0x14e   : > { %7826 = dma.hbm_to_vmem [thread:$0]  (%p8955_p4), %s9254_s27, 16, %s809_s10, %s10871_s0  }
 0x14f   : > { %s839_s2 = scalar_lea.vmem [#allocation12], %s8966_s25 }
 0x150   : > { %s846_s22 = sshll.u32 %s839_s2, 4  ;;  %s847_s22 = int_to_ptr.vmem [resolvable:$true] %s846_s22 }
 0x153   : > { %s9280_s6 = scalar_lea.hbm %s10872_s9, %s8987_s23  ;;  %s8534_s27 = scalar_lea.hbm %s10872_s9, 32 }
 0x154   : > { %s8530_s29 = scalar_lea.hbm %s9280_s6, 16  ;;  %p8535_p3 = scmp.lt.u32.totalorder %s9280_s6, %s10872_s9 }
 0x155   : > { %p8531_p12 = scmp.ne.s32.totalorder %s9280_s6, %s8530_s29  ;;  %p8536_p0 = scmp.lt.u32.totalorder %s8534_s27, %s8530_s29 }
 0x156   : > { %p8538_p7 = scmp.lt.u32.totalorder %s8530_s29, %s9280_s6 }
 0x157   : > { %p8532_p13 = pnand %p8531_p12, %p8955_p4  ;;  %p8537_p2 = por %p8536_p0, %p8535_p3 }
 0x159   : > { %p8533_p6 = pneg %p8532_p13  ;;  %p8539_p5 = por %p8538_p7, %p8537_p2 }
 0x15b   : > { %p8540_p8 = pnand %p8539_p5, %p8533_p6 }
 0x15d   : > { %8543 = shalt.err (!%p8540_p8)
}
 0x15e   : > { %s8544_s7 = scalar_lea.vmem %s847_s22, 16  ;;  %s8778_s24 = smov [#allocation12]  }
 0x15f   : > { %p8545_p10 = scmp.ne.s32.totalorder %s847_s22, %s8544_s7  ;;  %s8548_s2 = sshll.u32 %s8778_s24, 4  ;;  %s8549_s2 = int_to_ptr.vmem [resolvable:$false] %s8548_s2 }
 0x160   : > { %s8550_s3 = scalar_lea.vmem %s8549_s2, 32  ;;  %p8551_p1 = scmp.lt.s32.totalorder %s847_s22, %s8549_s2 }
 0x161   : > { %p8546_p9 = pnand %p8545_p10, %p8955_p4  ;;  %p8552_p12 = scmp.lt.s32.totalorder %s8550_s3, %s8544_s7 }
 0x163   : > { %p8547_p11 = pneg %p8546_p9  ;;  %p8553_p13 = por %p8552_p12, %p8551_p1 }
 0x165   : > { %p8554_p0 = pnand %p8553_p13, %p8547_p11 }
 0x167   : > { %8557 = shalt.err (!%p8554_p0)
}
 0x168   : > { %s10873_s29 = scalar_lea.sflag [#allocation11], %s8969_s8  ;;  %s10874_s12 = sld [smem:[#allocation54_spill]] }
 0x169   : > { %7828 = dma.hbm_to_vmem [thread:$0]  (%p8955_p4), %s9280_s6, 16, %s847_s22, %s10873_s29  }
 0x16a   : > { %s884_s0 = scalar_lea.vmem [#allocation15], %s8972_s4 }
 0x16b   : > { %s891_s7 = sshll.u32 %s884_s0, 4  ;;  %s9309_s7 = int_to_ptr.vmem [resolvable:$true] %s891_s7 }
 0x16e   : > { %s9306_s10 = scalar_lea.hbm %s10874_s12, %s8975_s1  ;;  %s8562_s22 = scalar_lea.hbm %s10874_s12, 2048 }
 0x16f   : > { %s8558_s24 = scalar_lea.hbm %s9306_s10, 1024  ;;  %p8563_p7 = scmp.lt.u32.totalorder %s9306_s10, %s10874_s12 }
 0x170   : > { %p8559_p6 = scmp.ne.s32.totalorder %s9306_s10, %s8558_s24  ;;  %p8564_p5 = scmp.lt.u32.totalorder %s8562_s22, %s8558_s24 }
 0x171   : > { %p8566_p10 = scmp.lt.u32.totalorder %s8558_s24, %s9306_s10 }
 0x172   : > { %p8560_p3 = pnand %p8559_p6, %p8955_p4  ;;  %p8565_p8 = por %p8564_p5, %p8563_p7 }
 0x174   : > { %p8561_p2 = pneg %p8560_p3  ;;  %p8567_p9 = por %p8566_p10, %p8565_p8 }
 0x176   : > { %p8568_p11 = pnand %p8567_p9, %p8561_p2 }
 0x178   : > { %8571 = shalt.err (!%p8568_p11)
}
 0x179   : > { %s8572_s4 = scalar_lea.vmem %s9309_s7, 1024  ;;  %s8779_s29 = smov [#allocation15]  }
 0x17a   : > { %p8573_p1 = scmp.ne.s32.totalorder %s9309_s7, %s8572_s4  ;;  %s8576_s5 = sshll.u32 %s8779_s29, 4  ;;  %s8577_s5 = int_to_ptr.vmem [resolvable:$false] %s8576_s5 }
 0x17b   : > { %s8578_s27 = scalar_lea.vmem %s8577_s5, 2048  ;;  %p8579_p0 = scmp.lt.s32.totalorder %s9309_s7, %s8577_s5 }
 0x17c   : > { %p8574_p12 = pnand %p8573_p1, %p8955_p4  ;;  %p8580_p6 = scmp.lt.s32.totalorder %s8578_s27, %s8572_s4 }
 0x17e   : > { %p8575_p13 = pneg %p8574_p12  ;;  %p8581_p3 = por %p8580_p6, %p8579_p0 }
 0x180   : > { %p8582_p7 = pnand %p8581_p3, %p8575_p13 }
 0x182   : > { %8585 = shalt.err (!%p8582_p7)
}
 0x183   : > { %s10875_s0 = smov 4   ;;  %s10876_s24 = scalar_lea.sflag [#allocation14], %s8969_s8 }
 0x184   : > { %7830 = dma.hbm_to_vmem [thread:$0]  (%p8955_p4), %s9306_s10, 1024, %s9309_s7, %s10876_s24, %s10862_s26, %s10862_s26, %s10875_s0  }
 0x185   : > { %s10877_s14 = sld [smem:[#allocation56_spill]]  ;;  %s921_s3 = scalar_lea.vmem [#allocation18], %s8966_s25 }
 0x186   : > { %s928_s1 = sshll.u32 %s921_s3, 4  ;;  %s929_s1 = int_to_ptr.vmem [resolvable:$true] %s928_s1 }
 0x18b   : > { %s9341_s22 = scalar_lea.hbm %s10877_s14, %s8987_s23  ;;  %s8590_s26 = scalar_lea.hbm %s10877_s14, 32 }
 0x18c   : > { %s8586_s4 = scalar_lea.hbm %s9341_s22, 16  ;;  %p8591_p10 = scmp.lt.u32.totalorder %s9341_s22, %s10877_s14 }
 0x18d   : > { %p8587_p2 = scmp.ne.s32.totalorder %s9341_s22, %s8586_s4  ;;  %p8592_p9 = scmp.lt.u32.totalorder %s8590_s26, %s8586_s4 }
 0x18e   : > { %p8594_p1 = scmp.lt.u32.totalorder %s8586_s4, %s9341_s22 }
 0x18f   : > { %p8588_p5 = pnand %p8587_p2, %p8955_p4  ;;  %p8593_p11 = por %p8592_p9, %p8591_p10 }
 0x191   : > { %p8589_p8 = pneg %p8588_p5  ;;  %p8595_p12 = por %p8594_p1, %p8593_p11 }
 0x193   : > { %p8596_p13 = pnand %p8595_p12, %p8589_p8 }
 0x195   : > { %8599 = shalt.err (!%p8596_p13)
}
 0x196   : > { %s8600_s27 = scalar_lea.vmem %s929_s1, 16  ;;  %s8780_s0 = smov [#allocation18]  }
 0x197   : > { %p8601_p0 = scmp.ne.s32.totalorder %s929_s1, %s8600_s27  ;;  %s8604_s24 = sshll.u32 %s8780_s0, 4  ;;  %s8605_s24 = int_to_ptr.vmem [resolvable:$false] %s8604_s24 }
 0x198   : > { %s8606_s2 = scalar_lea.vmem %s8605_s24, 32  ;;  %p8607_p7 = scmp.lt.s32.totalorder %s929_s1, %s8605_s24 }
 0x199   : > { %p8602_p6 = pnand %p8601_p0, %p8955_p4  ;;  %p8608_p2 = scmp.lt.s32.totalorder %s8606_s2, %s8600_s27 }
 0x19b   : > { %p8603_p3 = pneg %p8602_p6  ;;  %p8609_p5 = por %p8608_p2, %p8607_p7 }
 0x19d   : > { %p8610_p9 = pnand %p8609_p5, %p8603_p3 }
 0x19f   : > { %8613 = shalt.err (!%p8610_p9)
}
 0x1a0   : > { %s10878_s6 = scalar_lea.sflag [#allocation17], %s8969_s8  ;;  %s10879_s3 = sshll.u32 %s8764_s28, 5 }
 0x1a1   : > { %7832 = dma.hbm_to_vmem [thread:$0]  (%p8955_p4), %s9341_s22, 16, %s929_s1, %s10878_s6  }
 0x1a2   : > { %s10880_s17 = sld [smem:[#allocation59_spill]]  ;;  %s10881_s26 = sshll.u32 %s8966_s25, 1 }
 0x1a3   : > { %s964_s10 = scalar_lea.vmem [#allocation21], %s10881_s26 }
 0x1a4   : > { %s972_s7 = sshll.u32 %s964_s10, 4  ;;  %s973_s7 = int_to_ptr.vmem [resolvable:$true] %s972_s7 }
 0x1a8   : > { %s9368_s5 = scalar_lea.hbm %s10880_s17, %s10879_s3  ;;  %s8618_s0 = scalar_lea.hbm %s10880_s17, 64 }
 0x1a9   : > { %s8614_s27 = scalar_lea.hbm %s9368_s5, 32  ;;  %p8619_p1 = scmp.lt.u32.totalorder %s9368_s5, %s10880_s17 }
 0x1aa   : > { %p8615_p8 = scmp.ne.s32.totalorder %s9368_s5, %s8614_s27  ;;  %p8620_p12 = scmp.lt.u32.totalorder %s8618_s0, %s8614_s27 }
 0x1ab   : > { %p8622_p0 = scmp.lt.u32.totalorder %s8614_s27, %s9368_s5 }
 0x1ac   : > { %p8616_p10 = pnand %p8615_p8, %p8955_p4  ;;  %p8621_p13 = por %p8620_p12, %p8619_p1 }
 0x1ae   : > { %p8617_p11 = pneg %p8616_p10  ;;  %p8623_p6 = por %p8622_p0, %p8621_p13 }
 0x1b0   : > { %p8624_p3 = pnand %p8623_p6, %p8617_p11 }
 0x1b2   : > { %8627 = shalt.err (!%p8624_p3)
}
 0x1b3   : > { %s8628_s6 = scalar_lea.vmem %s973_s7, 32  ;;  %s8781_s3 = smov [#allocation21]  }
 0x1b4   : > { %p8629_p7 = scmp.ne.s32.totalorder %s973_s7, %s8628_s6  ;;  %s8632_s4 = sshll.u32 %s8781_s3, 4  ;;  %s8633_s4 = int_to_ptr.vmem [resolvable:$false] %s8632_s4 }
 0x1b5   : > { %s8634_s29 = scalar_lea.vmem %s8633_s4, 64  ;;  %p8635_p9 = scmp.lt.s32.totalorder %s973_s7, %s8633_s4 }
 0x1b6   : > { %p8630_p2 = pnand %p8629_p7, %p8955_p4  ;;  %p8636_p8 = scmp.lt.s32.totalorder %s8634_s29, %s8628_s6 }
 0x1b8   : > { %p8631_p5 = pneg %p8630_p2  ;;  %p8637_p10 = por %p8636_p8, %p8635_p9 }
 0x1ba   : > { %p8638_p1 = pnand %p8637_p10, %p8631_p5 }
 0x1bc   : > { %8641 = shalt.err (!%p8638_p1)
}
 0x1bd   : > { %s10882_s26 = scalar_lea.sflag [#allocation20], %s8969_s8  ;;  %s9395_s22 = scalar_lea.hbm %s10785_s20, %s8987_s23 }
 0x1be   : > { %7834 = dma.hbm_to_vmem [thread:$0]  (%p8955_p4), %s9368_s5, 32, %s973_s7, %s10882_s26  }
 0x1bf   : > { %s1007_s1 = scalar_lea.vmem [#allocation24], %s8966_s25  ;;  %s8642_s24 = scalar_lea.hbm %s9395_s22, 16 }
 0x1c0   : > { %s1014_s0 = sshll.u32 %s1007_s1, 4  ;;  %p8643_p11 = scmp.ne.s32.totalorder %s9395_s22, %s8642_s24  ;;  %s1015_s0 = int_to_ptr.vmem [resolvable:$true] %s1014_s0 }
 0x1c1   : > { %s8646_s5 = scalar_lea.hbm %s10785_s20, 32  ;;  %p8647_p0 = scmp.lt.u32.totalorder %s9395_s22, %s10785_s20 }
 0x1c2   : > { %p8644_p12 = pnand %p8643_p11, %p8955_p4  ;;  %p8648_p6 = scmp.lt.u32.totalorder %s8646_s5, %s8642_s24 }
 0x1c3   : > { %p8650_p7 = scmp.lt.u32.totalorder %s8642_s24, %s9395_s22 }
 0x1c4   : > { %p8645_p13 = pneg %p8644_p12  ;;  %p8649_p3 = por %p8648_p6, %p8647_p0 }
 0x1c6   : > { %p8651_p2 = por %p8650_p7, %p8649_p3 }
 0x1c8   : > { %p8652_p5 = pnand %p8651_p2, %p8645_p13 }
 0x1ca   : > { %8655 = shalt.err (!%p8652_p5)
}
 0x1cb   : > { %s8656_s4 = scalar_lea.vmem %s1015_s0, 16  ;;  %s8782_s29 = smov [#allocation24]  }
 0x1cc   : > { %p8657_p9 = scmp.ne.s32.totalorder %s1015_s0, %s8656_s4  ;;  %s8660_s26 = sshll.u32 %s8782_s29, 4  ;;  %s8661_s26 = int_to_ptr.vmem [resolvable:$false] %s8660_s26 }
 0x1cd   : > { %s8662_s10 = scalar_lea.vmem %s8661_s26, 32  ;;  %p8663_p1 = scmp.lt.s32.totalorder %s1015_s0, %s8661_s26 }
 0x1ce   : > { %p8658_p8 = pnand %p8657_p9, %p8955_p4  ;;  %p8664_p11 = scmp.lt.s32.totalorder %s8662_s10, %s8656_s4 }
 0x1d0   : > { %p8659_p10 = pneg %p8658_p8  ;;  %p8665_p12 = por %p8664_p11, %p8663_p1 }
 0x1d2   : > { %p8666_p0 = pnand %p8665_p12, %p8659_p10 }
 0x1d4   : > { %8669 = shalt.err (!%p8666_p0)
}
 0x1d5   : > { %s10883_s27 = scalar_lea.sflag [#allocation23], %s8969_s8  ;;  %s9421_s2 = scalar_lea.hbm %s10786_s21, %s8987_s23 }
 0x1d6   : > { %7836 = dma.hbm_to_vmem [thread:$0]  (%p8955_p4), %s9395_s22, 16, %s1015_s0, %s10883_s27  }
 0x1d7   : > { %s1024_s6 = scalar_lea.vmem [#allocation25], %s8966_s25  ;;  %s1022_s7 = scalar_lea.sflag [#allocation26], %s8966_s25 }
 0x1d8   : > { %s1031_s5 = sshll.u32 %s1024_s6, 4  ;;  %s8670_s8 = scalar_lea.hbm %s9421_s2, 16  ;;  %s1032_s5 = int_to_ptr.vmem [resolvable:$true] %s1031_s5 }
 0x1d9   : > { %p8671_p13 = scmp.ne.s32.totalorder %s9421_s2, %s8670_s8  ;;  %s8674_s0 = scalar_lea.hbm %s10786_s21, 32 }
 0x1da   : > { %p8675_p7 = scmp.lt.u32.totalorder %s9421_s2, %s10786_s21  ;;  %p8676_p2 = scmp.lt.u32.totalorder %s8674_s0, %s8670_s8 }
 0x1db   : > { %p8672_p6 = pnand %p8671_p13, %p8955_p4  ;;  %p8678_p9 = scmp.lt.u32.totalorder %s8670_s8, %s9421_s2 }
 0x1dc   : > { %p8677_p5 = por %p8676_p2, %p8675_p7 }
 0x1dd   : > { %p8673_p3 = pneg %p8672_p6 }
 0x1de   : > { %p8679_p8 = por %p8678_p9, %p8677_p5 }
 0x1e0   : > { %p8680_p10 = pnand %p8679_p8, %p8673_p3 }
 0x1e2   : > { %8683 = shalt.err (!%p8680_p10)
}
 0x1e3   : > { %s8684_s25 = scalar_lea.vmem %s1032_s5, 16  ;;  %s8783_s29 = smov [#allocation25]  }
 0x1e4   : > { %p8685_p1 = scmp.ne.s32.totalorder %s1032_s5, %s8684_s25  ;;  %s8688_s26 = sshll.u32 %s8783_s29, 4  ;;  %s8689_s26 = int_to_ptr.vmem [resolvable:$false] %s8688_s26 }
 0x1e5   : > { %s8690_s10 = scalar_lea.vmem %s8689_s26, 32  ;;  %p8691_p0 = scmp.lt.s32.totalorder %s1032_s5, %s8689_s26 }
 0x1e6   : > { %p8686_p11 = pnand %p8685_p1, %p8955_p4  ;;  %p8692_p13 = scmp.lt.s32.totalorder %s8690_s10, %s8684_s25 }
 0x1e8   : > { %p8687_p12 = pneg %p8686_p11  ;;  %p8693_p6 = por %p8692_p13, %p8691_p0 }
 0x1ea   : > { %p8694_p2 = pnand %p8693_p6, %p8687_p12 }
 0x1ec   : > { %8697 = shalt.err (!%p8694_p2)
}
 0x1ed   : > { %7837 = dma.hbm_to_vmem [thread:$0]  (%p8955_p4), %s9421_s2, 16, %s1032_s5, %s1022_s7  }
 0x1ee PF: > { %p6935_p3 = scmp.ge.s32.totalorder %s8764_s28, 1  ;;  %p1036_p7 = scmp.lt.s32.totalorder %s8764_s28, 3 }
 0x1f0   : > { %p1037_p5 = pnand %p6935_p3, %p1036_p7 }
 0x1f1   : > { %s10884_s27 = sld [smem:[#allocation36_spill]] (!%p1037_p5)  ;;  %s10885_s1 = sld [smem:[#allocation41_spill]] (!%p1037_p5) }
 0x1f2   : > { %1040 = sbr.rel (%p1037_p5) target bundleno = 5234 (0x1472), region = 116 }
 0x1f7   : > { %s9445_s24 = sand.u32 (!%p1037_p5), 1, %s10884_s27   ;;  %p10886_p9 = scmp.ne.s32.totalorder (!%p1037_p5), %s10885_s1, 0 }
 0x1f8   : > { %s7820_s6 = smul.u32 (!%p1037_p5), 3, %s9445_s24  ;;  %s1043_s8 = scalar_lea.sflag (!%p1037_p5), [#allocation3], %s9445_s24 }
 0x1fa   : > { %s9449_s3 = scalar_lea.vmem [#allocation2], %s7820_s6 }
 0x1fb   : > { %8715 = dma.done.wait (%p10886_p9), %s1043_s8, 48  }
 0x1fc   : > { %8717 = vsyncadd (%p10886_p9), %s1043_s8, 4294967248  ;;  %s10887_s30 = sld [smem:[#allocation38_spill]]  ;;  %s6936_s2 = sshll.u32 %s9445_s24, 6 }
 0x1fd   : > { %s9460_s7 = scalar_lea.vmem [#allocation4], %s6936_s2 }
 0x202   : > { %s9456_s28 = sand.u32 1, %s10887_s30  }
 0x203   : > { %s1052_s5 = scalar_lea.sflag [#allocation5], %s9456_s28 }
 0x204   : > { %8719 = dma.done.wait (%p10886_p9), %s1052_s5, 1040  }
 0x205   : > { %8721 = vsyncadd (%p10886_p9), %s1052_s5, 4294966256  ;;  %s1069_s0 = scalar_lea.sflag [#allocation8], %s9456_s28 }
 0x206   : > { %8723 = dma.done.wait (%p10886_p9), %s1069_s0, 32  }
 0x207   : > { %8725 = vsyncadd (%p10886_p9), %s1069_s0, 4294967264  ;;  %s1085_s25 = scalar_lea.sflag [#allocation11], %s9456_s28  ;;  %s9475_s29 = scalar_lea.vmem [#allocation10], %s6936_s2 }
 0x208   : > { %8727 = dma.done.wait (%p10886_p9), %s1085_s25, 1040  }
 0x209   : > { %8729 = vsyncadd (%p10886_p9), %s1085_s25, 4294966256  ;;  %s6938_s26 = sshll.u32 %s9445_s24, 1  ;;  %s1102_s27 = scalar_lea.sflag [#allocation14], %s9456_s28 }
 0x20a   : > { %s9484_s6 = scalar_lea.vmem [#allocation13], %s6938_s26 }
 0x20b   : > { %8731 = dma.done.wait (%p10886_p9), %s1102_s27, 1056  }
 0x20c   : > { %8733 = vsyncadd (%p10886_p9), %s1102_s27, 4294966240  ;;  %s9490_s8 = scalar_lea.vmem [#allocation15], %s6936_s2  ;;  %s1120_s5 = scalar_lea.sflag [#allocation17], %s9456_s28 }
 0x20d   : > { %8735 = dma.done.wait (%p10886_p9), %s1120_s5, 32  }
 0x20e   : > { %8737 = vsyncadd (%p10886_p9), %s1120_s5, 4294967264  ;;  %s1136_s10 = scalar_lea.sflag [#allocation20], %s9456_s28 }
 0x20f   : > { %8739 = dma.done.wait (%p10886_p9), %s1136_s10, 48  }
 0x210   : > { %8741 = vsyncadd (%p10886_p9), %s1136_s10, 4294967248  ;;  %s9505_s2 = scalar_lea.vmem [#allocation21], %s6938_s26  ;;  %s1153_s27 = scalar_lea.sflag [#allocation23], %s9456_s28 }
 0x211   : > { %8743 = dma.done.wait (%p10886_p9), %s1153_s27, 32  }
 0x212   : > { %8745 = vsyncadd (%p10886_p9), %s1153_s27, 4294967264  ;;  %s1169_s23 = scalar_lea.sflag [#allocation26], %s9445_s24 }
 0x213   : > { %8747 = dma.done.wait (%p10886_p9), %s1169_s23, 16  }
 0x214   : > { %8749 = vsyncadd (%p10886_p9), %s1169_s23, 4294967280  ;;  %p1316_p4 = scmp.lt.s32.totalorder %s10887_s30, 1  ;;  %s10888_s4 = sld [smem:[#allocation52_spill]] }
 0x215   : > { %s10889_s11 = sld [smem:[#allocation58_spill]]  ;;  %s10890_s1 = sld [smem:[#allocation44_spill]] }
 0x216   : > { %s1317_s28 = scalar_select %p1316_p4, %s10887_s30, 1 }
 0x217   : > { %s10891_s16 = sld [smem:[#allocation60_spill]]  ;;  %p6948_p8 = scmp.ne.s32.totalorder %s10887_s30, 0 }
 0x218   : > { %s7821_s26 = smul.u32 192, %s1317_s28  ;;  %s7136_s10 = sshll.u32 %s1317_s28, 7 }
 0x219   : > { %1340 = sbr.rel (%p6948_p8) target bundleno = 546 (0x222), region = 184  ;;  %s10892_s28 = sld [smem:[#allocation42_spill]] (!%p6948_p8) }
 0x21a   : > { %s9525_s22 = scalar_lea.vmem %s10888_s4, %s7136_s10  ;;  %s10894_s13 = sld [smem:[#allocation63_spill]] (!%p6948_p8) }
 0x21b   : > { %s9530_s25 = scalar_lea.vmem %s10889_s11, %s7136_s10  ;;  %s9535_s23 = scalar_lea.vmem %s10890_s1, %s7821_s26 }
 0x21d   : > { %s9540_s17 = scalar_lea.vmem %s10891_s16, %s7136_s10 }
 0x21f   : > { %s10893_s18 = smov (!%p6948_p8), %s10892_s28  ;;  %v1341_v0 = vld [vmem:[%s10892_s28] sm:$0xff] (!%p6948_p8) }
 0x220   : > { %v1342_v1 = vld [vmem:[%s10893_s18 + $0x8] sm:$0xff]  ;;  %1343 = vst [vmem:[%s10894_s13] sm:$0xff] %v1341_v0 }
 0x221   : > { %1344 = vst [vmem:[%s10894_s13 + $0x8] sm:$0xff] %v1342_v1 }
 0x222 PF: > { %v7980_v2 = vld [vmem:[%s9535_s23 + $0x4] ss:$12 sps:$4 sm:$0xff]   ;;  %v7982_v3 = vld [vmem:[%s9535_s23] ss:$12 sps:$4 sm:$0xff]   ;;  %v8784_v4 = vmov 0   ;;  %v8785_v5 = vmov 0.0   ;;  %v1402_v31 = vlaneseq }
 0x223   : > { %1577 = vmatprep.mubr.bf16.mxu0 %v8784_v4  ;;  %7334 = vmatprep.subr.bf16.mxu1 %v8785_v5  ;;  %v7983_v6 = vld [vmem:[%s9535_s23 + $0x1c] ss:$12 sps:$4 sm:$0xff]   ;;  %vm8786_vm0 = vmmov 0   ;;  %v7985_v7 = vld [vmem:[%s9535_s23 + $0x18] ss:$12 sps:$4 sm:$0xff]   ;;  %s10895_s16 = sld [smem:[#allocation63_spill]] }
 0x224   : > { %1545 = vmatprep.subr.bf16.mxu0 %v7980_v2  ;;  %7350 = vmatprep.mubr.msk.bf16.mxu1 %vm8786_vm0, %v8785_v5  ;;  %v7986_v8 = vld [vmem:[%s9535_s23 + $0x34] ss:$12 sps:$4 sm:$0xff]   ;;  %v7988_v9 = vld [vmem:[%s9535_s23 + $0x30] ss:$12 sps:$4 sm:$0xff]   ;;  %v7989_v10 = vld [vmem:[%s9535_s23 + $0x4c] ss:$12 sps:$4 sm:$0xff]  }
 0x225   : > { %1546 = vmatpush1.bf16.msra.mxu0 %v7982_v3  ;;  %v7991_v11 = vld [vmem:[%s9535_s23 + $0x48] ss:$12 sps:$4 sm:$0xff]   ;;  %v7992_v12 = vld [vmem:[%s9535_s23 + $0x64] ss:$12 sps:$4 sm:$0xff]   ;;  %v8005_v14 = vld [vmem:[%s9535_s23 + $0x20] ss:$12 sps:$4 sm:$0xff]  }
 0x226   : > { %1547 = vmatprep.subr.bf16.mxu0 %v7983_v6  ;;  %v8004_v13 = vld [vmem:[%s9535_s23 + $0x8] ss:$12 sps:$4 sm:$0xff]   ;;  %v7994_v15 = vld [vmem:[%s9535_s23 + $0x60] ss:$12 sps:$4 sm:$0xff]   ;;  %v8006_v17 = vld [vmem:[%s9535_s23 + $0x38] ss:$12 sps:$4 sm:$0xff]  }
 0x227   : > { %7335 = vmatpush3.bf16.msra.mxu1 %v8004_v13  ;;  %v7995_v16 = vld [vmem:[%s9535_s23 + $0x7c] ss:$12 sps:$4 sm:$0xff]   ;;  %v7997_v18 = vld [vmem:[%s9535_s23 + $0x78] ss:$12 sps:$4 sm:$0xff]   ;;  %v7998_v19 = vld [vmem:[%s9535_s23 + $0x94] ss:$12 sps:$4 sm:$0xff]  }
 0x228   : > { %7336 = vmatprep.subr.bf16.mxu1 %v8785_v5  ;;  %v8007_v20 = vld [vmem:[%s9535_s23 + $0x50] ss:$12 sps:$4 sm:$0xff]   ;;  %v8001_v22 = vld [vmem:[%s9535_s23 + $0xac] ss:$12 sps:$4 sm:$0xff]   ;;  %v8008_v23 = vld [vmem:[%s9535_s23 + $0x68] ss:$12 sps:$4 sm:$0xff]  }
 0x229   : > { %1548 = vmatpush1.bf16.msra.mxu0 %v7985_v7  ;;  %v8000_v21 = vld [vmem:[%s9535_s23 + $0x90] ss:$12 sps:$4 sm:$0xff]   ;;  %v8003_v24 = vld [vmem:[%s9535_s23 + $0xa8] ss:$12 sps:$4 sm:$0xff]   ;;  %v1345_v25 = vld [vmem:[%s10895_s16] sm:$0xff]  ;;  %v1403_v32 = vshrl.u32 %v1402_v31, 7 }
 0x22a   : > { %1549 = vmatprep.subr.bf16.mxu0 %v7986_v8  ;;  %v1346_v26 = vld [vmem:[%s10895_s16 + $0x8] sm:$0xff]  ;;  %v8010_v29 = vld [vmem:[%s9535_s23 + $0x98] ss:$12 sps:$4 sm:$0xff]   ;;  %v8011_v30 = vld [vmem:[%s9535_s23 + $0xb0] ss:$12 sps:$4 sm:$0xff]   ;;  %vm1811_vm1 = vcmask 130048  }
 0x22b   : > { %7337 = vmatpush3.bf16.msra.mxu1 %v8005_v14  ;;  %v8009_v27 = vld [vmem:[%s9535_s23 + $0x80] ss:$12 sps:$4 sm:$0xff]   ;;  %v1350_v28 = vpack.c.bf16 %v1346_v26, %v1345_v25  ;;  %v9602_v33 = vsub.s32 0, %v1403_v32  ;;  %v9604_v34 = vsub.s32 1, %v1403_v32  ;;  %s8787_s1 = smov 96   ;;  %s8788_s23 = smov 112  }
 0x22c   : > { %7338 = vmatprep.subr.bf16.mxu1 %v8785_v5  ;;  %v1383_v35 = vld [vmem:[%s9449_s3] sm:$0x7]  ;;  %s8789_s3 = smov 64   ;;  %s8790_s4 = smov 80   ;;  %v1412_v51 = vsub.s32 2, %v1403_v32  ;;  %vm2744_vm2 = vcmask 1043456  }
 0x22d   : > { %1550 = vmatpush1.bf16.msra.mxu0 %v7988_v9  ;;  %v1405_v36 = vrot.slane %v1383_v35, %v9602_v33  ;;  %v1409_v37 = vrot.slane %v1383_v35, %v9604_v34  ;;  %s8791_s0 = smov 48   ;;  %s8792_s28 = smov 32   ;;  %vm2548_vm3 = vcmask 64512   ;;  %vm3507_vm4 = vcmask 261120  }
 0x22e   : > { %1551 = vmatprep.subr.bf16.mxu0 %v7989_v10  ;;  %s8793_s9 = smov 16   ;;  %v1413_v54 = vrot.slane %v1383_v35, %v1412_v51  ;;  %vm3509_vm5 = vcmask 392192   ;;  %vm3511_vm6 = vcmask 523264   ;;  %vm3513_vm7 = vcmask 654336   ;;  %s10897_s14 = sld [smem:[#allocation43_spill]] }
 0x22f   : > { %7339 = vmatpush3.bf16.msra.mxu1 %v8006_v17  ;;  %vm3515_vm8 = vcmask 785408   ;;  %vm3517_vm9 = vcmask 916480   ;;  %s10903_s10 = scalar_lea.vmem [#allocation19], %s9445_s24 }
 0x230   : > { %7340 = vmatprep.subr.bf16.mxu1 %v8785_v5 }
 0x231   : > { %1552 = vmatpush1.bf16.msra.mxu0 %v7991_v11 }
 0x232   : > { %1553 = vmatprep.subr.bf16.mxu0 %v7992_v12 }
 0x233   : > { %7341 = vmatpush3.bf16.msra.mxu1 %v8007_v20 }
 0x234   : > { %7342 = vmatprep.subr.bf16.mxu1 %v8785_v5 }
 0x235   : > { %1554 = vmatpush1.bf16.msra.mxu0 %v7994_v15 }
 0x236   : > { %1555 = vmatprep.subr.bf16.mxu0 %v7995_v16 }
 0x237   : > { %7343 = vmatpush3.bf16.msra.mxu1 %v8008_v23 }
 0x238   : > { %7344 = vmatprep.subr.bf16.mxu1 %v8785_v5 }
 0x239   : > { %1556 = vmatpush1.bf16.msra.mxu0 %v7997_v18 }
 0x23a   : > { %1557 = vmatprep.subr.bf16.mxu0 %v7998_v19 }
 0x23b   : > { %7345 = vmatpush3.bf16.msra.mxu1 %v8009_v27 }
 0x23c   : > { %7346 = vmatprep.subr.bf16.mxu1 %v8785_v5 }
 0x23d   : > { %1558 = vmatpush1.bf16.msra.mxu0 %v8000_v21 }
 0x23e   : > { %1559 = vmatprep.subr.bf16.mxu0 %v8001_v22 }
 0x23f   : > { %7347 = vmatpush3.bf16.msra.mxu1 %v8010_v29 }
 0x240   : > { %7348 = vmatprep.subr.bf16.mxu1 %v8785_v5 }
 0x241   : > { %1560 = vmatpush1.bf16.msra.mxu0 %v8003_v24 }
 0x242   : > { %7378 = vmatprep.subr.bf16.mxu0 %v8785_v5 }
 0x243   : > { %7349 = vmatpush3.bf16.msra.mxu1 %v8011_v30 }
 0x244   : > { %1578 = vmatmul.mubr.bf16.vlgmr.msra.gmra.mrb[0].mxu0 %v1350_v28  ;;  %7354 = vmatprep.subr.bf16.mxu1 %v8785_v5 }
 0x245   : > { %7380 = vmatprep.mubr.msk.bf16.mxu0 %vm8786_vm0, %v8785_v5 }
 0x246   : > { %7351 = vmatmul.mubr.bf16.vlgmr.msra.gmra.mrb[0].mxu1 %v1350_v28 }
 0x247   : > { %7356 = vmatprep.mubr.msk.bf16.mxu1 %vm8786_vm0, %v8785_v5 }
 0x317   : > { %v1579_v38 = vpop.f32.mrb[0].mxu0 }
 0x318   : > { %v1581_v39 = vpop.f32.mrb[1].mxu0  ;;  %v1580_v40 = vadd.f32 %v1579_v38, %v1405_v36 }
 0x319   : > { %v1582_v41 = vadd.f32 %v1581_v39, %v1409_v37  ;;  %v1583_v42 = vpop.f32.mrb[2].mxu0  ;;  %v1622_v52 = vpop.f32.mrb[0].mxu1 }
 0x31a   : > { %v1585_v43 = vpop.f32.mrb[3].mxu0  ;;  %v1629_v45 = vmul.f32 0.25, %v1580_v40  ;;  %v1584_v48 = vadd.f32 %v1583_v42, %v1405_v36  ;;  %v7352_v53 = vpop.f32.mrb[1].mxu1  ;;  %v9660_v55 = vadd.f32 %v1622_v52, %v1413_v54 }
 0x31b   : > { %1695 = vrot.lane.b32.xlu1 %v1582_v41, %s8787_s1  ;;  %1692 = vrot.lane.b32.xlu0 %v1582_v41, %s8788_s23  ;;  %v1735_v44 = vpack.c.bf16 %v1582_v41, %v1582_v41  ;;  %v9628_v49 = vadd.f32 %v1585_v43, %v1409_v37  ;;  %v1625_v56 = vpop.f32.mrb[2].mxu1 }
 0x31c   : > { %v1675_v47 = vpack.c.bf16 %v1629_v45, %v1629_v45  ;;  %v9634_v50 = vmul.f32 0.25, %v1584_v48  ;;  %v7353_v57 = vpop.f32.mrb[3].mxu1  ;;  %v9668_v58 = vadd.f32 %v1625_v56, %v1413_v54 }
 0x31d   : > { %v1816_v46 = vsel %vm1811_vm1, %v1735_v44, 0  ;;  %v1743_v24 = vpack.c.bf16 %v9628_v49, %v9628_v49 }
 0x31e   : > { %7355 = vmatpush3.bf16.xpose.msra.mxu1 %v1816_v46  ;;  %v7900_v59 = vpack.i.bf16 %v9668_v58, %v9660_v55  ;;  %v1683_v40 = vpack.c.bf16 %v9634_v50, %v9634_v50 }
 0x31f   : > { %1635 = vrot.lane.b32.xlu1 %v1629_v45, %s8787_s1  ;;  %1632 = vrot.lane.b32.xlu0 %v1629_v45, %s8788_s23  ;;  %v2184_v29 = vsel %vm1811_vm1, %v1743_v24, 0 }
 0x320   : > { %7360 = vmatprep.subr.bf16.mxu1 %v8785_v5 }
 0x323   : > { %1701 = vrot.lane.b32.xlu1 %v1582_v41, %s8789_s3  ;;  %1698 = vrot.lane.b32.xlu0 %v1582_v41, %s8790_s4 }
 0x325   : > { %7357 = vmatmul.mubr.msk.bf16.vlgmr.msra.gmra.mrb[4].mxu1 %vm1811_vm1, %v1675_v47 }
 0x326   : > { %7362 = vmatprep.mubr.msk.bf16.mxu1 %vm8786_vm0, %v8785_v5 }
 0x327   : > { %1704 = vrot.lane.b32.xlu1 %v1582_v41, %s8791_s0  ;;  %1638 = vrot.lane.b32.xlu0 %v1629_v45, %s8790_s4 }
 0x32b   : > { %1707 = vrot.lane.b32.xlu1 %v1582_v41, %s8792_s28  ;;  %1641 = vrot.lane.b32.xlu0 %v1629_v45, %s8789_s3 }
 0x32f   : > { %1710 = vrot.lane.b32.xlu1 %v1582_v41, %s8793_s9  ;;  %1644 = vrot.lane.b32.xlu0 %v1629_v45, %s8791_s0 }
 0x333   : > { %1650 = vrot.lane.b32.xlu1 %v1629_v45, %s8793_s9  ;;  %1647 = vrot.lane.b32.xlu0 %v1629_v45, %s8792_s28 }
 0x337   : > { %1717 = vrot.lane.b32.xlu1 %v9628_v49, %s8787_s1  ;;  %1714 = vrot.lane.b32.xlu0 %v9628_v49, %s8788_s23 }
 0x33b   : > { %1720 = vrot.lane.b32.xlu1 %v9628_v49, %s8790_s4  ;;  %1654 = vrot.lane.b32.xlu0 %v9634_v50, %s8788_s23 }
 0x33f   : > { %1723 = vrot.lane.b32.xlu1 %v9628_v49, %s8789_s3  ;;  %1657 = vrot.lane.b32.xlu0 %v9634_v50, %s8787_s1 }
 0x343   : > { %1726 = vrot.lane.b32.xlu1 %v9628_v49, %s8791_s0  ;;  %1660 = vrot.lane.b32.xlu0 %v9634_v50, %s8790_s4 }
 0x347   : > { %1729 = vrot.lane.b32.xlu1 %v9628_v49, %s8792_s28  ;;  %1663 = vrot.lane.b32.xlu0 %v9634_v50, %s8789_s3 }
 0x34b   : > { %1732 = vrot.lane.b32.xlu1 %v9628_v49, %s8793_s9  ;;  %1666 = vrot.lane.b32.xlu0 %v9634_v50, %s8791_s0 }
 0x34f   : > { %1672 = vrot.lane.b32.xlu1 %v9634_v50, %s8793_s9  ;;  %1669 = vrot.lane.b32.xlu0 %v9634_v50, %s8792_s28 }
 0x353   : > { %1755 = vrot.lane.b32.xlu0 %v9660_v55, %s8787_s1  ;;  %7901 = vrot.lane.b32.xlu1 %v7900_v59, %s8788_s23 }
 0x357   : > { %1764 = vrot.lane.b32.xlu0 %v9660_v55, %s8791_s0  ;;  %1758 = vrot.lane.b32.xlu1 %v9660_v55, %s8790_s4 }
 0x35b   : > { %1770 = vrot.lane.b32.xlu0 %v9660_v55, %s8793_s9  ;;  %1761 = vrot.lane.b32.xlu1 %v9660_v55, %s8789_s3 }
 0x35f   : > { %1767 = vrot.lane.b32.xlu1 %v9660_v55, %s8792_s28 }
 0x38d   : > { %v1696_v60 = vpop.permute.xlu1 %1695  ;;  %v1693_v61 = vpop.permute.xlu0 %1692 }
 0x38e   : > { %v1736_v62 = vpack.c.bf16 %v1693_v61, %v1693_v61  ;;  %v1737_v2 = vpack.c.bf16 %v1696_v60, %v1696_v60 }
 0x390   : > { %v1862_v63 = vsel %vm1811_vm1, %v1736_v62, 0  ;;  %v1908_v10 = vsel %vm1811_vm1, %v1737_v2, 0 }
 0x391   : > { %v1636_v0 = vpop.permute.xlu1 %1635  ;;  %v1633_v1 = vpop.permute.xlu0 %1632  ;;  %7361 = vmatpush3.bf16.xpose.msra.mxu1 %v1862_v63 }
 0x392   : > { %7366 = vmatprep.subr.bf16.mxu1 %v8785_v5  ;;  %v1676_v7 = vpack.c.bf16 %v1633_v1, %v1633_v1  ;;  %v1677_v16 = vpack.c.bf16 %v1636_v0, %v1636_v0  ;;  %v1795_v1 = vpack.c.bf16 %v9660_v55, %v9660_v55 }
 0x395   : > { %v1702_v3 = vpop.permute.xlu1 %1701  ;;  %v1699_v6 = vpop.permute.xlu0 %1698 }
 0x396   : > { %v1739_v8 = vpack.c.bf16 %v1702_v3, %v1702_v3  ;;  %v1738_v13 = vpack.c.bf16 %v1699_v6, %v1699_v6 }
 0x398   : > { %7363 = vmatmul.mubr.msk.bf16.vlgmr.msra.gmra.mrb[8].mxu1 %vm1811_vm1, %v1676_v7  ;;  %v2000_v9 = vsel %vm1811_vm1, %v1739_v8, 0  ;;  %v1954_v20 = vsel %vm1811_vm1, %v1738_v13, 0  ;;  %v2746_v7 = vsel %vm2744_vm2, %v1795_v1, 0 }
 0x399   : > { %7379 = vmatpush3.bf16.xpose.msra.mxu0 %v2000_v9  ;;  %v1705_v11 = vpop.permute.xlu1 %1704  ;;  %v1639_v12 = vpop.permute.xlu0 %1638  ;;  %7367 = vmatpush3.bf16.xpose.msra.mxu1 %v1908_v10 }
 0x39a   : > { %7368 = vmatprep.mubr.msk.bf16.mxu1 %vm8786_vm0, %v8785_v5  ;;  %7372 = vmatprep.subr.bf16.mxu1 %v8785_v5  ;;  %v1740_v23 = vpack.c.bf16 %v1705_v11, %v1705_v11  ;;  %v1678_v27 = vpack.c.bf16 %v1639_v12, %v1639_v12 }
 0x39b   : > { %7390 = vmatprep.subr.bf16.mxu0 %v8785_v5 }
 0x39c   : > { %v2046_v30 = vsel %vm1811_vm1, %v1740_v23, 0 }
 0x39d   : > { %v1708_v14 = vpop.permute.xlu1 %1707  ;;  %v1642_v15 = vpop.permute.xlu0 %1641 }
 0x39e   : > { %v1741_v17 = vpack.c.bf16 %v1708_v14, %v1708_v14  ;;  %v1679_v18 = vpack.c.bf16 %v1642_v15, %v1642_v15 }
 0x3a0   : > { %7369 = vmatmul.mubr.msk.bf16.vlgmr.msra.gmra.mrb[12].mxu1 %vm1811_vm1, %v1677_v16  ;;  %7381 = vmatmul.mubr.msk.bf16.vlgmr.msra.gmra.mrb[4].mxu0 %vm1811_vm1, %v1679_v18  ;;  %v2092_v19 = vsel %vm1811_vm1, %v1741_v17, 0 }
 0x3a1   : > { %v1711_v21 = vpop.permute.xlu1 %1710  ;;  %7391 = vmatpush3.bf16.xpose.msra.mxu0 %v2092_v19  ;;  %v1645_v22 = vpop.permute.xlu0 %1644  ;;  %7373 = vmatpush3.bf16.xpose.msra.mxu1 %v1954_v20 }
 0x3a2   : > { %7374 = vmatprep.mubr.msk.bf16.mxu1 %vm8786_vm0, %v8785_v5  ;;  %7392 = vmatprep.mubr.msk.bf16.mxu0 %vm8786_vm0, %v8785_v5  ;;  %v1742_v35 = vpack.c.bf16 %v1711_v21, %v1711_v21  ;;  %v1680_v39 = vpack.c.bf16 %v1645_v22, %v1645_v22 }
 0x3a3   : > { %7384 = vmatprep.subr.bf16.mxu1 %v8785_v5  ;;  %7402 = vmatprep.subr.bf16.mxu0 %v8785_v5 }
 0x3a4   : > { %v2138_v42 = vsel %vm1811_vm1, %v1742_v35, 0 }
 0x3a5   : > { %v1651_v25 = vpop.permute.xlu1 %1650  ;;  %v1648_v26 = vpop.permute.xlu0 %1647 }
 0x3a6   : > { %v1681_v28 = vpack.c.bf16 %v1648_v26, %v1648_v26  ;;  %v1682_v49 = vpack.c.bf16 %v1651_v25, %v1651_v25 }
 0x3a8   : > { %7375 = vmatmul.mubr.msk.bf16.vlgmr.msra.gmra.mrb[16].mxu1 %vm1811_vm1, %v1678_v27  ;;  %7393 = vmatmul.mubr.msk.bf16.vlgmr.msra.gmra.mrb[8].mxu0 %vm1811_vm1, %v1681_v28 }
 0x3a9   : > { %v1718_v31 = vpop.permute.xlu1 %1717  ;;  %7403 = vmatpush3.bf16.xpose.msra.mxu0 %v2184_v29  ;;  %v1715_v32 = vpop.permute.xlu0 %1714  ;;  %7385 = vmatpush3.bf16.xpose.msra.mxu1 %v2046_v30 }
 0x3aa   : > { %7386 = vmatprep.mubr.msk.bf16.mxu1 %vm8786_vm0, %v8785_v5  ;;  %7404 = vmatprep.mubr.msk.bf16.mxu0 %vm8786_vm0, %v8785_v5  ;;  %v1745_v36 = vpack.c.bf16 %v1718_v31, %v1718_v31  ;;  %v1744_v45 = vpack.c.bf16 %v1715_v32, %v1715_v32 }
 0x3ab   : > { %7396 = vmatprep.subr.bf16.mxu1 %v8785_v5  ;;  %7414 = vmatprep.subr.bf16.mxu0 %v8785_v5 }
 0x3ac   : > { %v2276_v41 = vsel %vm1811_vm1, %v1745_v36, 0  ;;  %v2230_v52 = vsel %vm1811_vm1, %v1744_v45, 0 }
 0x3ad   : > { %v1721_v37 = vpop.permute.xlu1 %1720  ;;  %v1655_v38 = vpop.permute.xlu0 %1654 }
 0x3ae   : > { %v1746_v56 = vpack.c.bf16 %v1721_v37, %v1721_v37  ;;  %v1684_v60 = vpack.c.bf16 %v1655_v38, %v1655_v38 }
 0x3b0   : > { %7387 = vmatmul.mubr.msk.bf16.vlgmr.msra.gmra.mrb[20].mxu1 %vm1811_vm1, %v1680_v39  ;;  %7405 = vmatmul.mubr.msk.bf16.vlgmr.msra.gmra.mrb[12].mxu0 %vm1811_vm1, %v1683_v40  ;;  %v2322_v63 = vsel %vm1811_vm1, %v1746_v56, 0 }
 0x3b1   : > { %v1724_v43 = vpop.permute.xlu1 %1723  ;;  %7415 = vmatpush3.bf16.xpose.msra.mxu0 %v2276_v41  ;;  %v1658_v44 = vpop.permute.xlu0 %1657  ;;  %7397 = vmatpush3.bf16.xpose.msra.mxu1 %v2138_v42 }
 0x3b2   : > { %7398 = vmatprep.mubr.msk.bf16.mxu1 %vm8786_vm0, %v8785_v5  ;;  %7416 = vmatprep.mubr.msk.bf16.mxu0 %vm8786_vm0, %v8785_v5  ;;  %v1747_v46 = vpack.c.bf16 %v1724_v43, %v1724_v43  ;;  %v1685_v50 = vpack.c.bf16 %v1658_v44, %v1658_v44 }
 0x3b3   : > { %7408 = vmatprep.subr.bf16.mxu1 %v8785_v5  ;;  %7426 = vmatprep.subr.bf16.mxu0 %v8785_v5 }
 0x3b4   : > { %v2368_v51 = vsel %vm1811_vm1, %v1747_v46, 0 }
 0x3b5   : > { %v1727_v47 = vpop.permute.xlu1 %1726  ;;  %v1661_v48 = vpop.permute.xlu0 %1660 }
 0x3b6   : > { %v1748_v2 = vpack.c.bf16 %v1727_v47, %v1727_v47  ;;  %v1686_v3 = vpack.c.bf16 %v1661_v48, %v1661_v48 }
 0x3b8   : > { %7399 = vmatmul.mubr.msk.bf16.vlgmr.msra.gmra.mrb[24].mxu1 %vm1811_vm1, %v1682_v49  ;;  %7417 = vmatmul.mubr.msk.bf16.vlgmr.msra.gmra.mrb[16].mxu0 %vm1811_vm1, %v1685_v50  ;;  %v2414_v8 = vsel %vm1811_vm1, %v1748_v2, 0 }
 0x3b9   : > { %v1730_v53 = vpop.permute.xlu1 %1729  ;;  %7427 = vmatpush3.bf16.xpose.msra.mxu0 %v2368_v51  ;;  %v1664_v54 = vpop.permute.xlu0 %1663  ;;  %7409 = vmatpush3.bf16.xpose.msra.mxu1 %v2230_v52 }
 0x3ba   : > { %7410 = vmatprep.mubr.msk.bf16.mxu1 %vm8786_vm0, %v8785_v5  ;;  %7428 = vmatprep.mubr.msk.bf16.mxu0 %vm8786_vm0, %v8785_v5  ;;  %v1749_v57 = vpack.c.bf16 %v1730_v53, %v1730_v53  ;;  %v1687_v61 = vpack.c.bf16 %v1664_v54, %v1664_v54 }
 0x3bb   : > { %7420 = vmatprep.subr.bf16.mxu1 %v8785_v5  ;;  %7438 = vmatprep.subr.bf16.mxu0 %v8785_v5 }
 0x3bc   : > { %v2460_v62 = vsel %vm1811_vm1, %v1749_v57, 0 }
 0x3bd   : > { %v1667_v59 = vpop.permute.xlu0 %1666  ;;  %v1733_v9 = vpop.permute.xlu1 %1732 }
 0x3be   : > { %v1750_v55 = vpack.c.bf16 %v1733_v9, %v1733_v9  ;;  %v1688_v10 = vpack.c.bf16 %v1667_v59, %v1667_v59 }
 0x3c0   : > { %7411 = vmatmul.mubr.msk.bf16.vlgmr.msra.gmra.mrb[28].mxu1 %vm1811_vm1, %v1684_v60  ;;  %7429 = vmatmul.mubr.msk.bf16.vlgmr.msra.gmra.mrb[20].mxu0 %vm1811_vm1, %v1687_v61  ;;  %v2506_v11 = vsel %vm1811_vm1, %v1750_v55, 0 }
 0x3c1   : > { %7439 = vmatpush3.bf16.xpose.msra.mxu0 %v2460_v62  ;;  %7421 = vmatpush3.bf16.xpose.msra.mxu1 %v2322_v63  ;;  %v1670_v0 = vpop.permute.xlu0 %1669  ;;  %v1673_v12 = vpop.permute.xlu1 %1672 }
 0x3c2   : > { %7422 = vmatprep.mubr.msk.bf16.mxu1 %vm8786_vm0, %v8785_v5  ;;  %7440 = vmatprep.mubr.msk.bf16.mxu0 %vm8786_vm0, %v8785_v5  ;;  %v1689_v6 = vpack.c.bf16 %v1670_v0, %v1670_v0  ;;  %v1690_v13 = vpack.c.bf16 %v1673_v12, %v1673_v12 }
 0x3c3   : > { %7432 = vmatprep.subr.bf16.mxu1 %v8785_v5  ;;  %7450 = vmatprep.subr.bf16.mxu0 %v8785_v5 }
 0x3c5   : > { %v9766_v19 = vpop.permute.xlu1 %7901  ;;  %v9775_v28 = vpop.permute.xlu0 %1755 }
 0x3c6   : > { %v7903_v20 = vunpack.i.l.bf16 %v9766_v19 }
 0x3c8   : > { %7423 = vmatmul.mubr.msk.bf16.vlgmr.msra.gmra.mrb[32].mxu1 %vm1811_vm1, %v1686_v3  ;;  %7441 = vmatmul.mubr.msk.bf16.vlgmr.msra.gmra.mrb[24].mxu0 %vm1811_vm1, %v1689_v6  ;;  %v1796_v21 = vpack.c.bf16 %v7903_v20, %v7903_v20 }
 0x3c9   : > { %7433 = vmatpush3.bf16.xpose.msra.mxu1 %v2414_v8  ;;  %7434 = vmatprep.mubr.msk.bf16.mxu1 %vm8786_vm0, %v8785_v5  ;;  %v9785_v41 = vpop.permute.xlu0 %1764 }
 0x3ca   : > { %7444 = vmatprep.subr.bf16.mxu1 %v8785_v5  ;;  %7451 = vmatpush3.bf16.msra.mxu0 %v2746_v7  ;;  %v2792_v22 = vsel %vm2744_vm2, %v1796_v21, 0 }
 0x3cb   : > { %7452 = vmatprep.mubr.msk.bf16.mxu0 %vm8786_vm0, %v8785_v5  ;;  %7462 = vmatprep.subr.bf16.mxu0 %v8785_v5 }
 0x3cd   : > { %v9795_v52 = vpop.permute.xlu0 %1770 }
 0x3d0   : > { %7435 = vmatmul.mubr.msk.bf16.vlgmr.msra.gmra.mrb[36].mxu1 %vm1811_vm1, %v1688_v10 }
 0x3d1   : > { %7445 = vmatpush3.bf16.xpose.msra.mxu1 %v2506_v11  ;;  %7446 = vmatprep.mubr.msk.bf16.mxu1 %vm8786_vm0, %v8785_v5 }
 0x3d2   : > { %7456 = vmatprep.subr.bf16.mxu1 %v8785_v5 }
 0x3d8   : > { %7447 = vmatmul.mubr.msk.bf16.vlgmr.msra.gmra.mrb[40].mxu1 %vm1811_vm1, %v1690_v13 }
 0x3d9   : > { %7458 = vmatprep.mubr.msk.bf16.mxu1 %vm8786_vm0, %v8785_v5  ;;  %7457 = vmatpush3.bf16.msra.mxu1 %v2792_v22 }
 0x3da   : > { %7468 = vmatprep.subr.bf16.mxu1 %v8785_v5 }
 0x3f8   : > { %v9762_v14 = vpop.f32.mrb[4].mxu1 }
 0x3f9   : > { %v7358_v15 = vpop.f32.mrb[5].mxu1  ;;  %v2549_v16 = vsel %vm2548_vm3, %v9762_v14, -inf }
 0x3fa   : > { %2550 = vmax.xlane.f32.xlu0 %v2549_v16  ;;  %v1855_v17 = vpop.f32.mrb[6].mxu1 }
 0x3fb   : > { %v7359_v18 = vpop.f32.mrb[7].mxu1 }
 0x46b   : > { %v9771_v23 = vpop.f32.mrb[8].mxu1 }
 0x46c   : > { %v7364_v24 = vpop.f32.mrb[9].mxu1  ;;  %v2552_v25 = vsel %vm2548_vm3, %v9771_v23, -inf }
 0x46d   : > { %2553 = vmax.xlane.f32.xlu1 %v2552_v25  ;;  %v1901_v26 = vpop.f32.mrb[10].mxu1 }
 0x46e   : > { %v7365_v27 = vpop.f32.mrb[11].mxu1 }
 0x473   : > { %v9777_v29 = vpop.f32.mrb[12].mxu1  ;;  %v9779_v30 = vpop.f32.mrb[4].mxu0 }
 0x474   : > { %v7370_v31 = vpop.f32.mrb[13].mxu1  ;;  %v7382_v32 = vpop.f32.mrb[5].mxu0  ;;  %v2561_v35 = vsel %vm2548_vm3, %v9779_v30, -inf  ;;  %v2555_v36 = vsel %vm2548_vm3, %v9777_v29, -inf }
 0x475   : > { %v2039_v37 = vpop.f32.mrb[6].mxu0  ;;  %2562 = vmax.xlane.f32.xlu1 %v2561_v35  ;;  %2556 = vmax.xlane.f32.xlu0 %v2555_v36  ;;  %v1947_v38 = vpop.f32.mrb[14].mxu1 }
 0x476   : > { %v7371_v39 = vpop.f32.mrb[15].mxu1  ;;  %v7383_v40 = vpop.f32.mrb[7].mxu0 }
 0x47b   : > { %v9787_v42 = vpop.f32.mrb[8].mxu0  ;;  %v9789_v43 = vpop.f32.mrb[16].mxu1 }
 0x47c   : > { %v7376_v44 = vpop.f32.mrb[17].mxu1  ;;  %v7394_v45 = vpop.f32.mrb[9].mxu0  ;;  %v2567_v46 = vsel %vm2548_vm3, %v9787_v42, -inf  ;;  %v2558_v47 = vsel %vm2548_vm3, %v9789_v43, -inf }
 0x47d   : > { %v2131_v48 = vpop.f32.mrb[10].mxu0  ;;  %2568 = vmax.xlane.f32.xlu1 %v2567_v46  ;;  %2559 = vmax.xlane.f32.xlu0 %v2558_v47  ;;  %v1993_v49 = vpop.f32.mrb[18].mxu1 }
 0x47e   : > { %v7377_v50 = vpop.f32.mrb[19].mxu1  ;;  %v7395_v51 = vpop.f32.mrb[11].mxu0 }
 0x483   : > { %v9797_v53 = vpop.f32.mrb[12].mxu0  ;;  %v9799_v54 = vpop.f32.mrb[20].mxu1 }
 0x484   : > { %v7388_v56 = vpop.f32.mrb[21].mxu1  ;;  %v7406_v57 = vpop.f32.mrb[13].mxu0  ;;  %v2573_v59 = vsel %vm2548_vm3, %v9797_v53, -inf  ;;  %v2564_v60 = vsel %vm2548_vm3, %v9799_v54, -inf }
 0x485   : > { %v2223_v61 = vpop.f32.mrb[14].mxu0  ;;  %2574 = vmax.xlane.f32.xlu1 %v2573_v59  ;;  %2565 = vmax.xlane.f32.xlu0 %v2564_v60  ;;  %v2085_v62 = vpop.f32.mrb[22].mxu1 }
 0x486   : > { %v7389_v63 = vpop.f32.mrb[23].mxu1  ;;  %v7407_v0 = vpop.f32.mrb[15].mxu0 }
 0x487   : > { %v2551_v1 = vpop.xlane.xlu0 %2550  ;;  %v9846_v62 = vpop.permute.xlu1 %1758 }
 0x488   : > { %v2597_v2 = vsub.f32 %v9762_v14, %v2551_v1 }
 0x48a   : > { %v2613_v15 = vmul.f32 1.442695, %v2597_v2 }
 0x48b   : > { %v9806_v3 = vpop.f32.mrb[24].mxu1  ;;  %v9808_v6 = vpop.f32.mrb[16].mxu0 }
 0x48c   : > { %v7400_v7 = vpop.f32.mrb[25].mxu1  ;;  %v7418_v8 = vpop.f32.mrb[17].mxu0  ;;  %v2579_v9 = vsel %vm2548_vm3, %v9808_v6, -inf  ;;  %v2570_v55 = vsel %vm2548_vm3, %v9806_v3, -inf  ;;  %8100 = vpow2.f32 %v2613_v15 }
 0x48d   : > { %v2315_v10 = vpop.f32.mrb[18].mxu0  ;;  %2580 = vmax.xlane.f32.xlu1 %v2579_v9  ;;  %2571 = vmax.xlane.f32.xlu0 %v2570_v55  ;;  %v2177_v11 = vpop.f32.mrb[26].mxu1 }
 0x48e   : > { %v7401_v12 = vpop.f32.mrb[27].mxu1  ;;  %v7419_v13 = vpop.f32.mrb[19].mxu0 }
 0x48f   : > { %v9848_v63 = vpop.permute.xlu1 %1761 }
 0x493   : > { %v9814_v14 = vpop.f32.mrb[28].mxu1  ;;  %v9816_v16 = vpop.f32.mrb[20].mxu0 }
 0x494   : > { %v7412_v17 = vpop.f32.mrb[29].mxu1  ;;  %v7430_v18 = vpop.f32.mrb[21].mxu0  ;;  %v2585_v20 = vsel %vm2548_vm3, %v9816_v16, -inf  ;;  %v2576_v21 = vsel %vm2548_vm3, %v9814_v14, -inf }
 0x495   : > { %v2407_v22 = vpop.f32.mrb[22].mxu0  ;;  %2586 = vmax.xlane.f32.xlu1 %v2585_v20  ;;  %2577 = vmax.xlane.f32.xlu0 %v2576_v21  ;;  %v2269_v24 = vpop.f32.mrb[30].mxu1 }
 0x496   : > { %v7413_v25 = vpop.f32.mrb[31].mxu1  ;;  %v7431_v26 = vpop.f32.mrb[23].mxu0 }
 0x497   : > { %v9830_v38 = vpop.eup %8100  ;;  %v9850_v0 = vpop.permute.xlu1 %1767 }
 0x498   : > { %v2645_v46 = vsel %vm2548_vm3, %v9830_v38, 0.0 }
 0x49b   : > { %v9822_v27 = vpop.f32.mrb[32].mxu1  ;;  %v9824_v31 = vpop.f32.mrb[24].mxu0 }
 0x49c   : > { %v7424_v32 = vpop.f32.mrb[33].mxu1  ;;  %v7442_v35 = vpop.f32.mrb[25].mxu0  ;;  %v2591_v36 = vsel %vm2548_vm3, %v9824_v31, -inf  ;;  %v2582_v37 = vsel %vm2548_vm3, %v9822_v27, -inf }
 0x49d   : > { %v2499_v39 = vpop.f32.mrb[26].mxu0  ;;  %2592 = vmax.xlane.f32.xlu1 %v2591_v36  ;;  %2583 = vmax.xlane.f32.xlu0 %v2582_v37  ;;  %v2361_v40 = vpop.f32.mrb[34].mxu1 }
 0x49e   : > { %v7425_v44 = vpop.f32.mrb[35].mxu1  ;;  %v7443_v45 = vpop.f32.mrb[27].mxu0 }
 0x4a1   : > { %2646 = vadd.xlane.f32.xlu1 %v2645_v46 }
 0x4a3   : > { %v9834_v47 = vpop.f32.mrb[36].mxu1 }
 0x4a4   : > { %v7436_v48 = vpop.f32.mrb[37].mxu1  ;;  %v2588_v49 = vsel %vm2548_vm3, %v9834_v47, -inf }
 0x4a5   : > { %2589 = vmax.xlane.f32.xlu0 %v2588_v49  ;;  %v2453_v50 = vpop.f32.mrb[38].mxu1 }
 0x4a6   : > { %v7437_v51 = vpop.f32.mrb[39].mxu1 }
 0x4ab   : > { %v9838_v56 = vpop.f32.mrb[40].mxu1 }
 0x4ac   : > { %v7448_v57 = vpop.f32.mrb[41].mxu1  ;;  %v2594_v61 = vsel %vm2548_vm3, %v9838_v56, -inf }
 0x4ad   : > { %v2545_v59 = vpop.f32.mrb[42].mxu1 }
 0x4ae   : > { %v7449_v60 = vpop.f32.mrb[43].mxu1 }
 0x4b2   : > { %1780 = vrot.lane.b32.xlu1 %v9668_v58, %s8790_s4 }
 0x4bb   : > { %1777 = vrot.lane.b32.xlu0 %v9668_v58, %s8787_s1 }
 0x4da   : > { %2595 = vmax.xlane.f32.xlu0 %v2594_v61 }
 0x4fa   : > { %v2554_v1 = vpop.xlane.xlu1 %2553 }
 0x4fb   : > { %v2598_v2 = vsub.f32 %v9771_v23, %v2554_v1 }
 0x4fd   : > { %v2615_v7 = vmul.f32 1.442695, %v2598_v2 }
 0x4ff   : > { %8102 = vpow2.f32 %v2615_v7 }
 0x502   : > { %v2563_v8 = vpop.xlane.xlu1 %2562  ;;  %v2557_v9 = vpop.xlane.xlu0 %2556 }
 0x503   : > { %v2601_v55 = vsub.f32 %v9779_v30, %v2563_v8  ;;  %v2599_v10 = vsub.f32 %v9777_v29, %v2557_v9 }
 0x505   : > { %v2621_v11 = vmul.f32 1.442695, %v2601_v55  ;;  %v2617_v12 = vmul.f32 1.442695, %v2599_v10 }
 0x507   : > { %8104 = vpow2.f32 %v2621_v11 }
 0x508   : > { %8106 = vpow2.f32 %v2617_v12 }
 0x509   : > { %v9855_v13 = vpop.eup %8102 }
 0x50a   : > { %v2569_v15 = vpop.xlane.xlu1 %2568  ;;  %v2560_v17 = vpop.xlane.xlu0 %2559  ;;  %v2648_v18 = vsel %vm2548_vm3, %v9855_v13, 0.0 }
 0x50b   : > { %v2603_v23 = vsub.f32 %v9787_v42, %v2569_v15  ;;  %v2600_v20 = vsub.f32 %v9789_v43, %v2560_v17  ;;  %2649 = vadd.xlane.f32.xlu0 %v2648_v18  ;;  %v1797_v15 = vpack.c.bf16 %v9775_v28, %v9775_v28 }
 0x50d   : > { %v2625_v21 = vmul.f32 1.442695, %v2603_v23  ;;  %v2619_v30 = vmul.f32 1.442695, %v2600_v20  ;;  %v2838_v20 = vsel %vm2744_vm2, %v1797_v15, 0 }
 0x50f   : > { %8108 = vpow2.f32 %v2625_v21 }
 0x510   : > { %8110 = vpow2.f32 %v2619_v30 }
 0x511   : > { %v9861_v29 = vpop.eup %8104 }
 0x512   : > { %v2566_v22 = vpop.xlane.xlu0 %2565  ;;  %v2657_v24 = vsel %vm2548_vm3, %v9861_v29, 0.0  ;;  %v9865_v25 = vpop.eup %8106 }
 0x513   : > { %v2602_v26 = vsub.f32 %v9799_v54, %v2566_v22  ;;  %2658 = vadd.xlane.f32.xlu1 %v2657_v24  ;;  %v2651_v42 = vsel %vm2548_vm3, %v9865_v25, 0.0  ;;  %v2575_v54 = vpop.xlane.xlu1 %2574 }
 0x514   : > { %v2605_v9 = vsub.f32 %v9797_v53, %v2575_v54 }
 0x515   : > { %v2623_v32 = vmul.f32 1.442695, %v2602_v26 }
 0x516   : > { %v2629_v10 = vmul.f32 1.442695, %v2605_v9 }
 0x517   : > { %2652 = vadd.xlane.f32.xlu1 %v2651_v42  ;;  %8112 = vpow2.f32 %v2623_v32 }
 0x519   : > { %v9870_v43 = vpop.eup %8108 }
 0x51a   : > { %v2572_v35 = vpop.xlane.xlu0 %2571  ;;  %v2663_v36 = vsel %vm2548_vm3, %v9870_v43, 0.0  ;;  %v9874_v37 = vpop.eup %8110 }
 0x51b   : > { %v2604_v39 = vsub.f32 %v9806_v3, %v2572_v35  ;;  %2664 = vadd.xlane.f32.xlu0 %v2663_v36  ;;  %v2654_v44 = vsel %vm2548_vm3, %v9874_v37, 0.0  ;;  %v2581_v46 = vpop.xlane.xlu1 %2580 }
 0x51d   : > { %v2627_v40 = vmul.f32 1.442695, %v2604_v39 }
 0x51f   : > { %2655 = vadd.xlane.f32.xlu0 %v2654_v44  ;;  %8114 = vpow2.f32 %v2627_v40 }
 0x521   : > { %v9879_v45 = vpop.eup %8112 }
 0x522   : > { %v2578_v48 = vpop.xlane.xlu0 %2577  ;;  %v2660_v50 = vsel %vm2548_vm3, %v9879_v45, 0.0  ;;  %v2587_v3 = vpop.xlane.xlu1 %2586 }
 0x523   : > { %v2606_v49 = vsub.f32 %v9814_v14, %v2578_v48  ;;  %2661 = vadd.xlane.f32.xlu0 %v2660_v50  ;;  %v2609_v23 = vsub.f32 %v9816_v16, %v2587_v3 }
 0x525   : > { %v2631_v51 = vmul.f32 1.442695, %v2606_v49 }
 0x527   : > { %8116 = vpow2.f32 %v2631_v51 }
 0x528   : > { %1783 = vrot.lane.b32.xlu1 %v9668_v58, %s8789_s3 }
 0x529   : > { %v9886_v57 = vpop.eup %8114 }
 0x52a   : > { %v2593_v59 = vpop.xlane.xlu1 %2592  ;;  %v2584_v60 = vpop.xlane.xlu0 %2583  ;;  %v2666_v1 = vsel %vm2548_vm3, %v9886_v57, 0.0 }
 0x52b   : > { %v2608_v61 = vsub.f32 %v9822_v27, %v2584_v60  ;;  %2667 = vadd.xlane.f32.xlu0 %v2666_v1  ;;  %v2607_v27 = vsub.f32 %v9808_v6, %v2581_v46  ;;  %v2637_v6 = vmul.f32 1.442695, %v2609_v23  ;;  %v2611_v28 = vsub.f32 %v9824_v31, %v2593_v59 }
 0x52c   : > { %v1798_v59 = vpack.c.bf16 %v9846_v62, %v9846_v62 }
 0x52d   : > { %v2635_v14 = vmul.f32 1.442695, %v2608_v61  ;;  %v2633_v18 = vmul.f32 1.442695, %v2607_v27 }
 0x52e   : > { %v2647_v2 = vpop.xlane.xlu1 %2646 }
 0x52f   : > { %8118 = vpow2.f32 %v2635_v14  ;;  %v2884_v14 = vsel %vm2744_vm2, %v1798_v59, 0 }
 0x530   : > { %8120 = vrcp.f32 %v2647_v2 }
 0x531   : > { %v9891_v7 = vpop.eup %8116  ;;  %8122 = vpow2.f32 %v2629_v10 }
 0x532   : > { %v2672_v8 = vsel %vm2548_vm3, %v9891_v7, 0.0  ;;  %8124 = vpow2.f32 %v2633_v18  ;;  %v2590_v42 = vpop.xlane.xlu0 %2589  ;;  %v9945_v50 = vpop.permute.xlu1 %1780 }
 0x533   : > { %2673 = vadd.xlane.f32.xlu0 %v2672_v8  ;;  %8126 = vpow2.f32 %v2637_v6  ;;  %v2610_v35 = vsub.f32 %v9834_v47, %v2590_v42 }
 0x535   : > { %v2639_v36 = vmul.f32 1.442695, %v2610_v35  ;;  %v7904_v35 = vunpack.i.h.bf16 %v9766_v19 }
 0x536   : > { %v9930_v39 = vpop.permute.xlu0 %1777 }
 0x537   : > { %v1804_v19 = vpack.c.bf16 %v7904_v35, %v7904_v35 }
 0x539   : > { %v9896_v55 = vpop.eup %8118 }
 0x53a   : > { %v8121_v11 = vpop.eup %8120  ;;  %v2678_v12 = vsel %vm2548_vm3, %v9896_v55, 0.0 }
 0x53b   : > { %2679 = vadd.xlane.f32.xlu0 %v2678_v12  ;;  %v2709_v17 = vmul.f32 %v8121_v11, %v9830_v38  ;;  %v2641_v38 = vmul.f32 1.442695, %v2611_v28  ;;  %v9911_v21 = vpop.eup %8122 }
 0x53c   : > { %v2669_v16 = vsel %vm2548_vm3, %v9911_v21, 0.0  ;;  %v9915_v30 = vpop.eup %8124 }
 0x53d   : > { %v2725_v53 = vpack.c.bf16 %v2709_v17, %v2709_v17  ;;  %8128 = vpow2.f32 %v2641_v38  ;;  %v2675_v22 = vsel %vm2548_vm3, %v9915_v30, 0.0  ;;  %v9919_v24 = vpop.eup %8126  ;;  %v1801_v17 = vpack.c.bf16 %v9850_v0, %v9850_v0 }
 0x53e   : > { %v2681_v31 = vsel %vm2548_vm3, %v9919_v24, 0.0  ;;  %8130 = vpow2.f32 %v2639_v36 }
 0x53f   : > { %7453 = vmatmul.mubr.msk.bf16.vlgmr.msra.gmra.mrb[28].mxu0 %vm2548_vm3, %v2725_v53  ;;  %v3022_v38 = vsel %vm2744_vm2, %v1801_v17, 0 }
 0x540   : > { %7463 = vmatpush3.bf16.msra.mxu0 %v2838_v20  ;;  %7464 = vmatprep.mubr.msk.bf16.mxu0 %vm8786_vm0, %v8785_v5 }
 0x541   : > { %7474 = vmatprep.subr.bf16.mxu0 %v8785_v5 }
 0x547   : > { %v9925_v26 = vpop.eup %8128 }
 0x548   : > { %v2687_v32 = vsel %vm2548_vm3, %v9925_v26, 0.0  ;;  %v9933_v46 = vpop.eup %8130 }
 0x549   : > { %v2684_v48 = vsel %vm2548_vm3, %v9933_v46, 0.0 }
 0x54c   : > { %2670 = vadd.xlane.f32.xlu1 %v2669_v16  ;;  %v1803_v16 = vpack.c.bf16 %v9668_v58, %v9668_v58 }
 0x550   : > { %2676 = vadd.xlane.f32.xlu1 %v2675_v22 }
 0x551   : > { %1786 = vrot.lane.b32.xlu0 %v9668_v58, %s8791_s0 }
 0x554   : > { %2682 = vadd.xlane.f32.xlu1 %v2681_v31 }
 0x558   : > { %2688 = vadd.xlane.f32.xlu1 %v2687_v32 }
 0x567   : > { %v2596_v40 = vpop.xlane.xlu0 %2595 }
 0x568   : > { %v2612_v54 = vsub.f32 %v9838_v56, %v2596_v40 }
 0x56a   : > { %v2643_v44 = vmul.f32 1.442695, %v2612_v54  ;;  %v3160_v54 = vsel %vm2744_vm2, %v1804_v19, 0 }
 0x56c   : > { %8132 = vpow2.f32 %v2643_v44  ;;  %v1806_v44 = vpack.c.bf16 %v9945_v50, %v9945_v50 }
 0x570   : > { %2685 = vadd.xlane.f32.xlu0 %v2684_v48 }
 0x576   : > { %v9937_v49 = vpop.eup %8132 }
 0x577   : > { %v2690_v47 = vsel %vm2548_vm3, %v9937_v49, 0.0 }
 0x578   : > { %2691 = vadd.xlane.f32.xlu1 %v2690_v47 }
 0x586   : > { %1792 = vrot.lane.b32.xlu0 %v9668_v58, %s8793_s9 }
 0x589   : > { %1789 = vrot.lane.b32.xlu1 %v9668_v58, %s8792_s28 }
 0x598   : > { %v2650_v56 = vpop.xlane.xlu0 %2649 }
 0x599   : > { %8134 = vrcp.f32 %v2650_v56  ;;  %v3252_v56 = vsel %vm2744_vm2, %v1806_v44, 0 }
 0x5a0   : > { %v2659_v51 = vpop.xlane.xlu1 %2658 }
 0x5a3   : > { %v8135_v3 = vpop.eup %8134 }
 0x5a4   : > { %v2653_v60 = vpop.xlane.xlu1 %2652  ;;  %v2710_v61 = vmul.f32 %v8135_v3, %v9855_v13  ;;  %v1799_v13 = vpack.c.bf16 %v9848_v63, %v9848_v63 }
 0x5a5   : > { %8136 = vrcp.f32 %v2653_v60 }
 0x5a6   : > { %v2726_v1 = vpack.c.bf16 %v2710_v61, %v2710_v61  ;;  %8138 = vrcp.f32 %v2659_v51  ;;  %v2930_v12 = vsel %vm2744_vm2, %v1799_v13, 0 }
 0x5a8   : > { %7459 = vmatmul.mubr.msk.bf16.vlgmr.msra.gmra.mrb[44].mxu1 %vm2548_vm3, %v2726_v1  ;;  %v2665_v2 = vpop.xlane.xlu0 %2664  ;;  %v1784_v51 = vpop.permute.xlu1 %1783 }
 0x5a9   : > { %7469 = vmatpush3.bf16.msra.mxu1 %v2884_v14  ;;  %7470 = vmatprep.mubr.msk.bf16.mxu1 %vm8786_vm0, %v8785_v5 }
 0x5aa   : > { %7480 = vmatprep.subr.bf16.mxu1 %v8785_v5 }
 0x5ac   : > { %v2656_v8 = vpop.xlane.xlu0 %2655 }
 0x5ad   : > { %8140 = vrcp.f32 %v2656_v8 }
 0x5ae   : > { %8142 = vrcp.f32 %v2665_v2 }
 0x5af   : > { %v8137_v62 = vpop.eup %8136 }
 0x5b0   : > { %v2711_v9 = vmul.f32 %v8137_v62, %v9865_v25  ;;  %v2662_v10 = vpop.xlane.xlu0 %2661  ;;  %v8139_v11 = vpop.eup %8138  ;;  %v1800_v25 = vpack.c.bf16 %v9785_v41, %v9785_v41 }
 0x5b1   : > { %8144 = vrcp.f32 %v2662_v10  ;;  %v2713_v15 = vmul.f32 %v8139_v11, %v9861_v29 }
 0x5b2   : > { %v2727_v27 = vpack.c.bf16 %v2711_v9, %v2711_v9  ;;  %v2976_v29 = vsel %vm2744_vm2, %v1800_v25, 0 }
 0x5b3   : > { %v2729_v20 = vpack.c.bf16 %v2713_v15, %v2713_v15 }
 0x5b4   : > { %7465 = vmatmul.mubr.msk.bf16.vlgmr.msra.gmra.mrb[32].mxu0 %vm2548_vm3, %v2727_v27  ;;  %v1807_v27 = vpack.c.bf16 %v1784_v51, %v1784_v51 }
 0x5b5   : > { %7475 = vmatpush3.bf16.msra.mxu0 %v2930_v12  ;;  %7476 = vmatprep.mubr.msk.bf16.mxu0 %vm8786_vm0, %v8785_v5 }
 0x5b6   : > { %7486 = vmatprep.subr.bf16.mxu0 %v8785_v5 }
 0x5b7   : > { %v8141_v63 = vpop.eup %8140 }
 0x5b8   : > { %v2712_v18 = vmul.f32 %v8141_v63, %v9874_v37  ;;  %v2668_v23 = vpop.xlane.xlu0 %2667  ;;  %v8143_v6 = vpop.eup %8142  ;;  %v1802_v37 = vpack.c.bf16 %v9795_v52, %v9795_v52 }
 0x5b9   : > { %8146 = vrcp.f32 %v2668_v23  ;;  %v2715_v0 = vmul.f32 %v8143_v6, %v9870_v43 }
 0x5ba   : > { %v2728_v53 = vpack.c.bf16 %v2712_v18, %v2712_v18  ;;  %v3068_v43 = vsel %vm2744_vm2, %v1802_v37, 0 }
 0x5bb   : > { %v8145_v28 = vpop.eup %8144  ;;  %v2731_v32 = vpack.c.bf16 %v2715_v0, %v2715_v0 }
 0x5bc   : > { %7471 = vmatmul.mubr.msk.bf16.vlgmr.msra.gmra.mrb[48].mxu1 %vm2548_vm3, %v2728_v53  ;;  %7477 = vmatmul.mubr.msk.bf16.vlgmr.msra.gmra.mrb[36].mxu0 %vm2548_vm3, %v2729_v20  ;;  %v2714_v41 = vmul.f32 %v8145_v28, %v9879_v45  ;;  %v3114_v45 = vsel %vm2744_vm2, %v1803_v16, 0 }
 0x5bd   : > { %7481 = vmatpush3.bf16.msra.mxu1 %v2976_v29  ;;  %7487 = vmatpush3.bf16.msra.mxu0 %v3022_v38 }
 0x5be   : > { %7482 = vmatprep.mubr.msk.bf16.mxu1 %vm8786_vm0, %v8785_v5  ;;  %7488 = vmatprep.mubr.msk.bf16.mxu0 %vm8786_vm0, %v8785_v5  ;;  %v2730_v31 = vpack.c.bf16 %v2714_v41, %v2714_v41 }
 0x5bf   : > { %7492 = vmatprep.subr.bf16.mxu1 %v8785_v5  ;;  %7498 = vmatprep.subr.bf16.mxu0 %v8785_v5 }
 0x5c0   : > { %v2674_v22 = vpop.xlane.xlu0 %2673 }
 0x5c1   : > { %8148 = vrcp.f32 %v2674_v22 }
 0x5c3   : > { %v8147_v42 = vpop.eup %8146 }
 0x5c4   : > { %7483 = vmatmul.mubr.msk.bf16.vlgmr.msra.gmra.mrb[52].mxu1 %vm2548_vm3, %v2730_v31  ;;  %7489 = vmatmul.mubr.msk.bf16.vlgmr.msra.gmra.mrb[40].mxu0 %vm2548_vm3, %v2731_v32  ;;  %v2716_v58 = vmul.f32 %v8147_v42, %v9886_v57 }
 0x5c5   : > { %7493 = vmatpush3.bf16.msra.mxu1 %v3068_v43  ;;  %7499 = vmatpush3.bf16.msra.mxu0 %v3114_v45 }
 0x5c6   : > { %7494 = vmatprep.mubr.msk.bf16.mxu1 %vm8786_vm0, %v8785_v5  ;;  %7504 = vmatprep.subr.bf16.mxu1 %v8785_v5  ;;  %v2732_v36 = vpack.c.bf16 %v2716_v58, %v2716_v58 }
 0x5c7   : > { %7500 = vmatprep.mubr.msk.bf16.mxu0 %vm8786_vm0, %v8785_v5  ;;  %7510 = vmatprep.subr.bf16.mxu0 %v8785_v5 }
 0x5c8   : > { %v2680_v52 = vpop.xlane.xlu0 %2679 }
 0x5c9   : > { %8150 = vrcp.f32 %v2680_v52 }
 0x5cb   : > { %v8149_v40 = vpop.eup %8148 }
 0x5cc   : > { %7495 = vmatmul.mubr.msk.bf16.vlgmr.msra.gmra.mrb[56].mxu1 %vm2548_vm3, %v2732_v36  ;;  %v2718_v57 = vmul.f32 %v8149_v40, %v9891_v7  ;;  %v1787_v3 = vpop.permute.xlu0 %1786 }
 0x5cd   : > { %7505 = vmatpush3.bf16.msra.mxu1 %v3160_v54  ;;  %7506 = vmatprep.mubr.msk.bf16.mxu1 %vm8786_vm0, %v8785_v5  ;;  %v1808_v7 = vpack.c.bf16 %v1787_v3, %v1787_v3 }
 0x5ce   : > { %7516 = vmatprep.subr.bf16.mxu1 %v8785_v5  ;;  %v2734_v48 = vpack.c.bf16 %v2718_v57, %v2718_v57 }
 0x5cf   : > { %v3344_v61 = vsel %vm2744_vm2, %v1808_v7, 0 }
 0x5d3   : > { %v8151_v47 = vpop.eup %8150 }
 0x5d4   : > { %7507 = vmatmul.mubr.msk.bf16.vlgmr.msra.gmra.mrb[60].mxu1 %vm2548_vm3, %v2734_v48  ;;  %v2720_v59 = vmul.f32 %v8151_v47, %v9896_v55  ;;  %v1805_v55 = vpack.c.bf16 %v9930_v39, %v9930_v39 }
 0x5d5   : > { %7517 = vmatpush3.bf16.msra.mxu1 %v3252_v56  ;;  %7518 = vmatprep.mubr.msk.bf16.mxu1 %vm8786_vm0, %v8785_v5 }
 0x5d6   : > { %7528 = vmatprep.subr.bf16.mxu1 %v8785_v5  ;;  %v2736_v50 = vpack.c.bf16 %v2720_v59, %v2720_v59  ;;  %v3206_v9 = vsel %vm2744_vm2, %v1805_v55, 0 }
 0x5d9   : > { %v2671_v60 = vpop.xlane.xlu1 %2670 }
 0x5da   : > { %8152 = vrcp.f32 %v2671_v60 }
 0x5dc   : > { %7519 = vmatmul.mubr.msk.bf16.vlgmr.msra.gmra.mrb[64].mxu1 %vm2548_vm3, %v2736_v50 }
 0x5dd   : > { %7529 = vmatpush3.bf16.msra.mxu1 %v3344_v61  ;;  %v2677_v1 = vpop.xlane.xlu1 %2676  ;;  %7530 = vmatprep.mubr.msk.bf16.mxu1 %vm8786_vm0, %v8785_v5 }
 0x5de   : > { %8154 = vrcp.f32 %v2677_v1  ;;  %7540 = vmatprep.subr.bf16.mxu1 %v8785_v5 }
 0x5e1   : > { %v2683_v14 = vpop.xlane.xlu1 %2682 }
 0x5e2   : > { %8156 = vrcp.f32 %v2683_v14 }
 0x5e4   : > { %v8153_v2 = vpop.eup %8152 }
 0x5e5   : > { %v2717_v8 = vmul.f32 %v8153_v2, %v9911_v21  ;;  %v3298_v21 = vsel %vm2744_vm2, %v1807_v27, 0  ;;  %v2689_v63 = vpop.xlane.xlu1 %2688 }
 0x5e6   : > { %8158 = vrcp.f32 %v2689_v63 }
 0x5e7   : > { %v2733_v62 = vpack.c.bf16 %v2717_v8, %v2717_v8 }
 0x5e8   : > { %v8155_v13 = vpop.eup %8154 }
 0x5e9   : > { %7501 = vmatmul.mubr.msk.bf16.vlgmr.msra.gmra.mrb[44].mxu0 %vm2548_vm3, %v2733_v62  ;;  %v2719_v10 = vmul.f32 %v8155_v13, %v9915_v30 }
 0x5ea   : > { %7511 = vmatpush3.bf16.msra.mxu0 %v3206_v9  ;;  %7512 = vmatprep.mubr.msk.bf16.mxu0 %vm8786_vm0, %v8785_v5 }
 0x5eb   : > { %7522 = vmatprep.subr.bf16.mxu0 %v8785_v5  ;;  %v2735_v11 = vpack.c.bf16 %v2719_v10, %v2719_v10 }
 0x5ec   : > { %v8157_v39 = vpop.eup %8156 }
 0x5ed   : > { %v2721_v12 = vmul.f32 %v8157_v39, %v9919_v24 }
 0x5ef   : > { %v2737_v15 = vpack.c.bf16 %v2721_v12, %v2721_v12 }
 0x5f0   : > { %v8159_v17 = vpop.eup %8158 }
 0x5f1   : > { %7513 = vmatmul.mubr.msk.bf16.vlgmr.msra.gmra.mrb[48].mxu0 %vm2548_vm3, %v2735_v11  ;;  %v2723_v28 = vmul.f32 %v8159_v17, %v9925_v26 }
 0x5f2   : > { %7523 = vmatpush3.bf16.msra.mxu0 %v3298_v21  ;;  %7524 = vmatprep.mubr.msk.bf16.mxu0 %vm8786_vm0, %v8785_v5 }
 0x5f3   : > { %7534 = vmatprep.subr.bf16.mxu0 %v8785_v5  ;;  %v2739_v0 = vpack.c.bf16 %v2723_v28, %v2723_v28 }
 0x5f9   : > { %7525 = vmatmul.mubr.msk.bf16.vlgmr.msra.gmra.mrb[52].mxu0 %vm2548_vm3, %v2737_v15 }
 0x5fa   : > { %7536 = vmatprep.mubr.msk.bf16.mxu0 %vm8786_vm0, %v8785_v5 }
 0x5fd   : > { %v2686_v30 = vpop.xlane.xlu0 %2685 }
 0x5fe   : > { %8160 = vrcp.f32 %v2686_v30 }
 0x601   : > { %v1793_v18 = vpop.permute.xlu0 %1792 }
 0x602   : > { %v1810_v20 = vpack.c.bf16 %v1793_v18, %v1793_v18 }
 0x604   : > { %v3436_v41 = vsel %vm2744_vm2, %v1810_v20, 0 }
 0x605   : > { %v2692_v25 = vpop.xlane.xlu1 %2691 }
 0x606   : > { %8162 = vrcp.f32 %v2692_v25 }
 0x608   : > { %v8161_v23 = vpop.eup %8160 }
 0x609   : > { %v1790_v53 = vpop.permute.xlu1 %1789  ;;  %v2722_v6 = vmul.f32 %v8161_v23, %v9933_v46  ;;  %v8012_v23 = vld [vmem:[%s9460_s7] sm:$0xff]  }
 0x60a   : > { %v1809_v24 = vpack.c.bf16 %v1790_v53, %v1790_v53 }
 0x60b   : > { %v2738_v29 = vpack.c.bf16 %v2722_v6, %v2722_v6  ;;  %v8013_v6 = vld [vmem:[%s9460_s7 + $0x8] sm:$0xff]  }
 0x60c   : > { %v3390_v38 = vsel %vm2744_vm2, %v1809_v24, 0 }
 0x60d   : > { %7535 = vmatpush3.bf16.msra.mxu0 %v3390_v38  ;;  %7531 = vmatmul.mubr.msk.bf16.vlgmr.msra.gmra.mrb[68].mxu1 %vm2548_vm3, %v2738_v29  ;;  %v8014_v29 = vld [vmem:[%s9460_s7 + $0x10] sm:$0xff]  }
 0x60e   : > { %7546 = vmatprep.subr.bf16.mxu0 %v8785_v5  ;;  %7541 = vmatpush3.bf16.msra.mxu1 %v3436_v41 }
 0x60f   : > { %7542 = vmatprep.mubr.msk.bf16.mxu1 %vm8786_vm0, %v8785_v5  ;;  %7566 = vmatprep.subr.bf16.mxu1 %v8785_v5 }
 0x610   : > { %v8163_v37 = vpop.eup %8162  ;;  %7537 = vmatmul.mubr.msk.bf16.vlgmr.msra.gmra.mrb[56].mxu0 %vm2548_vm3, %v2739_v0 }
 0x611   : > { %v2724_v26 = vmul.f32 %v8163_v37, %v9937_v49  ;;  %7562 = vmatprep.mubr.msk.bf16.mxu0 %vm8786_vm0, %v8785_v5  ;;  %7547 = vmatpush3.bf16.msra.mxu0 %v8012_v23 }
 0x612   : > { %v10047_v46 = vpop.f32.mrb[28].mxu0  ;;  %7548 = vmatprep.subr.bf16.mxu0 %v8785_v5 }
 0x613   : > { %v2740_v16 = vpack.c.bf16 %v2724_v26, %v2724_v26  ;;  %v7454_v22 = vpop.f32.mrb[29].mxu0  ;;  %v8015_v26 = vld [vmem:[%s9460_s7 + $0x18] sm:$0xff]  }
 0x614   : > { %v2785_v31 = vpop.f32.mrb[30].mxu0  ;;  %v8016_v22 = vld [vmem:[%s9460_s7 + $0x20] sm:$0xff]  }
 0x615   : > { %v7455_v32 = vpop.f32.mrb[31].mxu0  ;;  %7543 = vmatmul.mubr.msk.bf16.vlgmr.msra.gmra.mrb[72].mxu1 %vm2548_vm3, %v2740_v16  ;;  %7549 = vmatpush3.bf16.msra.mxu0 %v8013_v6  ;;  %v8017_v31 = vld [vmem:[%s9460_s7 + $0x28] sm:$0xff]  }
 0x616   : > { %7582 = vmatprep.mubr.msk.bf16.mxu1 %vm8786_vm0, %v8785_v5  ;;  %7550 = vmatprep.subr.bf16.mxu0 %v8785_v5  ;;  %v8018_v32 = vld [vmem:[%s9460_s7 + $0x30] sm:$0xff]  }
 0x619   : > { %7551 = vmatpush3.bf16.msra.mxu0 %v8014_v29 }
 0x61a   : > { %7552 = vmatprep.subr.bf16.mxu0 %v8785_v5 }
 0x61d   : > { %7553 = vmatpush3.bf16.msra.mxu0 %v8015_v26 }
 0x61e   : > { %7554 = vmatprep.subr.bf16.mxu0 %v8785_v5 }
 0x621   : > { %7555 = vmatpush3.bf16.msra.mxu0 %v8016_v22 }
 0x622   : > { %7556 = vmatprep.subr.bf16.mxu0 %v8785_v5 }
 0x625   : > { %7557 = vmatpush3.bf16.msra.mxu0 %v8017_v31 }
 0x626   : > { %7558 = vmatprep.subr.bf16.mxu0 %v8785_v5 }
 0x629   : > { %7559 = vmatpush3.bf16.msra.mxu0 %v8018_v32  ;;  %v8240_v32 = vld [vmem:[%s10895_s16] sm:$0xff] }
 0x62a   : > { %7560 = vmatprep.subr.bf16.mxu0 %v8785_v5 }
 0x67b   : > { %v2828_v42 = vpop.f32.mrb[44].mxu1 }
 0x67c   : > { %v7460_v35 = vpop.f32.mrb[45].mxu1 }
 0x67d   : > { %v2831_v43 = vpop.f32.mrb[46].mxu1  ;;  %v8019_v35 = vld [vmem:[%s9460_s7 + $0x38] sm:$0xff]   ;;  %s10896_s7 = scalar_lea.vmem [#allocation6], %s9445_s24 }
 0x67e   : > { %v7461_v45 = vpop.f32.mrb[47].mxu1  ;;  %7561 = vmatpush3.bf16.msra.mxu0 %v8019_v35  ;;  %v8241_v35 = vld [vmem:[%s10895_s16 + $0x8] sm:$0xff] }
 0x687   : > { %v2874_v58 = vpop.f32.mrb[32].mxu0 }
 0x688   : > { %v7466_v49 = vpop.f32.mrb[33].mxu0 }
 0x689   : > { %v2877_v19 = vpop.f32.mrb[34].mxu0 }
 0x68a   : > { %v7467_v52 = vpop.f32.mrb[35].mxu0 }
 0x68f   : > { %v2920_v36 = vpop.f32.mrb[48].mxu1  ;;  %v2966_v40 = vpop.f32.mrb[36].mxu0 }
 0x690   : > { %v7472_v54 = vpop.f32.mrb[49].mxu1  ;;  %v7478_v57 = vpop.f32.mrb[37].mxu0 }
 0x691   : > { %v2923_v44 = vpop.f32.mrb[50].mxu1  ;;  %v2969_v48 = vpop.f32.mrb[38].mxu0 }
 0x692   : > { %v7473_v47 = vpop.f32.mrb[51].mxu1  ;;  %v7479_v56 = vpop.f32.mrb[39].mxu0 }
 0x697   : > { %v10052_v51 = vpop.f32.mrb[52].mxu1  ;;  %v10054_v3 = vpop.f32.mrb[40].mxu0 }
 0x698   : > { %v7484_v59 = vpop.f32.mrb[53].mxu1  ;;  %v7490_v7 = vpop.f32.mrb[41].mxu0 }
 0x699   : > { %v3015_v60 = vpop.f32.mrb[54].mxu1  ;;  %v3061_v50 = vpop.f32.mrb[42].mxu0 }
 0x69a   : > { %v7485_v61 = vpop.f32.mrb[55].mxu1  ;;  %v7491_v1 = vpop.f32.mrb[43].mxu0 }
 0x69f   : > { %v10056_v14 = vpop.f32.mrb[56].mxu1 }
 0x6a0   : > { %v7496_v2 = vpop.f32.mrb[57].mxu1 }
 0x6a1   : > { %v3107_v55 = vpop.f32.mrb[58].mxu1 }
 0x6a2   : > { %v7497_v8 = vpop.f32.mrb[59].mxu1 }
 0x6a7   : > { %v3196_v62 = vpop.f32.mrb[60].mxu1 }
 0x6a8   : > { %v7905_v13 = vpack.i.bf16 %v3196_v62, %v2828_v42  ;;  %v7508_v9 = vpop.f32.mrb[61].mxu1 }
 0x6a9   : > { %v3199_v10 = vpop.f32.mrb[62].mxu1 }
 0x6aa   : > { %7906 = vrot.lane.b32.xlu1 %v7905_v13, %s8793_s9  ;;  %v7509_v27 = vpop.f32.mrb[63].mxu1 }
 0x6af   : > { %v3288_v11 = vpop.f32.mrb[64].mxu1 }
 0x6b0   : > { %v7915_v39 = vpack.i.bf16 %v3288_v11, %v2920_v36  ;;  %v7520_v21 = vpop.f32.mrb[65].mxu1 }
 0x6b1   : > { %v3291_v12 = vpop.f32.mrb[66].mxu1 }
 0x6b2   : > { %7916 = vrot.lane.b32.xlu1 %v7915_v39, %s8791_s0  ;;  %v7521_v15 = vpop.f32.mrb[67].mxu1 }
 0x6bc   : > { %v10060_v63 = vpop.f32.mrb[44].mxu0 }
 0x6bd   : > { %v7502_v30 = vpop.f32.mrb[45].mxu0 }
 0x6be   : > { %v3153_v25 = vpop.f32.mrb[46].mxu0 }
 0x6bf   : > { %v7503_v17 = vpop.f32.mrb[47].mxu0 }
 0x6c4   : > { %v3242_v18 = vpop.f32.mrb[48].mxu0 }
 0x6c5   : > { %v7910_v53 = vpack.i.bf16 %v3242_v18, %v2874_v58  ;;  %v7514_v20 = vpop.f32.mrb[49].mxu0 }
 0x6c6   : > { %v3245_v24 = vpop.f32.mrb[50].mxu0 }
 0x6c7   : > { %7911 = vrot.lane.b32.xlu0 %v7910_v53, %s8792_s28  ;;  %v7515_v28 = vpop.f32.mrb[51].mxu0 }
 0x6cc   : > { %v3334_v38 = vpop.f32.mrb[52].mxu0 }
 0x6cd   : > { %v7920_v41 = vpack.i.bf16 %v3334_v38, %v2966_v40  ;;  %v7526_v0 = vpop.f32.mrb[53].mxu0 }
 0x6ce   : > { %v3337_v37 = vpop.f32.mrb[54].mxu0 }
 0x6cf   : > { %7921 = vrot.lane.b32.xlu0 %v7920_v41, %s8789_s3  ;;  %v7527_v16 = vpop.f32.mrb[55].mxu0  ;;  %v7005_v41 = vld [vmem:[%s10896_s7] ss:$0 sm:$0xff] }
 0x6e0   : > { %v3380_v42 = vpop.f32.mrb[68].mxu1 }
 0x6e1   : > { %v7925_v43 = vpack.i.bf16 %v3380_v42, %v10052_v51  ;;  %v7532_v45 = vpop.f32.mrb[69].mxu1 }
 0x6e2   : > { %v3383_v58 = vpop.f32.mrb[70].mxu1  ;;  %v8020_v45 = vld [vmem:[%s9525_s22] ss:$8 sps:$4 sm:$0xff]  }
 0x6e3   : > { %v3426_v49 = vpop.f32.mrb[56].mxu0  ;;  %7926 = vrot.lane.b32.xlu1 %v7925_v43, %s8790_s4  ;;  %v7533_v52 = vpop.f32.mrb[71].mxu1  ;;  %v8022_v58 = vld [vmem:[%s9525_s22 + $0x4] ss:$8 sps:$4 sm:$0xff]  }
 0x6e4   : > { %v7930_v19 = vpack.i.bf16 %v3426_v49, %v10054_v3  ;;  %v7538_v36 = vpop.f32.mrb[57].mxu0  ;;  %v8025_v49 = vld [vmem:[%s9525_s22 + $0x14] ss:$8 sps:$4 sm:$0xff]   ;;  %3933 = vmatprep.subr.bf16.mxu0 %v8022_v58  ;;  %v8023_v52 = vld [vmem:[%s9525_s22 + $0x10] ss:$8 sps:$4 sm:$0xff]  }
 0x6e5   : > { %v3429_v40 = vpop.f32.mrb[58].mxu0  ;;  %v8028_v36 = vld [vmem:[%s9525_s22 + $0x24] ss:$8 sps:$4 sm:$0xff]  }
 0x6e6   : > { %7931 = vrot.lane.b32.xlu0 %v7930_v19, %s8787_s1  ;;  %v7539_v54 = vpop.f32.mrb[59].mxu0  ;;  %v8029_v19 = vld [vmem:[%s9475_s29] sm:$0xff]   ;;  %v8026_v40 = vld [vmem:[%s9525_s22 + $0x20] ss:$8 sps:$4 sm:$0xff]  }
 0x6e7   : > { %7567 = vmatpush3.bf16.msra.mxu1 %v8029_v19  ;;  %v8032_v54 = vld [vmem:[%s9525_s22 + $0x34] ss:$8 sps:$4 sm:$0xff]  }
 0x6e8   : > { %v3472_v57 = vpop.f32.mrb[72].mxu1  ;;  %7568 = vmatprep.subr.bf16.mxu1 %v8785_v5 }
 0x6e9   : > { %v7935_v44 = vpack.i.bf16 %v3472_v57, %v10056_v14  ;;  %v7544_v48 = vpop.f32.mrb[73].mxu1  ;;  %v8030_v57 = vld [vmem:[%s9525_s22 + $0x30] ss:$8 sps:$4 sm:$0xff]  }
 0x6ea   : > { %v3475_v47 = vpop.f32.mrb[74].mxu1 }
 0x6eb   : > { %7936 = vrot.lane.b32.xlu1 %v7935_v44, %s8788_s23  ;;  %v7545_v56 = vpop.f32.mrb[75].mxu1 }
 0x71c   : > { %v7907_v51 = vpop.permute.xlu1 %7906 }
 0x71d   : > { %v7909_v3 = vunpack.i.h.bf16 %v7907_v51  ;;  %v7908_v60 = vunpack.i.l.bf16 %v7907_v51 }
 0x71f   : > { %v3547_v55 = vsel %vm1811_vm1, %v10060_v63, %v7909_v3  ;;  %v3506_v14 = vsel %vm1811_vm1, %v10047_v46, %v7908_v60  ;;  %v8033_v60 = vld [vmem:[%s9475_s29 + $0x8] sm:$0xff]  }
 0x720   : > { %7569 = vmatpush3.bf16.msra.mxu1 %v8033_v60 }
 0x721   : > { %7570 = vmatprep.subr.bf16.mxu1 %v8785_v5 }
 0x724   : > { %v7917_v7 = vpop.permute.xlu1 %7916 }
 0x725   : > { %v7919_v27 = vunpack.i.h.bf16 %v7917_v7  ;;  %v7918_v11 = vunpack.i.l.bf16 %v7917_v7 }
 0x739   : > { %v7912_v59 = vpop.permute.xlu0 %7911 }
 0x73a   : > { %v7914_v61 = vunpack.i.h.bf16 %v7912_v59  ;;  %v7913_v1 = vunpack.i.l.bf16 %v7912_v59 }
 0x73c   : > { %v3508_v62 = vsel %vm3507_vm4, %v3506_v14, %v7913_v1  ;;  %v3548_v13 = vsel %vm3507_vm4, %v3547_v55, %v7914_v61  ;;  %v8034_v61 = vld [vmem:[%s9525_s22 + $0x40] ss:$8 sps:$4 sm:$0xff]   ;;  %v8038_v55 = vld [vmem:[%s9525_s22 + $0x50] ss:$8 sps:$4 sm:$0xff]  }
 0x73d   : > { %v3510_v63 = vsel %vm3509_vm5, %v3508_v62, %v7918_v11  ;;  %v3549_v46 = vsel %vm3509_vm5, %v3548_v13, %v7919_v27  ;;  %v8037_v1 = vld [vmem:[%s9475_s29 + $0x10] sm:$0xff]   ;;  %v8041_v14 = vld [vmem:[%s9475_s29 + $0x18] sm:$0xff]   ;;  %v8045_v13 = vld [vmem:[%s9475_s29 + $0x20] sm:$0xff]  }
 0x73e   : > { %7571 = vmatpush3.bf16.msra.mxu1 %v8037_v1  ;;  %v8042_v62 = vld [vmem:[%s9525_s22 + $0x60] ss:$8 sps:$4 sm:$0xff]   ;;  %v8049_v27 = vld [vmem:[%s9475_s29 + $0x28] sm:$0xff]  }
 0x73f   : > { %7572 = vmatprep.subr.bf16.mxu1 %v8785_v5  ;;  %v1347_v11 = vld [vmem:[%s10897_s14] sm:$0xff] }
 0x741   : > { %v7922_v50 = vpop.permute.xlu0 %7921 }
 0x742   : > { %v7924_v9 = vunpack.i.h.bf16 %v7922_v50  ;;  %v7923_v10 = vunpack.i.l.bf16 %v7922_v50  ;;  %v8036_v50 = vld [vmem:[%s9525_s22 + $0x44] ss:$8 sps:$4 sm:$0xff]   ;;  %7573 = vmatpush3.bf16.msra.mxu1 %v8041_v14 }
 0x743   : > { %7574 = vmatprep.subr.bf16.mxu1 %v8785_v5 }
 0x744   : > { %v3512_v30 = vsel %vm3511_vm6, %v3510_v63, %v7923_v10  ;;  %v3550_v25 = vsel %vm3511_vm6, %v3549_v46, %v7924_v9  ;;  %v8048_v9 = vld [vmem:[%s9525_s22 + $0x74] ss:$8 sps:$4 sm:$0xff]   ;;  %v8046_v10 = vld [vmem:[%s9525_s22 + $0x70] ss:$8 sps:$4 sm:$0xff]  }
 0x746   : > { %7575 = vmatpush3.bf16.msra.mxu1 %v8045_v13 }
 0x747   : > { %7576 = vmatprep.subr.bf16.mxu1 %v8785_v5 }
 0x74a   : > { %7577 = vmatpush3.bf16.msra.mxu1 %v8049_v27 }
 0x74b   : > { %7578 = vmatprep.subr.bf16.mxu1 %v8785_v5 }
 0x755   : > { %v7927_v2 = vpop.permute.xlu1 %7926 }
 0x756   : > { %v7929_v39 = vunpack.i.h.bf16 %v7927_v2  ;;  %v7928_v21 = vunpack.i.l.bf16 %v7927_v2  ;;  %v8040_v2 = vld [vmem:[%s9525_s22 + $0x54] ss:$8 sps:$4 sm:$0xff]  }
 0x758   : > { %v7932_v8 = vpop.permute.xlu0 %7931  ;;  %v3551_v18 = vsel %vm3513_vm7, %v3550_v25, %v7929_v39  ;;  %v3514_v23 = vsel %vm3513_vm7, %v3512_v30, %v7928_v21  ;;  %v1348_v39 = vld [vmem:[%s10897_s14 + $0x8] sm:$0xff] }
 0x759   : > { %v7934_v12 = vunpack.i.h.bf16 %v7932_v8  ;;  %v7933_v15 = vunpack.i.l.bf16 %v7932_v8  ;;  %v8044_v8 = vld [vmem:[%s9525_s22 + $0x64] ss:$8 sps:$4 sm:$0xff]   ;;  %v1349_v21 = vpack.c.bf16 %v1348_v39, %v1347_v11  ;;  %s10898_s22 = scalar_lea.vmem [#allocation7], %s9445_s24 }
 0x75b   : > { %v3516_v24 = vsel %vm3515_vm8, %v3514_v23, %v7933_v15  ;;  %v3552_v6 = vsel %vm3515_vm8, %v3551_v18, %v7934_v12  ;;  %v8050_v12 = vld [vmem:[%s9475_s29 + $0x30] sm:$0xff]   ;;  %v8051_v15 = vld [vmem:[%s9475_s29 + $0x38] sm:$0xff]   ;;  %s10899_s29 = scalar_lea.vmem [#allocation9], %s9445_s24 }
 0x75c   : > { %7579 = vmatpush3.bf16.msra.mxu1 %v8050_v12 }
 0x75d   : > { %v7937_v17 = vpop.permute.xlu1 %7936  ;;  %7580 = vmatprep.subr.bf16.mxu1 %v8785_v5 }
 0x75e   : > { %v7939_v53 = vunpack.i.h.bf16 %v7937_v17  ;;  %v7938_v20 = vunpack.i.l.bf16 %v7937_v17 }
 0x760   : > { %v3553_v28 = vsel %vm3517_vm9, %v3552_v6, %v7939_v53  ;;  %v3518_v29 = vsel %vm3517_vm9, %v3516_v24, %v7938_v20  ;;  %7581 = vmatpush3.bf16.msra.mxu1 %v8051_v15  ;;  %v7014_v20 = vld [vmem:[%s10898_s22] ss:$0 sm:$0xff] }
 0x761   : > { %v3554_v38 = vpack.c.bf16 %v3553_v28, %v3518_v29  ;;  %7586 = vmatprep.subr.bf16.mxu1 %v8785_v5  ;;  %v7015_v29 = vld [vmem:[%s10899_s29] ss:$0 sm:$0xff] }
 0x763   : > { %7563 = vmatmul.mubr.bf16.vlgmr.msra.gmra.mrb[60].mxu0 %v3554_v38 }
 0x764   : > { %3965 = vmatprep.mubr.bf16.mxu0 %v8784_v4  ;;  %3934 = vmatpush1.bf16.msra.mxu0 %v8020_v45 }
 0x765   : > { %3935 = vmatprep.subr.bf16.mxu0 %v8025_v49 }
 0x768   : > { %3936 = vmatpush1.bf16.msra.mxu0 %v8023_v52 }
 0x769   : > { %3937 = vmatprep.subr.bf16.mxu0 %v8028_v36 }
 0x76c   : > { %3938 = vmatpush1.bf16.msra.mxu0 %v8026_v40 }
 0x76d   : > { %3939 = vmatprep.subr.bf16.mxu0 %v8032_v54 }
 0x770   : > { %3940 = vmatpush1.bf16.msra.mxu0 %v8030_v57 }
 0x771   : > { %3941 = vmatprep.subr.bf16.mxu0 %v8036_v50 }
 0x774   : > { %3942 = vmatpush1.bf16.msra.mxu0 %v8034_v61 }
 0x775   : > { %3943 = vmatprep.subr.bf16.mxu0 %v8040_v2 }
 0x778   : > { %3944 = vmatpush1.bf16.msra.mxu0 %v8038_v55 }
 0x779   : > { %3945 = vmatprep.subr.bf16.mxu0 %v8044_v8 }
 0x77c   : > { %3946 = vmatpush1.bf16.msra.mxu0 %v8042_v62 }
 0x77d   : > { %3947 = vmatprep.subr.bf16.mxu0 %v8048_v9 }
 0x780   : > { %3948 = vmatpush1.bf16.msra.mxu0 %v8046_v10 }
 0x781   : > { %7610 = vmatprep.subr.bf16.mxu0 %v8785_v5 }
 0x783   : > { %3966 = vmatmul.mubr.bf16.vlgmr.msra.gmra.mrb[64].mxu0 %v1349_v21 }
 0x784   : > { %7612 = vmatprep.mubr.msk.bf16.mxu0 %vm8786_vm0, %v8785_v5 }
 0x836   : > { %v3643_v0 = vpop.f32.mrb[60].mxu0 }
 0x837   : > { %v3644_v37 = vadd.f32 %v7005_v41, %v3643_v0  ;;  %v7564_v26 = vpop.f32.mrb[61].mxu0 }
 0x838   : > { %v3646_v16 = vpop.f32.mrb[62].mxu0  ;;  %v3727_v26 = vld [vmem:[%s9484_s6] sm:$0x3]  ;;  %s10900_s6 = scalar_lea.vmem [#allocation12], %s9445_s24 }
 0x839   : > { %v3647_v22 = vadd.f32 %v7005_v41, %v3646_v16  ;;  %v7565_v31 = vpop.f32.mrb[63].mxu0  ;;  %v3650_v42 = vadd.f32 %v8240_v32, %v3644_v37  ;;  %v3846_v16 = vrot.slane %v3727_v26, %v9602_v33  ;;  %v7016_v49 = vld [vmem:[%s10900_s6] ss:$0 sm:$0xff] }
 0x83b   : > { %3654 = vadd.xlane.f32.xlu0 %v3650_v42  ;;  %v3651_v43 = vadd.f32 %v8241_v35, %v3647_v22 }
 0x83d   : > { %3656 = vadd.xlane.f32.xlu1 %v3651_v43 }
 0x856   : > { %v3967_v22 = vpop.f32.mrb[64].mxu0 }
 0x857   : > { %v3968_v31 = vadd.f32 %v3967_v22, %v3846_v16  ;;  %v3969_v32 = vpop.f32.mrb[65].mxu0 }
 0x859   : > { %4037 = vrot.lane.b32.xlu1 %v3968_v31, %s8788_s23  ;;  %v4080_v45 = vpack.c.bf16 %v3968_v31, %v3968_v31 }
 0x85b   : > { %v4160_v58 = vsel %vm1811_vm1, %v4080_v45, 0 }
 0x85d   : > { %4040 = vrot.lane.b32.xlu1 %v3968_v31, %s8787_s1 }
 0x8c8   : > { %v3655_v44 = vpop.xlane.xlu0 %3654 }
 0x8c9   : > { %v3659_v48 = vmul.f32 0.0078125, %v3655_v44 }
 0x8ca   : > { %v3657_v47 = vpop.xlane.xlu1 %3656 }
 0x8cb   : > { %v3661_v56 = vsub.f32 %v3650_v42, %v3659_v48  ;;  %v3660_v51 = vmul.f32 0.0078125, %v3657_v47  ;;  %v3971_v42 = vpop.f32.mrb[66].mxu0 }
 0x8cc   : > { %v10165_v35 = vadd.f32 %v3971_v42, %v3846_v16 }
 0x8cd   : > { %v3662_v59 = vsub.f32 %v3651_v43, %v3660_v51  ;;  %v3663_v7 = vmul.f32 %v3661_v56, %v3661_v56  ;;  %v3973_v43 = vpop.f32.mrb[67].mxu0 }
 0x8ce   : > { %v4038_v52 = vpop.permute.xlu1 %4037 }
 0x8cf   : > { %3665 = vadd.xlane.f32.xlu0 %v3663_v7  ;;  %v3664_v3 = vmul.f32 %v3662_v59, %v3662_v59  ;;  %v4081_v54 = vpack.c.bf16 %v4038_v52, %v4038_v52  ;;  %v3850_v7 = vrot.slane %v3727_v26, %v9604_v34 }
 0x8d1   : > { %v10219_v60 = vadd.f32 %v3973_v43, %v3850_v7 }
 0x8d2   : > { %v4041_v61 = vpop.permute.xlu1 %4040 }
 0x8d3   : > { %3667 = vadd.xlane.f32.xlu0 %v3664_v3  ;;  %v10217_v3 = vadd.f32 %v3969_v32, %v3850_v7  ;;  %v4082_v1 = vpack.c.bf16 %v4041_v61, %v4041_v61 }
 0x8d5   : > { %v7940_v50 = vpack.i.bf16 %v10219_v60, %v10217_v3  ;;  %v4252_v8 = vsel %vm1811_vm1, %v4082_v1, 0 }
 0x95c   : > { %v3666_v63 = vpop.xlane.xlu0 %3665 }
 0x95d   : > { %v3669_v46 = vmul.f32 0.0078125, %v3666_v63 }
 0x95f   : > { %v3671_v30 = vadd.f32 1e-05, %v3669_v46 }
 0x960   : > { %v3668_v25 = vpop.xlane.xlu0 %3667 }
 0x961   : > { %8164 = vrsqrt.f32 %v3671_v30  ;;  %v3670_v17 = vmul.f32 0.0078125, %v3668_v25 }
 0x963   : > { %v3672_v18 = vadd.f32 1e-05, %v3670_v17 }
 0x965   : > { %8166 = vrsqrt.f32 %v3672_v18 }
 0x96b   : > { %v8165_v23 = vpop.eup %8164 }
 0x96c   : > { %v3675_v53 = vmul.f32 %v8165_v23, %v3661_v56  ;;  %v4206_v56 = vsel %vm1811_vm1, %v4081_v54, 0 }
 0x96e   : > { %v3683_v28 = vmul.f32 %v7014_v20, %v3675_v53 }
 0x96f   : > { %v8167_v24 = vpop.eup %8166 }
 0x970   : > { %v3676_v6 = vmul.f32 %v8167_v24, %v3662_v59  ;;  %v10155_v41 = vadd.f32 %v7015_v29, %v3683_v28  ;;  %v4088_v24 = vpack.c.bf16 %v10165_v35, %v10165_v35 }
 0x972   : > { %v3684_v38 = vmul.f32 %v7014_v20, %v3676_v6 }
 0x974   : > { %v10157_v0 = vadd.f32 %v7015_v29, %v3684_v38 }
 0x976   : > { %v3693_v37 = vpack.c.bf16 %v10157_v0, %v10155_v41 }
 0x978   : > { %7583 = vmatmul.mubr.bf16.vlgmr.msra.gmra.mrb[76].mxu1 %v3693_v37  ;;  %v4528_v37 = vsel %vm1811_vm1, %v4088_v24, 0 }
 0x979   : > { %7588 = vmatprep.mubr.msk.bf16.mxu1 %vm8786_vm0, %v8785_v5  ;;  %7587 = vmatpush3.bf16.xpose.msra.mxu1 %v4160_v58 }
 0x97a   : > { %7592 = vmatprep.subr.bf16.mxu1 %v8785_v5 }
 0xa4b   : > { %v3833_v19 = vpop.f32.mrb[76].mxu1 }
 0xa4c   : > { %v3834_v36 = vadd.f32 %v7016_v49, %v3833_v19  ;;  %v7584_v40 = vpop.f32.mrb[77].mxu1 }
 0xa4d   : > { %v3836_v57 = vpop.f32.mrb[78].mxu1 }
 0xa4e   : > { %v3840_v44 = vmul.f32 0.25, %v3834_v36  ;;  %v7585_v48 = vpop.f32.mrb[79].mxu1  ;;  %v3837_v51 = vadd.f32 %v7016_v49, %v3836_v57 }
 0xa50   : > { %3980 = vrot.lane.b32.xlu1 %v3840_v44, %s8787_s1  ;;  %3977 = vrot.lane.b32.xlu0 %v3840_v44, %s8788_s23  ;;  %v4020_v47 = vpack.c.bf16 %v3840_v44, %v3840_v44  ;;  %v10194_v59 = vmul.f32 0.25, %v3837_v51 }
 0xa52   : > { %7589 = vmatmul.mubr.msk.bf16.vlgmr.msra.gmra.mrb[80].mxu1 %vm1811_vm1, %v4020_v47  ;;  %v4028_v43 = vpack.c.bf16 %v10194_v59, %v10194_v59 }
 0xa53   : > { %7593 = vmatpush3.bf16.xpose.msra.mxu1 %v4206_v56  ;;  %7594 = vmatprep.mubr.msk.bf16.mxu1 %vm8786_vm0, %v8785_v5 }
 0xa54   : > { %4046 = vrot.lane.b32.xlu1 %v3968_v31, %s8789_s3  ;;  %4043 = vrot.lane.b32.xlu0 %v3968_v31, %s8790_s4 }
 0xa55   : > { %7598 = vmatprep.subr.bf16.mxu1 %v8785_v5 }
 0xa58   : > { %4049 = vrot.lane.b32.xlu1 %v3968_v31, %s8791_s0  ;;  %3983 = vrot.lane.b32.xlu0 %v3840_v44, %s8790_s4 }
 0xa5c   : > { %4052 = vrot.lane.b32.xlu1 %v3968_v31, %s8792_s28  ;;  %3986 = vrot.lane.b32.xlu0 %v3840_v44, %s8789_s3 }
 0xa60   : > { %4055 = vrot.lane.b32.xlu1 %v3968_v31, %s8793_s9  ;;  %3989 = vrot.lane.b32.xlu0 %v3840_v44, %s8791_s0 }
 0xa64   : > { %3995 = vrot.lane.b32.xlu1 %v3840_v44, %s8793_s9  ;;  %3992 = vrot.lane.b32.xlu0 %v3840_v44, %s8792_s28 }
 0xa68   : > { %4062 = vrot.lane.b32.xlu1 %v10165_v35, %s8787_s1  ;;  %4059 = vrot.lane.b32.xlu0 %v10165_v35, %s8788_s23 }
 0xa6c   : > { %4065 = vrot.lane.b32.xlu1 %v10165_v35, %s8790_s4  ;;  %3999 = vrot.lane.b32.xlu0 %v10194_v59, %s8788_s23 }
 0xa70   : > { %4068 = vrot.lane.b32.xlu1 %v10165_v35, %s8789_s3  ;;  %4002 = vrot.lane.b32.xlu0 %v10194_v59, %s8787_s1 }
 0xa74   : > { %4071 = vrot.lane.b32.xlu1 %v10165_v35, %s8791_s0  ;;  %4005 = vrot.lane.b32.xlu0 %v10194_v59, %s8790_s4 }
 0xa78   : > { %4074 = vrot.lane.b32.xlu1 %v10165_v35, %s8792_s28  ;;  %4008 = vrot.lane.b32.xlu0 %v10194_v59, %s8789_s3 }
 0xa7c   : > { %4077 = vrot.lane.b32.xlu1 %v10165_v35, %s8793_s9  ;;  %4011 = vrot.lane.b32.xlu0 %v10194_v59, %s8791_s0 }
 0xa80   : > { %4017 = vrot.lane.b32.xlu1 %v10194_v59, %s8793_s9  ;;  %4014 = vrot.lane.b32.xlu0 %v10194_v59, %s8792_s28 }
 0xa84   : > { %7941 = vrot.lane.b32.xlu1 %v7940_v50, %s8788_s23  ;;  %4100 = vrot.lane.b32.xlu0 %v10217_v3, %s8787_s1 }
 0xa88   : > { %4103 = vrot.lane.b32.xlu1 %v10217_v3, %s8790_s4  ;;  %4109 = vrot.lane.b32.xlu0 %v10217_v3, %s8791_s0 }
 0xa8c   : > { %4106 = vrot.lane.b32.xlu1 %v10217_v3, %s8789_s3  ;;  %4115 = vrot.lane.b32.xlu0 %v10217_v3, %s8793_s9 }
 0xa90   : > { %4112 = vrot.lane.b32.xlu1 %v10217_v3, %s8792_s28 }
 0xac2   : > { %v3981_v2 = vpop.permute.xlu1 %3980  ;;  %v3978_v55 = vpop.permute.xlu0 %3977 }
 0xac3   : > { %v4021_v14 = vpack.c.bf16 %v3978_v55, %v3978_v55  ;;  %v4022_v21 = vpack.c.bf16 %v3981_v2, %v3981_v2 }
 0xac5   : > { %7595 = vmatmul.mubr.msk.bf16.vlgmr.msra.gmra.mrb[84].mxu1 %vm1811_vm1, %v4021_v14 }
 0xac6   : > { %7599 = vmatpush3.bf16.xpose.msra.mxu1 %v4252_v8  ;;  %v4047_v62 = vpop.permute.xlu1 %4046  ;;  %v4044_v13 = vpop.permute.xlu0 %4043  ;;  %7600 = vmatprep.mubr.msk.bf16.mxu1 %vm8786_vm0, %v8785_v5 }
 0xac7   : > { %v4084_v9 = vpack.c.bf16 %v4047_v62, %v4047_v62  ;;  %7604 = vmatprep.subr.bf16.mxu1 %v8785_v5  ;;  %v4083_v27 = vpack.c.bf16 %v4044_v13, %v4044_v13 }
 0xac9   : > { %v4344_v10 = vsel %vm1811_vm1, %v4084_v9, 0  ;;  %v4298_v12 = vsel %vm1811_vm1, %v4083_v27, 0 }
 0xaca   : > { %7611 = vmatpush3.bf16.xpose.msra.mxu0 %v4344_v10  ;;  %v4050_v11 = vpop.permute.xlu1 %4049  ;;  %v3984_v39 = vpop.permute.xlu0 %3983  ;;  %v4140_v10 = vpack.c.bf16 %v10217_v3, %v10217_v3 }
 0xacb   : > { %7622 = vmatprep.subr.bf16.mxu0 %v8785_v5  ;;  %v4085_v25 = vpack.c.bf16 %v4050_v11, %v4050_v11  ;;  %v4023_v53 = vpack.c.bf16 %v3984_v39, %v3984_v39 }
 0xacc   : > { %v5088_v39 = vsel %vm2744_vm2, %v4140_v10, 0 }
 0xacd   : > { %7601 = vmatmul.mubr.msk.bf16.vlgmr.msra.gmra.mrb[88].mxu1 %vm1811_vm1, %v4022_v21  ;;  %v4390_v20 = vsel %vm1811_vm1, %v4085_v25, 0 }
 0xace   : > { %7605 = vmatpush3.bf16.xpose.msra.mxu1 %v4298_v12  ;;  %v4053_v15 = vpop.permute.xlu1 %4052  ;;  %v3987_v63 = vpop.permute.xlu0 %3986  ;;  %7606 = vmatprep.mubr.msk.bf16.mxu1 %vm8786_vm0, %v8785_v5 }
 0xacf   : > { %v4086_v46 = vpack.c.bf16 %v4053_v15, %v4053_v15  ;;  %v4024_v30 = vpack.c.bf16 %v3987_v63, %v3987_v63  ;;  %7616 = vmatprep.subr.bf16.mxu1 %v8785_v5 }
 0xad1   : > { %v4436_v17 = vsel %vm1811_vm1, %v4086_v46, 0  ;;  %7613 = vmatmul.mubr.msk.bf16.vlgmr.msra.gmra.mrb[68].mxu0 %vm1811_vm1, %v4024_v30 }
 0xad2   : > { %v4056_v18 = vpop.permute.xlu1 %4055  ;;  %7623 = vmatpush3.bf16.xpose.msra.mxu0 %v4436_v17  ;;  %v3990_v23 = vpop.permute.xlu0 %3989  ;;  %7624 = vmatprep.mubr.msk.bf16.mxu0 %vm8786_vm0, %v8785_v5 }
 0xad3   : > { %7634 = vmatprep.subr.bf16.mxu0 %v8785_v5  ;;  %v4087_v38 = vpack.c.bf16 %v4056_v18, %v4056_v18  ;;  %v4025_v22 = vpack.c.bf16 %v3990_v23, %v3990_v23 }
 0xad5   : > { %7607 = vmatmul.mubr.msk.bf16.vlgmr.msra.gmra.mrb[92].mxu1 %vm1811_vm1, %v4023_v53  ;;  %v4482_v31 = vsel %vm1811_vm1, %v4087_v38, 0 }
 0xad6   : > { %7617 = vmatpush3.bf16.xpose.msra.mxu1 %v4390_v20  ;;  %v3996_v6 = vpop.permute.xlu1 %3995  ;;  %v3993_v28 = vpop.permute.xlu0 %3992  ;;  %7618 = vmatprep.mubr.msk.bf16.mxu1 %vm8786_vm0, %v8785_v5 }
 0xad7   : > { %v4026_v29 = vpack.c.bf16 %v3993_v28, %v3993_v28  ;;  %7628 = vmatprep.subr.bf16.mxu1 %v8785_v5  ;;  %v4027_v52 = vpack.c.bf16 %v3996_v6, %v3996_v6 }
 0xad9   : > { %7625 = vmatmul.mubr.msk.bf16.vlgmr.msra.gmra.mrb[72].mxu0 %vm1811_vm1, %v4026_v29 }
 0xada   : > { %v4063_v26 = vpop.permute.xlu1 %4062  ;;  %7635 = vmatpush3.bf16.xpose.msra.mxu0 %v4528_v37  ;;  %v4060_v16 = vpop.permute.xlu0 %4059  ;;  %7636 = vmatprep.mubr.msk.bf16.mxu0 %vm8786_vm0, %v8785_v5 }
 0xadb   : > { %7646 = vmatprep.subr.bf16.mxu0 %v8785_v5  ;;  %v4090_v32 = vpack.c.bf16 %v4063_v26, %v4063_v26  ;;  %v4089_v58 = vpack.c.bf16 %v4060_v16, %v4060_v16 }
 0xadd   : > { %7619 = vmatmul.mubr.msk.bf16.vlgmr.msra.gmra.mrb[96].mxu1 %vm1811_vm1, %v4025_v22  ;;  %v4620_v45 = vsel %vm1811_vm1, %v4090_v32, 0  ;;  %v4574_v36 = vsel %vm1811_vm1, %v4089_v58, 0 }
 0xade   : > { %7629 = vmatpush3.bf16.xpose.msra.mxu1 %v4482_v31  ;;  %v4066_v42 = vpop.permute.xlu1 %4065  ;;  %v4000_v35 = vpop.permute.xlu0 %3999  ;;  %7630 = vmatprep.mubr.msk.bf16.mxu1 %vm8786_vm0, %v8785_v5 }
 0xadf   : > { %7640 = vmatprep.subr.bf16.mxu1 %v8785_v5  ;;  %v4091_v48 = vpack.c.bf16 %v4066_v42, %v4066_v42  ;;  %v4029_v59 = vpack.c.bf16 %v4000_v35, %v4000_v35 }
 0xae1   : > { %7637 = vmatmul.mubr.msk.bf16.vlgmr.msra.gmra.mrb[76].mxu0 %vm1811_vm1, %v4028_v43  ;;  %v4666_v7 = vsel %vm1811_vm1, %v4091_v48, 0 }
 0xae2   : > { %v4069_v49 = vpop.permute.xlu1 %4068  ;;  %v4003_v19 = vpop.permute.xlu0 %4002  ;;  %7647 = vmatpush3.bf16.xpose.msra.mxu0 %v4620_v45  ;;  %7648 = vmatprep.mubr.msk.bf16.mxu0 %vm8786_vm0, %v8785_v5 }
 0xae3   : > { %7658 = vmatprep.subr.bf16.mxu0 %v8785_v5  ;;  %v4092_v40 = vpack.c.bf16 %v4069_v49, %v4069_v49  ;;  %v4030_v44 = vpack.c.bf16 %v4003_v19, %v4003_v19 }
 0xae5   : > { %7631 = vmatmul.mubr.msk.bf16.vlgmr.msra.gmra.mrb[100].mxu1 %vm1811_vm1, %v4027_v52  ;;  %v4712_v47 = vsel %vm1811_vm1, %v4092_v40, 0 }
 0xae6   : > { %7641 = vmatpush3.bf16.xpose.msra.mxu1 %v4574_v36  ;;  %v4072_v54 = vpop.permute.xlu1 %4071  ;;  %v4006_v57 = vpop.permute.xlu0 %4005  ;;  %7642 = vmatprep.mubr.msk.bf16.mxu1 %vm8786_vm0, %v8785_v5 }
 0xae7   : > { %7652 = vmatprep.subr.bf16.mxu1 %v8785_v5  ;;  %v4093_v55 = vpack.c.bf16 %v4072_v54, %v4072_v54  ;;  %v4031_v8 = vpack.c.bf16 %v4006_v57, %v4006_v57 }
 0xae9   : > { %7649 = vmatmul.mubr.msk.bf16.vlgmr.msra.gmra.mrb[80].mxu0 %vm1811_vm1, %v4030_v44  ;;  %v4758_v9 = vsel %vm1811_vm1, %v4093_v55, 0 }
 0xaea   : > { %v4075_v56 = vpop.permute.xlu1 %4074  ;;  %v4009_v51 = vpop.permute.xlu0 %4008  ;;  %7659 = vmatpush3.bf16.xpose.msra.mxu0 %v4712_v47  ;;  %7660 = vmatprep.mubr.msk.bf16.mxu0 %vm8786_vm0, %v8785_v5 }
 0xaeb   : > { %7670 = vmatprep.subr.bf16.mxu0 %v8785_v5  ;;  %v4094_v50 = vpack.c.bf16 %v4075_v56, %v4075_v56  ;;  %v4032_v2 = vpack.c.bf16 %v4009_v51, %v4009_v51 }
 0xaed   : > { %7643 = vmatmul.mubr.msk.bf16.vlgmr.msra.gmra.mrb[104].mxu1 %vm1811_vm1, %v4029_v59  ;;  %v4804_v14 = vsel %vm1811_vm1, %v4094_v50, 0 }
 0xaee   : > { %7653 = vmatpush3.bf16.xpose.msra.mxu1 %v4666_v7  ;;  %v4078_v61 = vpop.permute.xlu1 %4077  ;;  %v4012_v1 = vpop.permute.xlu0 %4011  ;;  %7654 = vmatprep.mubr.msk.bf16.mxu1 %vm8786_vm0, %v8785_v5 }
 0xaef   : > { %7664 = vmatprep.subr.bf16.mxu1 %v8785_v5  ;;  %v4095_v11 = vpack.c.bf16 %v4078_v61, %v4078_v61  ;;  %v4033_v12 = vpack.c.bf16 %v4012_v1, %v4012_v1 }
 0xaf1   : > { %7661 = vmatmul.mubr.msk.bf16.vlgmr.msra.gmra.mrb[84].mxu0 %vm1811_vm1, %v4032_v2  ;;  %v4850_v3 = vsel %vm1811_vm1, %v4095_v11, 0 }
 0xaf2   : > { %7671 = vmatpush3.bf16.xpose.msra.mxu0 %v4804_v14  ;;  %7672 = vmatprep.mubr.msk.bf16.mxu0 %vm8786_vm0, %v8785_v5  ;;  %v4018_v62 = vpop.permute.xlu1 %4017  ;;  %v4015_v13 = vpop.permute.xlu0 %4014 }
 0xaf3   : > { %7682 = vmatprep.subr.bf16.mxu0 %v8785_v5  ;;  %v4034_v27 = vpack.c.bf16 %v4015_v13, %v4015_v13  ;;  %v4035_v46 = vpack.c.bf16 %v4018_v62, %v4018_v62 }
 0xaf5   : > { %7655 = vmatmul.mubr.msk.bf16.vlgmr.msra.gmra.mrb[108].mxu1 %vm1811_vm1, %v4031_v8 }
 0xaf6   : > { %7665 = vmatpush3.bf16.xpose.msra.mxu1 %v4758_v9  ;;  %7666 = vmatprep.mubr.msk.bf16.mxu1 %vm8786_vm0, %v8785_v5  ;;  %v10310_v21 = vpop.permute.xlu1 %7941  ;;  %v10344_v58 = vpop.permute.xlu0 %4100 }
 0xaf7   : > { %7676 = vmatprep.subr.bf16.mxu1 %v8785_v5  ;;  %v7943_v15 = vunpack.i.l.bf16 %v10310_v21 }
 0xaf9   : > { %7673 = vmatmul.mubr.msk.bf16.vlgmr.msra.gmra.mrb[88].mxu0 %vm1811_vm1, %v4034_v27  ;;  %v4141_v63 = vpack.c.bf16 %v7943_v15, %v7943_v15 }
 0xafa   : > { %7683 = vmatpush3.bf16.msra.mxu0 %v5088_v39  ;;  %7684 = vmatprep.mubr.msk.bf16.mxu0 %vm8786_vm0, %v8785_v5  ;;  %v10352_v48 = vpop.permute.xlu0 %4109 }
 0xafb   : > { %7694 = vmatprep.subr.bf16.mxu0 %v8785_v5  ;;  %v5134_v30 = vsel %vm2744_vm2, %v4141_v63, 0 }
 0xafd   : > { %7667 = vmatmul.mubr.msk.bf16.vlgmr.msra.gmra.mrb[112].mxu1 %vm1811_vm1, %v4033_v12 }
 0xafe   : > { %7677 = vmatpush3.bf16.xpose.msra.mxu1 %v4850_v3  ;;  %7678 = vmatprep.mubr.msk.bf16.mxu1 %vm8786_vm0, %v8785_v5  ;;  %v10360_v1 = vpop.permute.xlu0 %4115 }
 0xaff   : > { %7688 = vmatprep.subr.bf16.mxu1 %v8785_v5 }
 0xb05   : > { %7679 = vmatmul.mubr.msk.bf16.vlgmr.msra.gmra.mrb[116].mxu1 %vm1811_vm1, %v4035_v46 }
 0xb06   : > { %7689 = vmatpush3.bf16.msra.mxu1 %v5134_v30  ;;  %7690 = vmatprep.mubr.msk.bf16.mxu1 %vm8786_vm0, %v8785_v5 }
 0xb07   : > { %7700 = vmatprep.subr.bf16.mxu1 %v8785_v5 }
 0xb25   : > { %v10326_v25 = vpop.f32.mrb[80].mxu1 }
 0xb26   : > { %v7590_v17 = vpop.f32.mrb[81].mxu1  ;;  %v4892_v18 = vsel %vm2548_vm3, %v10326_v25, -inf }
 0xb27   : > { %4893 = vmax.xlane.f32.xlu0 %v4892_v18  ;;  %v4199_v23 = vpop.f32.mrb[82].mxu1 }
 0xb28   : > { %v7591_v53 = vpop.f32.mrb[83].mxu1 }
 0xb98   : > { %v10330_v20 = vpop.f32.mrb[84].mxu1 }
 0xb99   : > { %v7596_v24 = vpop.f32.mrb[85].mxu1  ;;  %v4895_v6 = vsel %vm2548_vm3, %v10330_v20, -inf }
 0xb9a   : > { %4896 = vmax.xlane.f32.xlu1 %v4895_v6  ;;  %v4245_v28 = vpop.f32.mrb[86].mxu1 }
 0xb9b   : > { %v7597_v29 = vpop.f32.mrb[87].mxu1 }
 0xba0   : > { %v10334_v38 = vpop.f32.mrb[88].mxu1 }
 0xba1   : > { %v7602_v37 = vpop.f32.mrb[89].mxu1  ;;  %v4898_v26 = vsel %vm2548_vm3, %v10334_v38, -inf }
 0xba2   : > { %4899 = vmax.xlane.f32.xlu0 %v4898_v26  ;;  %v4291_v16 = vpop.f32.mrb[90].mxu1 }
 0xba3   : > { %v7603_v22 = vpop.f32.mrb[91].mxu1 }
 0xba4   : > { %v10338_v31 = vpop.f32.mrb[68].mxu0 }
 0xba5   : > { %v7614_v32 = vpop.f32.mrb[69].mxu0  ;;  %v4904_v42 = vsel %vm2548_vm3, %v10338_v31, -inf }
 0xba6   : > { %v4383_v35 = vpop.f32.mrb[70].mxu0  ;;  %4905 = vmax.xlane.f32.xlu1 %v4904_v42 }
 0xba7   : > { %v7615_v43 = vpop.f32.mrb[71].mxu0 }
 0xba8   : > { %v10342_v45 = vpop.f32.mrb[92].mxu1 }
 0xba9   : > { %v7608_v49 = vpop.f32.mrb[93].mxu1  ;;  %v4901_v19 = vsel %vm2548_vm3, %v10342_v45, -inf }
 0xbaa   : > { %4902 = vmax.xlane.f32.xlu0 %v4901_v19  ;;  %v4337_v52 = vpop.f32.mrb[94].mxu1 }
 0xbab   : > { %v7609_v36 = vpop.f32.mrb[95].mxu1 }
 0xbac   : > { %v10348_v40 = vpop.f32.mrb[72].mxu0 }
 0xbad   : > { %v7626_v54 = vpop.f32.mrb[73].mxu0  ;;  %v4910_v57 = vsel %vm2548_vm3, %v10348_v40, -inf }
 0xbae   : > { %v4475_v44 = vpop.f32.mrb[74].mxu0  ;;  %4911 = vmax.xlane.f32.xlu1 %v4910_v57 }
 0xbaf   : > { %v7627_v47 = vpop.f32.mrb[75].mxu0 }
 0xbb0   : > { %v10354_v56 = vpop.f32.mrb[96].mxu1 }
 0xbb1   : > { %v7620_v51 = vpop.f32.mrb[97].mxu1  ;;  %v4907_v59 = vsel %vm2548_vm3, %v10354_v56, -inf }
 0xbb2   : > { %4908 = vmax.xlane.f32.xlu0 %v4907_v59  ;;  %v4429_v7 = vpop.f32.mrb[98].mxu1 }
 0xbb3   : > { %v7621_v50 = vpop.f32.mrb[99].mxu1 }
 0xbb4   : > { %v10358_v61 = vpop.f32.mrb[76].mxu0  ;;  %v4894_v13 = vpop.xlane.xlu0 %4893 }
 0xbb5   : > { %v7638_v2 = vpop.f32.mrb[77].mxu0  ;;  %v4916_v55 = vsel %vm2548_vm3, %v10358_v61, -inf  ;;  %v4940_v39 = vsub.f32 %v10326_v25, %v4894_v13 }
 0xbb6   : > { %v4567_v14 = vpop.f32.mrb[78].mxu0  ;;  %4917 = vmax.xlane.f32.xlu1 %v4916_v55 }
 0xbb7   : > { %v7639_v8 = vpop.f32.mrb[79].mxu0  ;;  %v4956_v30 = vmul.f32 1.442695, %v4940_v39 }
 0xbb8   : > { %v10364_v62 = vpop.f32.mrb[100].mxu1  ;;  %v10405_v8 = vpop.permute.xlu1 %4103 }
 0xbb9   : > { %v7632_v9 = vpop.f32.mrb[101].mxu1  ;;  %v4913_v10 = vsel %vm2548_vm3, %v10364_v62, -inf  ;;  %8168 = vpow2.f32 %v4956_v30 }
 0xbba   : > { %4914 = vmax.xlane.f32.xlu0 %v4913_v10  ;;  %v4521_v27 = vpop.f32.mrb[102].mxu1 }
 0xbbb   : > { %v7633_v11 = vpop.f32.mrb[103].mxu1 }
 0xbbc   : > { %v10369_v12 = vpop.f32.mrb[80].mxu0  ;;  %v10407_v13 = vpop.permute.xlu1 %4106 }
 0xbbd   : > { %v7650_v3 = vpop.f32.mrb[81].mxu0  ;;  %v4922_v15 = vsel %vm2548_vm3, %v10369_v12, -inf }
 0xbbe   : > { %v4659_v63 = vpop.f32.mrb[82].mxu0  ;;  %4923 = vmax.xlane.f32.xlu1 %v4922_v15 }
 0xbbf   : > { %v7651_v46 = vpop.f32.mrb[83].mxu0 }
 0xbc0   : > { %v10373_v17 = vpop.f32.mrb[104].mxu1  ;;  %v10409_v9 = vpop.permute.xlu1 %4112 }
 0xbc1   : > { %v7644_v18 = vpop.f32.mrb[105].mxu1  ;;  %v4919_v23 = vsel %vm2548_vm3, %v10373_v17, -inf }
 0xbc2   : > { %4920 = vmax.xlane.f32.xlu0 %v4919_v23  ;;  %v4613_v53 = vpop.f32.mrb[106].mxu1 }
 0xbc3   : > { %v7645_v24 = vpop.f32.mrb[107].mxu1  ;;  %v10389_v19 = vpop.eup %8168 }
 0xbc4   : > { %v10377_v25 = vpop.f32.mrb[84].mxu0  ;;  %v4988_v44 = vsel %vm2548_vm3, %v10389_v19, 0.0 }
 0xbc5   : > { %v7662_v6 = vpop.f32.mrb[85].mxu0  ;;  %v4928_v28 = vsel %vm2548_vm3, %v10377_v25, -inf }
 0xbc6   : > { %v4751_v29 = vpop.f32.mrb[86].mxu0  ;;  %4929 = vmax.xlane.f32.xlu1 %v4928_v28 }
 0xbc7   : > { %v7663_v37 = vpop.f32.mrb[87].mxu0 }
 0xbc8   : > { %v10381_v26 = vpop.f32.mrb[108].mxu1 }
 0xbc9   : > { %v7656_v16 = vpop.f32.mrb[109].mxu1  ;;  %v4925_v22 = vsel %vm2548_vm3, %v10381_v26, -inf }
 0xbca   : > { %4926 = vmax.xlane.f32.xlu0 %v4925_v22  ;;  %v4705_v32 = vpop.f32.mrb[110].mxu1 }
 0xbcb   : > { %v7657_v42 = vpop.f32.mrb[111].mxu1 }
 0xbcc   : > { %v10385_v35 = vpop.f32.mrb[88].mxu0 }
 0xbcd   : > { %v7674_v43 = vpop.f32.mrb[89].mxu0  ;;  %v4934_v49 = vsel %vm2548_vm3, %v10385_v35, -inf }
 0xbce   : > { %v4843_v52 = vpop.f32.mrb[90].mxu0  ;;  %4935 = vmax.xlane.f32.xlu1 %v4934_v49 }
 0xbcf   : > { %v7675_v36 = vpop.f32.mrb[91].mxu0 }
 0xbd0   : > { %v10391_v54 = vpop.f32.mrb[112].mxu1 }
 0xbd1   : > { %v7668_v57 = vpop.f32.mrb[113].mxu1  ;;  %v4931_v47 = vsel %vm2548_vm3, %v10391_v54, -inf }
 0xbd2   : > { %4989 = vadd.xlane.f32.xlu1 %v4988_v44  ;;  %4932 = vmax.xlane.f32.xlu0 %v4931_v47  ;;  %v4797_v51 = vpop.f32.mrb[114].mxu1 }
 0xbd3   : > { %v7669_v59 = vpop.f32.mrb[115].mxu1 }
 0xbd8   : > { %v10397_v7 = vpop.f32.mrb[116].mxu1 }
 0xbd9   : > { %v7680_v50 = vpop.f32.mrb[117].mxu1  ;;  %v4937_v14 = vsel %vm2548_vm3, %v10397_v7, -inf }
 0xbda   : > { %v4889_v2 = vpop.f32.mrb[118].mxu1 }
 0xbdb   : > { %v7681_v55 = vpop.f32.mrb[119].mxu1 }
 0xbe3   : > { %4125 = vrot.lane.b32.xlu1 %v10219_v60, %s8790_s4 }
 0xbe8   : > { %4122 = vrot.lane.b32.xlu0 %v10219_v60, %s8787_s1 }
 0xc07   : > { %4938 = vmax.xlane.f32.xlu0 %v4937_v14 }
 0xc27   : > { %v4897_v10 = vpop.xlane.xlu1 %4896 }
 0xc28   : > { %v4941_v27 = vsub.f32 %v10330_v20, %v4897_v10 }
 0xc2a   : > { %v4958_v11 = vmul.f32 1.442695, %v4941_v27 }
 0xc2c   : > { %8170 = vpow2.f32 %v4958_v11 }
 0xc2f   : > { %v4900_v39 = vpop.xlane.xlu0 %4899 }
 0xc30   : > { %v4942_v3 = vsub.f32 %v10334_v38, %v4900_v39 }
 0xc32   : > { %v4960_v30 = vmul.f32 1.442695, %v4942_v3 }
 0xc33   : > { %v4906_v15 = vpop.xlane.xlu1 %4905 }
 0xc34   : > { %v4944_v63 = vsub.f32 %v10338_v31, %v4906_v15 }
 0xc36   : > { %v10414_v46 = vpop.eup %8170  ;;  %v4964_v18 = vmul.f32 1.442695, %v4944_v63 }
 0xc37   : > { %v4903_v23 = vpop.xlane.xlu0 %4902  ;;  %v4991_v53 = vsel %vm2548_vm3, %v10414_v46, 0.0 }
 0xc38   : > { %8172 = vpow2.f32 %v4964_v18  ;;  %4992 = vadd.xlane.f32.xlu0 %v4991_v53  ;;  %v4943_v20 = vsub.f32 %v10342_v45, %v4903_v23 }
 0xc39   : > { %8174 = vpow2.f32 %v4960_v30 }
 0xc3a   : > { %v4962_v38 = vmul.f32 1.442695, %v4943_v20  ;;  %v4142_v20 = vpack.c.bf16 %v10344_v58, %v10344_v58 }
 0xc3b   : > { %v4912_v24 = vpop.xlane.xlu1 %4911 }
 0xc3c   : > { %v4946_v6 = vsub.f32 %v10348_v40, %v4912_v24 }
 0xc3e   : > { %v4968_v28 = vmul.f32 1.442695, %v4946_v6 }
 0xc3f   : > { %v4909_v29 = vpop.xlane.xlu0 %4908 }
 0xc40   : > { %8176 = vpow2.f32 %v4968_v28  ;;  %v4945_v31 = vsub.f32 %v10354_v56, %v4909_v29 }
 0xc41   : > { %8178 = vpow2.f32 %v4962_v38 }
 0xc42   : > { %v10421_v37 = vpop.eup %8172  ;;  %v4966_v16 = vmul.f32 1.442695, %v4945_v31 }
 0xc43   : > { %v5000_v22 = vsel %vm2548_vm3, %v10421_v37, 0.0  ;;  %v10425_v32 = vpop.eup %8174  ;;  %v4918_v36 = vpop.xlane.xlu1 %4917 }
 0xc44   : > { %5001 = vadd.xlane.f32.xlu1 %v5000_v22  ;;  %8180 = vpow2.f32 %v4966_v16  ;;  %v4994_v40 = vsel %vm2548_vm3, %v10425_v32, 0.0  ;;  %v4948_v30 = vsub.f32 %v10358_v61, %v4918_v36  ;;  %v5180_v61 = vsel %vm2744_vm2, %v4142_v20, 0 }
 0xc46   : > { %v4972_v23 = vmul.f32 1.442695, %v4948_v30 }
 0xc47   : > { %v4915_v45 = vpop.xlane.xlu0 %4914 }
 0xc48   : > { %v4947_v42 = vsub.f32 %v10364_v62, %v4915_v45  ;;  %4995 = vadd.xlane.f32.xlu1 %v4994_v40 }
 0xc4a   : > { %v10430_v43 = vpop.eup %8176  ;;  %v4970_v56 = vmul.f32 1.442695, %v4947_v42 }
 0xc4b   : > { %v5006_v49 = vsel %vm2548_vm3, %v10430_v43, 0.0  ;;  %v10434_v52 = vpop.eup %8178  ;;  %v4924_v59 = vpop.xlane.xlu1 %4923 }
 0xc4c   : > { %8182 = vpow2.f32 %v4970_v56  ;;  %5007 = vadd.xlane.f32.xlu0 %v5006_v49  ;;  %v4997_v44 = vsel %vm2548_vm3, %v10434_v52, 0.0  ;;  %v4950_v53 = vsub.f32 %v10369_v12, %v4924_v59 }
 0xc4e   : > { %v10438_v47 = vpop.eup %8180  ;;  %v4976_v38 = vmul.f32 1.442695, %v4950_v53 }
 0xc4f   : > { %v4921_v57 = vpop.xlane.xlu0 %4920  ;;  %v5003_v50 = vsel %vm2548_vm3, %v10438_v47, 0.0 }
 0xc50   : > { %v4949_v62 = vsub.f32 %v10373_v17, %v4921_v57  ;;  %4998 = vadd.xlane.f32.xlu0 %v4997_v44 }
 0xc52   : > { %v4974_v51 = vmul.f32 1.442695, %v4949_v62 }
 0xc53   : > { %v4930_v55 = vpop.xlane.xlu1 %4929 }
 0xc54   : > { %8184 = vpow2.f32 %v4974_v51  ;;  %5004 = vadd.xlane.f32.xlu0 %v5003_v50  ;;  %v4952_v28 = vsub.f32 %v10377_v25, %v4930_v55 }
 0xc56   : > { %v10443_v2 = vpop.eup %8182  ;;  %v4980_v12 = vmul.f32 1.442695, %v4952_v28  ;;  %v4146_v28 = vpack.c.bf16 %v10409_v9, %v10409_v9 }
 0xc57   : > { %v4927_v14 = vpop.xlane.xlu0 %4926  ;;  %v5009_v10 = vsel %vm2548_vm3, %v10443_v2, 0.0 }
 0xc58   : > { %v4951_v27 = vsub.f32 %v10381_v26, %v4927_v14  ;;  %5010 = vadd.xlane.f32.xlu0 %v5009_v10  ;;  %v4143_v10 = vpack.c.bf16 %v10405_v8, %v10405_v8 }
 0xc59   : > { %4128 = vrot.lane.b32.xlu1 %v10219_v60, %s8789_s3 }
 0xc5a   : > { %v4978_v17 = vmul.f32 1.442695, %v4951_v27 }
 0xc5b   : > { %v4936_v11 = vpop.xlane.xlu1 %4935 }
 0xc5c   : > { %8186 = vpow2.f32 %v4978_v17  ;;  %v4954_v58 = vsub.f32 %v10385_v35, %v4936_v11 }
 0xc5e   : > { %v10450_v39 = vpop.eup %8184 }
 0xc5f   : > { %v4990_v3 = vpop.xlane.xlu1 %4989  ;;  %v5015_v15 = vsel %vm2548_vm3, %v10450_v39, 0.0  ;;  %v4933_v35 = vpop.xlane.xlu0 %4932 }
 0xc60   : > { %5016 = vadd.xlane.f32.xlu0 %v5015_v15  ;;  %8188 = vrcp.f32 %v4990_v3  ;;  %v4953_v42 = vsub.f32 %v10391_v54, %v4933_v35  ;;  %v5226_v3 = vsel %vm2744_vm2, %v4143_v10, 0  ;;  %v4147_v35 = vpack.c.bf16 %v10360_v1, %v10360_v1 }
 0xc61   : > { %8190 = vpow2.f32 %v4972_v23 }
 0xc62   : > { %8192 = vpow2.f32 %v4976_v38  ;;  %v4982_v49 = vmul.f32 1.442695, %v4953_v42 }
 0xc63   : > { %8194 = vpow2.f32 %v4980_v12  ;;  %v10489_v36 = vpop.permute.xlu0 %4122  ;;  %v10504_v55 = vpop.permute.xlu1 %4125 }
 0xc66   : > { %v10454_v63 = vpop.eup %8186 }
 0xc67   : > { %v5021_v26 = vsel %vm2548_vm3, %v10454_v63, 0.0 }
 0xc68   : > { %5022 = vadd.xlane.f32.xlu0 %v5021_v26 }
 0xc6a   : > { %v8189_v18 = vpop.eup %8188 }
 0xc6b   : > { %v5052_v24 = vmul.f32 %v8189_v18, %v10389_v19  ;;  %v4984_v19 = vmul.f32 1.442695, %v4954_v58  ;;  %v10470_v29 = vpop.eup %8190 }
 0xc6c   : > { %v5012_v25 = vsel %vm2548_vm3, %v10470_v29, 0.0  ;;  %v10474_v31 = vpop.eup %8192 }
 0xc6d   : > { %v5068_v6 = vpack.c.bf16 %v5052_v24, %v5052_v24  ;;  %8196 = vpow2.f32 %v4984_v19  ;;  %v5018_v16 = vsel %vm2548_vm3, %v10474_v31, 0.0  ;;  %v10480_v22 = vpop.eup %8194 }
 0xc6e   : > { %v5024_v45 = vsel %vm2548_vm3, %v10480_v22, 0.0  ;;  %8198 = vpow2.f32 %v4982_v49  ;;  %v5410_v49 = vsel %vm2744_vm2, %v4147_v35, 0 }
 0xc6f   : > { %7685 = vmatmul.mubr.msk.bf16.vlgmr.msra.gmra.mrb[92].mxu0 %vm2548_vm3, %v5068_v6 }
 0xc70   : > { %7695 = vmatpush3.bf16.msra.mxu0 %v5180_v61  ;;  %7696 = vmatprep.mubr.msk.bf16.mxu0 %vm8786_vm0, %v8785_v5 }
 0xc71   : > { %7706 = vmatprep.subr.bf16.mxu0 %v8785_v5 }
 0xc77   : > { %v10484_v40 = vpop.eup %8196 }
 0xc78   : > { %v5030_v56 = vsel %vm2548_vm3, %v10484_v40, 0.0  ;;  %v10492_v51 = vpop.eup %8198 }
 0xc79   : > { %v5027_v59 = vsel %vm2548_vm3, %v10492_v51, 0.0 }
 0xc7d   : > { %5013 = vadd.xlane.f32.xlu1 %v5012_v25 }
 0xc7e   : > { %4131 = vrot.lane.b32.xlu0 %v10219_v60, %s8791_s0 }
 0xc81   : > { %5019 = vadd.xlane.f32.xlu1 %v5018_v16 }
 0xc85   : > { %5025 = vadd.xlane.f32.xlu1 %v5024_v45  ;;  %v4148_v45 = vpack.c.bf16 %v10219_v60, %v10219_v60 }
 0xc89   : > { %5031 = vadd.xlane.f32.xlu1 %v5030_v56  ;;  %v7944_v56 = vunpack.i.h.bf16 %v10310_v21 }
 0xc94   : > { %v4939_v57 = vpop.xlane.xlu0 %4938 }
 0xc95   : > { %v4955_v44 = vsub.f32 %v10397_v7, %v4939_v57  ;;  %v5456_v57 = vsel %vm2744_vm2, %v4148_v45, 0 }
 0xc97   : > { %v4986_v62 = vmul.f32 1.442695, %v4955_v44 }
 0xc99   : > { %8200 = vpow2.f32 %v4986_v62 }
 0xc9d   : > { %5028 = vadd.xlane.f32.xlu0 %v5027_v59 }
 0xca3   : > { %v10496_v54 = vpop.eup %8200 }
 0xca4   : > { %v5033_v50 = vsel %vm2548_vm3, %v10496_v54, 0.0 }
 0xca5   : > { %5034 = vadd.xlane.f32.xlu1 %v5033_v50  ;;  %v4151_v50 = vpack.c.bf16 %v10504_v55, %v10504_v55 }
 0xca7   : > { %v5594_v10 = vsel %vm2744_vm2, %v4151_v50, 0 }
 0xcb3   : > { %4137 = vrot.lane.b32.xlu0 %v10219_v60, %s8793_s9 }
 0xcb6   : > { %4134 = vrot.lane.b32.xlu1 %v10219_v60, %s8792_s28  ;;  %v4149_v60 = vpack.c.bf16 %v7944_v56, %v7944_v56 }
 0xcb8   : > { %v5502_v59 = vsel %vm2744_vm2, %v4149_v60, 0 }
 0xcc5   : > { %v4993_v7 = vpop.xlane.xlu0 %4992 }
 0xcc6   : > { %8202 = vrcp.f32 %v4993_v7 }
 0xcd0   : > { %v8203_v14 = vpop.eup %8202 }
 0xcd1   : > { %v5053_v27 = vmul.f32 %v8203_v14, %v10414_v46  ;;  %v5002_v17 = vpop.xlane.xlu1 %5001  ;;  %v4144_v46 = vpack.c.bf16 %v10407_v13, %v10407_v13 }
 0xcd3   : > { %v5069_v11 = vpack.c.bf16 %v5053_v27, %v5053_v27  ;;  %v5272_v24 = vsel %vm2744_vm2, %v4144_v46, 0 }
 0xcd5   : > { %v4996_v15 = vpop.xlane.xlu1 %4995  ;;  %7691 = vmatmul.mubr.msk.bf16.vlgmr.msra.gmra.mrb[120].mxu1 %vm2548_vm3, %v5069_v11 }
 0xcd6   : > { %8204 = vrcp.f32 %v4996_v15  ;;  %7701 = vmatpush3.bf16.msra.mxu1 %v5226_v3  ;;  %7702 = vmatprep.mubr.msk.bf16.mxu1 %vm8786_vm0, %v8785_v5 }
 0xcd7   : > { %7712 = vmatprep.subr.bf16.mxu1 %v8785_v5  ;;  %8206 = vrcp.f32 %v5002_v17 }
 0xcd9   : > { %v5008_v30 = vpop.xlane.xlu0 %5007  ;;  %v4129_v27 = vpop.permute.xlu1 %4128 }
 0xcdd   : > { %v4999_v26 = vpop.xlane.xlu0 %4998 }
 0xcde   : > { %8208 = vrcp.f32 %v4999_v26 }
 0xcdf   : > { %8210 = vrcp.f32 %v5008_v30 }
 0xce0   : > { %v8205_v8 = vpop.eup %8204 }
 0xce1   : > { %v5054_v18 = vmul.f32 %v8205_v8, %v10425_v32  ;;  %v5005_v23 = vpop.xlane.xlu0 %5004  ;;  %v8207_v20 = vpop.eup %8206  ;;  %v4145_v32 = vpack.c.bf16 %v10352_v48, %v10352_v48  ;;  %v4150_v8 = vpack.c.bf16 %v10489_v36, %v10489_v36 }
 0xce2   : > { %8212 = vrcp.f32 %v5005_v23  ;;  %v5056_v6 = vmul.f32 %v8207_v20, %v10421_v37  ;;  %v5364_v37 = vsel %vm2744_vm2, %v4146_v28, 0 }
 0xce3   : > { %v5070_v53 = vpack.c.bf16 %v5054_v18, %v5054_v18  ;;  %v5318_v16 = vsel %vm2744_vm2, %v4145_v32, 0 }
 0xce4   : > { %v5072_v19 = vpack.c.bf16 %v5056_v6, %v5056_v6 }
 0xce5   : > { %7697 = vmatmul.mubr.msk.bf16.vlgmr.msra.gmra.mrb[96].mxu0 %vm2548_vm3, %v5070_v53  ;;  %v5011_v38 = vpop.xlane.xlu0 %5010  ;;  %v5548_v53 = vsel %vm2744_vm2, %v4150_v8, 0 }
 0xce6   : > { %7707 = vmatpush3.bf16.msra.mxu0 %v5272_v24  ;;  %7708 = vmatprep.mubr.msk.bf16.mxu0 %vm8786_vm0, %v8785_v5  ;;  %8214 = vrcp.f32 %v5011_v38  ;;  %v4152_v24 = vpack.c.bf16 %v4129_v27, %v4129_v27 }
 0xce7   : > { %7718 = vmatprep.subr.bf16.mxu0 %v8785_v5 }
 0xce8   : > { %v8209_v13 = vpop.eup %8208 }
 0xce9   : > { %v5055_v61 = vmul.f32 %v8209_v13, %v10434_v52  ;;  %v8211_v12 = vpop.eup %8210 }
 0xcea   : > { %v5058_v48 = vmul.f32 %v8211_v12, %v10430_v43 }
 0xceb   : > { %v5071_v58 = vpack.c.bf16 %v5055_v61, %v5055_v61 }
 0xcec   : > { %v8213_v25 = vpop.eup %8212 }
 0xced   : > { %7703 = vmatmul.mubr.msk.bf16.vlgmr.msra.gmra.mrb[124].mxu1 %vm2548_vm3, %v5071_v58  ;;  %7709 = vmatmul.mubr.msk.bf16.vlgmr.msra.gmra.mrb[100].mxu0 %vm2548_vm3, %v5072_v19  ;;  %v5057_v9 = vmul.f32 %v8213_v25, %v10438_v47  ;;  %v5017_v52 = vpop.xlane.xlu0 %5016  ;;  %v5074_v47 = vpack.c.bf16 %v5058_v48, %v5058_v48 }
 0xcee   : > { %7713 = vmatpush3.bf16.msra.mxu1 %v5318_v16  ;;  %7719 = vmatpush3.bf16.msra.mxu0 %v5364_v37  ;;  %8216 = vrcp.f32 %v5017_v52 }
 0xcef   : > { %7714 = vmatprep.mubr.msk.bf16.mxu1 %vm8786_vm0, %v8785_v5  ;;  %7720 = vmatprep.mubr.msk.bf16.mxu0 %vm8786_vm0, %v8785_v5  ;;  %v5073_v43 = vpack.c.bf16 %v5057_v9, %v5057_v9 }
 0xcf0   : > { %7724 = vmatprep.subr.bf16.mxu1 %v8785_v5  ;;  %7730 = vmatprep.subr.bf16.mxu0 %v8785_v5  ;;  %v8215_v42 = vpop.eup %8214 }
 0xcf1   : > { %v5059_v1 = vmul.f32 %v8215_v42, %v10443_v2 }
 0xcf3   : > { %v5075_v21 = vpack.c.bf16 %v5059_v1, %v5059_v1 }
 0xcf5   : > { %7715 = vmatmul.mubr.msk.bf16.vlgmr.msra.gmra.mrb[128].mxu1 %vm2548_vm3, %v5073_v43  ;;  %7721 = vmatmul.mubr.msk.bf16.vlgmr.msra.gmra.mrb[104].mxu0 %vm2548_vm3, %v5074_v47  ;;  %v5023_v44 = vpop.xlane.xlu0 %5022 }
 0xcf6   : > { %7725 = vmatpush3.bf16.msra.mxu1 %v5410_v49  ;;  %7731 = vmatpush3.bf16.msra.mxu0 %v5456_v57  ;;  %8218 = vrcp.f32 %v5023_v44 }
 0xcf7   : > { %7726 = vmatprep.mubr.msk.bf16.mxu1 %vm8786_vm0, %v8785_v5  ;;  %7736 = vmatprep.subr.bf16.mxu1 %v8785_v5 }
 0xcf8   : > { %7732 = vmatprep.mubr.msk.bf16.mxu0 %vm8786_vm0, %v8785_v5  ;;  %7742 = vmatprep.subr.bf16.mxu0 %v8785_v5  ;;  %v8217_v62 = vpop.eup %8216 }
 0xcf9   : > { %v5061_v2 = vmul.f32 %v8217_v62, %v10450_v39  ;;  %v4132_v17 = vpop.permute.xlu0 %4131 }
 0xcfa   : > { %v4153_v39 = vpack.c.bf16 %v4132_v17, %v4132_v17 }
 0xcfb   : > { %v5077_v7 = vpack.c.bf16 %v5061_v2, %v5061_v2 }
 0xcfc   : > { %v5686_v15 = vsel %vm2744_vm2, %v4153_v39, 0 }
 0xcfd   : > { %7727 = vmatmul.mubr.msk.bf16.vlgmr.msra.gmra.mrb[132].mxu1 %vm2548_vm3, %v5075_v21 }
 0xcfe   : > { %7737 = vmatpush3.bf16.msra.mxu1 %v5502_v59  ;;  %7738 = vmatprep.mubr.msk.bf16.mxu1 %vm8786_vm0, %v8785_v5 }
 0xcff   : > { %7748 = vmatprep.subr.bf16.mxu1 %v8785_v5 }
 0xd00   : > { %v8219_v14 = vpop.eup %8218 }
 0xd01   : > { %v5063_v11 = vmul.f32 %v8219_v14, %v10454_v63 }
 0xd03   : > { %v5079_v55 = vpack.c.bf16 %v5063_v11, %v5063_v11 }
 0xd05   : > { %7739 = vmatmul.mubr.msk.bf16.vlgmr.msra.gmra.mrb[136].mxu1 %vm2548_vm3, %v5077_v7 }
 0xd06   : > { %7749 = vmatpush3.bf16.msra.mxu1 %v5594_v10  ;;  %7750 = vmatprep.mubr.msk.bf16.mxu1 %vm8786_vm0, %v8785_v5 }
 0xd07   : > { %7760 = vmatprep.subr.bf16.mxu1 %v8785_v5 }
 0xd0a   : > { %v5014_v3 = vpop.xlane.xlu1 %5013 }
 0xd0b   : > { %8220 = vrcp.f32 %v5014_v3 }
 0xd0d   : > { %7751 = vmatmul.mubr.msk.bf16.vlgmr.msra.gmra.mrb[140].mxu1 %vm2548_vm3, %v5079_v55 }
 0xd0e   : > { %7761 = vmatpush3.bf16.msra.mxu1 %v5686_v15  ;;  %v5020_v30 = vpop.xlane.xlu1 %5019  ;;  %7762 = vmatprep.mubr.msk.bf16.mxu1 %vm8786_vm0, %v8785_v5 }
 0xd0f   : > { %8222 = vrcp.f32 %v5020_v30  ;;  %7772 = vmatprep.subr.bf16.mxu1 %v8785_v5 }
 0xd12   : > { %v5026_v26 = vpop.xlane.xlu1 %5025 }
 0xd13   : > { %8224 = vrcp.f32 %v5026_v26 }
 0xd15   : > { %v8221_v63 = vpop.eup %8220 }
 0xd16   : > { %v5060_v46 = vmul.f32 %v8221_v63, %v10470_v29  ;;  %v5640_v29 = vsel %vm2744_vm2, %v4152_v24, 0  ;;  %v5032_v13 = vpop.xlane.xlu1 %5031 }
 0xd17   : > { %8226 = vrcp.f32 %v5032_v13 }
 0xd18   : > { %v5076_v18 = vpack.c.bf16 %v5060_v46, %v5060_v46 }
 0xd19   : > { %v8223_v23 = vpop.eup %8222 }
 0xd1a   : > { %7733 = vmatmul.mubr.msk.bf16.vlgmr.msra.gmra.mrb[108].mxu0 %vm2548_vm3, %v5076_v18  ;;  %v5062_v20 = vmul.f32 %v8223_v23, %v10474_v31 }
 0xd1b   : > { %7743 = vmatpush3.bf16.msra.mxu0 %v5548_v53  ;;  %7744 = vmatprep.mubr.msk.bf16.mxu0 %vm8786_vm0, %v8785_v5 }
 0xd1c   : > { %7754 = vmatprep.subr.bf16.mxu0 %v8785_v5  ;;  %v5078_v6 = vpack.c.bf16 %v5062_v20, %v5062_v20 }
 0xd1d   : > { %v8225_v36 = vpop.eup %8224 }
 0xd1e   : > { %v5064_v38 = vmul.f32 %v8225_v36, %v10480_v22 }
 0xd20   : > { %v5080_v32 = vpack.c.bf16 %v5064_v38, %v5064_v38 }
 0xd21   : > { %v8227_v12 = vpop.eup %8226 }
 0xd22   : > { %7745 = vmatmul.mubr.msk.bf16.vlgmr.msra.gmra.mrb[112].mxu0 %vm2548_vm3, %v5078_v6  ;;  %v5066_v16 = vmul.f32 %v8227_v12, %v10484_v40 }
 0xd23   : > { %7755 = vmatpush3.bf16.msra.mxu0 %v5640_v29  ;;  %7756 = vmatprep.mubr.msk.bf16.mxu0 %vm8786_vm0, %v8785_v5 }
 0xd24   : > { %7766 = vmatprep.subr.bf16.mxu0 %v8785_v5  ;;  %v5082_v35 = vpack.c.bf16 %v5066_v16, %v5066_v16 }
 0xd2a   : > { %7757 = vmatmul.mubr.msk.bf16.vlgmr.msra.gmra.mrb[116].mxu0 %vm2548_vm3, %v5080_v32  ;;  %v5029_v31 = vpop.xlane.xlu0 %5028 }
 0xd2b   : > { %8228 = vrcp.f32 %v5029_v31  ;;  %7768 = vmatprep.mubr.msk.bf16.mxu0 %vm8786_vm0, %v8785_v5 }
 0xd2e   : > { %v4138_v61 = vpop.permute.xlu0 %4137 }
 0xd2f   : > { %v4155_v22 = vpack.c.bf16 %v4138_v61, %v4138_v61 }
 0xd31   : > { %v5778_v52 = vsel %vm2744_vm2, %v4155_v22, 0  ;;  %v8053_v22 = vld [vmem:[%s9490_s8 + $0x8] sm:$0xff]  }
 0xd32   : > { %v5035_v28 = vpop.xlane.xlu1 %5034 }
 0xd33   : > { %8230 = vrcp.f32 %v5035_v28  ;;  %v8052_v28 = vld [vmem:[%s9490_s8] sm:$0xff]  }
 0xd35   : > { %v8229_v58 = vpop.eup %8228 }
 0xd36   : > { %v5065_v19 = vmul.f32 %v8229_v58, %v10492_v51  ;;  %v4135_v25 = vpop.permute.xlu1 %4134 }
 0xd37   : > { %v4154_v37 = vpack.c.bf16 %v4135_v25, %v4135_v25 }
 0xd38   : > { %v5081_v48 = vpack.c.bf16 %v5065_v19, %v5065_v19 }
 0xd39   : > { %v5732_v9 = vsel %vm2744_vm2, %v4154_v37, 0 }
 0xd3a   : > { %7763 = vmatmul.mubr.msk.bf16.vlgmr.msra.gmra.mrb[144].mxu1 %vm2548_vm3, %v5081_v48  ;;  %7767 = vmatpush3.bf16.msra.mxu0 %v5732_v9  ;;  %v8054_v48 = vld [vmem:[%s9490_s8 + $0x10] sm:$0xff]  }
 0xd3b   : > { %7773 = vmatpush3.bf16.msra.mxu1 %v5778_v52  ;;  %7774 = vmatprep.mubr.msk.bf16.mxu1 %vm8786_vm0, %v8785_v5  ;;  %v8055_v52 = vld [vmem:[%s9490_s8 + $0x18] sm:$0xff]  }
 0xd3c   : > { %7778 = vmatprep.subr.bf16.mxu0 %v8785_v5 }
 0xd3d   : > { %v8231_v51 = vpop.eup %8230  ;;  %7769 = vmatmul.mubr.msk.bf16.vlgmr.msra.gmra.mrb[120].mxu0 %vm2548_vm3, %v5082_v35 }
 0xd3e   : > { %v5067_v40 = vmul.f32 %v8231_v51, %v10496_v54  ;;  %7794 = vmatprep.mubr.msk.bf16.mxu0 %vm8786_vm0, %v8785_v5  ;;  %7779 = vmatpush3.bf16.msra.mxu0 %v8052_v28 }
 0xd3f   : > { %7780 = vmatprep.subr.bf16.mxu0 %v8785_v5 }
 0xd40   : > { %v5083_v45 = vpack.c.bf16 %v5067_v40, %v5067_v40 }
 0xd42   : > { %7775 = vmatmul.mubr.msk.bf16.vlgmr.msra.gmra.mrb[148].mxu1 %vm2548_vm3, %v5083_v45  ;;  %v10606_v43 = vpop.f32.mrb[92].mxu0  ;;  %7781 = vmatpush3.bf16.msra.mxu0 %v8053_v22 }
 0xd43   : > { %6202 = vmatprep.mubr.bf16.mxu1 %v8784_v4  ;;  %v7686_v47 = vpop.f32.mrb[93].mxu0  ;;  %7782 = vmatprep.subr.bf16.mxu0 %v8785_v5 }
 0xd44   : > { %v5127_v42 = vpop.f32.mrb[94].mxu0  ;;  %v8056_v47 = vld [vmem:[%s9490_s8 + $0x20] sm:$0xff]  }
 0xd45   : > { %v7687_v56 = vpop.f32.mrb[95].mxu0 }
 0xd46   : > { %7783 = vmatpush3.bf16.msra.mxu0 %v8054_v48  ;;  %v8057_v56 = vld [vmem:[%s9490_s8 + $0x28] sm:$0xff]  }
 0xd47   : > { %7784 = vmatprep.subr.bf16.mxu0 %v8785_v5 }
 0xd4a   : > { %7785 = vmatpush3.bf16.msra.mxu0 %v8055_v52 }
 0xd4b   : > { %7786 = vmatprep.subr.bf16.mxu0 %v8785_v5 }
 0xd4e   : > { %7787 = vmatpush3.bf16.msra.mxu0 %v8056_v47 }
 0xd4f   : > { %7788 = vmatprep.subr.bf16.mxu0 %v8785_v5 }
 0xd52   : > { %7789 = vmatpush3.bf16.msra.mxu0 %v8057_v56 }
 0xd53   : > { %7790 = vmatprep.subr.bf16.mxu0 %v8785_v5 }
 0xda8   : > { %v5170_v49 = vpop.f32.mrb[120].mxu1 }
 0xda9   : > { %v7692_v57 = vpop.f32.mrb[121].mxu1 }
 0xdaa   : > { %v5173_v1 = vpop.f32.mrb[122].mxu1 }
 0xdab   : > { %v7693_v44 = vpop.f32.mrb[123].mxu1  ;;  %v8059_v1 = vld [vmem:[%s9490_s8 + $0x38] sm:$0xff]  }
 0xdb8   : > { %v5216_v60 = vpop.f32.mrb[96].mxu0 }
 0xdb9   : > { %v7698_v21 = vpop.f32.mrb[97].mxu0 }
 0xdba   : > { %v5219_v54 = vpop.f32.mrb[98].mxu0 }
 0xdbb   : > { %v7699_v62 = vpop.f32.mrb[99].mxu0 }
 0xdc0   : > { %v5262_v59 = vpop.f32.mrb[124].mxu1  ;;  %v5308_v2 = vpop.f32.mrb[100].mxu0 }
 0xdc1   : > { %v7704_v50 = vpop.f32.mrb[125].mxu1  ;;  %v7710_v7 = vpop.f32.mrb[101].mxu0 }
 0xdc2   : > { %v5265_v14 = vpop.f32.mrb[126].mxu1  ;;  %v5311_v10 = vpop.f32.mrb[102].mxu0 }
 0xdc3   : > { %v7705_v27 = vpop.f32.mrb[127].mxu1  ;;  %v7711_v17 = vpop.f32.mrb[103].mxu0 }
 0xdc8   : > { %v10609_v4 = vpop.f32.mrb[128].mxu1  ;;  %v10611_v11 = vpop.f32.mrb[104].mxu0 }
 0xdc9   : > { %v7716_v39 = vpop.f32.mrb[129].mxu1  ;;  %v7722_v3 = vpop.f32.mrb[105].mxu0 }
 0xdca   : > { %v5357_v55 = vpop.f32.mrb[130].mxu1  ;;  %v5403_v15 = vpop.f32.mrb[106].mxu0 }
 0xdcb   : > { %v7717_v30 = vpop.f32.mrb[131].mxu1  ;;  %v7723_v26 = vpop.f32.mrb[107].mxu0 }
 0xdd0   : > { %v10613_v63 = vpop.f32.mrb[132].mxu1 }
 0xdd1   : > { %v7728_v8 = vpop.f32.mrb[133].mxu1 }
 0xdd2   : > { %v5449_v46 = vpop.f32.mrb[134].mxu1 }
 0xdd3   : > { %v7729_v18 = vpop.f32.mrb[135].mxu1 }
 0xdd8   : > { %v5538_v23 = vpop.f32.mrb[136].mxu1 }
 0xdd9   : > { %v7945_v53 = vpack.i.bf16 %v5538_v23, %v5170_v49  ;;  %v7740_v20 = vpop.f32.mrb[137].mxu1  ;;  %v8058_v49 = vld [vmem:[%s9490_s8 + $0x30] sm:$0xff]   ;;  %s10901_s8 = scalar_lea.vmem [#allocation16], %s9445_s24 }
 0xdda   : > { %v5541_v24 = vpop.f32.mrb[138].mxu1  ;;  %7791 = vmatpush3.bf16.msra.mxu0 %v8058_v49 }
 0xddb   : > { %7946 = vrot.lane.b32.xlu1 %v7945_v53, %s8793_s9  ;;  %v7741_v6 = vpop.f32.mrb[139].mxu1  ;;  %7792 = vmatprep.subr.bf16.mxu0 %v8785_v5 }
 0xdde   : > { %7793 = vmatpush3.bf16.msra.mxu0 %v8059_v1  ;;  %v8060_v1 = vld [vmem:[%s9530_s25] ss:$8 sps:$4 sm:$0xff]  }
 0xde0   : > { %v5630_v36 = vpop.f32.mrb[140].mxu1 }
 0xde1   : > { %v7955_v29 = vpack.i.bf16 %v5630_v36, %v5262_v59  ;;  %v7752_v38 = vpop.f32.mrb[141].mxu1 }
 0xde2   : > { %v5633_v13 = vpop.f32.mrb[142].mxu1 }
 0xde3   : > { %7956 = vrot.lane.b32.xlu1 %v7955_v29, %s8791_s0  ;;  %v7753_v32 = vpop.f32.mrb[143].mxu1 }
 0xded   : > { %v10617_v31 = vpop.f32.mrb[108].mxu0 }
 0xdee   : > { %v7734_v61 = vpop.f32.mrb[109].mxu0 }
 0xdef   : > { %v5495_v12 = vpop.f32.mrb[110].mxu0 }
 0xdf0   : > { %v7735_v58 = vpop.f32.mrb[111].mxu0 }
 0xdf5   : > { %v5584_v19 = vpop.f32.mrb[112].mxu0 }
 0xdf6   : > { %v7950_v25 = vpack.i.bf16 %v5584_v19, %v5216_v60  ;;  %v7746_v16 = vpop.f32.mrb[113].mxu0 }
 0xdf7   : > { %v5587_v37 = vpop.f32.mrb[114].mxu0 }
 0xdf8   : > { %7951 = vrot.lane.b32.xlu0 %v7950_v25, %s8792_s28  ;;  %v7747_v9 = vpop.f32.mrb[115].mxu0  ;;  %s10907_s28 = sld [smem:[#allocation38_spill]] }
 0xdfd   : > { %v5676_v35 = vpop.f32.mrb[116].mxu0 }
 0xdfe   : > { %v7960_v51 = vpack.i.bf16 %v5676_v35, %v5308_v2  ;;  %v7758_v40 = vpop.f32.mrb[117].mxu0  ;;  %v7073_v35 = vld [vmem:[%s10901_s8] ss:$0 sm:$0xff]  ;;  %p7119_p10 = scmp.ne.s32.totalorder %s10907_s28, 1 }
 0xdff   : > { %v5679_v45 = vpop.f32.mrb[118].mxu0  ;;  %vm8795_vm10 = vmmov (!%p7119_p10), 0  }
 0xe00   : > { %7961 = vrot.lane.b32.xlu0 %v7960_v51, %s8789_s3  ;;  %v7759_v42 = vpop.f32.mrb[119].mxu0  ;;  %s10910_s3 = sld [smem:[#allocation63_spill]] (!%p7119_p10) }
 0xe0d   : > { %v5722_v57 = vpop.f32.mrb[144].mxu1 }
 0xe0e   : > { %v7965_v44 = vpack.i.bf16 %v5722_v57, %v10609_v4  ;;  %v7764_v60 = vpop.f32.mrb[145].mxu1 }
 0xe0f   : > { %v5725_v21 = vpop.f32.mrb[146].mxu1  ;;  %v8065_v60 = vld [vmem:[%s9530_s25 + $0x14] ss:$8 sps:$4 sm:$0xff]  }
 0xe10   : > { %v5768_v54 = vpop.f32.mrb[120].mxu0  ;;  %7966 = vrot.lane.b32.xlu1 %v7965_v44, %s8790_s4  ;;  %v7765_v62 = vpop.f32.mrb[147].mxu1  ;;  %v8062_v44 = vld [vmem:[%s9530_s25 + $0x4] ss:$8 sps:$4 sm:$0xff]   ;;  %v8063_v21 = vld [vmem:[%s9530_s25 + $0x10] ss:$8 sps:$4 sm:$0xff]  }
 0xe11   : > { %v7970_v59 = vpack.i.bf16 %v5768_v54, %v10611_v11  ;;  %v7770_v2 = vpop.f32.mrb[121].mxu0  ;;  %6170 = vmatprep.subr.bf16.mxu1 %v8062_v44 }
 0xe12   : > { %v5771_v50 = vpop.f32.mrb[122].mxu0  ;;  %6171 = vmatpush1.bf16.msra.mxu1 %v8060_v1 }
 0xe13   : > { %7971 = vrot.lane.b32.xlu0 %v7970_v59, %s8787_s1  ;;  %v7771_v7 = vpop.f32.mrb[123].mxu0  ;;  %6172 = vmatprep.subr.bf16.mxu1 %v8065_v60  ;;  %s10906_s1 = scalar_lea.vmem [#allocation25], %s9445_s24 }
 0xe15   : > { %v5814_v14 = vpop.f32.mrb[148].mxu1 }
 0xe16   : > { %v7975_v5 = vpack.i.bf16 %v5814_v14, %v10613_v63  ;;  %v7776_v10 = vpop.f32.mrb[149].mxu1  ;;  %6173 = vmatpush1.bf16.msra.mxu1 %v8063_v21  ;;  %v8068_v14 = vld [vmem:[%s9530_s25 + $0x24] ss:$8 sps:$4 sm:$0xff]  }
 0xe17   : > { %v5817_v27 = vpop.f32.mrb[150].mxu1  ;;  %6174 = vmatprep.subr.bf16.mxu1 %v8068_v14  ;;  %v8071_v10 = vld [vmem:[%s9530_s25 + $0x34] ss:$8 sps:$4 sm:$0xff]  }
 0xe18   : > { %7976 = vrot.lane.b32.xlu1 %v7975_v5, %s8788_s23  ;;  %v7777_v17 = vpop.f32.mrb[151].mxu1  ;;  %v8066_v5 = vld [vmem:[%s9530_s25 + $0x20] ss:$8 sps:$4 sm:$0xff]   ;;  %v8069_v27 = vld [vmem:[%s9530_s25 + $0x30] ss:$8 sps:$4 sm:$0xff]  }
 0xe19   : > { %v8074_v17 = vld [vmem:[%s9530_s25 + $0x44] ss:$8 sps:$4 sm:$0xff]  }
 0xe1a   : > { %6175 = vmatpush1.bf16.msra.mxu1 %v8066_v5 }
 0xe1b   : > { %6176 = vmatprep.subr.bf16.mxu1 %v8071_v10 }
 0xe1e   : > { %6177 = vmatpush1.bf16.msra.mxu1 %v8069_v27 }
 0xe1f   : > { %6178 = vmatprep.subr.bf16.mxu1 %v8074_v17 }
 0xe4d   : > { %v7947_v4 = vpop.permute.xlu1 %7946 }
 0xe4e   : > { %v7949_v55 = vunpack.i.h.bf16 %v7947_v4  ;;  %v7948_v15 = vunpack.i.l.bf16 %v7947_v4  ;;  %v8072_v4 = vld [vmem:[%s9530_s25 + $0x40] ss:$8 sps:$4 sm:$0xff]  }
 0xe4f   : > { %6179 = vmatpush1.bf16.msra.mxu1 %v8072_v4 }
 0xe50   : > { %v5883_v46 = vsel %vm1811_vm1, %v10617_v31, %v7949_v55  ;;  %v5848_v63 = vsel %vm1811_vm1, %v10606_v43, %v7948_v15  ;;  %v8078_v55 = vld [vmem:[%s9530_s25 + $0x60] ss:$8 sps:$4 sm:$0xff]   ;;  %v8080_v15 = vld [vmem:[%s9530_s25 + $0x64] ss:$8 sps:$4 sm:$0xff]  }
 0xe55   : > { %v7957_v3 = vpop.permute.xlu1 %7956 }
 0xe56   : > { %v7959_v6 = vunpack.i.h.bf16 %v7957_v3  ;;  %v7958_v36 = vunpack.i.l.bf16 %v7957_v3  ;;  %v8075_v3 = vld [vmem:[%s9530_s25 + $0x50] ss:$8 sps:$4 sm:$0xff]  }
 0xe6a   : > { %v7952_v39 = vpop.permute.xlu0 %7951 }
 0xe6b   : > { %v7954_v11 = vunpack.i.h.bf16 %v7952_v39  ;;  %v7953_v26 = vunpack.i.l.bf16 %v7952_v39  ;;  %v8077_v39 = vld [vmem:[%s9530_s25 + $0x54] ss:$8 sps:$4 sm:$0xff]  }
 0xe6c   : > { %6180 = vmatprep.subr.bf16.mxu1 %v8077_v39 }
 0xe6d   : > { %v5849_v23 = vsel %vm3507_vm4, %v5848_v63, %v7953_v26  ;;  %v5884_v53 = vsel %vm3507_vm4, %v5883_v46, %v7954_v11  ;;  %6181 = vmatpush1.bf16.msra.mxu1 %v8075_v3  ;;  %v8081_v11 = vld [vmem:[%s9530_s25 + $0x70] ss:$8 sps:$4 sm:$0xff]   ;;  %v8084_v26 = vld [vmem:[%s9540_s17 + $0x40] sm:$0xff]   ;;  %v8086_v46 = vld [vmem:[%s9540_s17 + $0x48] sm:$0xff]  }
 0xe6e   : > { %v5850_v28 = vsel %vm3509_vm5, %v5849_v23, %v7958_v36  ;;  %v5885_v31 = vsel %vm3509_vm5, %v5884_v53, %v7959_v6  ;;  %6182 = vmatprep.subr.bf16.mxu1 %v8080_v15  ;;  %7303 = vmatprep.subr.bf16.mxu0 %v8084_v26  ;;  %v8087_v63 = vld [vmem:[%s9540_s17 + $0x8] sm:$0xff]   ;;  %v8089_v23 = vld [vmem:[%s9540_s17 + $0x10] sm:$0xff]   ;;  %v8090_v53 = vld [vmem:[%s9540_s17 + $0x58] sm:$0xff]  }
 0xe6f   : > { %v8093_v6 = vld [vmem:[%s9540_s17 + $0x20] sm:$0xff]   ;;  %v8094_v36 = vld [vmem:[%s9540_s17 + $0x68] sm:$0xff]  }
 0xe71   : > { %6183 = vmatpush1.bf16.msra.mxu1 %v8078_v55 }
 0xe72   : > { %v7962_v30 = vpop.permute.xlu0 %7961 }
 0xe73   : > { %v7964_v20 = vunpack.i.h.bf16 %v7962_v30  ;;  %v7963_v24 = vunpack.i.l.bf16 %v7962_v30  ;;  %v8083_v30 = vld [vmem:[%s9530_s25 + $0x74] ss:$8 sps:$4 sm:$0xff]   ;;  %s10902_s25 = scalar_lea.vmem [#allocation18], %s9445_s24 }
 0xe74   : > { %6184 = vmatprep.subr.bf16.mxu1 %v8083_v30 }
 0xe75   : > { %v5851_v43 = vsel %vm3511_vm6, %v5850_v28, %v7963_v24  ;;  %v5886_v61 = vsel %vm3511_vm6, %v5885_v31, %v7964_v20  ;;  %6185 = vmatpush1.bf16.msra.mxu1 %v8081_v11  ;;  %v8091_v20 = vld [vmem:[%s9540_s17 + $0x18] sm:$0xff]   ;;  %v8092_v24 = vld [vmem:[%s9540_s17 + $0x60] sm:$0xff]  }
 0xe82   : > { %v7967_v8 = vpop.permute.xlu1 %7966 }
 0xe83   : > { %v7969_v29 = vunpack.i.h.bf16 %v7967_v8  ;;  %v7968_v38 = vunpack.i.l.bf16 %v7967_v8  ;;  %v8085_v8 = vld [vmem:[%s9540_s17] sm:$0xff]  }
 0xe85   : > { %v7972_v18 = vpop.permute.xlu0 %7971  ;;  %v5887_v58 = vsel %vm3513_vm7, %v5886_v61, %v7969_v29  ;;  %v5852_v19 = vsel %vm3513_vm7, %v5851_v43, %v7968_v38 }
 0xe86   : > { %v7974_v13 = vunpack.i.h.bf16 %v7972_v18  ;;  %v7973_v32 = vunpack.i.l.bf16 %v7972_v18  ;;  %v8088_v18 = vld [vmem:[%s9540_s17 + $0x50] sm:$0xff]  }
 0xe88   : > { %v5853_v16 = vsel %vm3515_vm8, %v5852_v19, %v7973_v32  ;;  %v5888_v37 = vsel %vm3515_vm8, %v5887_v58, %v7974_v13 }
 0xe8a   : > { %v7977_v12 = vpop.permute.xlu1 %7976 }
 0xe8b   : > { %v7979_v22 = vunpack.i.h.bf16 %v7977_v12  ;;  %v7978_v25 = vunpack.i.l.bf16 %v7977_v12  ;;  %v7082_v12 = vld [vmem:[%s10902_s25] ss:$0 sm:$0xff] }
 0xe8d   : > { %v5889_v48 = vsel %vm3517_vm9, %v5888_v37, %v7979_v22  ;;  %v5854_v9 = vsel %vm3517_vm9, %v5853_v16, %v7978_v25  ;;  %v7083_v25 = vld [vmem:[%s10903_s10] ss:$0 sm:$0xff] }
 0xe8e   : > { %v5890_v52 = vpack.c.bf16 %v5889_v48, %v5854_v9 }
 0xe90   : > { %7795 = vmatmul.mubr.bf16.vlgmr.msra.gmra.mrb[124].mxu0 %v5890_v52  ;;  %v8095_v52 = vld [vmem:[%s9540_s17 + $0x28] sm:$0xff]  }
 0xe91   : > { %7304 = vmatpush3.bf16.msra.mxu0 %v8085_v8 }
 0xe92   : > { %7305 = vmatprep.subr.bf16.mxu0 %v8086_v46 }
 0xe95   : > { %7306 = vmatpush3.bf16.msra.mxu0 %v8087_v63 }
 0xe96   : > { %7307 = vmatprep.subr.bf16.mxu0 %v8088_v18 }
 0xe99   : > { %7308 = vmatpush3.bf16.msra.mxu0 %v8089_v23 }
 0xe9a   : > { %7309 = vmatprep.subr.bf16.mxu0 %v8090_v53 }
 0xe9d   : > { %7310 = vmatpush3.bf16.msra.mxu0 %v8091_v20 }
 0xe9e   : > { %7311 = vmatprep.subr.bf16.mxu0 %v8092_v24 }
 0xea1   : > { %7312 = vmatpush3.bf16.msra.mxu0 %v8093_v6 }
 0xea2   : > { %7313 = vmatprep.subr.bf16.mxu0 %v8094_v36 }
 0xea5   : > { %7314 = vmatpush3.bf16.msra.mxu0 %v8095_v52 }
 0xf63   : > { %v5979_v51 = vpop.f32.mrb[124].mxu0 }
 0xf64   : > { %v5980_v40 = vadd.f32 %v7073_v35, %v5979_v51  ;;  %v7796_v45 = vpop.f32.mrb[125].mxu0  ;;  %v8097_v51 = vld [vmem:[%s9540_s17 + $0x30] sm:$0xff]  }
 0xf65   : > { %v5982_v47 = vpop.f32.mrb[126].mxu0  ;;  %v8099_v45 = vld [vmem:[%s9540_s17 + $0x38] sm:$0xff]  }
 0xf66   : > { %v5986_v42 = vadd.f32 %v5980_v40, %v10155_v41  ;;  %v5983_v56 = vadd.f32 %v7073_v35, %v5982_v47  ;;  %v7797_v49 = vpop.f32.mrb[127].mxu0  ;;  %v8096_v35 = vld [vmem:[%s9540_s17 + $0x70] sm:$0xff]   ;;  %v8098_v40 = vld [vmem:[%s9540_s17 + $0x78] sm:$0xff]   ;;  %s10904_s17 = scalar_lea.vmem [#allocation22], %s9445_s24 }
 0xf67   : > { %7315 = vmatprep.subr.bf16.mxu0 %v8096_v35  ;;  %v6045_v47 = vld [vmem:[%s9505_s2] sm:$0x3]  ;;  %s10905_s2 = scalar_lea.vmem [#allocation24], %s9445_s24  ;;  %s10908_s24 = sld [smem:[#allocation61_spill]] (!%p7119_p10) }
 0xf68   : > { %v5987_v57 = vadd.f32 %v5983_v56, %v10157_v0  ;;  %5990 = vadd.xlane.f32.xlu0 %v5986_v42  ;;  %7316 = vmatpush3.bf16.msra.mxu0 %v8097_v51  ;;  %v6087_v56 = vrot.slane %v6045_v47, %v9604_v34  ;;  %v7100_v34 = vld [vmem:[%s10904_s17] ss:$0 sm:$0xff] }
 0xf69   : > { %7317 = vmatprep.subr.bf16.mxu0 %v8098_v40 }
 0xf6a   : > { %5992 = vadd.xlane.f32.xlu1 %v5987_v57 }
 0xf6c   : > { %7318 = vmatpush3.bf16.msra.mxu0 %v8099_v45 }
 0xf6d   : > { %v8248_v52 = vld [vmem:[%s10908_s24 + $0x30] sm:$0xff] (!%p7119_p10)   ;;  %v8249_v35 = vld [vmem:[%s10908_s24 + $0x38] sm:$0xff] (!%p7119_p10)  }
 0xff5   : > { %v5991_v54 = vpop.xlane.xlu0 %5990 }
 0xff6   : > { %v5994_v41 = vmul.f32 0.0078125, %v5991_v54 }
 0xff7   : > { %v5993_v62 = vpop.xlane.xlu1 %5992 }
 0xff8   : > { %v5996_v59 = vsub.f32 %v5986_v42, %v5994_v41  ;;  %v5995_v0 = vmul.f32 0.0078125, %v5993_v62  ;;  %v6083_v42 = vrot.slane %v6045_v47, %v9602_v33 }
 0xffa   : > { %v10666_v2 = vsub.f32 %v5987_v57, %v5995_v0  ;;  %v5998_v50 = vmul.f32 %v5996_v59, %v5996_v59 }
 0xffc   : > { %6000 = vadd.xlane.f32.xlu0 %v5998_v50  ;;  %v5999_v7 = vmul.f32 %v10666_v2, %v10666_v2 }
0x1000   : > { %6002 = vadd.xlane.f32.xlu0 %v5999_v7 }
0x1089   : > { %v6001_v29 = vpop.xlane.xlu0 %6000 }
0x108a   : > { %v6004_v38 = vmul.f32 0.0078125, %v6001_v29 }
0x108c   : > { %v6006_v13 = vadd.f32 1e-05, %v6004_v38  ;;  %v7117_v38 = vld [vmem:[%s10905_s2] ss:$0 sm:$0xff]  ;;  %s10909_s2 = sld [smem:[#allocation62_spill]] (!%p7119_p10) }
0x108d   : > { %v6003_v32 = vpop.xlane.xlu0 %6002 }
0x108e   : > { %8232 = vrsqrt.f32 %v6006_v13  ;;  %v6005_v28 = vmul.f32 0.0078125, %v6003_v32 }
0x1090   : > { %v6007_v31 = vadd.f32 1e-05, %v6005_v28  ;;  %v7118_v28 = vld [vmem:[%s10906_s1] ss:$0 sm:$0xff] }
0x1092   : > { %8234 = vrsqrt.f32 %v6007_v31  ;;  %v7120_v40 = vld [vmem:[%s10909_s2] ss:$0 sm:$0xff] (!%p7119_p10) }
0x1098   : > { %v8233_v43 = vpop.eup %8232 }
0x1099   : > { %v6010_v61 = vmul.f32 %v8233_v43, %v5996_v59 }
0x109b   : > { %v6018_v22 = vmul.f32 %v7082_v12, %v6010_v61 }
0x109c   : > { %v8235_v58 = vpop.eup %8234 }
0x109d   : > { %v6011_v19 = vmul.f32 %v8235_v58, %v10666_v2  ;;  %v6026_v37 = vadd.f32 %v7083_v25, %v6018_v22  ;;  %v8794_v22 = vmov (!%p7119_p10), 0.0  }
0x109e   : > { %7798 = vmatprep.subr.bf16.mxu0 (!%p7119_p10), %v8794_v22 }
0x109f   : > { %v6019_v16 = vmul.f32 %v7082_v12, %v6011_v19  ;;  %v8242_v19 = vld [vmem:[%s10908_s24] sm:$0xff] (!%p7119_p10)  }
0x10a1   : > { %v6027_v48 = vadd.f32 %v7083_v25, %v6019_v16  ;;  %v8243_v25 = vld [vmem:[%s10908_s24 + $0x8] sm:$0xff] (!%p7119_p10)   ;;  %v8244_v16 = vld [vmem:[%s10908_s24 + $0x10] sm:$0xff] (!%p7119_p10)  }
0x10a3   : > { %v6028_v9 = vpack.c.bf16 %v6027_v48, %v6026_v37 }
0x10a5   : > { %6203 = vmatmul.mubr.bf16.vlgmr.msra.gmra.mrb[152].mxu1 %v6028_v9  ;;  %v8247_v9 = vld [vmem:[%s10908_s24 + $0x28] sm:$0xff] (!%p7119_p10)  }
0x1178   : > { %v6204_v49 = vpop.f32.mrb[152].mxu1 }
0x1179   : > { %v6205_v57 = vadd.f32 %v6204_v49, %v6083_v42  ;;  %v6206_v1 = vpop.f32.mrb[153].mxu1 }
0x117a   : > { %v6207_v44 = vadd.f32 %v6206_v1, %v6087_v56  ;;  %v6208_v60 = vpop.f32.mrb[154].mxu1 }
0x117b   : > { %v6209_v21 = vadd.f32 %v6208_v60, %v6083_v42  ;;  %v6210_v54 = vpop.f32.mrb[155].mxu1  ;;  %v6213_v62 = vmax.f32 %v6205_v57, 0.0 }
0x117c   : > { %v6211_v41 = vadd.f32 %v6210_v54, %v6087_v56  ;;  %v6214_v0 = vmax.f32 %v6207_v44, 0.0 }
0x117d   : > { %v6215_v59 = vmax.f32 %v6209_v21, 0.0 }
0x117e   : > { %v6216_v2 = vmax.f32 %v6211_v41, 0.0 }
0x117f   : > { %v6217_v50 = vpack.c.bf16 %v6215_v59, %v6213_v62 }
0x1180   : > { %v6218_v7 = vpack.c.bf16 %v6216_v2, %v6214_v0 }
0x1182   : > { %6353 = vmatprep.mubr.bf16.mxu0 %v6218_v7 }
0x1183   : > { %6354 = vmatmul.mubr.bf16.vlgmr.msra.gmra.mrb[128].mxu0 %v6217_v50 }
0x1184   : > { %7799 = vmatpush3.bf16.msra.mxu0 (!%p7119_p10), %v8242_v19  ;;  %7814 = vmatprep.mubr.msk.bf16.mxu0 (!%p7119_p10), %vm8795_vm10, %v8794_v22 }
0x1185   : > { %7800 = vmatprep.subr.bf16.mxu0 (!%p7119_p10), %v8794_v22 }
0x1188   : > { %7801 = vmatpush3.bf16.msra.mxu0 (!%p7119_p10), %v8243_v25 }
0x1189   : > { %7802 = vmatprep.subr.bf16.mxu0 (!%p7119_p10), %v8794_v22 }
0x118c   : > { %7803 = vmatpush3.bf16.msra.mxu0 (!%p7119_p10), %v8244_v16 }
0x118d   : > { %7804 = vmatprep.subr.bf16.mxu0 (!%p7119_p10), %v8794_v22 }
0x1256   : > { %v7319_v33 = vpop.f32.mrb[128].mxu0 }
0x1257   : > { %v7320_v14 = vpop.f32.mrb[129].mxu0 }
0x1258   : > { %v7321_v5 = vadd.f32 %v7320_v14, %v7319_v33  ;;  %v7322_v10 = vpop.f32.mrb[130].mxu0 }
0x1259   : > { %v7323_v27 = vpop.f32.mrb[131].mxu0 }
0x125a   : > { %v6356_v17 = vadd.f32 %v7321_v5, %v7100_v34  ;;  %v7324_v4 = vadd.f32 %v7323_v27, %v7322_v10 }
0x125c   : > { %v6359_v39 = vadd.f32 %v7324_v4, %v7100_v34  ;;  %v6362_v3 = vadd.f32 %v6356_v17, %v6026_v37  ;;  %v8245_v37 = vld [vmem:[%s10908_s24 + $0x18] sm:$0xff] (!%p7119_p10)  }
0x125d   : > { %7805 = vmatpush3.bf16.msra.mxu0 (!%p7119_p10), %v8245_v37 }
0x125e   : > { %6366 = vadd.xlane.f32.xlu1 %v6362_v3  ;;  %v6363_v55 = vadd.f32 %v6359_v39, %v6027_v48  ;;  %v8246_v48 = vld [vmem:[%s10908_s24 + $0x20] sm:$0xff] (!%p7119_p10)   ;;  %7806 = vmatprep.subr.bf16.mxu0 (!%p7119_p10), %v8794_v22 }
0x1260   : > { %6368 = vadd.xlane.f32.xlu0 %v6363_v55 }
0x1261   : > { %7807 = vmatpush3.bf16.msra.mxu0 (!%p7119_p10), %v8246_v48 }
0x1262   : > { %7808 = vmatprep.subr.bf16.mxu0 (!%p7119_p10), %v8794_v22 }
0x1265   : > { %7809 = vmatpush3.bf16.msra.mxu0 (!%p7119_p10), %v8247_v9 }
0x1266   : > { %7810 = vmatprep.subr.bf16.mxu0 (!%p7119_p10), %v8794_v22 }
0x1269   : > { %7811 = vmatpush3.bf16.msra.mxu0 (!%p7119_p10), %v8248_v52 }
0x126a   : > { %7812 = vmatprep.subr.bf16.mxu0 (!%p7119_p10), %v8794_v22 }
0x126d   : > { %7813 = vmatpush3.bf16.msra.mxu0 (!%p7119_p10), %v8249_v35 }
0x12eb   : > { %v6367_v15 = vpop.xlane.xlu1 %6366 }
0x12ec   : > { %v6370_v30 = vmul.f32 0.0078125, %v6367_v15 }
0x12ed   : > { %v6369_v11 = vpop.xlane.xlu0 %6368 }
0x12ee   : > { %v6372_v26 = vsub.f32 %v6362_v3, %v6370_v30  ;;  %v6371_v8 = vmul.f32 0.0078125, %v6369_v11 }
0x12f0   : > { %v6373_v46 = vsub.f32 %v6363_v55, %v6371_v8  ;;  %v6374_v63 = vmul.f32 %v6372_v26, %v6372_v26 }
0x12f2   : > { %6376 = vadd.xlane.f32.xlu1 %v6374_v63  ;;  %v6375_v18 = vmul.f32 %v6373_v46, %v6373_v46 }
0x12f4   : > { %6378 = vadd.xlane.f32.xlu0 %v6375_v18 }
0x137f   : > { %v6377_v23 = vpop.xlane.xlu1 %6376 }
0x1380   : > { %v6380_v53 = vmul.f32 0.0078125, %v6377_v23 }
0x1381   : > { %v6379_v20 = vpop.xlane.xlu0 %6378 }
0x1382   : > { %v6382_v24 = vadd.f32 1e-05, %v6380_v53  ;;  %v6381_v6 = vmul.f32 0.0078125, %v6379_v20 }
0x1384   : > { %8236 = vrsqrt.f32 %v6382_v24  ;;  %v6383_v36 = vadd.f32 1e-05, %v6381_v6 }
0x1386   : > { %8238 = vrsqrt.f32 %v6383_v36 }
0x138e   : > { %v8237_v29 = vpop.eup %8236 }
0x138f   : > { %v6386_v13 = vmul.f32 %v8237_v29, %v6372_v26 }
0x1390   : > { %v8239_v32 = vpop.eup %8238 }
0x1391   : > { %v6394_v31 = vmul.f32 %v7117_v38, %v6386_v13  ;;  %v6387_v43 = vmul.f32 %v8239_v32, %v6373_v46  ;;  %6409 = sbr.rel (%p7119_p10) target bundleno = 5234 (0x1472), region = 188 }
0x1393   : > { %v6402_v61 = vadd.f32 %v7118_v28, %v6394_v31  ;;  %v6395_v12 = vmul.f32 %v7117_v38, %v6387_v43 }
0x1395   : > { %6404 = vst [vmem:[%s10895_s16] sm:$0xff] %v6402_v61  ;;  %v6403_v58 = vadd.f32 %v7118_v28, %v6395_v12 }
0x1397   : > { %6405 = vst [vmem:[%s10895_s16 + $0x8] sm:$0xff] %v6403_v58  ;;  %v6410_v51 = vpack.c.bf16 (!%p7119_p10), %v6403_v58, %v6402_v61 }
0x1399   : > { %7815 = vmatmul.mubr.bf16.vlgmr.msra.gmra.mrb[0].mxu0 %v6410_v51 }
0x146c   : > { %v6516_v45 = vpop.f32.mrb[0].mxu0 }
0x146d   : > { %v6517_v47 = vadd.f32 %v7120_v40, %v6516_v45  ;;  %v7816_v42 = vpop.f32.mrb[1].mxu0 }
0x146e   : > { %v6519_v56 = vpop.f32.mrb[2].mxu0 }
0x146f   : > { %6523 = vst [vmem:[%s10910_s3] sm:$0xff] %v6517_v47  ;;  %v6520_v49 = vadd.f32 %v7120_v40, %v6519_v56  ;;  %v7817_v57 = vpop.f32.mrb[3].mxu0 }
0x1471   : > { %6524 = vst [vmem:[%s10910_s3 + $0x8] sm:$0xff] %v6520_v49 }
0x1472 PF: > { %s10911_s28 = sld [smem:[#allocation39_spill]]  ;;  %s10912_s5 = sld [smem:[#allocation36_spill]] }
0x1473   : > { %s10913_s26 = sld [smem:[#allocation37_spill]]  ;;  %s10914_s27 = sld [smem:[#allocation40_spill]] }
0x1478   : > { %p58_p1 = scmp.ge.s32.totalorder %s10911_s28, 4  }
0x147a   :  { %60 = sbr.rel (!%p58_p1) target bundleno = 42 (0x2a), region = 353 }
0x1481   :  { %6536 = vsyncpa [#allocation3], 1 }
0x1482   :  { %6538 = vsyncpa [#allocation3 + $0x1], 1 }
0x1483   :  { %6539 = vsyncpa [#allocation5], 1 }
0x1484   :  { %6541 = vsyncpa [#allocation5 + $0x1], 1 }
0x1485   :  { %6542 = vsyncpa [#allocation8], 1 }
0x1486   :  { %6544 = vsyncpa [#allocation8 + $0x1], 1 }
0x1487   :  { %6545 = vsyncpa [#allocation11], 1 }
0x1488   :  { %6547 = vsyncpa [#allocation11 + $0x1], 1 }
0x1489   :  { %6548 = vsyncpa [#allocation14], 1 }
0x148a   :  { %6550 = vsyncpa [#allocation14 + $0x1], 1 }
0x148b   :  { %6551 = vsyncpa [#allocation17], 1 }
0x148c   :  { %6553 = vsyncpa [#allocation17 + $0x1], 1 }
0x148d   :  { %6554 = vsyncpa [#allocation20], 1 }
0x148e   :  { %6556 = vsyncpa [#allocation20 + $0x1], 1 }
0x148f   :  { %6557 = vsyncpa [#allocation23], 1 }
0x1490   :  { %6559 = vsyncpa [#allocation23 + $0x1], 1 }
0x1491   :  { %6560 = vsyncpa [#allocation26], 1 }
0x1492   :  { %6562 = vsyncpa [#allocation26 + $0x1], 1 }

</bundles_post_ra>
